<compile_context>
chip_gen: v7x
topology: tpu7x:2x2x1
jax: 0.10.0
libtpu: 0.0.40
codegen_flags: <defaults>
</compile_context>

<pallas_src>
import jax
import jax.numpy as jnp
from jax import lax
from jax.experimental import pallas as pl
from jax.experimental.pallas import tpu as pltpu

BN_EPS = 1e-5


# --------------------------------------------------------------------------
# Kernels
# --------------------------------------------------------------------------
def _first_linear(x, w1):
    """x: (tile, K) f32, w1: (K, 128) f32.  K (=point_dim) is tiny, so do the
    first 1x1 conv as K VPU multiply-adds instead of an MXU dot."""
    h = x[:, 0:1] * w1[0:1, :]
    for k in range(1, w1.shape[0]):
        h = h + x[:, k:k + 1] * w1[k:k + 1, :]
    return h


def _stage1_stats_kernel(x_ref, w1_ref, sum_ref, sq_ref):
    """Pass 1: per-sample partial sum / sum-of-squares of h1 = x @ w1."""
    t = pl.program_id(1)

    @pl.when(t == 0)
    def _init():
        sum_ref[...] = jnp.zeros_like(sum_ref)
        sq_ref[...] = jnp.zeros_like(sq_ref)

    h = _first_linear(x_ref[0], w1_ref[...])                      # (tile, 128) f32
    sum_ref[0] = sum_ref[0] + jnp.sum(h, axis=0, keepdims=True)
    sq_ref[0] = sq_ref[0] + jnp.sum(h * h, axis=0, keepdims=True)


def _stage1_apply_kernel(x_ref, w1_ref, scale1_ref, shift1_ref, w2_ref, b2_ref,
                         f_ref, fg_ref):
    """Pass 2: fused BN1 + ReLU, conv2 -> f, running per-sample max -> fg."""
    t = pl.program_id(1)
    h = _first_linear(x_ref[0], w1_ref[...])                      # (tile, 128) f32
    h = jnp.maximum(h * scale1_ref[...] + shift1_ref[...], 0.0)   # fused BN + ReLU
    f = jnp.dot(h.astype(jnp.bfloat16), w2_ref[...],
                preferred_element_type=jnp.float32) + b2_ref[...]  # (tile, 256) f32
    f_ref[0] = f.astype(jnp.bfloat16)
    tile_max = jnp.max(f, axis=0, keepdims=True)                   # (1, 256)

    @pl.when(t == 0)
    def _init():
        fg_ref[0] = tile_max

    @pl.when(t > 0)
    def _acc():
        fg_ref[0] = jnp.maximum(fg_ref[0], tile_max)


def _stage2_stats_kernel(f_ref, fg_ref, w3l_ref, w3g_ref, sum_ref, sq_ref):
    """Pass 3: per-sample partial stats of h2 = f @ w3_local + fg @ w3_global."""
    t = pl.program_id(1)

    @pl.when(t == 0)
    def _init():
        sum_ref[...] = jnp.zeros_like(sum_ref)
        sq_ref[...] = jnp.zeros_like(sq_ref)

    c = jnp.dot(fg_ref[0].astype(jnp.bfloat16), w3g_ref[...],
                preferred_element_type=jnp.float32)                # (1, 512)
    h2 = jnp.dot(f_ref[0], w3l_ref[...],
                 preferred_element_type=jnp.float32) + c           # (tile, 512)
    sum_ref[0] = sum_ref[0] + jnp.sum(h2, axis=0, keepdims=True)
    sq_ref[0] = sq_ref[0] + jnp.sum(h2 * h2, axis=0, keepdims=True)


def _stage2_apply_kernel(f_ref, fg_ref, w3l_ref, w3g_ref,
                         scale2_ref, shift2_ref, w4_ref, b4_ref, out_ref):
    """Pass 4: fused BN2 + ReLU, final conv, running per-sample max -> latent."""
    t = pl.program_id(1)
    c = jnp.dot(fg_ref[0].astype(jnp.bfloat16), w3g_ref[...],
                preferred_element_type=jnp.float32)                # (1, 512)
    h2 = jnp.dot(f_ref[0], w3l_ref[...],
                 preferred_element_type=jnp.float32) + c           # (tile, 512)
    h2 = jnp.maximum(h2 * scale2_ref[...] + shift2_ref[...], 0.0)  # fused BN + ReLU
    g = jnp.dot(h2.astype(jnp.bfloat16), w4_ref[...],
                preferred_element_type=jnp.float32) + b4_ref[...]  # (tile, L)
    tile_max = jnp.max(g, axis=0, keepdims=True)                   # (1, L)

    @pl.when(t == 0)
    def _init():
        out_ref[0] = tile_max

    @pl.when(t > 0)
    def _acc():
        out_ref[0] = jnp.maximum(out_ref[0], tile_max)


# --------------------------------------------------------------------------
# Wrapper
# --------------------------------------------------------------------------
def _bn_scale_shift(sum_b, sq_b, count, gamma, beta):
    """Combine per-sample partial sums into fused BN scale/shift (f32, tiny)."""
    s = jnp.sum(sum_b, axis=0)                    # (1, C)
    sq = jnp.sum(sq_b, axis=0)                    # (1, C)
    mean = s / count
    var = jnp.maximum(sq / count - mean * mean, 0.0)
    scale = gamma * lax.rsqrt(var + BN_EPS)
    shift = beta - mean * scale
    return scale, shift


def pnet2stage_forward(xyz, params, latent_dim, *, tile_n=None):
    """xyz: (B, N, C) float32.  Returns (B, latent_dim) float32."""
    B, N, C = xyz.shape
    (w1, b1, g1, be1, w2, b2, w3, b3, g2, be2, w4, b4) = params
    # b1 and b3 are cancelled by the training-mode BN mean subtraction -> unused.

    if tile_n is None:
        tile_n = N
        for cand in (1024, 512, 256, 128):
            if N % cand == 0:
                tile_n = cand
                break
    assert N % tile_n == 0 and tile_n % 8 == 0, (N, tile_n)
    n_tiles = N // tile_n
    grid = (B, n_tiles)
    count = float(B * N)

    bf16 = jnp.bfloat16
    c_mid = w2.shape[1]                            # 256
    w2b = w2.astype(bf16)
    w3g = w3[:c_mid, :].astype(bf16)               # acts on the broadcast global feature
    w3l = w3[c_mid:, :].astype(bf16)               # acts on the per-point features
    w4b = w4.astype(bf16)

    def resident(arr):
        nd = arr.ndim
        return pl.BlockSpec(arr.shape, lambda b, t, _nd=nd: (0,) * _nd)

    def per_sample(last):
        return pl.BlockSpec((1, 1, last), lambda b, t: (b, 0, 0))

    x_spec = pl.BlockSpec((1, tile_n, C), lambda b, t: (b, t, 0))
    f_spec = pl.BlockSpec((1, tile_n, c_mid), lambda b, t: (b, t, 0))

    cparams = pltpu.CompilerParams(
        dimension_semantics=("parallel", "arbitrary"),   # batch across TCs, tiles accumulate
        vmem_limit_bytes=64 * 1024 * 1024)

    # ---- Pass 1: BN1 batch statistics --------------------------------------
    s1_sum, s1_sq = pl.pallas_call(
        _stage1_stats_kernel,
        out_shape=(jax.ShapeDtypeStruct((B, 1, 128), jnp.float32),
                   jax.ShapeDtypeStruct((B, 1, 128), jnp.float32)),
        grid=grid,
        in_specs=[x_spec, resident(w1)],
        out_specs=(per_sample(128), per_sample(128)),
        compiler_params=cparams,
    )(xyz, w1)
    scale1, shift1 = _bn_scale_shift(s1_sum, s1_sq, count, g1, be1)

    # ---- Pass 2: apply BN1+ReLU, conv2, per-sample global max --------------
    f, fg = pl.pallas_call(
        _stage1_apply_kernel,
        out_shape=(jax.ShapeDtypeStruct((B, N, c_mid), bf16),
                   jax.ShapeDtypeStruct((B, 1, c_mid), jnp.float32)),
        grid=grid,
        in_specs=[x_spec, resident(w1), resident(scale1), resident(shift1),
                  resident(w2b), resident(b2)],
        out_specs=(f_spec, per_sample(c_mid)),
        compiler_params=cparams,
    )(xyz, w1, scale1, shift1, w2b, b2)

    # ---- Pass 3: BN2 batch statistics (w3 split, no concat) ----------------
    s2_sum, s2_sq = pl.pallas_call(
        _stage2_stats_kernel,
        out_shape=(jax.ShapeDtypeStruct((B, 1, 512), jnp.float32),
                   jax.ShapeDtypeStruct((B, 1, 512), jnp.float32)),
        grid=grid,
        in_specs=[f_spec, per_sample(c_mid), resident(w3l), resident(w3g)],
        out_specs=(per_sample(512), per_sample(512)),
        compiler_params=cparams,
    )(f, fg, w3l, w3g)
    scale2, shift2 = _bn_scale_shift(s2_sum, s2_sq, count, g2, be2)

    # ---- Pass 4: apply BN2+ReLU, final conv, per-sample global max ---------
    out3 = pl.pallas_call(
        _stage2_apply_kernel,
        out_shape=jax.ShapeDtypeStruct((B, 1, latent_dim), jnp.float32),
        grid=grid,
        in_specs=[f_spec, per_sample(c_mid), resident(w3l), resident(w3g),
                  resident(scale2), resident(shift2), resident(w4b), resident(b4)],
        out_specs=per_sample(latent_dim),
        compiler_params=cparams,
    )(f, fg, w3l, w3g, scale2, shift2, w4b, b4)

    return out3.reshape(B, latent_dim)


# --------------------------------------------------------------------------
# References
# --------------------------------------------------------------------------
def pnet2stage_reference(xyz, params):
    """Pure-JAX f32 reference mirroring the PyTorch forward (training-mode BN)."""
    (w1, b1, g1, be1, w2, b2, w3, b3, g2, be2, w4, b4) = params
    B, N, C = xyz.shape
    hp = jax.lax.Precision.HIGHEST
    x = xyz.reshape(B * N, C)

    def bn(h, gamma, beta):
        mu = jnp.mean(h, axis=0, keepdims=True)
        var = jnp.mean((h - mu) ** 2, axis=0, keepdims=True)
        return (h - mu) / jnp.sqrt(var + BN_EPS) * gamma + beta

    h = jnp.dot(x, w1, precision=hp) + b1
    h = jnp.maximum(bn(h, g1, be1), 0.0)
    f = (jnp.dot(h, w2, precision=hp) + b2).reshape(B, N, -1)
    fg = jnp.max(f, axis=1, keepdims=True)
    feat = jnp.concatenate([jnp.broadcast_to(fg, f.shape), f], axis=2).reshape(B * N, -1)
    h2 = jnp.dot(feat, w3, precision=hp) + b3
    h2 = jnp.maximum(bn(h2, g2, be2), 0.0)
    g = (jnp.dot(h2, w4, precision=hp) + b4).reshape(B, N, -1)
    return jnp.max(g, axis=1)


def pnet2stage_reference_mixed(xyz, params):
    """Pure-JAX mirror of the kernel numerics: f32 first layer, bf16 MXU matmuls
    elsewhere, fused training-mode BN without the (cancelled) b1/b3 biases."""
    (w1, b1, g1, be1, w2, b2, w3, b3, g2, be2, w4, b4) = params
    B, N, C = xyz.shape
    bf16 = jnp.bfloat16
    hp = jax.lax.Precision.HIGHEST
    c_mid = w2.shape[1]
    x = xyz.reshape(B * N, C)

    def bn(h, gamma, beta):
        mean = jnp.mean(h, axis=0, keepdims=True)
        var = jnp.maximum(jnp.mean(h * h, axis=0, keepdims=True) - mean * mean, 0.0)
        scale = gamma * lax.rsqrt(var + BN_EPS)
        return h * scale + (beta - mean * scale)

    h = jnp.dot(x, w1, precision=hp)                               # b1 cancelled by BN
    h = jnp.maximum(bn(h, g1, be1), 0.0)
    f = jnp.dot(h.astype(bf16), w2.astype(bf16),
                preferred_element_type=jnp.float32) + b2           # (B*N, 256)
    fg = jnp.max(f.reshape(B, N, -1), axis=1)                      # (B, 256)
    c = jnp.dot(fg.astype(bf16), w3[:c_mid, :].astype(bf16),
                preferred_element_type=jnp.float32)                # (B, 512)
    h2 = jnp.dot(f.astype(bf16), w3[c_mid:, :].astype(bf16),
                 preferred_element_type=jnp.float32)
    h2 = h2 + jnp.repeat(c, N, axis=0)                             # b3 cancelled by BN
    h2 = jnp.maximum(bn(h2, g2, be2), 0.0)
    g = jnp.dot(h2.astype(bf16), w4.astype(bf16),
                preferred_element_type=jnp.float32) + b4
    return jnp.max(g.reshape(B, N, -1), axis=1)


def init_params(key, point_dim, latent_dim):
    ks = jax.random.split(key, 12)
    f32 = jnp.float32
    w1 = 0.1 * jax.random.normal(ks[0], (point_dim, 128), f32)
    b1 = 0.01 * jax.random.normal(ks[1], (1, 128), f32)
    g1 = 1.0 + 0.1 * jax.random.normal(ks[2], (1, 128), f32)
    be1 = 0.05 * jax.random.normal(ks[3], (1, 128), f32)
    w2 = 0.1 * jax.random.normal(ks[4], (128, 256), f32)
    b2 = 0.01 * jax.random.normal(ks[5], (1, 256), f32)
    w3 = 0.05 * jax.random.normal(ks[6], (512, 512), f32)
    b3 = 0.01 * jax.random.normal(ks[7], (1, 512), f32)
    g2 = 1.0 + 0.1 * jax.random.normal(ks[8], (1, 512), f32)
    be2 = 0.05 * jax.random.normal(ks[9], (1, 512), f32)
    w4 = 0.05 * jax.random.normal(ks[10], (512, latent_dim), f32)
    b4 = 0.01 * jax.random.normal(ks[11], (1, latent_dim), f32)
    return (w1, b1, g1, be1, w2, b2, w3, b3, g2, be2, w4, b4)


if __name__ == "__main__":
    B, N, POINT_DIM, LATENT_DIM = 2, 256, 3, 256
    TILE_N = 128   # two row-tiles per sample -> exercises the accumulating grid path

    key = jax.random.PRNGKey(0)
    k_x, k_p = jax.random.split(key)
    xyz = jax.random.normal(k_x, (B, N, POINT_DIM), jnp.float32)
    params = init_params(k_p, POINT_DIM, LATENT_DIM)

    fwd = jax.jit(lambda x, p: pnet2stage_forward(x, p, LATENT_DIM, tile_n=TILE_N))
    out = jax.block_until_ready(fwd(xyz, params))
    assert out.shape == (B, LATENT_DIM), out.shape

    # Tight check vs a pure-JAX mirror of the kernel's numerics (bf16 matmuls).
    ref_mixed = jax.block_until_ready(pnet2stage_reference_mixed(xyz, params))
    assert jnp.allclose(out, ref_mixed, rtol=1e-2, atol=1e-2), (
        float(jnp.max(jnp.abs(out - ref_mixed))))

    # Loose check vs the full-f32 reference (difference is bf16 MXU rounding).
    ref_f32 = jax.block_until_ready(pnet2stage_reference(xyz, params))
    assert jnp.allclose(out, ref_f32, rtol=5e-2, atol=5e-2), (
        float(jnp.max(jnp.abs(out - ref_f32))))

    print("KERNEL_OK")
</pallas_src>

<mosaic_0001>
module attributes {stable_mosaic.version = 11 : i64} {
  func.func @_stage1_stats_kernel(%arg0: i32, %arg1: i32, %arg2: memref<1x128x3xf32, #tpu.memory_space<vmem>>, %arg3: memref<3x128xf32, #tpu.memory_space<vmem>>, %arg4: memref<1x1x128xf32, #tpu.memory_space<vmem>>, %arg5: memref<1x1x128xf32, #tpu.memory_space<vmem>>) attributes {dimension_semantics = [#tpu.dimension_semantics<parallel>, #tpu.dimension_semantics<arbitrary>], iteration_bounds = array<i64: 2, 2>, scalar_prefetch = 0 : i64, scratch_operands = 0 : i64, tpu.core_type = #tpu.core_type<tc>, window_params = [{transform_indices = @transform_0, window_bounds = array<i64: 1, 128, 3>}, {pipeline_mode = #tpu.pipeline_mode<synchronous>, transform_indices = @transform_1, window_bounds = array<i64: 3, 128>}, {transform_indices = @transform_2, window_bounds = array<i64: 1, 1, 128>}, {transform_indices = @transform_3, window_bounds = array<i64: 1, 1, 128>}]} {
    %c0_i32 = arith.constant 0 : i32
    %0 = arith.cmpi eq, %arg1, %c0_i32 : i32
    %1 = arith.extui %0 : i1 to i32
    %c0_i32_0 = arith.constant 0 : i32
    %2 = arith.cmpi ne, %1, %c0_i32_0 : i32
    scf.if %2 {
      %cst_18 = arith.constant 0.000000e+00 : f32
      %40 = vector.broadcast %cst_18 : f32 to vector<1x1x128xf32>
      %c0_19 = arith.constant 0 : index
      %c0_20 = arith.constant 0 : index
      %c0_21 = arith.constant 0 : index
      %41 = vector.load %arg4[%c0_19, %c0_20, %c0_21] : memref<1x1x128xf32, #tpu.memory_space<vmem>>, vector<1x1x128xf32>
      tpu.vector_store %arg4[%c0_19, %c0_20, %c0_21], %40 {strides = array<i32>} : memref<1x1x128xf32, #tpu.memory_space<vmem>>, vector<1x1x128xf32>,
      %cst_22 = arith.constant 0.000000e+00 : f32
      %42 = vector.broadcast %cst_22 : f32 to vector<1x1x128xf32>
      %c0_23 = arith.constant 0 : index
      %c0_24 = arith.constant 0 : index
      %c0_25 = arith.constant 0 : index
      %43 = vector.load %arg5[%c0_23, %c0_24, %c0_25] : memref<1x1x128xf32, #tpu.memory_space<vmem>>, vector<1x1x128xf32>
      tpu.vector_store %arg5[%c0_23, %c0_24, %c0_25], %42 {strides = array<i32>} : memref<1x1x128xf32, #tpu.memory_space<vmem>>, vector<1x1x128xf32>,
    } else {
    }
    %c0 = arith.constant 0 : index
    %c0_1 = arith.constant 0 : index
    %c0_2 = arith.constant 0 : index
    %3 = vector.load %arg2[%c0, %c0_1, %c0_2] : memref<1x128x3xf32, #tpu.memory_space<vmem>>, vector<1x128x3xf32>
    %4 = vector.shape_cast %3 : vector<1x128x3xf32> to vector<128x3xf32>
    %c0_3 = arith.constant 0 : index
    %c0_4 = arith.constant 0 : index
    %5 = vector.load %arg3[%c0_3, %c0_4] : memref<3x128xf32, #tpu.memory_space<vmem>>, vector<3x128xf32>
    %6 = vector.extract_strided_slice %4 {offsets = [0, 0], sizes = [128, 1], strides = [1, 1]} : vector<128x3xf32> to vector<128x1xf32>
    %7 = vector.extract_strided_slice %5 {offsets = [0, 0], sizes = [1, 128], strides = [1, 1]} : vector<3x128xf32> to vector<1x128xf32>
    %8 = vector.broadcast %6 : vector<128x1xf32> to vector<128x128xf32>
    %9 = vector.broadcast %7 : vector<1x128xf32> to vector<128x128xf32>
    %10 = arith.mulf %8, %9 : vector<128x128xf32>
    %11 = vector.extract_strided_slice %4 {offsets = [0, 1], sizes = [128, 1], strides = [1, 1]} : vector<128x3xf32> to vector<128x1xf32>
    %12 = vector.extract_strided_slice %5 {offsets = [1, 0], sizes = [1, 128], strides = [1, 1]} : vector<3x128xf32> to vector<1x128xf32>
    %13 = vector.broadcast %11 : vector<128x1xf32> to vector<128x128xf32>
    %14 = vector.broadcast %12 : vector<1x128xf32> to vector<128x128xf32>
    %15 = arith.mulf %13, %14 : vector<128x128xf32>
    %16 = arith.addf %10, %15 : vector<128x128xf32>
    %17 = vector.extract_strided_slice %4 {offsets = [0, 2], sizes = [128, 1], strides = [1, 1]} : vector<128x3xf32> to vector<128x1xf32>
    %18 = vector.extract_strided_slice %5 {offsets = [2, 0], sizes = [1, 128], strides = [1, 1]} : vector<3x128xf32> to vector<1x128xf32>
    %19 = vector.broadcast %17 : vector<128x1xf32> to vector<128x128xf32>
    %20 = vector.broadcast %18 : vector<1x128xf32> to vector<128x128xf32>
    %21 = arith.mulf %19, %20 : vector<128x128xf32>
    %22 = arith.addf %16, %21 : vector<128x128xf32>
    %c0_5 = arith.constant 0 : index
    %c0_6 = arith.constant 0 : index
    %c0_7 = arith.constant 0 : index
    %23 = vector.load %arg4[%c0_5, %c0_6, %c0_7] : memref<1x1x128xf32, #tpu.memory_space<vmem>>, vector<1x1x128xf32>
    %24 = vector.shape_cast %23 : vector<1x1x128xf32> to vector<1x128xf32>
    %cst = arith.constant dense<0.000000e+00> : vector<128xf32>
    %25 = vector.multi_reduction <add>, %22, %cst [0] : vector<128x128xf32> to vector<128xf32>
    %26 = vector.shape_cast %25 : vector<128xf32> to vector<1x128xf32>
    %27 = arith.addf %24, %26 : vector<1x128xf32>
    %c0_8 = arith.constant 0 : index
    %c0_9 = arith.constant 0 : index
    %c0_10 = arith.constant 0 : index
    %28 = vector.load %arg4[%c0_8, %c0_9, %c0_10] : memref<1x1x128xf32, #tpu.memory_space<vmem>>, vector<1x1x128xf32>
    %29 = vector.shape_cast %28 : vector<1x1x128xf32> to vector<1x128xf32>
    %30 = vector.shape_cast %27 : vector<1x128xf32> to vector<1x1x128xf32>
    tpu.vector_store %arg4[%c0_8, %c0_9, %c0_10], %30 {strides = array<i32>} : memref<1x1x128xf32, #tpu.memory_space<vmem>>, vector<1x1x128xf32>,
    %c0_11 = arith.constant 0 : index
    %c0_12 = arith.constant 0 : index
    %c0_13 = arith.constant 0 : index
    %31 = vector.load %arg5[%c0_11, %c0_12, %c0_13] : memref<1x1x128xf32, #tpu.memory_space<vmem>>, vector<1x1x128xf32>
    %32 = vector.shape_cast %31 : vector<1x1x128xf32> to vector<1x128xf32>
    %33 = arith.mulf %22, %22 : vector<128x128xf32>
    %cst_14 = arith.constant dense<0.000000e+00> : vector<128xf32>
    %34 = vector.multi_reduction <add>, %33, %cst_14 [0] : vector<128x128xf32> to vector<128xf32>
    %35 = vector.shape_cast %34 : vector<128xf32> to vector<1x128xf32>
    %36 = arith.addf %32, %35 : vector<1x128xf32>
    %c0_15 = arith.constant 0 : index
    %c0_16 = arith.constant 0 : index
    %c0_17 = arith.constant 0 : index
    %37 = vector.load %arg5[%c0_15, %c0_16, %c0_17] : memref<1x1x128xf32, #tpu.memory_space<vmem>>, vector<1x1x128xf32>
    %38 = vector.shape_cast %37 : vector<1x1x128xf32> to vector<1x128xf32>
    %39 = vector.shape_cast %36 : vector<1x128xf32> to vector<1x1x128xf32>
    tpu.vector_store %arg5[%c0_15, %c0_16, %c0_17], %39 {strides = array<i32>} : memref<1x1x128xf32, #tpu.memory_space<vmem>>, vector<1x1x128xf32>,
    return
  }
  func.func @transform_0(%arg0: i32, %arg1: i32) -> (i32, i32, i32) {
    %c0_i32 = arith.constant 0 : i32
    %c0_i32_0 = arith.constant 0 : i32
    return %arg0, %arg1, %c0_i32 : i32, i32, i32
  }
  func.func @transform_1(%arg0: i32, %arg1: i32) -> (i32, i32) {
    %c0_i32 = arith.constant 0 : i32
    %c0_i32_0 = arith.constant 0 : i32
    %c0_i32_1 = arith.constant 0 : i32
    return %c0_i32, %c0_i32_0 : i32, i32
  }
  func.func @transform_2(%arg0: i32, %arg1: i32) -> (i32, i32, i32) {
    %c0_i32 = arith.constant 0 : i32
    %c0_i32_0 = arith.constant 0 : i32
    %c0_i32_1 = arith.constant 0 : i32
    return %arg0, %c0_i32, %c0_i32_0 : i32, i32, i32
  }
  func.func @transform_3(%arg0: i32, %arg1: i32) -> (i32, i32, i32) {
    %c0_i32 = arith.constant 0 : i32
    %c0_i32_0 = arith.constant 0 : i32
    %c0_i32_1 = arith.constant 0 : i32
    return %arg0, %c0_i32, %c0_i32_0 : i32, i32, i32
  }
}

module attributes {stable_mosaic.version = 11 : i64} {
  func.func @_stage1_apply_kernel(%arg0: i32, %arg1: i32, %arg2: memref<1x128x3xf32, #tpu.memory_space<vmem>>, %arg3: memref<3x128xf32, #tpu.memory_space<vmem>>, %arg4: memref<1x128xf32, #tpu.memory_space<vmem>>, %arg5: memref<1x128xf32, #tpu.memory_space<vmem>>, %arg6: memref<128x256xbf16, #tpu.memory_space<vmem>>, %arg7: memref<1x256xf32, #tpu.memory_space<vmem>>, %arg8: memref<1x128x256xbf16, #tpu.memory_space<vmem>>, %arg9: memref<1x1x256xf32, #tpu.memory_space<vmem>>) attributes {dimension_semantics = [#tpu.dimension_semantics<parallel>, #tpu.dimension_semantics<arbitrary>], iteration_bounds = array<i64: 2, 2>, scalar_prefetch = 0 : i64, scratch_operands = 0 : i64, tpu.core_type = #tpu.core_type<tc>, window_params = [{transform_indices = @transform_0, window_bounds = array<i64: 1, 128, 3>}, {pipeline_mode = #tpu.pipeline_mode<synchronous>, transform_indices = @transform_1, window_bounds = array<i64: 3, 128>}, {pipeline_mode = #tpu.pipeline_mode<synchronous>, transform_indices = @transform_2, window_bounds = array<i64: 1, 128>}, {pipeline_mode = #tpu.pipeline_mode<synchronous>, transform_indices = @transform_3, window_bounds = array<i64: 1, 128>}, {pipeline_mode = #tpu.pipeline_mode<synchronous>, transform_indices = @transform_4, window_bounds = array<i64: 128, 256>}, {pipeline_mode = #tpu.pipeline_mode<synchronous>, transform_indices = @transform_5, window_bounds = array<i64: 1, 256>}, {transform_indices = @transform_6, window_bounds = array<i64: 1, 128, 256>}, {transform_indices = @transform_7, window_bounds = array<i64: 1, 1, 256>}]} {
    %c0 = arith.constant 0 : index
    %c0_0 = arith.constant 0 : index
    %c0_1 = arith.constant 0 : index
    %0 = vector.load %arg2[%c0, %c0_0, %c0_1] : memref<1x128x3xf32, #tpu.memory_space<vmem>>, vector<1x128x3xf32>
    %1 = vector.shape_cast %0 : vector<1x128x3xf32> to vector<128x3xf32>
    %c0_2 = arith.constant 0 : index
    %c0_3 = arith.constant 0 : index
    %2 = vector.load %arg3[%c0_2, %c0_3] : memref<3x128xf32, #tpu.memory_space<vmem>>, vector<3x128xf32>
    %3 = vector.extract_strided_slice %1 {offsets = [0, 0], sizes = [128, 1], strides = [1, 1]} : vector<128x3xf32> to vector<128x1xf32>
    %4 = vector.extract_strided_slice %2 {offsets = [0, 0], sizes = [1, 128], strides = [1, 1]} : vector<3x128xf32> to vector<1x128xf32>
    %5 = vector.broadcast %3 : vector<128x1xf32> to vector<128x128xf32>
    %6 = vector.broadcast %4 : vector<1x128xf32> to vector<128x128xf32>
    %7 = arith.mulf %5, %6 : vector<128x128xf32>
    %8 = vector.extract_strided_slice %1 {offsets = [0, 1], sizes = [128, 1], strides = [1, 1]} : vector<128x3xf32> to vector<128x1xf32>
    %9 = vector.extract_strided_slice %2 {offsets = [1, 0], sizes = [1, 128], strides = [1, 1]} : vector<3x128xf32> to vector<1x128xf32>
    %10 = vector.broadcast %8 : vector<128x1xf32> to vector<128x128xf32>
    %11 = vector.broadcast %9 : vector<1x128xf32> to vector<128x128xf32>
    %12 = arith.mulf %10, %11 : vector<128x128xf32>
    %13 = arith.addf %7, %12 : vector<128x128xf32>
    %14 = vector.extract_strided_slice %1 {offsets = [0, 2], sizes = [128, 1], strides = [1, 1]} : vector<128x3xf32> to vector<128x1xf32>
    %15 = vector.extract_strided_slice %2 {offsets = [2, 0], sizes = [1, 128], strides = [1, 1]} : vector<3x128xf32> to vector<1x128xf32>
    %16 = vector.broadcast %14 : vector<128x1xf32> to vector<128x128xf32>
    %17 = vector.broadcast %15 : vector<1x128xf32> to vector<128x128xf32>
    %18 = arith.mulf %16, %17 : vector<128x128xf32>
    %19 = arith.addf %13, %18 : vector<128x128xf32>
    %c0_4 = arith.constant 0 : index
    %c0_5 = arith.constant 0 : index
    %20 = vector.load %arg4[%c0_4, %c0_5] : memref<1x128xf32, #tpu.memory_space<vmem>>, vector<1x128xf32>
    %21 = vector.broadcast %20 : vector<1x128xf32> to vector<128x128xf32>
    %22 = arith.mulf %19, %21 : vector<128x128xf32>
    %c0_6 = arith.constant 0 : index
    %c0_7 = arith.constant 0 : index
    %23 = vector.load %arg5[%c0_6, %c0_7] : memref<1x128xf32, #tpu.memory_space<vmem>>, vector<1x128xf32>
    %24 = vector.broadcast %23 : vector<1x128xf32> to vector<128x128xf32>
    %25 = arith.addf %22, %24 : vector<128x128xf32>
    %cst = arith.constant 0.000000e+00 : f32
    %26 = vector.broadcast %cst : f32 to vector<128x128xf32>
    %27 = arith.maximumf %25, %26 : vector<128x128xf32>
    %28 = arith.truncf %27 : vector<128x128xf32> to vector<128x128xbf16>
    %c0_8 = arith.constant 0 : index
    %c0_9 = arith.constant 0 : index
    %29 = vector.load %arg6[%c0_8, %c0_9] : memref<128x256xbf16, #tpu.memory_space<vmem>>, vector<128x256xbf16>
    %cst_10 = arith.constant dense<0.000000e+00> : vector<128x256xf32>
    %30 = tpu.matmul %28, %29, %cst_10 {dimension_numbers = #tpu.dot_dimension_numbers<[1], [0], [0], [1], [0, 0, 1, 1], [], []>} : vector<128x128xbf16>, vector<128x256xbf16>, vector<128x256xf32> -> vector<128x256xf32>
    %c0_11 = arith.constant 0 : index
    %c0_12 = arith.constant 0 : index
    %31 = vector.load %arg7[%c0_11, %c0_12] : memref<1x256xf32, #tpu.memory_space<vmem>>, vector<1x256xf32>
    %32 = vector.broadcast %31 : vector<1x256xf32> to vector<128x256xf32>
    %33 = arith.addf %30, %32 : vector<128x256xf32>
    %34 = arith.truncf %33 : vector<128x256xf32> to vector<128x256xbf16>
    %c0_13 = arith.constant 0 : index
    %c0_14 = arith.constant 0 : index
    %c0_15 = arith.constant 0 : index
    %35 = vector.load %arg8[%c0_13, %c0_14, %c0_15] : memref<1x128x256xbf16, #tpu.memory_space<vmem>>, vector<1x128x256xbf16>
    %36 = vector.shape_cast %35 : vector<1x128x256xbf16> to vector<128x256xbf16>
    %37 = vector.shape_cast %34 : vector<128x256xbf16> to vector<1x128x256xbf16>
    tpu.vector_store %arg8[%c0_13, %c0_14, %c0_15], %37 {strides = array<i32>} : memref<1x128x256xbf16, #tpu.memory_space<vmem>>, vector<1x128x256xbf16>,
    %cst_16 = arith.constant dense<0xFF800000> : vector<256xf32>
    %38 = vector.multi_reduction <maximumf>, %33, %cst_16 [0] : vector<128x256xf32> to vector<256xf32>
    %39 = vector.shape_cast %38 : vector<256xf32> to vector<1x256xf32>
    %c0_i32 = arith.constant 0 : i32
    %40 = arith.cmpi eq, %arg1, %c0_i32 : i32
    %41 = arith.extui %40 : i1 to i32
    %c0_i32_17 = arith.constant 0 : i32
    %42 = arith.cmpi ne, %41, %c0_i32_17 : i32
    scf.if %42 {
      %c0_20 = arith.constant 0 : index
      %c0_21 = arith.constant 0 : index
      %c0_22 = arith.constant 0 : index
      %46 = vector.load %arg9[%c0_20, %c0_21, %c0_22] : memref<1x1x256xf32, #tpu.memory_space<vmem>>, vector<1x1x256xf32>
      %47 = vector.shape_cast %46 : vector<1x1x256xf32> to vector<1x256xf32>
      %48 = vector.shape_cast %39 : vector<1x256xf32> to vector<1x1x256xf32>
      tpu.vector_store %arg9[%c0_20, %c0_21, %c0_22], %48 {strides = array<i32>} : memref<1x1x256xf32, #tpu.memory_space<vmem>>, vector<1x1x256xf32>,
    } else {
    }
    %c0_i32_18 = arith.constant 0 : i32
    %43 = arith.cmpi sgt, %arg1, %c0_i32_18 : i32
    %44 = arith.extui %43 : i1 to i32
    %c0_i32_19 = arith.constant 0 : i32
    %45 = arith.cmpi ne, %44, %c0_i32_19 : i32
    scf.if %45 {
      %c0_20 = arith.constant 0 : index
      %c0_21 = arith.constant 0 : index
      %c0_22 = arith.constant 0 : index
      %46 = vector.load %arg9[%c0_20, %c0_21, %c0_22] : memref<1x1x256xf32, #tpu.memory_space<vmem>>, vector<1x1x256xf32>
      %47 = vector.shape_cast %46 : vector<1x1x256xf32> to vector<1x256xf32>
      %48 = arith.maximumf %47, %39 : vector<1x256xf32>
      %c0_23 = arith.constant 0 : index
      %c0_24 = arith.constant 0 : index
      %c0_25 = arith.constant 0 : index
      %49 = vector.load %arg9[%c0_23, %c0_24, %c0_25] : memref<1x1x256xf32, #tpu.memory_space<vmem>>, vector<1x1x256xf32>
      %50 = vector.shape_cast %49 : vector<1x1x256xf32> to vector<1x256xf32>
      %51 = vector.shape_cast %48 : vector<1x256xf32> to vector<1x1x256xf32>
      tpu.vector_store %arg9[%c0_23, %c0_24, %c0_25], %51 {strides = array<i32>} : memref<1x1x256xf32, #tpu.memory_space<vmem>>, vector<1x1x256xf32>,
    } else {
    }
    return
  }
  func.func @transform_0(%arg0: i32, %arg1: i32) -> (i32, i32, i32) {
    %c0_i32 = arith.constant 0 : i32
    %c0_i32_0 = arith.constant 0 : i32
    return %arg0, %arg1, %c0_i32 : i32, i32, i32
  }
  func.func @transform_1(%arg0: i32, %arg1: i32) -> (i32, i32) {
    %c0_i32 = arith.constant 0 : i32
    %c0_i32_0 = arith.constant 0 : i32
    %c0_i32_1 = arith.constant 0 : i32
    return %c0_i32, %c0_i32_0 : i32, i32
  }
  func.func @transform_2(%arg0: i32, %arg1: i32) -> (i32, i32) {
    %c0_i32 = arith.constant 0 : i32
    %c0_i32_0 = arith.constant 0 : i32
    %c0_i32_1 = arith.constant 0 : i32
    return %c0_i32, %c0_i32_0 : i32, i32
  }
  func.func @transform_3(%arg0: i32, %arg1: i32) -> (i32, i32) {
    %c0_i32 = arith.constant 0 : i32
    %c0_i32_0 = arith.constant 0 : i32
    %c0_i32_1 = arith.constant 0 : i32
    return %c0_i32, %c0_i32_0 : i32, i32
  }
  func.func @transform_4(%arg0: i32, %arg1: i32) -> (i32, i32) {
    %c0_i32 = arith.constant 0 : i32
    %c0_i32_0 = arith.constant 0 : i32
    %c0_i32_1 = arith.constant 0 : i32
    return %c0_i32, %c0_i32_0 : i32, i32
  }
  func.func @transform_5(%arg0: i32, %arg1: i32) -> (i32, i32) {
    %c0_i32 = arith.constant 0 : i32
    %c0_i32_0 = arith.constant 0 : i32
    %c0_i32_1 = arith.constant 0 : i32
    return %c0_i32, %c0_i32_0 : i32, i32
  }
  func.func @transform_6(%arg0: i32, %arg1: i32) -> (i32, i32, i32) {
    %c0_i32 = arith.constant 0 : i32
    %c0_i32_0 = arith.constant 0 : i32
    return %arg0, %arg1, %c0_i32 : i32, i32, i32
  }
  func.func @transform_7(%arg0: i32, %arg1: i32) -> (i32, i32, i32) {
    %c0_i32 = arith.constant 0 : i32
    %c0_i32_0 = arith.constant 0 : i32
    %c0_i32_1 = arith.constant 0 : i32
    return %arg0, %c0_i32, %c0_i32_0 : i32, i32, i32
  }
}

module attributes {stable_mosaic.version = 11 : i64} {
  func.func @_stage2_stats_kernel(%arg0: i32, %arg1: i32, %arg2: memref<1x128x256xbf16, #tpu.memory_space<vmem>>, %arg3: memref<1x1x256xf32, #tpu.memory_space<vmem>>, %arg4: memref<256x512xbf16, #tpu.memory_space<vmem>>, %arg5: memref<256x512xbf16, #tpu.memory_space<vmem>>, %arg6: memref<1x1x512xf32, #tpu.memory_space<vmem>>, %arg7: memref<1x1x512xf32, #tpu.memory_space<vmem>>) attributes {dimension_semantics = [#tpu.dimension_semantics<parallel>, #tpu.dimension_semantics<arbitrary>], iteration_bounds = array<i64: 2, 2>, scalar_prefetch = 0 : i64, scratch_operands = 0 : i64, tpu.core_type = #tpu.core_type<tc>, window_params = [{transform_indices = @transform_0, window_bounds = array<i64: 1, 128, 256>}, {transform_indices = @transform_1, window_bounds = array<i64: 1, 1, 256>}, {pipeline_mode = #tpu.pipeline_mode<synchronous>, transform_indices = @transform_2, window_bounds = array<i64: 256, 512>}, {pipeline_mode = #tpu.pipeline_mode<synchronous>, transform_indices = @transform_3, window_bounds = array<i64: 256, 512>}, {transform_indices = @transform_4, window_bounds = array<i64: 1, 1, 512>}, {transform_indices = @transform_5, window_bounds = array<i64: 1, 1, 512>}]} {
    %c0_i32 = arith.constant 0 : i32
    %0 = arith.cmpi eq, %arg1, %c0_i32 : i32
    %1 = arith.extui %0 : i1 to i32
    %c0_i32_0 = arith.constant 0 : i32
    %2 = arith.cmpi ne, %1, %c0_i32_0 : i32
    scf.if %2 {
      %cst_25 = arith.constant 0.000000e+00 : f32
      %31 = vector.broadcast %cst_25 : f32 to vector<1x1x512xf32>
      %c0_26 = arith.constant 0 : index
      %c0_27 = arith.constant 0 : index
      %c0_28 = arith.constant 0 : index
      %32 = vector.load %arg6[%c0_26, %c0_27, %c0_28] : memref<1x1x512xf32, #tpu.memory_space<vmem>>, vector<1x1x512xf32>
      tpu.vector_store %arg6[%c0_26, %c0_27, %c0_28], %31 {strides = array<i32>} : memref<1x1x512xf32, #tpu.memory_space<vmem>>, vector<1x1x512xf32>,
      %cst_29 = arith.constant 0.000000e+00 : f32
      %33 = vector.broadcast %cst_29 : f32 to vector<1x1x512xf32>
      %c0_30 = arith.constant 0 : index
      %c0_31 = arith.constant 0 : index
      %c0_32 = arith.constant 0 : index
      %34 = vector.load %arg7[%c0_30, %c0_31, %c0_32] : memref<1x1x512xf32, #tpu.memory_space<vmem>>, vector<1x1x512xf32>
      tpu.vector_store %arg7[%c0_30, %c0_31, %c0_32], %33 {strides = array<i32>} : memref<1x1x512xf32, #tpu.memory_space<vmem>>, vector<1x1x512xf32>,
    } else {
    }
    %c0 = arith.constant 0 : index
    %c0_1 = arith.constant 0 : index
    %c0_2 = arith.constant 0 : index
    %3 = vector.load %arg3[%c0, %c0_1, %c0_2] : memref<1x1x256xf32, #tpu.memory_space<vmem>>, vector<1x1x256xf32>
    %4 = vector.shape_cast %3 : vector<1x1x256xf32> to vector<1x256xf32>
    %5 = arith.truncf %4 : vector<1x256xf32> to vector<1x256xbf16>
    %c0_3 = arith.constant 0 : index
    %c0_4 = arith.constant 0 : index
    %6 = vector.load %arg5[%c0_3, %c0_4] : memref<256x512xbf16, #tpu.memory_space<vmem>>, vector<256x512xbf16>
    %cst = arith.constant dense<0.000000e+00> : vector<1x512xf32>
    %7 = tpu.matmul %5, %6, %cst {dimension_numbers = #tpu.dot_dimension_numbers<[1], [0], [0], [1], [0, 0, 1, 1], [], []>} : vector<1x256xbf16>, vector<256x512xbf16>, vector<1x512xf32> -> vector<1x512xf32>
    %c0_5 = arith.constant 0 : index
    %c0_6 = arith.constant 0 : index
    %c0_7 = arith.constant 0 : index
    %8 = vector.load %arg2[%c0_5, %c0_6, %c0_7] : memref<1x128x256xbf16, #tpu.memory_space<vmem>>, vector<1x128x256xbf16>
    %9 = vector.shape_cast %8 : vector<1x128x256xbf16> to vector<128x256xbf16>
    %c0_8 = arith.constant 0 : index
    %c0_9 = arith.constant 0 : index
    %10 = vector.load %arg4[%c0_8, %c0_9] : memref<256x512xbf16, #tpu.memory_space<vmem>>, vector<256x512xbf16>
    %cst_10 = arith.constant dense<0.000000e+00> : vector<128x512xf32>
    %11 = tpu.matmul %9, %10, %cst_10 {dimension_numbers = #tpu.dot_dimension_numbers<[1], [0], [0], [1], [0, 0, 1, 1], [], []>} : vector<128x256xbf16>, vector<256x512xbf16>, vector<128x512xf32> -> vector<128x512xf32>
    %12 = vector.broadcast %7 : vector<1x512xf32> to vector<128x512xf32>
    %13 = arith.addf %11, %12 : vector<128x512xf32>
    %c0_11 = arith.constant 0 : index
    %c0_12 = arith.constant 0 : index
    %c0_13 = arith.constant 0 : index
    %14 = vector.load %arg6[%c0_11, %c0_12, %c0_13] : memref<1x1x512xf32, #tpu.memory_space<vmem>>, vector<1x1x512xf32>
    %15 = vector.shape_cast %14 : vector<1x1x512xf32> to vector<1x512xf32>
    %cst_14 = arith.constant dense<0.000000e+00> : vector<512xf32>
    %16 = vector.multi_reduction <add>, %13, %cst_14 [0] : vector<128x512xf32> to vector<512xf32>
    %17 = vector.shape_cast %16 : vector<512xf32> to vector<1x512xf32>
    %18 = arith.addf %15, %17 : vector<1x512xf32>
    %c0_15 = arith.constant 0 : index
    %c0_16 = arith.constant 0 : index
    %c0_17 = arith.constant 0 : index
    %19 = vector.load %arg6[%c0_15, %c0_16, %c0_17] : memref<1x1x512xf32, #tpu.memory_space<vmem>>, vector<1x1x512xf32>
    %20 = vector.shape_cast %19 : vector<1x1x512xf32> to vector<1x512xf32>
    %21 = vector.shape_cast %18 : vector<1x512xf32> to vector<1x1x512xf32>
    tpu.vector_store %arg6[%c0_15, %c0_16, %c0_17], %21 {strides = array<i32>} : memref<1x1x512xf32, #tpu.memory_space<vmem>>, vector<1x1x512xf32>,
    %c0_18 = arith.constant 0 : index
    %c0_19 = arith.constant 0 : index
    %c0_20 = arith.constant 0 : index
    %22 = vector.load %arg7[%c0_18, %c0_19, %c0_20] : memref<1x1x512xf32, #tpu.memory_space<vmem>>, vector<1x1x512xf32>
    %23 = vector.shape_cast %22 : vector<1x1x512xf32> to vector<1x512xf32>
    %24 = arith.mulf %13, %13 : vector<128x512xf32>
    %cst_21 = arith.constant dense<0.000000e+00> : vector<512xf32>
    %25 = vector.multi_reduction <add>, %24, %cst_21 [0] : vector<128x512xf32> to vector<512xf32>
    %26 = vector.shape_cast %25 : vector<512xf32> to vector<1x512xf32>
    %27 = arith.addf %23, %26 : vector<1x512xf32>
    %c0_22 = arith.constant 0 : index
    %c0_23 = arith.constant 0 : index
    %c0_24 = arith.constant 0 : index
    %28 = vector.load %arg7[%c0_22, %c0_23, %c0_24] : memref<1x1x512xf32, #tpu.memory_space<vmem>>, vector<1x1x512xf32>
    %29 = vector.shape_cast %28 : vector<1x1x512xf32> to vector<1x512xf32>
    %30 = vector.shape_cast %27 : vector<1x512xf32> to vector<1x1x512xf32>
    tpu.vector_store %arg7[%c0_22, %c0_23, %c0_24], %30 {strides = array<i32>} : memref<1x1x512xf32, #tpu.memory_space<vmem>>, vector<1x1x512xf32>,
    return
  }
  func.func @transform_0(%arg0: i32, %arg1: i32) -> (i32, i32, i32) {
    %c0_i32 = arith.constant 0 : i32
    %c0_i32_0 = arith.constant 0 : i32
    return %arg0, %arg1, %c0_i32 : i32, i32, i32
  }
  func.func @transform_1(%arg0: i32, %arg1: i32) -> (i32, i32, i32) {
    %c0_i32 = arith.constant 0 : i32
    %c0_i32_0 = arith.constant 0 : i32
    %c0_i32_1 = arith.constant 0 : i32
    return %arg0, %c0_i32, %c0_i32_0 : i32, i32, i32
  }
  func.func @transform_2(%arg0: i32, %arg1: i32) -> (i32, i32) {
    %c0_i32 = arith.constant 0 : i32
    %c0_i32_0 = arith.constant 0 : i32
    %c0_i32_1 = arith.constant 0 : i32
    return %c0_i32, %c0_i32_0 : i32, i32
  }
  func.func @transform_3(%arg0: i32, %arg1: i32) -> (i32, i32) {
    %c0_i32 = arith.constant 0 : i32
    %c0_i32_0 = arith.constant 0 : i32
    %c0_i32_1 = arith.constant 0 : i32
    return %c0_i32, %c0_i32_0 : i32, i32
  }
  func.func @transform_4(%arg0: i32, %arg1: i32) -> (i32, i32, i32) {
    %c0_i32 = arith.constant 0 : i32
    %c0_i32_0 = arith.constant 0 : i32
    %c0_i32_1 = arith.constant 0 : i32
    return %arg0, %c0_i32, %c0_i32_0 : i32, i32, i32
  }
  func.func @transform_5(%arg0: i32, %arg1: i32) -> (i32, i32, i32) {
    %c0_i32 = arith.constant 0 : i32
    %c0_i32_0 = arith.constant 0 : i32
    %c0_i32_1 = arith.constant 0 : i32
    return %arg0, %c0_i32, %c0_i32_0 : i32, i32, i32
  }
}

module attributes {stable_mosaic.version = 11 : i64} {
  func.func @_stage2_apply_kernel(%arg0: i32, %arg1: i32, %arg2: memref<1x128x256xbf16, #tpu.memory_space<vmem>>, %arg3: memref<1x1x256xf32, #tpu.memory_space<vmem>>, %arg4: memref<256x512xbf16, #tpu.memory_space<vmem>>, %arg5: memref<256x512xbf16, #tpu.memory_space<vmem>>, %arg6: memref<1x512xf32, #tpu.memory_space<vmem>>, %arg7: memref<1x512xf32, #tpu.memory_space<vmem>>, %arg8: memref<512x256xbf16, #tpu.memory_space<vmem>>, %arg9: memref<1x256xf32, #tpu.memory_space<vmem>>, %arg10: memref<1x1x256xf32, #tpu.memory_space<vmem>>) attributes {dimension_semantics = [#tpu.dimension_semantics<parallel>, #tpu.dimension_semantics<arbitrary>], iteration_bounds = array<i64: 2, 2>, scalar_prefetch = 0 : i64, scratch_operands = 0 : i64, tpu.core_type = #tpu.core_type<tc>, window_params = [{transform_indices = @transform_0, window_bounds = array<i64: 1, 128, 256>}, {transform_indices = @transform_1, window_bounds = array<i64: 1, 1, 256>}, {pipeline_mode = #tpu.pipeline_mode<synchronous>, transform_indices = @transform_2, window_bounds = array<i64: 256, 512>}, {pipeline_mode = #tpu.pipeline_mode<synchronous>, transform_indices = @transform_3, window_bounds = array<i64: 256, 512>}, {pipeline_mode = #tpu.pipeline_mode<synchronous>, transform_indices = @transform_4, window_bounds = array<i64: 1, 512>}, {pipeline_mode = #tpu.pipeline_mode<synchronous>, transform_indices = @transform_5, window_bounds = array<i64: 1, 512>}, {pipeline_mode = #tpu.pipeline_mode<synchronous>, transform_indices = @transform_6, window_bounds = array<i64: 512, 256>}, {pipeline_mode = #tpu.pipeline_mode<synchronous>, transform_indices = @transform_7, window_bounds = array<i64: 1, 256>}, {transform_indices = @transform_8, window_bounds = array<i64: 1, 1, 256>}]} {
    %c0 = arith.constant 0 : index
    %c0_0 = arith.constant 0 : index
    %c0_1 = arith.constant 0 : index
    %0 = vector.load %arg3[%c0, %c0_0, %c0_1] : memref<1x1x256xf32, #tpu.memory_space<vmem>>, vector<1x1x256xf32>
    %1 = vector.shape_cast %0 : vector<1x1x256xf32> to vector<1x256xf32>
    %2 = arith.truncf %1 : vector<1x256xf32> to vector<1x256xbf16>
    %c0_2 = arith.constant 0 : index
    %c0_3 = arith.constant 0 : index
    %3 = vector.load %arg5[%c0_2, %c0_3] : memref<256x512xbf16, #tpu.memory_space<vmem>>, vector<256x512xbf16>
    %cst = arith.constant dense<0.000000e+00> : vector<1x512xf32>
    %4 = tpu.matmul %2, %3, %cst {dimension_numbers = #tpu.dot_dimension_numbers<[1], [0], [0], [1], [0, 0, 1, 1], [], []>} : vector<1x256xbf16>, vector<256x512xbf16>, vector<1x512xf32> -> vector<1x512xf32>
    %c0_4 = arith.constant 0 : index
    %c0_5 = arith.constant 0 : index
    %c0_6 = arith.constant 0 : index
    %5 = vector.load %arg2[%c0_4, %c0_5, %c0_6] : memref<1x128x256xbf16, #tpu.memory_space<vmem>>, vector<1x128x256xbf16>
    %6 = vector.shape_cast %5 : vector<1x128x256xbf16> to vector<128x256xbf16>
    %c0_7 = arith.constant 0 : index
    %c0_8 = arith.constant 0 : index
    %7 = vector.load %arg4[%c0_7, %c0_8] : memref<256x512xbf16, #tpu.memory_space<vmem>>, vector<256x512xbf16>
    %cst_9 = arith.constant dense<0.000000e+00> : vector<128x512xf32>
    %8 = tpu.matmul %6, %7, %cst_9 {dimension_numbers = #tpu.dot_dimension_numbers<[1], [0], [0], [1], [0, 0, 1, 1], [], []>} : vector<128x256xbf16>, vector<256x512xbf16>, vector<128x512xf32> -> vector<128x512xf32>
    %9 = vector.broadcast %4 : vector<1x512xf32> to vector<128x512xf32>
    %10 = arith.addf %8, %9 : vector<128x512xf32>
    %c0_10 = arith.constant 0 : index
    %c0_11 = arith.constant 0 : index
    %11 = vector.load %arg6[%c0_10, %c0_11] : memref<1x512xf32, #tpu.memory_space<vmem>>, vector<1x512xf32>
    %12 = vector.broadcast %11 : vector<1x512xf32> to vector<128x512xf32>
    %13 = arith.mulf %10, %12 : vector<128x512xf32>
    %c0_12 = arith.constant 0 : index
    %c0_13 = arith.constant 0 : index
    %14 = vector.load %arg7[%c0_12, %c0_13] : memref<1x512xf32, #tpu.memory_space<vmem>>, vector<1x512xf32>
    %15 = vector.broadcast %14 : vector<1x512xf32> to vector<128x512xf32>
    %16 = arith.addf %13, %15 : vector<128x512xf32>
    %cst_14 = arith.constant 0.000000e+00 : f32
    %17 = vector.broadcast %cst_14 : f32 to vector<128x512xf32>
    %18 = arith.maximumf %16, %17 : vector<128x512xf32>
    %19 = arith.truncf %18 : vector<128x512xf32> to vector<128x512xbf16>
    %c0_15 = arith.constant 0 : index
    %c0_16 = arith.constant 0 : index
    %20 = vector.load %arg8[%c0_15, %c0_16] : memref<512x256xbf16, #tpu.memory_space<vmem>>, vector<512x256xbf16>
    %cst_17 = arith.constant dense<0.000000e+00> : vector<128x256xf32>
    %21 = tpu.matmul %19, %20, %cst_17 {dimension_numbers = #tpu.dot_dimension_numbers<[1], [0], [0], [1], [0, 0, 1, 1], [], []>} : vector<128x512xbf16>, vector<512x256xbf16>, vector<128x256xf32> -> vector<128x256xf32>
    %c0_18 = arith.constant 0 : index
    %c0_19 = arith.constant 0 : index
    %22 = vector.load %arg9[%c0_18, %c0_19] : memref<1x256xf32, #tpu.memory_space<vmem>>, vector<1x256xf32>
    %23 = vector.broadcast %22 : vector<1x256xf32> to vector<128x256xf32>
    %24 = arith.addf %21, %23 : vector<128x256xf32>
    %cst_20 = arith.constant dense<0xFF800000> : vector<256xf32>
    %25 = vector.multi_reduction <maximumf>, %24, %cst_20 [0] : vector<128x256xf32> to vector<256xf32>
    %26 = vector.shape_cast %25 : vector<256xf32> to vector<1x256xf32>
    %c0_i32 = arith.constant 0 : i32
    %27 = arith.cmpi eq, %arg1, %c0_i32 : i32
    %28 = arith.extui %27 : i1 to i32
    %c0_i32_21 = arith.constant 0 : i32
    %29 = arith.cmpi ne, %28, %c0_i32_21 : i32
    scf.if %29 {
      %c0_24 = arith.constant 0 : index
      %c0_25 = arith.constant 0 : index
      %c0_26 = arith.constant 0 : index
      %33 = vector.load %arg10[%c0_24, %c0_25, %c0_26] : memref<1x1x256xf32, #tpu.memory_space<vmem>>, vector<1x1x256xf32>
      %34 = vector.shape_cast %33 : vector<1x1x256xf32> to vector<1x256xf32>
      %35 = vector.shape_cast %26 : vector<1x256xf32> to vector<1x1x256xf32>
      tpu.vector_store %arg10[%c0_24, %c0_25, %c0_26], %35 {strides = array<i32>} : memref<1x1x256xf32, #tpu.memory_space<vmem>>, vector<1x1x256xf32>,
    } else {
    }
    %c0_i32_22 = arith.constant 0 : i32
    %30 = arith.cmpi sgt, %arg1, %c0_i32_22 : i32
    %31 = arith.extui %30 : i1 to i32
    %c0_i32_23 = arith.constant 0 : i32
    %32 = arith.cmpi ne, %31, %c0_i32_23 : i32
    scf.if %32 {
      %c0_24 = arith.constant 0 : index
      %c0_25 = arith.constant 0 : index
      %c0_26 = arith.constant 0 : index
      %33 = vector.load %arg10[%c0_24, %c0_25, %c0_26] : memref<1x1x256xf32, #tpu.memory_space<vmem>>, vector<1x1x256xf32>
      %34 = vector.shape_cast %33 : vector<1x1x256xf32> to vector<1x256xf32>
      %35 = arith.maximumf %34, %26 : vector<1x256xf32>
      %c0_27 = arith.constant 0 : index
      %c0_28 = arith.constant 0 : index
      %c0_29 = arith.constant 0 : index
      %36 = vector.load %arg10[%c0_27, %c0_28, %c0_29] : memref<1x1x256xf32, #tpu.memory_space<vmem>>, vector<1x1x256xf32>
      %37 = vector.shape_cast %36 : vector<1x1x256xf32> to vector<1x256xf32>
      %38 = vector.shape_cast %35 : vector<1x256xf32> to vector<1x1x256xf32>
      tpu.vector_store %arg10[%c0_27, %c0_28, %c0_29], %38 {strides = array<i32>} : memref<1x1x256xf32, #tpu.memory_space<vmem>>, vector<1x1x256xf32>,
    } else {
    }
    return
  }
  func.func @transform_0(%arg0: i32, %arg1: i32) -> (i32, i32, i32) {
    %c0_i32 = arith.constant 0 : i32
    %c0_i32_0 = arith.constant 0 : i32
    return %arg0, %arg1, %c0_i32 : i32, i32, i32
  }
  func.func @transform_1(%arg0: i32, %arg1: i32) -> (i32, i32, i32) {
    %c0_i32 = arith.constant 0 : i32
    %c0_i32_0 = arith.constant 0 : i32
    %c0_i32_1 = arith.constant 0 : i32
    return %arg0, %c0_i32, %c0_i32_0 : i32, i32, i32
  }
  func.func @transform_2(%arg0: i32, %arg1: i32) -> (i32, i32) {
    %c0_i32 = arith.constant 0 : i32
    %c0_i32_0 = arith.constant 0 : i32
    %c0_i32_1 = arith.constant 0 : i32
    return %c0_i32, %c0_i32_0 : i32, i32
  }
  func.func @transform_3(%arg0: i32, %arg1: i32) -> (i32, i32) {
    %c0_i32 = arith.constant 0 : i32
    %c0_i32_0 = arith.constant 0 : i32
    %c0_i32_1 = arith.constant 0 : i32
    return %c0_i32, %c0_i32_0 : i32, i32
  }
  func.func @transform_4(%arg0: i32, %arg1: i32) -> (i32, i32) {
    %c0_i32 = arith.constant 0 : i32
    %c0_i32_0 = arith.constant 0 : i32
    %c0_i32_1 = arith.constant 0 : i32
    return %c0_i32, %c0_i32_0 : i32, i32
  }
  func.func @transform_5(%arg0: i32, %arg1: i32) -> (i32, i32) {
    %c0_i32 = arith.constant 0 : i32
    %c0_i32_0 = arith.constant 0 : i32
    %c0_i32_1 = arith.constant 0 : i32
    return %c0_i32, %c0_i32_0 : i32, i32
  }
  func.func @transform_6(%arg0: i32, %arg1: i32) -> (i32, i32) {
    %c0_i32 = arith.constant 0 : i32
    %c0_i32_0 = arith.constant 0 : i32
    %c0_i32_1 = arith.constant 0 : i32
    return %c0_i32, %c0_i32_0 : i32, i32
  }
  func.func @transform_7(%arg0: i32, %arg1: i32) -> (i32, i32) {
    %c0_i32 = arith.constant 0 : i32
    %c0_i32_0 = arith.constant 0 : i32
    %c0_i32_1 = arith.constant 0 : i32
    return %c0_i32, %c0_i32_0 : i32, i32
  }
  func.func @transform_8(%arg0: i32, %arg1: i32) -> (i32, i32, i32) {
    %c0_i32 = arith.constant 0 : i32
    %c0_i32_0 = arith.constant 0 : i32
    %c0_i32_1 = arith.constant 0 : i32
    return %arg0, %c0_i32, %c0_i32_0 : i32, i32, i32
  }
}

</mosaic_0001>

<bundles_post_ra>
// kernel: _lambda_.4
= control target key start
LH: loop header
LB: loop body
LE: loop exit
PB: predicated region body
PF: predicated region fallthrough
CT: control target
= control target key end

     0   :  { %s1573_s0 = inlined_call_operand.hbm [shape: f32[2,256,3], index: 0, kind: input, shape index: {}]   ;;  %s1574_s1 = inlined_call_operand.hbm [shape: f32[3,128], index: 1, kind: input, shape index: {}]   ;;  %s1575_s2 = inlined_call_operand.hbm [shape: f32[2,1,128], index: 2, kind: output, shape index: {0}]   ;;  %s1576_s3 = inlined_call_operand.hbm [shape: f32[2,1,128], index: 3, kind: output, shape index: {1}]  }
   0x1   :  { %1588 = sst [smem:[#allocation19_spill]] %s1574_s1 }
   0x2   :  { %9 = vsyncpa [#allocation3], 0 }
   0x3   :  { %11 = vsyncpa [#allocation3 + $0x1], 0 }
   0x4   :  { %12 = vsyncpa [#allocation6], 0 }
   0x5   :  { %13 = vsyncpa [#allocation4], 0 }
   0x6   :  { %15 = vsyncpa [#allocation4 + $0x1], 0 }
   0x7   :  { %16 = vsyncpa [#allocation9], 0 }
   0x8   :  { %18 = vsyncpa [#allocation9 + $0x1], 0  ;;  %s1160_s12 = smov 0   ;;  %s1162_s13 = smov 0  }
   0x9   :  { %s1164_s14 = smov 0   ;;  %s1166_s15 = smov 0  }
   0xa   :  { %s1168_s16 = smov 0   ;;  %s1170_s17 = smov 0  }
   0xb   :  { %s1172_s18 = smov 0   ;;  %s1174_s19 = smov 0  }
   0xc   :  { %s1176_s20 = smov 0   ;;  %s1178_s21 = smov 0  }
   0xd   :  { %s1180_s22 = smov 0  }
   0xe LB: > { %1589 = sst [smem:[#allocation14_spill]] %s1088_s12  ;;  %s763_s23 = sadd.s32 4294967295, %s1128_s22   ;;  %s1128_s22 = sphi %s1180_s22, %s24_s22   ;;  %s1124_s21 = sphi %s1178_s21, %s1623_s21   ;;  %s1120_s20 = sphi %s1176_s20, %s1614_s20   ;;  %s1116_s19 = sphi %s1174_s19, %s1622_s19   ;;  %s1112_s18 = sphi %s1172_s18, %s1613_s18   ;;  %s1108_s17 = sphi %s1170_s17, %s1621_s17   ;;  %s1104_s16 = sphi %s1168_s16, %s1620_s16   ;;  %s1100_s15 = sphi %s1166_s15, %s1619_s15   ;;  %s1096_s14 = sphi %s1164_s14, %s1618_s14   ;;  %s1092_s13 = sphi %s1162_s13, %s1617_s13   ;;  %s1088_s12 = sphi %s1160_s12, %s1616_s12  }
   0xf   : > { %1590 = sst [smem:[#allocation15_spill]] %s1120_s20  ;;  %s764_s24 = sadd.s32 4294967294, %s1128_s22  }
  0x10   : > { %p52_p0 = scmp.ne.s32.totalorder %s1108_s17, %s1104_s16  ;;  %p53_p1 = scmp.eq.s32.totalorder %s1128_s22, 0 }
  0x11   : > { %p58_p2 = scmp.ne.s32.totalorder %s1104_s16, %s1100_s15  ;;  %p1220_p3 = scmp.eq.s32.totalorder %s763_s23, 0 }
  0x12   : > { %p1225_p4 = por %p53_p1, %p52_p0  ;;  %p102_p5 = scmp.ne.s32.totalorder %s1096_s14, %s1092_s13 }
  0x13   : > { %s1591_s26 = scalar_select %p1220_p3, 1, 0 }
  0x14   : > { %p1233_p6 = por %p1220_p3, %p58_p2  ;;  %p103_p7 = scmp.eq.s32.totalorder %s763_s23, 3 }
  0x15   : > { %p108_p8 = scmp.ne.s32.totalorder %s1092_s13, %s1088_s12  ;;  %p109_p9 = scmp.eq.s32.totalorder %s764_s24, 3 }
  0x16   : > { %s1593_s29 = scalar_select %p1233_p6, 1, 0 }
  0x17   : > { %p1239_p10 = por %p103_p7, %p102_p5  ;;  %p765_p11 = scmp.ge.s32.totalorder %s1128_s22, 1 }
  0x18   : > { %p1244_p12 = por %p109_p9, %p108_p8  ;;  %p142_p13 = scmp.lt.s32.totalorder %s1128_s22, 5 }
  0x19   : > { %s1594_s30 = scalar_select %p1239_p10, 1, 0 }
  0x1a   : > { %s1595_s4 = scalar_select %p1244_p12, 1, 0 }
  0x1b   : > { %p1249_p0 = pnand %p765_p11, %p142_p13  ;;  %s1130_s6 = smov [#allocation5]  }
  0x1c   : > { %1596 = sst [smem:[#allocation16_spill]] %s1595_s4  ;;  %s155_s7 = sshll.u32 %s1130_s6, 4  ;;  %s156_s7 = int_to_ptr.vmem [resolvable:$true] %s155_s7 }
  0x1d   : > { %s1597_s5 = scalar_select %p1249_p0, 1, 0 }
  0x1e   : > { %p790_p1 = pneg %p1249_p0  ;;  %p806_p2 = scmp.lt.s32.totalorder %s1128_s22, 4 }
  0x1f   : > { %s1600_s1 = sld [smem:[#allocation19_spill]] }
  0x20   : > { %p1258_p5 = pnand %p790_p1, %p1220_p3  ;;  %p1264_p7 = pnand %p806_p2, %p1225_p4 }
  0x22   : > { %s1599_s9 = scalar_select %p1264_p7, 1, 0 }
  0x23   : > { %p914_p9 = pneg %p1258_p5 }
  0x25   : > { %s912_s15 = scalar_lea.hbm %s1600_s1, 64 }
  0x26   : > { %p913_p8 = scmp.ne.s32.totalorder %s1600_s1, %s912_s15  ;;  %p919_p1 = scmp.lt.u32.totalorder %s912_s15, %s1600_s1 }
  0x28   : > { %p915_p11 = pnand %p914_p9, %p913_p8 }
  0x2a   : > { %p916_p13 = pneg %p915_p11 }
  0x2c   : > { %p921_p4 = pnand %p919_p1, %p916_p13 }
  0x2e   : > { %924 = shalt.err (!%p921_p4)
}
  0x2f   : > { %s925_s28 = scalar_lea.vmem %s156_s7, 64  ;;  %p933_p3 = scmp.lt.s32.totalorder %s156_s7, %s156_s7 }
  0x30   : > { %p926_p2 = scmp.ne.s32.totalorder %s156_s7, %s925_s28  ;;  %p934_p6 = scmp.lt.s32.totalorder %s925_s28, %s925_s28 }
  0x32   : > { %p928_p12 = pnand %p926_p2, %p914_p9  ;;  %p935_p0 = por %p934_p6, %p933_p3 }
  0x34   : > { %p929_p10 = pneg %p928_p12 }
  0x36   : > { %p936_p7 = pnand %p935_p0, %p929_p10 }
  0x38   : > { %939 = shalt.err (!%p936_p7)
}
  0x39   : > { %793 = dma.hbm_to_vmem [thread:$0]  (!%p1258_p5), %s1600_s1, 64, %s156_s7, [#allocation6]  }
  0x3a   : > { %s33_s25 = sadd.s32 1, %s1120_s20  ;;  %s36_s15 = sadd.s32 1, %s1124_s21 }
  0x3b   : > { %p34_p12 = scmp.ge.s32.totalorder %s33_s25, 2  ;;  %s166_s23 = sand.u32 1, %s1108_s17  }
  0x3c   : > { %s768_s24 = sshll.u32 %s166_s23, 7  ;;  %s769_s6 = sshll.u32 %s1120_s20, 4 }
  0x3d   : > { %s1625_s25 = smov (%p34_p12, %s33_s25), 0  ;;  %s1627_s15 = smov (!%p34_p12, %s36_s15), %s1124_s21 }
  0x3e   : > { %1601 = sst [smem:[#allocation17_spill]] %s1625_s25  ;;  %s41_s8 = ssub.s32 %s1120_s20, %s1625_s25 }
  0x3f   : > { %p38_p3 = scmp.ge.s32.totalorder %s1627_s15, 2  ;;  %s770_s28 = sshll.u32 %s1124_s21, 5 }
  0x40   : > { %s170_s10 = scalar_lea.vmem [#allocation2], %s768_s24  ;;  %s176_s11 = sadd.s32 %s770_s28, %s769_s6 }
  0x41   : > { %s179_s7 = sshll.u32 %s170_s10, 4  ;;  %s1629_s15 = smov (%p38_p3, %s1627_s15), 0  ;;  %s1296_s7 = int_to_ptr.vmem [resolvable:$true] %s179_s7 }
  0x42   : > { %1602 = sst [smem:[#allocation18_spill]] %s1629_s15  ;;  %s40_s27 = ssub.s32 %s1124_s21, %s1629_s15 }
  0x43   : > { %s771_s1 = sshll.u32 %s176_s11, 7  ;;  %s42_s4 = sor.u32 %s41_s8, %s40_s27 }
  0x44   : > { %p90_p6 = scmp.eq.s32.totalorder %s40_s27, 0  ;;  %p43_p10 = scmp.eq.s32.totalorder %s42_s4, 0 }
  0x45   : > { %s1303_s20 = scalar_lea.hbm %s1573_s0, %s771_s1  ;;  %s1603_s24 = sadd.s32 1, %s1096_s14 }
  0x46   : > { %s1308_s10 = scalar_select %p90_p6, %s1096_s14, %s1603_s24  }
  0x47   : > { %s1604_s6 = sadd.s32 1, %s1108_s17  ;;  %s1315_s15 = scalar_lea.sflag [#allocation3], %s166_s23 }
  0x48   : > { %s1313_s28 = scalar_select %p43_p10, %s1108_s17, %s1604_s6  }
  0x49   : > { %s940_s8 = scalar_lea.hbm %s1303_s20, 2048  ;;  %p1605_p5 = scmp.ne.s32.totalorder %s1599_s9, 0 }
  0x4a   : > { %p941_p0 = scmp.ne.s32.totalorder %s1303_s20, %s940_s8  ;;  %s945_s27 = scalar_lea.hbm %s1573_s0, 8192 }
  0x4b   : > { %p942_p7 = pneg %p1605_p5  ;;  %p946_p11 = scmp.lt.u32.totalorder %s1303_s20, %s1573_s0 }
  0x4c   : > { %p947_p13 = scmp.lt.u32.totalorder %s945_s27, %s940_s8  ;;  %p949_p4 = scmp.lt.u32.totalorder %s940_s8, %s1303_s20 }
  0x4d   : > { %p943_p8 = pnand %p942_p7, %p941_p0 }
  0x4e   : > { %p948_p1 = por %p947_p13, %p946_p11 }
  0x4f   : > { %p944_p9 = pneg %p943_p8 }
  0x50   : > { %p950_p2 = por %p949_p4, %p948_p1 }
  0x52   : > { %p951_p12 = pnand %p950_p2, %p944_p9 }
  0x54   : > { %954 = shalt.err (!%p951_p12)
}
  0x55   : > { %s955_s23 = scalar_lea.vmem %s1296_s7, 2048  ;;  %s1131_s11 = smov [#allocation2]  }
  0x56   : > { %p956_p3 = scmp.ne.s32.totalorder %s1296_s7, %s955_s23  ;;  %s960_s24 = sshll.u32 %s1131_s11, 4  ;;  %s961_s24 = int_to_ptr.vmem [resolvable:$false] %s960_s24 }
  0x57   : > { %s962_s6 = scalar_lea.vmem %s961_s24, 4096  ;;  %p963_p0 = scmp.lt.s32.totalorder %s1296_s7, %s961_s24 }
  0x58   : > { %p958_p6 = pnand %p956_p3, %p942_p7  ;;  %p964_p8 = scmp.lt.s32.totalorder %s962_s6, %s955_s23 }
  0x5a   : > { %p959_p10 = pneg %p958_p6  ;;  %p965_p11 = por %p964_p8, %p963_p0 }
  0x5c   : > { %p966_p13 = pnand %p965_p11, %p959_p10 }
  0x5e   : > { %969 = shalt.err (!%p966_p13)
}
  0x5f   : > { %s1132_s8 = smov 128   ;;  %s1133_s1 = smov 8  }
  0x60   : > { %797 = dma.hbm_to_vmem [thread:$0]  (!%p1605_p5), %s1303_s20, 2048, %s1296_s7, %s1315_s15, %s1132_s8, %s1132_s8, %s1133_s1  }
  0x61   : > { %p1606_p7 = scmp.ne.s32.totalorder %s1597_s5, 0 }
  0x62   : > { %s193_s12 = sand.u32 (!%p1606_p7), 1, %s1104_s16   ;;  %p1607_p9 = scmp.ne.s32.totalorder (!%p1606_p7), %s1593_s29, 0 }
  0x63   : > { %191 = sbr.rel (%p1606_p7) target bundleno = 406 (0x196), region = 28  ;;  %s773_s27 = sshll.u32 (!%p1606_p7), %s193_s12, 7 }
  0x64   : > { %s194_s4 = scalar_lea.sflag (!%p1606_p7), [#allocation3], %s193_s12  ;;  %s1346_s25 = scalar_lea.vmem (!%p1606_p7), [#allocation2], %s773_s27 }
  0x6a   : > { %1071 = dma.done.wait (%p1607_p9), %s194_s4, 2048  }
  0x6b   : > { %1073 = vsyncadd (%p1607_p9), %s194_s4, 4294965248  ;;  %p1608_p1 = scmp.ne.s32.totalorder %s1591_s26, 0 }
  0x6d   : > { %1075 = dma.done.wait (%p1608_p1), [#allocation6], 64  }
  0x6e   : > { %1077 = vsyncadd (%p1608_p1), [#allocation6], 4294967232  ;;  %s1357_s20 = sand.u32 1, %s1092_s13   ;;  %p775_p5 = scmp.ne.s32.totalorder %s1112_s18, 0 }
  0x6f   : > { %s1360_s5 = scalar_lea.vmem [#allocation7], %s1357_s20  ;;  %s1363_s9 = scalar_lea.vmem [#allocation8], %s1357_s20  ;;  %v1134_v0 = vmov (!%p775_p5), 0.0  }
  0x70   : > { %231 = sbr.rel (%p775_p5) target bundleno = 119 (0x77), region = 40  ;;  %232 = vst [vmem:[%s1360_s5] sm:$0x1] (!%p775_p5), %v1134_v0  ;;  %233 = vst [vmem:[%s1363_s9] sm:$0x1] (!%p775_p5), %v1134_v0 }
  0x77 PF: > { %v236_v1 = vld [vmem:[%s1346_s25 + $0x10] sm:$0xff]  ;;  %v234_v2 = vld [vmem:[%s1346_s25] sm:$0xff]  ;;  %v1135_v3 = vmov 0   ;;  %v237_v4 = vld [vmem:[%s1346_s25 + $0x18] sm:$0xff]  ;;  %v1136_v18 = vmov 1   ;;  %v1137_v19 = vmov 2   ;;  %v331_v32 = vlaneseq }
  0x78   : > { %905 = vset.pattern.permute.xlu1 %v1135_v3  ;;  %904 = vset.pattern.permute.xlu0 %v1135_v3  ;;  %v235_v5 = vld [vmem:[%s1346_s25 + $0x8] sm:$0xff]  ;;  %v238_v7 = vld [vmem:[%s1346_s25 + $0x20] sm:$0xff]  ;;  %v241_v8 = vld [vmem:[%s1346_s25 + $0x38] sm:$0xff]  ;;  %s776_s18 = sshll.u32 %s1116_s19, 4  ;;  %s632_s26 = sshll.u32 %s1360_s5, 4  ;;  %s1481_s26 = int_to_ptr.vmem [resolvable:$true] %s632_s26 }
  0x79   : > { %263 = vperm.xlu1 %905, %v236_v1   ;;  %253 = vperm.xlu0 %904, %v234_v2   ;;  %v239_v6 = vld [vmem:[%s1346_s25 + $0x28] sm:$0xff]  ;;  %v240_v9 = vld [vmem:[%s1346_s25 + $0x30] sm:$0xff]  ;;  %v242_v11 = vld [vmem:[%s1346_s25 + $0x40] sm:$0xff]  ;;  %v332_v35 = vshrl.u32 %v331_v32, 7  ;;  %s645_s29 = sshll.u32 %s1363_s9, 4  ;;  %s1479_s23 = scalar_lea.hbm %s1575_s2, %s776_s18  ;;  %s1489_s29 = int_to_ptr.vmem [resolvable:$true] %s645_s29 }
  0x7a   : > { %v243_v10 = vld [vmem:[%s1346_s25 + $0x48] sm:$0xff]  ;;  %v245_v12 = vld [vmem:[%s1346_s25 + $0x58] sm:$0xff]  ;;  %v244_v13 = vld [vmem:[%s1346_s25 + $0x50] sm:$0xff]  ;;  %s1487_s24 = scalar_lea.hbm %s1576_s3, %s776_s18  ;;  %s616_s6 = scalar_lea.sflag [#allocation4], %s1357_s20 }
  0x7b   : > { %v247_v14 = vld [vmem:[%s1346_s25 + $0x68] sm:$0xff]  ;;  %v246_v15 = vld [vmem:[%s1346_s25 + $0x60] sm:$0xff]  ;;  %v249_v16 = vld [vmem:[%s1346_s25 + $0x78] sm:$0xff]  ;;  %v417_v38 = vsub.s32 1, %v332_v35  ;;  %v517_v39 = vsub.s32 2, %v332_v35  ;;  %v333_v41 = vsub.s32 0, %v332_v35 }
  0x7c   : > { %v248_v17 = vld [vmem:[%s1346_s25 + $0x70] sm:$0xff]  ;;  %v250_v40 = vld [vmem:[#allocation5] sm:$0x7]  ;;  %s970_s8 = scalar_lea.vmem %s1481_s26, 16  ;;  %p1609_p2 = scmp.ne.s32.totalorder %s1594_s30, 0 }
  0x7d   : > { %268 = vperm.xlu1 %905, %v237_v4   ;;  %258 = vperm.xlu0 %904, %v235_v5   ;;  %v1406_v42 = vrot.slane %v250_v40, %v417_v38  ;;  %v1408_v45 = vrot.slane %v250_v40, %v517_v39  ;;  %v1410_v46 = vrot.slane %v250_v40, %v333_v41  ;;  %p971_p4 = scmp.ne.s32.totalorder %s1481_s26, %s970_s8  ;;  %s1138_s1 = smov [#allocation7]  }
  0x7e   : > { %s974_s12 = sshll.u32 %s1138_s1, 4  ;;  %s975_s12 = int_to_ptr.vmem [resolvable:$false] %s974_s12 }
  0x7f   : > { %p972_p12 = pnand %p971_p4, %p1609_p2  ;;  %s976_s27 = scalar_lea.vmem %s975_s12, 32 }
  0x80   : > { %p977_p6 = scmp.lt.s32.totalorder %s1481_s26, %s975_s12  ;;  %p978_p10 = scmp.lt.s32.totalorder %s976_s27, %s970_s8 }
  0x81   : > { %278 = vperm.xlu1 %905, %v239_v6   ;;  %273 = vperm.xlu0 %904, %v238_v7   ;;  %p973_p3 = pneg %p972_p12 }
  0x82   : > { %p979_p0 = por %p978_p10, %p977_p6 }
  0x84   : > { %p980_p8 = pnand %p979_p0, %p973_p3 }
  0x85   : > { %288 = vperm.xlu1 %905, %v241_v8   ;;  %283 = vperm.xlu0 %904, %v240_v9  }
  0x89   : > { %298 = vperm.xlu1 %905, %v243_v10   ;;  %293 = vperm.xlu0 %904, %v242_v11  }
  0x8d   : > { %308 = vperm.xlu1 %905, %v245_v12   ;;  %303 = vperm.xlu0 %904, %v244_v13  }
  0x91   : > { %318 = vperm.xlu1 %905, %v247_v14   ;;  %313 = vperm.xlu0 %904, %v246_v15  }
  0x95   : > { %328 = vperm.xlu1 %905, %v249_v16   ;;  %323 = vperm.xlu0 %904, %v248_v17  }
  0x99   : > { %907 = vset.pattern.permute.xlu1 %v1136_v18  ;;  %906 = vset.pattern.permute.xlu0 %v1136_v18 }
  0x9a   : > { %356 = vperm.xlu1 %907, %v235_v5   ;;  %352 = vperm.xlu0 %906, %v234_v2  }
  0x9e   : > { %360 = vperm.xlu1 %907, %v236_v1   ;;  %908 = vset.pattern.permute.xlu0 %v1137_v19 }
  0x9f   : > { %452 = vperm.xlu0 %908, %v234_v2  }
  0xa2   : > { %909 = vset.pattern.permute.xlu1 %v1137_v19 }
  0xa3   : > { %456 = vperm.xlu1 %909, %v235_v5   ;;  %460 = vperm.xlu0 %908, %v236_v1  }
  0xa7   : > { %910 = vset.pattern.permute.xlu1 %v1136_v18  ;;  %464 = vperm.xlu0 %908, %v237_v4  }
  0xa8   : > { %364 = vperm.xlu1 %910, %v237_v4  }
  0xab   : > { %468 = vperm.xlu0 %908, %v238_v7  }
  0xac   : > { %368 = vperm.xlu1 %910, %v238_v7  }
  0xaf   : > { %472 = vperm.xlu0 %908, %v239_v6  }
  0xb0   : > { %372 = vperm.xlu1 %910, %v239_v6  }
  0xb3   : > { %476 = vperm.xlu0 %908, %v240_v9  }
  0xb4   : > { %376 = vperm.xlu1 %910, %v240_v9  }
  0xb7   : > { %480 = vperm.xlu0 %908, %v241_v8  }
  0xb8   : > { %380 = vperm.xlu1 %910, %v241_v8  }
  0xbb   : > { %484 = vperm.xlu0 %908, %v242_v11  }
  0xbc   : > { %384 = vperm.xlu1 %910, %v242_v11  }
  0xbf   : > { %488 = vperm.xlu0 %908, %v243_v10  }
  0xc0   : > { %388 = vperm.xlu1 %910, %v243_v10  }
  0xc3   : > { %492 = vperm.xlu0 %908, %v244_v13  }
  0xc4   : > { %392 = vperm.xlu1 %910, %v244_v13  }
  0xc7   : > { %496 = vperm.xlu0 %908, %v245_v12  }
  0xc8   : > { %396 = vperm.xlu1 %910, %v245_v12  }
  0xcb   : > { %500 = vperm.xlu0 %908, %v246_v15  }
  0xcc   : > { %400 = vperm.xlu1 %910, %v246_v15  }
  0xcf   : > { %504 = vperm.xlu0 %908, %v247_v14  }
  0xd0   : > { %404 = vperm.xlu1 %910, %v247_v14  }
  0xd3   : > { %508 = vperm.xlu0 %908, %v248_v17  }
  0xd4   : > { %408 = vperm.xlu1 %910, %v248_v17  }
  0xd8   : > { %412 = vperm.xlu1 %910, %v249_v16  }
  0xdc   : > { %911 = vset.pattern.permute.xlu1 %v1137_v19 }
  0xdd   : > { %512 = vperm.xlu1 %911, %v249_v16  }
  0xf8   : > { %v264_v20 = vpop.permute.xlu1 %263  ;;  %v254_v21 = vpop.permute.xlu0 %253 }
  0xf9   : > { %v335_v50 = vmul.f32 %v1410_v46, %v254_v21  ;;  %v337_v56 = vmul.f32 %v1410_v46, %v264_v20 }
  0xfc   : > { %v269_v22 = vpop.permute.xlu1 %268  ;;  %v259_v23 = vpop.permute.xlu0 %258 }
  0xfd   : > { %v336_v53 = vmul.f32 %v1410_v46, %v259_v23  ;;  %v338_v6 = vmul.f32 %v1410_v46, %v269_v22 }
 0x100   : > { %v1384_v24 = vpop.permute.xlu1 %278  ;;  %v274_v25 = vpop.permute.xlu0 %273 }
 0x101   : > { %v339_v15 = vmul.f32 %v1410_v46, %v274_v25  ;;  %v340_v38 = vmul.f32 %v1410_v46, %v1384_v24 }
 0x104   : > { %v1386_v26 = vpop.permute.xlu1 %288  ;;  %v1388_v27 = vpop.permute.xlu0 %283 }
 0x108   : > { %v1390_v28 = vpop.permute.xlu1 %298  ;;  %v1392_v29 = vpop.permute.xlu0 %293 }
 0x10c   : > { %v1394_v30 = vpop.permute.xlu1 %308  ;;  %v1396_v31 = vpop.permute.xlu0 %303 }
 0x110   : > { %v1398_v33 = vpop.permute.xlu1 %318  ;;  %v1400_v34 = vpop.permute.xlu0 %313 }
 0x114   : > { %v1402_v36 = vpop.permute.xlu1 %328  ;;  %v1404_v37 = vpop.permute.xlu0 %323 }
 0x119   : > { %v357_v43 = vpop.permute.xlu1 %356  ;;  %v353_v44 = vpop.permute.xlu0 %352 }
 0x11a   : > { %v419_v47 = vmul.f32 %v1406_v42, %v353_v44  ;;  %v420_v51 = vmul.f32 %v1406_v42, %v357_v43 }
 0x11c   : > { %v435_v54 = vadd.f32 %v419_v47, %v335_v50  ;;  %v436_v59 = vadd.f32 %v420_v51, %v336_v53 }
 0x11d   : > { %v361_v48 = vpop.permute.xlu1 %360 }
 0x11e   : > { %v453_v49 = vpop.permute.xlu0 %452  ;;  %v421_v55 = vmul.f32 %v1406_v42, %v361_v48 }
 0x11f   : > { %v519_v52 = vmul.f32 %v1408_v45, %v453_v49  ;;  %v341_v49 = vmul.f32 %v1410_v46, %v1388_v27 }
 0x120   : > { %v437_v63 = vadd.f32 %v421_v55, %v337_v56 }
 0x121   : > { %v535_v60 = vadd.f32 %v519_v52, %v435_v54 }
 0x122   : > { %v457_v57 = vpop.permute.xlu1 %456  ;;  %v461_v58 = vpop.permute.xlu0 %460 }
 0x123   : > { %v520_v61 = vmul.f32 %v1408_v45, %v457_v57  ;;  %v521_v62 = vmul.f32 %v1408_v45, %v461_v58  ;;  %v576_v2 = vmul.f32 %v535_v60, %v535_v60 }
 0x125   : > { %v536_v0 = vadd.f32 %v520_v61, %v436_v59  ;;  %v537_v4 = vadd.f32 %v521_v62, %v437_v63  ;;  %v342_v59 = vmul.f32 %v1410_v46, %v1386_v26 }
 0x126   : > { %v465_v1 = vpop.permute.xlu0 %464 }
 0x127   : > { %v577_v3 = vmul.f32 %v536_v0, %v536_v0  ;;  %v365_v5 = vpop.permute.xlu1 %364  ;;  %v552_v7 = vadd.f32 %v536_v0, %v535_v60  ;;  %v522_v10 = vmul.f32 %v1408_v45, %v465_v1  ;;  %v578_v13 = vmul.f32 %v537_v4, %v537_v4 }
 0x128   : > { %v422_v8 = vmul.f32 %v1406_v42, %v365_v5 }
 0x129   : > { %v592_v9 = vadd.f32 %v577_v3, %v576_v2  ;;  %v553_v16 = vadd.f32 %v552_v7, %v537_v4  ;;  %v343_v3 = vmul.f32 %v1410_v46, %v1392_v29 }
 0x12a   : > { %v438_v11 = vadd.f32 %v422_v8, %v338_v6  ;;  %v469_v12 = vpop.permute.xlu0 %468 }
 0x12b   : > { %v369_v14 = vpop.permute.xlu1 %368  ;;  %v593_v19 = vadd.f32 %v592_v9, %v578_v13  ;;  %v523_v22 = vmul.f32 %v1408_v45, %v469_v12  ;;  %v344_v13 = vmul.f32 %v1410_v46, %v1390_v28 }
 0x12c   : > { %v538_v17 = vadd.f32 %v522_v10, %v438_v11  ;;  %v423_v18 = vmul.f32 %v1406_v42, %v369_v14 }
 0x12e   : > { %v554_v20 = vadd.f32 %v553_v16, %v538_v17  ;;  %v579_v21 = vmul.f32 %v538_v17, %v538_v17  ;;  %v439_v23 = vadd.f32 %v423_v18, %v339_v15  ;;  %v473_v32 = vpop.permute.xlu0 %472 }
 0x12f   : > { %v373_v35 = vpop.permute.xlu1 %372  ;;  %v524_v43 = vmul.f32 %v1408_v45, %v473_v32 }
 0x130   : > { %v594_v39 = vadd.f32 %v593_v19, %v579_v21  ;;  %v539_v40 = vadd.f32 %v523_v22, %v439_v23  ;;  %v424_v41 = vmul.f32 %v1406_v42, %v373_v35  ;;  %v345_v21 = vmul.f32 %v1410_v46, %v1396_v31 }
 0x132   : > { %v580_v25 = vmul.f32 %v539_v40, %v539_v40  ;;  %v440_v44 = vadd.f32 %v424_v41, %v340_v38  ;;  %v477_v47 = vpop.permute.xlu0 %476  ;;  %v555_v50 = vadd.f32 %v554_v20, %v539_v40 }
 0x133   : > { %v377_v48 = vpop.permute.xlu1 %376  ;;  %v525_v53 = vmul.f32 %v1408_v45, %v477_v47 }
 0x134   : > { %v540_v51 = vadd.f32 %v524_v43, %v440_v44  ;;  %v425_v52 = vmul.f32 %v1406_v42, %v377_v48  ;;  %v595_v24 = vadd.f32 %v594_v39, %v580_v25  ;;  %v346_v43 = vmul.f32 %v1410_v46, %v1394_v30 }
 0x136   : > { %v556_v54 = vadd.f32 %v555_v50, %v540_v51  ;;  %v581_v55 = vmul.f32 %v540_v51, %v540_v51  ;;  %v441_v56 = vadd.f32 %v425_v52, %v341_v49  ;;  %v481_v57 = vpop.permute.xlu0 %480 }
 0x137   : > { %v381_v58 = vpop.permute.xlu1 %380  ;;  %v526_v63 = vmul.f32 %v1408_v45, %v481_v57 }
 0x138   : > { %v596_v60 = vadd.f32 %v595_v24, %v581_v55  ;;  %v541_v61 = vadd.f32 %v525_v53, %v441_v56  ;;  %v426_v62 = vmul.f32 %v1406_v42, %v381_v58  ;;  %v347_v53 = vmul.f32 %v1410_v46, %v1400_v34 }
 0x13a   : > { %v582_v27 = vmul.f32 %v541_v61, %v541_v61  ;;  %v442_v0 = vadd.f32 %v426_v62, %v342_v59  ;;  %v485_v1 = vpop.permute.xlu0 %484  ;;  %v557_v4 = vadd.f32 %v556_v54, %v541_v61  ;;  %v348_v62 = vmul.f32 %v1410_v46, %v1398_v33 }
 0x13b   : > { %v385_v2 = vpop.permute.xlu1 %384  ;;  %v527_v7 = vmul.f32 %v1408_v45, %v485_v1 }
 0x13c   : > { %v542_v5 = vadd.f32 %v526_v63, %v442_v0  ;;  %v427_v6 = vmul.f32 %v1406_v42, %v385_v2  ;;  %v597_v26 = vadd.f32 %v596_v60, %v582_v27 }
 0x13e   : > { %v558_v8 = vadd.f32 %v557_v4, %v542_v5  ;;  %v583_v9 = vmul.f32 %v542_v5, %v542_v5  ;;  %v443_v10 = vadd.f32 %v427_v6, %v343_v3  ;;  %v489_v11 = vpop.permute.xlu0 %488  ;;  %v349_v4 = vmul.f32 %v1410_v46, %v1404_v37 }
 0x13f   : > { %v389_v12 = vpop.permute.xlu1 %388  ;;  %v528_v17 = vmul.f32 %v1408_v45, %v489_v11 }
 0x140   : > { %v598_v14 = vadd.f32 %v597_v26, %v583_v9  ;;  %v543_v15 = vadd.f32 %v527_v7, %v443_v10  ;;  %v428_v16 = vmul.f32 %v1406_v42, %v389_v12 }
 0x142   : > { %v584_v29 = vmul.f32 %v543_v15, %v543_v15  ;;  %v444_v18 = vadd.f32 %v428_v16, %v344_v13  ;;  %v493_v19 = vpop.permute.xlu0 %492  ;;  %v559_v22 = vadd.f32 %v558_v8, %v543_v15  ;;  %v350_v16 = vmul.f32 %v1410_v46, %v1402_v36 }
 0x143   : > { %v393_v20 = vpop.permute.xlu1 %392  ;;  %v529_v35 = vmul.f32 %v1408_v45, %v493_v19 }
 0x144   : > { %v544_v23 = vadd.f32 %v528_v17, %v444_v18  ;;  %v429_v32 = vmul.f32 %v1406_v42, %v393_v20  ;;  %v599_v28 = vadd.f32 %v598_v14, %v584_v29 }
 0x146   : > { %v560_v38 = vadd.f32 %v559_v22, %v544_v23  ;;  %v585_v39 = vmul.f32 %v544_v23, %v544_v23  ;;  %v445_v40 = vadd.f32 %v429_v32, %v345_v21  ;;  %v497_v41 = vpop.permute.xlu0 %496 }
 0x147   : > { %v397_v25 = vpop.permute.xlu1 %396  ;;  %v530_v49 = vmul.f32 %v1408_v45, %v497_v41  ;;  %v551_v41 = vld [vmem:[%s1360_s5] sm:$0x1] }
 0x148   : > { %v600_v44 = vadd.f32 %v599_v28, %v585_v39  ;;  %v545_v47 = vadd.f32 %v529_v35, %v445_v40  ;;  %v430_v48 = vmul.f32 %v1406_v42, %v397_v25 }
 0x14a   : > { %v586_v31 = vmul.f32 %v545_v47, %v545_v47  ;;  %v446_v50 = vadd.f32 %v430_v48, %v346_v43  ;;  %v501_v51 = vpop.permute.xlu0 %500  ;;  %v561_v24 = vadd.f32 %v560_v38, %v545_v47 }
 0x14b   : > { %v401_v52 = vpop.permute.xlu1 %400  ;;  %v531_v56 = vmul.f32 %v1408_v45, %v501_v51 }
 0x14c   : > { %v546_v54 = vadd.f32 %v530_v49, %v446_v50  ;;  %v431_v55 = vmul.f32 %v1406_v42, %v401_v52  ;;  %v601_v30 = vadd.f32 %v600_v44, %v586_v31  ;;  %v575_v44 = vld [vmem:[%s1363_s9] sm:$0x1] }
 0x14e   : > { %v562_v57 = vadd.f32 %v561_v24, %v546_v54  ;;  %v587_v58 = vmul.f32 %v546_v54, %v546_v54  ;;  %v447_v59 = vadd.f32 %v431_v55, %v347_v53  ;;  %v505_v60 = vpop.permute.xlu0 %504 }
 0x14f   : > { %v405_v61 = vpop.permute.xlu1 %404  ;;  %v532_v1 = vmul.f32 %v1408_v45, %v505_v60 }
 0x150   : > { %v602_v27 = vadd.f32 %v601_v30, %v587_v58  ;;  %v547_v63 = vadd.f32 %v531_v56, %v447_v59  ;;  %v432_v0 = vmul.f32 %v1406_v42, %v405_v61 }
 0x152   : > { %v588_v34 = vmul.f32 %v547_v63, %v547_v63  ;;  %v448_v2 = vadd.f32 %v432_v0, %v348_v62  ;;  %v563_v5 = vadd.f32 %v562_v57, %v547_v63  ;;  %v509_v7 = vpop.permute.xlu0 %508 }
 0x153   : > { %v409_v3 = vpop.permute.xlu1 %408  ;;  %v533_v11 = vmul.f32 %v1408_v45, %v509_v7 }
 0x154   : > { %v548_v6 = vadd.f32 %v532_v1, %v448_v2  ;;  %v433_v26 = vmul.f32 %v1406_v42, %v409_v3  ;;  %v603_v8 = vadd.f32 %v602_v27, %v588_v34 }
 0x156   : > { %v564_v9 = vadd.f32 %v563_v5, %v548_v6  ;;  %v589_v33 = vmul.f32 %v548_v6, %v548_v6  ;;  %v449_v10 = vadd.f32 %v433_v26, %v349_v4 }
 0x157   : > { %v413_v12 = vpop.permute.xlu1 %412 }
 0x158   : > { %v604_v13 = vadd.f32 %v603_v8, %v589_v33  ;;  %v549_v14 = vadd.f32 %v533_v11, %v449_v10  ;;  %v434_v15 = vmul.f32 %v1406_v42, %v413_v12 }
 0x15a   : > { %v590_v29 = vmul.f32 %v549_v14, %v549_v14  ;;  %v450_v17 = vadd.f32 %v434_v15, %v350_v16  ;;  %v565_v20 = vadd.f32 %v564_v9, %v549_v14 }
 0x15c   : > { %v513_v37 = vpop.permute.xlu1 %512  ;;  %v605_v23 = vadd.f32 %v604_v13, %v590_v29 }
 0x15d   : > { %v534_v18 = vmul.f32 %v1408_v45, %v513_v37 }
 0x15f   : > { %v550_v19 = vadd.f32 %v534_v18, %v450_v17 }
 0x161   : > { %v566_v21 = vadd.f32 %v565_v20, %v550_v19  ;;  %v591_v22 = vmul.f32 %v550_v19, %v550_v19 }
 0x163   : > { %v567_v32 = vrot.slane %v566_v21, 4  ;;  %v606_v42 = vadd.f32 %v605_v23, %v591_v22 }
 0x165   : > { %v568_v35 = vadd.f32 %v567_v32, %v566_v21  ;;  %v607_v28 = vrot.slane %v606_v42, 4 }
 0x167   : > { %v569_v36 = vrot.slane %v568_v35, 2  ;;  %v608_v46 = vadd.f32 %v607_v28, %v606_v42 }
 0x169   : > { %v570_v38 = vadd.f32 %v569_v36, %v568_v35  ;;  %v609_v39 = vrot.slane %v608_v46, 2 }
 0x16b   : > { %v571_v45 = vrot.slane %v570_v38, 1  ;;  %v610_v40 = vadd.f32 %v609_v39, %v608_v46 }
 0x16d   : > { %v572_v25 = vadd.f32 %v571_v45, %v570_v38  ;;  %v611_v43 = vrot.slane %v610_v40, 1 }
 0x16f   : > { %v573_v47 = vadd.f32 %v572_v25, %v551_v41  ;;  %v612_v48 = vadd.f32 %v611_v43, %v610_v40 }
 0x171   : > { %574 = vst [vmem:[%s1360_s5] sm:$0x1] %v573_v47  ;;  %v613_v31 = vadd.f32 %v612_v48, %v575_v44 }
 0x172   : > { %983 = shalt.err (!%p980_p8)
}
 0x173   : > { %s984_s4 = scalar_lea.hbm %s1479_s23, 16  ;;  %s988_s18 = scalar_lea.hbm %s1575_s2, 32 }
 0x174   : > { %p985_p11 = scmp.ne.s32.totalorder %s1479_s23, %s984_s4  ;;  %p989_p9 = scmp.lt.u32.totalorder %s1479_s23, %s1575_s2 }
 0x175   : > { %p990_p1 = scmp.lt.u32.totalorder %s988_s18, %s984_s4  ;;  %p992_p4 = scmp.lt.u32.totalorder %s984_s4, %s1479_s23 }
 0x176   : > { %p986_p13 = pnand %p985_p11, %p1609_p2 }
 0x177   : > { %p991_p5 = por %p990_p1, %p989_p9 }
 0x178   : > { %p987_p7 = pneg %p986_p13 }
 0x179   : > { %p993_p12 = por %p992_p4, %p991_p5 }
 0x17b   : > { %p994_p3 = pnand %p993_p12, %p987_p7 }
 0x17d   : > { %997 = shalt.err (!%p994_p3)
}
 0x17e   : > { %786 = dma.vmem_to_hbm [thread:$0]  (%p1609_p2), %s1481_s26, 16, %s1479_s23, %s616_s6   ;;  %614 = vst [vmem:[%s1363_s9] sm:$0x1] %v613_v31 }
 0x17f   : > { %s620_s19 = scalar_lea.sflag [#allocation9], %s1357_s20  ;;  %s998_s11 = scalar_lea.vmem %s1489_s29, 16 }
 0x180   : > { %p999_p6 = scmp.ne.s32.totalorder %s1489_s29, %s998_s11  ;;  %s1139_s8 = smov [#allocation8]  }
 0x181   : > { %s1002_s1 = sshll.u32 %s1139_s8, 4  ;;  %s1003_s1 = int_to_ptr.vmem [resolvable:$false] %s1002_s1 }
 0x182   : > { %p1000_p10 = pnand %p999_p6, %p1609_p2  ;;  %s1004_s12 = scalar_lea.vmem %s1003_s1, 32 }
 0x183   : > { %p1005_p8 = scmp.lt.s32.totalorder %s1489_s29, %s1003_s1  ;;  %p1006_p11 = scmp.lt.s32.totalorder %s1004_s12, %s998_s11 }
 0x184   : > { %p1001_p0 = pneg %p1000_p10 }
 0x185   : > { %p1007_p13 = por %p1006_p11, %p1005_p8 }
 0x187   : > { %p1008_p7 = pnand %p1007_p13, %p1001_p0 }
 0x189   : > { %1011 = shalt.err (!%p1008_p7)
}
 0x18a   : > { %s1012_s20 = scalar_lea.hbm %s1487_s24, 16  ;;  %s1016_s23 = scalar_lea.hbm %s1576_s3, 32 }
 0x18b   : > { %p1013_p9 = scmp.ne.s32.totalorder %s1487_s24, %s1012_s20  ;;  %p1017_p4 = scmp.lt.u32.totalorder %s1487_s24, %s1576_s3 }
 0x18c   : > { %p1018_p12 = scmp.lt.u32.totalorder %s1016_s23, %s1012_s20  ;;  %p1020_p6 = scmp.lt.u32.totalorder %s1012_s20, %s1487_s24 }
 0x18d   : > { %p1014_p1 = pnand %p1013_p9, %p1609_p2 }
 0x18e   : > { %p1019_p3 = por %p1018_p12, %p1017_p4 }
 0x18f   : > { %p1015_p5 = pneg %p1014_p1 }
 0x190   : > { %p1021_p10 = por %p1020_p6, %p1019_p3 }
 0x192   : > { %p1022_p0 = pnand %p1021_p10, %p1015_p5 }
 0x194   : > { %1025 = shalt.err (!%p1022_p0)
}
 0x195   : > { %787 = dma.vmem_to_hbm [thread:$0]  (%p1609_p2), %s1489_s29, 16, %s1487_s24, %s620_s19  }
 0x196 PF: > { %s1610_s4 = sld [smem:[#allocation14_spill]]  ;;  %s1611_s25 = sld [smem:[#allocation16_spill]] }
 0x197   : > { %p808_p8 = scmp.ge.s32.totalorder %s1128_s22, 2 }
 0x19c   : > { %s657_s5 = sand.u32 1, %s1610_s4   ;;  %p1612_p11 = scmp.ne.s32.totalorder %s1611_s25, 0 }
 0x19d   : > { %s658_s18 = scalar_lea.sflag [#allocation4], %s657_s5 }
 0x19e   : > { %p799_p13 = pnand %p808_p8, %p1612_p11 }
 0x1a0   : > { %1079 = dma.done.wait (!%p799_p13), %s658_s18, 16  }
 0x1a1   : > { %1081 = vsyncadd (!%p799_p13), %s658_s18, 4294967280  ;;  %s666_s15 = scalar_lea.sflag [#allocation9], %s657_s5 }
 0x1a2   : > { %1083 = dma.done.wait (!%p799_p13), %s666_s15, 16  }
 0x1a3   : > { %1085 = vsyncadd (!%p799_p13), %s666_s15, 4294967280  ;;  %s24_s22 = sadd.s32 1, %s1128_s22   ;;  %s1613_s18 = sld [smem:[#allocation15_spill]] }
 0x1a4   : > { %p21_p7 = scmp.ge.s32.totalorder %s24_s22, 6   ;;  %s1614_s20 = sld [smem:[#allocation17_spill]] }
 0x1a5   : > { %s1615_s30 = sld [smem:[#allocation18_spill]]  ;;  %s1616_s12 = smov %s1092_s13 }
 0x1a6   : > { %s1617_s13 = smov %s1096_s14  ;;  %s1618_s14 = smov %s1308_s10 }
 0x1a7   : > { %s1619_s15 = smov %s1104_s16  ;;  %s1620_s16 = smov %s1108_s17 }
 0x1a8   : > { %s1621_s17 = smov %s1313_s28  ;;  %s1622_s19 = smov %s1124_s21 }
 0x1a9   :  { %23 = sbr.rel (!%p21_p7) target bundleno = 14 (0xe), region = 98 }
 0x1ab   : > { %s1623_s21 = smov %s1615_s30 }
 0x1b0   :  { %670 = vsyncpa [#allocation3], 1 }
 0x1b1   :  { %672 = vsyncpa [#allocation3 + $0x1], 1 }
 0x1b2   :  { %673 = vsyncpa [#allocation6], 1 }
 0x1b3   :  { %674 = vsyncpa [#allocation4], 1 }
 0x1b4   :  { %676 = vsyncpa [#allocation4 + $0x1], 1 }
 0x1b5   :  { %677 = vsyncpa [#allocation9], 1 }
 0x1b6   :  { %679 = vsyncpa [#allocation9 + $0x1], 1 }

// kernel: _lambda_.5
= control target key start
LH: loop header
LB: loop body
LE: loop exit
PB: predicated region body
PF: predicated region fallthrough
CT: control target
= control target key end

     0   :  { %s2839_s0 = inlined_call_operand.hbm [shape: f32[2,256,3], index: 0, kind: input, shape index: {}]   ;;  %s2840_s1 = inlined_call_operand.hbm [shape: f32[3,128], index: 1, kind: input, shape index: {}]   ;;  %s2841_s2 = inlined_call_operand.hbm [shape: f32[1,128], index: 2, kind: input, shape index: {}]   ;;  %s2842_s3 = inlined_call_operand.hbm [shape: f32[1,128], index: 3, kind: input, shape index: {}]   ;;  %s2843_s4 = inlined_call_operand.hbm [shape: bf16[128,256], index: 4, kind: input, shape index: {}]   ;;  %s2844_s5 = inlined_call_operand.hbm [shape: f32[1,256], index: 5, kind: input, shape index: {}]   ;;  %s2845_s6 = inlined_call_operand.hbm [shape: bf16[2,256,256], index: 6, kind: output, shape index: {0}]   ;;  %s2846_s7 = inlined_call_operand.hbm [shape: f32[2,1,256], index: 7, kind: output, shape index: {1}]  }
   0x1   :  { %2864 = sst [smem:[#allocation29_spill]] %s2839_s0 }
   0x2   :  { %2865 = sst [smem:[#allocation30_spill]] %s2840_s1 }
   0x3   :  { %2866 = sst [smem:[#allocation31_spill]] %s2841_s2 }
   0x4   :  { %2867 = sst [smem:[#allocation32_spill]] %s2842_s3 }
   0x5   :  { %2868 = sst [smem:[#allocation33_spill]] %s2843_s4 }
   0x6   :  { %2869 = sst [smem:[#allocation34_spill]] %s2844_s5 }
   0x7   :  { %2870 = sst [smem:[#allocation35_spill]] %s2845_s6 }
   0x8   :  { %2871 = sst [smem:[#allocation36_spill]] %s2846_s7 }
   0x9   :  { %13 = vsyncpa [#allocation3], 0 }
   0xa   :  { %15 = vsyncpa [#allocation3 + $0x1], 0 }
   0xb   :  { %16 = vsyncpa [#allocation6], 0 }
   0xc   :  { %17 = vsyncpa [#allocation9], 0 }
   0xd   :  { %18 = vsyncpa [#allocation12], 0 }
   0xe   :  { %19 = vsyncpa [#allocation4], 0 }
   0xf   :  { %21 = vsyncpa [#allocation4 + $0x1], 0 }
  0x10   :  { %22 = vsyncpa [#allocation15], 0 }
  0x11   :  { %24 = vsyncpa [#allocation15 + $0x1], 0  ;;  %s2126_s24 = smov 0   ;;  %s2128_s25 = smov 0  }
  0x12   :  { %s2130_s26 = smov 0   ;;  %s2132_s27 = smov 0  }
  0x13   :  { %s2134_s28 = smov 0   ;;  %s2136_s29 = smov 0  }
  0x14   :  { %s2138_s30 = smov 0   ;;  %s2140_s8 = smov 0  }
  0x15   :  { %s2142_s9 = smov 0   ;;  %s2144_s10 = smov 0  }
  0x16   :  { %s2146_s11 = smov 0  }
  0x17 LB: > { %2872 = sst [smem:[#allocation22_spill]] %s2051_s30  ;;  %s2847_s12 = sadd.s32 4294967295, %s2067_s11   ;;  %s2067_s11 = sphi %s2146_s11, %s30_s11   ;;  %s2063_s10 = sphi %s2144_s10, %s2919_s10   ;;  %s2059_s9 = sphi %s2142_s9, %s2918_s9   ;;  %s2055_s8 = sphi %s2140_s8, %s2917_s8   ;;  %s2051_s30 = sphi %s2138_s30, %s2916_s30   ;;  %s2047_s29 = sphi %s2136_s29, %s2925_s29   ;;  %s2043_s28 = sphi %s2134_s28, %s2924_s28   ;;  %s2039_s27 = sphi %s2132_s27, %s2923_s27   ;;  %s2035_s26 = sphi %s2130_s26, %s2922_s26   ;;  %s2031_s25 = sphi %s2128_s25, %s2921_s25   ;;  %s2027_s24 = sphi %s2126_s24, %s2920_s24  }
  0x18   : > { %2873 = sst [smem:[#allocation23_spill]] %s2055_s8  ;;  %p1420_p0 = scmp.ge.s32.totalorder %s2067_s11, 1 }
  0x19   : > { %2874 = sst [smem:[#allocation24_spill]] %s2059_s9  ;;  %p2185_p1 = scmp.eq.s32.totalorder %s2847_s12, 0 }
  0x1a   : > { %2875 = sst [smem:[#allocation25_spill]] %s2063_s10  ;;  %p234_p2 = scmp.lt.s32.totalorder %s2067_s11, 5 }
  0x1b   : > { %s2876_s13 = scalar_select %p2185_p1, 1, 0 }
  0x1c   : > { %p2190_p3 = pnand %p1420_p0, %p234_p2  ;;  %s2069_s15 = smov [#allocation5]  }
  0x1d   : > { %s247_s16 = sshll.u32 %s2069_s15, 4  ;;  %s2070_s17 = smov [#allocation8]   ;;  %s248_s16 = int_to_ptr.vmem [resolvable:$true] %s247_s16 }
  0x1e   : > { %s2877_s14 = scalar_select %p2190_p3, 1, 0 }
  0x1f   : > { %p1546_p4 = pneg %p2190_p3  ;;  %s269_s18 = sshll.u32 %s2070_s17, 4  ;;  %s2202_s18 = int_to_ptr.vmem [resolvable:$true] %s269_s18 }
  0x20   : > { %s2071_s20 = smov [#allocation7]   ;;  %s2879_s1 = sld [smem:[#allocation30_spill]] }
  0x21   : > { %p2198_p5 = pnand %p1546_p4, %p2185_p1  ;;  %s258_s21 = sshll.u32 %s2071_s20, 4  ;;  %s2204_s21 = int_to_ptr.vmem [resolvable:$true] %s258_s21 }
  0x23   : > { %p2214_p7 = pneg %p2198_p5 }
  0x26   : > { %s1731_s15 = scalar_lea.hbm %s2879_s1, 64 }
  0x27   : > { %p1732_p6 = scmp.ne.s32.totalorder %s2879_s1, %s1731_s15  ;;  %p1738_p10 = scmp.lt.u32.totalorder %s1731_s15, %s2879_s1 }
  0x29   : > { %p1734_p8 = pnand %p2214_p7, %p1732_p6 }
  0x2b   : > { %p1735_p9 = pneg %p1734_p8 }
  0x2d   : > { %p1740_p11 = pnand %p1738_p10, %p1735_p9 }
  0x2f   : > { %1743 = shalt.err (!%p1740_p11)
}
  0x30   : > { %s1744_s22 = scalar_lea.vmem %s248_s16, 64  ;;  %p1752_p2 = scmp.lt.s32.totalorder %s248_s16, %s248_s16 }
  0x31   : > { %p1745_p12 = scmp.ne.s32.totalorder %s248_s16, %s1744_s22  ;;  %p1753_p4 = scmp.lt.s32.totalorder %s1744_s22, %s1744_s22 }
  0x33   : > { %p1747_p13 = pnand %p1745_p12, %p2214_p7  ;;  %p1754_p3 = por %p1753_p4, %p1752_p2 }
  0x35   : > { %p1748_p0 = pneg %p1747_p13 }
  0x37   : > { %p1755_p1 = pnand %p1754_p3, %p1748_p0 }
  0x39   : > { %1758 = shalt.err (!%p1755_p1)
}
  0x3a   : > { %1549 = dma.hbm_to_vmem [thread:$0]  (!%p2198_p5), %s2879_s1, 64, %s248_s16, [#allocation6]  }
  0x3b   : > { %s2881_s3 = sld [smem:[#allocation32_spill]] }
  0x41   : > { %s1759_s15 = scalar_lea.hbm %s2881_s3, 16 }
  0x42   : > { %p1760_p6 = scmp.ne.s32.totalorder %s2881_s3, %s1759_s15  ;;  %p1766_p1 = scmp.lt.u32.totalorder %s1759_s15, %s2881_s3 }
  0x44   : > { %p1762_p8 = pnand %p1760_p6, %p2214_p7 }
  0x46   : > { %p1763_p9 = pneg %p1762_p8 }
  0x48   : > { %p1768_p3 = pnand %p1766_p1, %p1763_p9 }
  0x4a   : > { %1771 = shalt.err (!%p1768_p3)
}
  0x4b   : > { %s1772_s16 = scalar_lea.vmem %s2202_s18, 16  ;;  %s1779_s8 = scalar_lea.vmem %s2202_s18, 32 }
  0x4c   : > { %p1773_p10 = scmp.ne.s32.totalorder %s2202_s18, %s1772_s16  ;;  %p1780_p13 = scmp.lt.s32.totalorder %s2202_s18, %s2202_s18 }
  0x4d   : > { %p1781_p0 = scmp.lt.s32.totalorder %s1779_s8, %s1772_s16 }
  0x4e   : > { %p1775_p11 = pnand %p1773_p10, %p2214_p7 }
  0x4f   : > { %p1782_p2 = por %p1781_p0, %p1780_p13 }
  0x50   : > { %p1776_p12 = pneg %p1775_p11 }
  0x52   : > { %p1783_p4 = pnand %p1782_p2, %p1776_p12 }
  0x54   : > { %1786 = shalt.err (!%p1783_p4)
}
  0x55   : > { %1555 = dma.hbm_to_vmem [thread:$0]  (!%p2198_p5), %s2881_s3, 16, %s2202_s18, [#allocation9]  }
  0x56   : > { %s2882_s2 = sld [smem:[#allocation31_spill]] }
  0x5c   : > { %s1787_s23 = scalar_lea.hbm %s2882_s2, 16 }
  0x5d   : > { %p1788_p6 = scmp.ne.s32.totalorder %s2882_s2, %s1787_s23  ;;  %p1794_p1 = scmp.lt.u32.totalorder %s1787_s23, %s2882_s2 }
  0x5f   : > { %p1790_p8 = pnand %p1788_p6, %p2214_p7 }
  0x61   : > { %p1791_p9 = pneg %p1790_p8 }
  0x63   : > { %p1796_p3 = pnand %p1794_p1, %p1791_p9 }
  0x65   : > { %1799 = shalt.err (!%p1796_p3)
}
  0x66   : > { %s1800_s18 = scalar_lea.vmem %s2204_s21, 16  ;;  %s1807_s8 = scalar_lea.vmem %s2204_s21, 32 }
  0x67   : > { %p1801_p10 = scmp.ne.s32.totalorder %s2204_s21, %s1800_s18  ;;  %p1808_p13 = scmp.lt.s32.totalorder %s2204_s21, %s2204_s21 }
  0x68   : > { %p1809_p0 = scmp.lt.s32.totalorder %s1807_s8, %s1800_s18 }
  0x69   : > { %p1803_p11 = pnand %p1801_p10, %p2214_p7 }
  0x6a   : > { %p1810_p2 = por %p1809_p0, %p1808_p13 }
  0x6b   : > { %p1804_p12 = pneg %p1803_p11 }
  0x6d   : > { %p1811_p4 = pnand %p1810_p2, %p1804_p12 }
  0x6f   : > { %1814 = shalt.err (!%p1811_p4)
}
  0x70   : > { %1552 = dma.hbm_to_vmem [thread:$0]  (!%p2198_p5), %s2882_s2, 16, %s2204_s21, [#allocation6]  }
  0x71   : > { %s2072_s12 = smov [#allocation10]   ;;  %s2883_s4 = sld [smem:[#allocation33_spill]] }
  0x72   : > { %s279_s6 = sshll.u32 %s2072_s12, 4  ;;  %s280_s6 = int_to_ptr.vmem [resolvable:$true] %s279_s6 }
  0x77   : > { %s1815_s20 = scalar_lea.hbm %s2883_s4, 2048 }
  0x78   : > { %p1816_p6 = scmp.ne.s32.totalorder %s2883_s4, %s1815_s20  ;;  %p1822_p1 = scmp.lt.u32.totalorder %s1815_s20, %s2883_s4 }
  0x7a   : > { %p1818_p8 = pnand %p1816_p6, %p2214_p7 }
  0x7c   : > { %p1819_p9 = pneg %p1818_p8 }
  0x7e   : > { %p1824_p3 = pnand %p1822_p1, %p1819_p9 }
  0x80   : > { %1827 = shalt.err (!%p1824_p3)
}
  0x81   : > { %s1828_s21 = scalar_lea.vmem %s280_s6, 2048  ;;  %p1836_p13 = scmp.lt.s32.totalorder %s280_s6, %s280_s6 }
  0x82   : > { %p1829_p10 = scmp.ne.s32.totalorder %s280_s6, %s1828_s21  ;;  %p1837_p0 = scmp.lt.s32.totalorder %s1828_s21, %s1828_s21 }
  0x84   : > { %p1831_p11 = pnand %p1829_p10, %p2214_p7  ;;  %p1838_p2 = por %p1837_p0, %p1836_p13 }
  0x86   : > { %p1832_p12 = pneg %p1831_p11 }
  0x88   : > { %p1839_p4 = pnand %p1838_p2, %p1832_p12 }
  0x8a   : > { %1842 = shalt.err (!%p1839_p4)
}
  0x8b   : > { %s2854_s30 = smov 128   ;;  %s2855_s7 = smov 8  }
  0x8c   : > { %1558 = dma.hbm_to_vmem [thread:$0]  (!%p2198_p5), %s2883_s4, 2048, %s280_s6, [#allocation9], %s2854_s30, %s2854_s30, %s2855_s7  }
  0x8d   : > { %s2075_s15 = smov [#allocation11]   ;;  %s2884_s5 = sld [smem:[#allocation34_spill]] }
  0x8e   : > { %s293_s20 = sshll.u32 %s2075_s15, 4  ;;  %s294_s20 = int_to_ptr.vmem [resolvable:$true] %s293_s20 }
  0x93   : > { %s1843_s18 = scalar_lea.hbm %s2884_s5, 32 }
  0x94   : > { %p1844_p6 = scmp.ne.s32.totalorder %s2884_s5, %s1843_s18  ;;  %p1850_p1 = scmp.lt.u32.totalorder %s1843_s18, %s2884_s5 }
  0x96   : > { %p1846_p8 = pnand %p1844_p6, %p2214_p7 }
  0x98   : > { %p1847_p9 = pneg %p1846_p8 }
  0x9a   : > { %p1852_p3 = pnand %p1850_p1, %p1847_p9 }
  0x9c   : > { %1855 = shalt.err (!%p1852_p3)
}
  0x9d   : > { %s1856_s6 = scalar_lea.vmem %s294_s20, 32  ;;  %p1864_p13 = scmp.lt.s32.totalorder %s294_s20, %s294_s20 }
  0x9e   : > { %p1857_p10 = scmp.ne.s32.totalorder %s294_s20, %s1856_s6  ;;  %p1865_p0 = scmp.lt.s32.totalorder %s1856_s6, %s1856_s6 }
  0xa0   : > { %p1859_p11 = pnand %p1857_p10, %p2214_p7  ;;  %p1866_p2 = por %p1865_p0, %p1864_p13 }
  0xa2   : > { %p1860_p12 = pneg %p1859_p11 }
  0xa4   : > { %p1867_p4 = pnand %p1866_p2, %p1860_p12 }
  0xa6   : > { %1870 = shalt.err (!%p1867_p4)
}
  0xa7   : > { %1561 = dma.hbm_to_vmem [thread:$0]  (!%p2198_p5), %s2884_s5, 32, %s294_s20, [#allocation12]  }
  0xa8   : > { %s1419_s1 = sadd.s32 4294967294, %s2067_s11   ;;  %s39_s2 = sadd.s32 1, %s2059_s9 }
  0xa9   : > { %s42_s19 = sadd.s32 1, %s2063_s10  ;;  %p40_p7 = scmp.ge.s32.totalorder %s39_s2, 2 }
  0xaa   : > { %s51_s17 = sadd.s32 1, %s2047_s29  ;;  %p58_p6 = scmp.ne.s32.totalorder %s2047_s29, %s2043_s28 }
  0xab   : > { %p59_p8 = scmp.eq.s32.totalorder %s2067_s11, 0  ;;  %s2927_s2 = smov (%p40_p7, %s39_s2), 0 }
  0xac   : > { %2885 = sst [smem:[#allocation26_spill]] %s2927_s2  ;;  %s2929_s19 = smov (!%p40_p7, %s42_s19), %s2063_s10 }
  0xad   : > { %s47_s15 = ssub.s32 %s2059_s9, %s2927_s2  ;;  %p2329_p9 = por %p59_p8, %p58_p6 }
  0xae   : > { %p44_p5 = scmp.ge.s32.totalorder %s2929_s19, 2  ;;  %p64_p1 = scmp.ne.s32.totalorder %s2043_s28, %s2039_s27 }
  0xaf   : > { %s2887_s20 = sadd.s32 4294967295, %s2067_s11   ;;  %p2341_p10 = scmp.eq.s32.totalorder %s1419_s1, 3 }
  0xb0   : > { %p2337_p3 = scmp.eq.s32.totalorder %s2887_s20, 3  ;;  %s2931_s19 = smov (%p44_p5, %s2929_s19), 0 }
  0xb1   : > { %2890 = sst [smem:[#allocation27_spill]] %s2931_s19  ;;  %p2891_p11 = scmp.ne.s32.totalorder %s2876_s13, 0 }
  0xb2   : > { %p2355_p13 = por %p2337_p3, %p58_p6  ;;  %s46_s6 = ssub.s32 %s2063_s10, %s2931_s19 }
  0xb3   : > { %p2349_p12 = por %p2891_p11, %p64_p1  ;;  %p2363_p0 = por %p2341_p10, %p64_p1 }
  0xb4   : > { %s2893_s21 = scalar_select %p2355_p13, 1, 0 }
  0xb5   : > { %s2894_s12 = scalar_select %p2363_p0, 1, 0 }
  0xb6   : > { %s48_s23 = sor.u32 %s47_s15, %s46_s6  ;;  %p208_p2 = scmp.eq.s32.totalorder %s46_s6, 0 }
  0xb7   : > { %p49_p4 = scmp.eq.s32.totalorder %s48_s23, 0  ;;  %s210_s1 = sadd.s32 1, %s2035_s26 }
  0xb8   : > { %s2369_s20 = scalar_select %p208_p2, %s2035_s26, %s210_s1  }
  0xb9   : > { %s2372_s30 = scalar_select %p49_p4, %s2047_s29, %s51_s17  }
  0xba   : > { %p220_p7 = scmp.ne.s32.totalorder %s2035_s26, %s2031_s25  ;;  %p226_p6 = scmp.ne.s32.totalorder %s2031_s25, %s2027_s24 }
  0xbb   : > { %2895 = sst [smem:[#allocation28_spill]] %s2372_s30  ;;  %p1578_p8 = scmp.lt.s32.totalorder %s2067_s11, 4 }
  0xbc   : > { %s304_s7 = sand.u32 1, %s2047_s29   ;;  %p2382_p5 = por %p220_p7, %p2337_p3 }
  0xbd   : > { %p2388_p1 = por %p226_p6, %p2341_p10  ;;  %s1427_s6 = sshll.u32 %s304_s7, 7 }
  0xbe   : > { %s2896_s3 = scalar_select %p2382_p5, 1, 0 }
  0xbf   : > { %s2897_s15 = scalar_select %p2388_p1, 1, 0 }
  0xc0   : > { %s1428_s23 = sshll.u32 %s2059_s9, 4  ;;  %s1429_s1 = sshll.u32 %s2063_s10, 5 }
  0xc1   : > { %s308_s4 = scalar_lea.vmem [#allocation2], %s1427_s6  ;;  %s314_s5 = sadd.s32 %s1429_s1, %s1428_s23 }
  0xc2   : > { %s317_s17 = sshll.u32 %s308_s4, 4  ;;  %s1430_s19 = sshll.u32 %s314_s5, 7  ;;  %s2394_s17 = int_to_ptr.vmem [resolvable:$true] %s317_s17 }
  0xc3   : > { %p2398_p11 = pnand %p1578_p8, %p2329_p9  ;;  %s2899_s0 = sld [smem:[#allocation29_spill]] }
  0xc4   : > { %s2407_s4 = scalar_lea.sflag [#allocation3], %s304_s7 }
  0xc5   : > { %p1873_p9 = pneg %p2398_p11 }
  0xc9   : > { %s2405_s30 = scalar_lea.hbm %s2899_s0, %s1430_s19  ;;  %s1876_s22 = scalar_lea.hbm %s2899_s0, 8192 }
  0xca   : > { %s1871_s6 = scalar_lea.hbm %s2405_s30, 2048  ;;  %p1877_p4 = scmp.lt.u32.totalorder %s2405_s30, %s2899_s0 }
  0xcb   : > { %p1872_p3 = scmp.ne.s32.totalorder %s2405_s30, %s1871_s6  ;;  %p1878_p7 = scmp.lt.u32.totalorder %s1876_s22, %s1871_s6 }
  0xcc   : > { %p1880_p8 = scmp.lt.u32.totalorder %s1871_s6, %s2405_s30 }
  0xcd   : > { %p1874_p10 = pnand %p1873_p9, %p1872_p3  ;;  %p1879_p6 = por %p1878_p7, %p1877_p4 }
  0xcf   : > { %p1875_p2 = pneg %p1874_p10  ;;  %p1881_p1 = por %p1880_p8, %p1879_p6 }
  0xd1   : > { %p1882_p0 = pnand %p1881_p1, %p1875_p2 }
  0xd3   : > { %1885 = shalt.err (!%p1882_p0)
}
  0xd4   : > { %s1886_s7 = scalar_lea.vmem %s2394_s17, 2048  ;;  %s2076_s1 = smov [#allocation2]  }
  0xd5   : > { %p1887_p3 = scmp.ne.s32.totalorder %s2394_s17, %s1886_s7  ;;  %s1891_s18 = sshll.u32 %s2076_s1, 4  ;;  %s1892_s18 = int_to_ptr.vmem [resolvable:$false] %s1891_s18 }
  0xd6   : > { %s1893_s5 = scalar_lea.vmem %s1892_s18, 4096  ;;  %p1894_p13 = scmp.lt.s32.totalorder %s2394_s17, %s1892_s18 }
  0xd7   : > { %p1889_p10 = pnand %p1887_p3, %p1873_p9  ;;  %p1895_p4 = scmp.lt.s32.totalorder %s1893_s5, %s1886_s7 }
  0xd9   : > { %p1890_p5 = pneg %p1889_p10  ;;  %p1896_p7 = por %p1895_p4, %p1894_p13 }
  0xdb   : > { %p1897_p6 = pnand %p1896_p7, %p1890_p5 }
  0xdd   : > { %1900 = shalt.err (!%p1897_p6)
}
  0xde   : > { %s2900_s6 = smov 8   ;;  %s2901_s2 = smov 128  }
  0xdf   : > { %1565 = dma.hbm_to_vmem [thread:$0]  (!%p2398_p11), %s2405_s30, 2048, %s2394_s17, %s2407_s4, %s2901_s2, %s2901_s2, %s2900_s6  }
  0xe0   : > { %p2902_p0 = scmp.ne.s32.totalorder %s2877_s14, 0 }
  0xe1   : > { %s2441_s22 = sand.u32 (!%p2902_p0), 1, %s2043_s28  }
  0xe2   : > { %329 = sbr.rel (%p2902_p0) target bundleno = 832 (0x340), region = 44  ;;  %s1432_s19 = sshll.u32 (!%p2902_p0), %s2441_s22, 7 }
  0xe3   : > { %s332_s23 = scalar_lea.sflag (!%p2902_p0), [#allocation3], %s2441_s22  ;;  %s2447_s16 = scalar_lea.vmem (!%p2902_p0), [#allocation2], %s1432_s19 }
  0xe9   : > { %2002 = dma.done.wait (%p2349_p12), %s332_s23, 2048  }
  0xea   : > { %2004 = vsyncadd (%p2349_p12), %s332_s23, 4294965248  ;;  %p2903_p13 = scmp.ne.s32.totalorder %s2876_s13, 0 }
  0xec   : > { %2006 = dma.done.wait (%p2903_p13), [#allocation6], 80  }
  0xed   : > { %2008 = vsyncadd (%p2903_p13), [#allocation6], 4294967216 }
  0xee   : > { %2010 = dma.done.wait (%p2903_p13), [#allocation9], 2064  }
  0xef   : > { %2012 = vsyncadd (%p2903_p13), [#allocation9], 4294965232 }
  0xf0   : > { %2014 = dma.done.wait (%p2903_p13), [#allocation12], 32  }
  0xf1   : > { %2016 = vsyncadd (%p2903_p13), [#allocation12], 4294967264  ;;  %v2077_v0 = vmov 1   ;;  %v2078_v1 = vmov 0   ;;  %v394_v2 = vld [vmem:[%s2447_s16] sm:$0xff]  ;;  %v395_v3 = vld [vmem:[%s2447_s16 + $0x8] sm:$0xff]  ;;  %v491_v39 = vlaneseq }
  0xf2   : > { %1688 = vset.pattern.permute.xlu1 %v2077_v0  ;;  %1687 = vset.pattern.permute.xlu0 %v2078_v1  ;;  %v2472_v4 = vld [vmem:[%s2447_s16 + $0x10] sm:$0xff]  ;;  %v2079_v5 = vmov 2   ;;  %v2477_v6 = vld [vmem:[%s2447_s16 + $0x48] sm:$0xff]  ;;  %v1710_v9 = vld [vmem:[#allocation10 + $0x14] ss:$8 sps:$4 sm:$0xff]   ;;  %s2860_s13 = sand.u32 1, %s2031_s25  }
  0xf3   : > { %921 = vmatprep.mubr.bf16.mxu0 %v2078_v1  ;;  %961 = vmatprep.mubr.bf16.mxu1 %v2078_v1  ;;  %v1707_v7 = vld [vmem:[#allocation10 + $0x4] ss:$8 sps:$4 sm:$0xff]   ;;  %v1709_v8 = vld [vmem:[#allocation10] ss:$8 sps:$4 sm:$0xff]   ;;  %v1712_v10 = vld [vmem:[#allocation10 + $0x10] ss:$8 sps:$4 sm:$0xff]  }
  0xf4   : > { %512 = vperm.xlu1 %1688, %v394_v2   ;;  %413 = vperm.xlu0 %1687, %v394_v2   ;;  %v2485_v11 = vld [vmem:[%s2447_s16 + $0x28] sm:$0xff]  ;;  %s2489_s14 = sshll.u32 %s2860_s13, 1  ;;  %v402_v12 = vld [vmem:[%s2447_s16 + $0x40] sm:$0xff]  ;;  %v2494_v15 = vld [vmem:[%s2447_s16 + $0x30] sm:$0xff]  ;;  %v2534_v42 = vshrl.u32 %v491_v39, 7  ;;  %s2665_s30 = scalar_lea.vmem [#allocation13], %s1432_s19 }
  0xf5   : > { %889 = vmatprep.subr.bf16.mxu0 %v1707_v7  ;;  %1504 = vmatprep.subr.bf16.mxu1 %v1707_v7  ;;  %v1713_v13 = vld [vmem:[#allocation10 + $0x24] ss:$8 sps:$4 sm:$0xff]   ;;  %v1715_v14 = vld [vmem:[#allocation10 + $0x20] ss:$8 sps:$4 sm:$0xff]   ;;  %v1716_v16 = vld [vmem:[#allocation10 + $0x34] ss:$8 sps:$4 sm:$0xff]  }
  0xf6   : > { %890 = vmatpush1.bf16.msra.mxu0 %v1709_v8  ;;  %1512 = vmatpush1.bf16.msra.mxu1 %v1709_v8  ;;  %v1718_v17 = vld [vmem:[#allocation10 + $0x30] ss:$8 sps:$4 sm:$0xff]   ;;  %v2499_v18 = vld [vmem:[%s2447_s16 + $0x68] sm:$0xff]  ;;  %v1722_v22 = vld [vmem:[#allocation10 + $0x54] ss:$8 sps:$4 sm:$0xff]   ;;  %v577_v45 = vsub.s32 1, %v2534_v42 }
  0xf7   : > { %891 = vmatprep.subr.bf16.mxu0 %v1710_v9  ;;  %1505 = vmatprep.subr.bf16.mxu1 %v1710_v9  ;;  %v397_v19 = vld [vmem:[%s2447_s16 + $0x18] sm:$0xff]  ;;  %v1719_v20 = vld [vmem:[#allocation10 + $0x44] ss:$8 sps:$4 sm:$0xff]   ;;  %v1721_v21 = vld [vmem:[#allocation10 + $0x40] ss:$8 sps:$4 sm:$0xff]   ;;  %v493_v46 = vsub.s32 0, %v2534_v42 }
  0xf8   : > { %516 = vperm.xlu1 %1688, %v395_v3   ;;  %418 = vperm.xlu0 %1687, %v395_v3   ;;  %v1724_v23 = vld [vmem:[#allocation10 + $0x50] ss:$8 sps:$4 sm:$0xff]   ;;  %v1725_v24 = vld [vmem:[#allocation10 + $0x64] ss:$8 sps:$4 sm:$0xff]   ;;  %v1727_v25 = vld [vmem:[#allocation10 + $0x60] ss:$8 sps:$4 sm:$0xff]  }
  0xf9   : > { %v398_v26 = vld [vmem:[%s2447_s16 + $0x20] sm:$0xff]  ;;  %v405_v29 = vld [vmem:[%s2447_s16 + $0x58] sm:$0xff]  ;;  %v404_v31 = vld [vmem:[%s2447_s16 + $0x50] sm:$0xff]  ;;  %v677_v47 = vsub.s32 2, %v2534_v42  ;;  %s2728_s8 = scalar_lea.vmem [#allocation14], %s2489_s14  ;;  %s2904_s17 = sld [smem:[#allocation22_spill]] }
  0xfa   : > { %892 = vmatpush1.bf16.msra.mxu0 %v1712_v10  ;;  %1513 = vmatpush1.bf16.msra.mxu1 %v1712_v10  ;;  %v1728_v27 = vld [vmem:[#allocation10 + $0x74] ss:$8 sps:$4 sm:$0xff]   ;;  %v1730_v28 = vld [vmem:[#allocation10 + $0x70] ss:$8 sps:$4 sm:$0xff]   ;;  %v408_v32 = vld [vmem:[%s2447_s16 + $0x70] sm:$0xff] }
  0xfb   : > { %893 = vmatprep.subr.bf16.mxu0 %v1713_v13  ;;  %1506 = vmatprep.subr.bf16.mxu1 %v1713_v13  ;;  %v401_v30 = vld [vmem:[%s2447_s16 + $0x38] sm:$0xff]  ;;  %v406_v34 = vld [vmem:[%s2447_s16 + $0x60] sm:$0xff] }
  0xfc   : > { %1689 = vset.pattern.permute.xlu1 %v2079_v5  ;;  %1691 = vset.pattern.permute.xlu0 %v2077_v0  ;;  %v409_v33 = vld [vmem:[%s2447_s16 + $0x78] sm:$0xff]  ;;  %v410_v48 = vld [vmem:[#allocation5] sm:$0x7]  ;;  %v2564_v8 = vld [vmem:[#allocation8] ss:$0 sm:$0xff] }
  0xfd   : > { %616 = vperm.xlu1 %1689, %v395_v3   ;;  %520 = vperm.xlu0 %1691, %v2472_v4   ;;  %v2543_v51 = vrot.slane %v410_v48, %v577_v45  ;;  %v2547_v52 = vrot.slane %v410_v48, %v493_v46  ;;  %v2549_v53 = vrot.slane %v410_v48, %v677_v47 }
  0xfe   : > { %894 = vmatpush1.bf16.msra.mxu0 %v1715_v14  ;;  %1514 = vmatpush1.bf16.msra.mxu1 %v1715_v14 }
  0xff   : > { %895 = vmatprep.subr.bf16.mxu0 %v1716_v16  ;;  %1507 = vmatprep.subr.bf16.mxu1 %v1716_v16  ;;  %p1474_p12 = scmp.ne.s32.totalorder %s2904_s17, 0 }
 0x100   : > { %vm1180_vm0 = vcmp.lt.s32.totalorder (!%p1474_p12), %v491_v39, 256 }
 0x101   : > { %1690 = vset.pattern.permute.xlu1 %v2078_v1  ;;  %548 = vperm.xlu0 %1691, %v2477_v6  }
 0x102   : > { %423 = vperm.xlu1 %1690, %v2472_v4   ;;  %896 = vmatpush1.bf16.msra.mxu0 %v1718_v17 }
 0x103   : > { %1515 = vmatpush1.bf16.msra.mxu1 %v1718_v17  ;;  %897 = vmatprep.subr.bf16.mxu0 %v1719_v20 }
 0x104   : > { %1508 = vmatprep.subr.bf16.mxu1 %v1719_v20 }
 0x105   : > { %532 = vperm.xlu0 %1691, %v2485_v11  }
 0x106   : > { %453 = vperm.xlu1 %1690, %v402_v12   ;;  %898 = vmatpush1.bf16.msra.mxu0 %v1721_v21 }
 0x107   : > { %1516 = vmatpush1.bf16.msra.mxu1 %v1721_v21  ;;  %899 = vmatprep.subr.bf16.mxu0 %v1722_v22 }
 0x108   : > { %1509 = vmatprep.subr.bf16.mxu1 %v1722_v22 }
 0x109   : > { %536 = vperm.xlu0 %1691, %v2494_v15  }
 0x10a   : > { %458 = vperm.xlu1 %1690, %v2477_v6   ;;  %900 = vmatpush1.bf16.msra.mxu0 %v1724_v23 }
 0x10b   : > { %1517 = vmatpush1.bf16.msra.mxu1 %v1724_v23  ;;  %901 = vmatprep.subr.bf16.mxu0 %v1725_v24 }
 0x10c   : > { %1510 = vmatprep.subr.bf16.mxu1 %v1725_v24 }
 0x10d   : > { %564 = vperm.xlu0 %1691, %v2499_v18  }
 0x10e   : > { %1692 = vset.pattern.permute.xlu1 %v2077_v0  ;;  %902 = vmatpush1.bf16.msra.mxu0 %v1727_v25 }
 0x10f   : > { %524 = vperm.xlu1 %1692, %v397_v19   ;;  %1518 = vmatpush1.bf16.msra.mxu1 %v1727_v25 }
 0x110   : > { %903 = vmatprep.subr.bf16.mxu0 %v1728_v27  ;;  %1511 = vmatprep.subr.bf16.mxu1 %v1728_v27 }
 0x111   : > { %1699 = vset.pattern.permute.xlu0 %v2079_v5 }
 0x112   : > { %612 = vperm.xlu0 %1699, %v394_v2   ;;  %904 = vmatpush1.bf16.msra.mxu0 %v1730_v28  ;;  %v2560_v2 = vld [vmem:[#allocation7] ss:$0 sm:$0xff] }
 0x113   : > { %544 = vperm.xlu1 %1692, %v402_v12   ;;  %1519 = vmatpush1.bf16.msra.mxu1 %v1730_v28 }
 0x116   : > { %624 = vperm.xlu0 %1699, %v397_v19  }
 0x117   : > { %1693 = vset.pattern.permute.xlu1 %v2079_v5 }
 0x118   : > { %620 = vperm.xlu1 %1693, %v2472_v4  }
 0x11a   : > { %628 = vperm.xlu0 %1699, %v398_v26  }
 0x11c   : > { %644 = vperm.xlu1 %1693, %v402_v12  }
 0x11e   : > { %656 = vperm.xlu0 %1699, %v405_v29  }
 0x120   : > { %648 = vperm.xlu1 %1693, %v2477_v6  }
 0x122   : > { %640 = vperm.xlu0 %1699, %v401_v30  }
 0x124   : > { %1694 = vset.pattern.permute.xlu1 %v2078_v1 }
 0x125   : > { %438 = vperm.xlu1 %1694, %v2485_v11  }
 0x126   : > { %1701 = vset.pattern.permute.xlu0 %v2078_v1 }
 0x127   : > { %428 = vperm.xlu0 %1701, %v397_v19  }
 0x129   : > { %463 = vperm.xlu1 %1694, %v404_v31  }
 0x12b   : > { %433 = vperm.xlu0 %1701, %v398_v26  }
 0x12d   : > { %1695 = vset.pattern.permute.xlu1 %v2077_v0 }
 0x12e   : > { %528 = vperm.xlu1 %1695, %v398_v26  }
 0x12f   : > { %468 = vperm.xlu0 %1701, %v405_v29  }
 0x132   : > { %552 = vperm.xlu1 %1695, %v404_v31  }
 0x133   : > { %448 = vperm.xlu0 %1701, %v401_v30  }
 0x136   : > { %556 = vperm.xlu1 %1695, %v405_v29  }
 0x137   : > { %483 = vperm.xlu0 %1701, %v408_v32  }
 0x13a   : > { %1696 = vset.pattern.permute.xlu1 %v2079_v5 }
 0x13b   : > { %632 = vperm.xlu1 %1696, %v2485_v11   ;;  %1704 = vset.pattern.permute.xlu0 %v2077_v0 }
 0x13c   : > { %572 = vperm.xlu0 %1704, %v409_v33  }
 0x13f   : > { %652 = vperm.xlu1 %1696, %v404_v31  }
 0x140   : > { %1706 = vset.pattern.permute.xlu0 %v2079_v5 }
 0x143   : > { %1697 = vset.pattern.permute.xlu1 %v2078_v1 }
 0x144   : > { %443 = vperm.xlu1 %1697, %v2494_v15  }
 0x148   : > { %473 = vperm.xlu1 %1697, %v406_v34  }
 0x14c   : > { %478 = vperm.xlu1 %1697, %v2499_v18  }
 0x150   : > { %1698 = vset.pattern.permute.xlu1 %v2077_v0 }
 0x151   : > { %540 = vperm.xlu1 %1698, %v401_v30  }
 0x155   : > { %560 = vperm.xlu1 %1698, %v406_v34  }
 0x159   : > { %1700 = vset.pattern.permute.xlu1 %v2079_v5 }
 0x15a   : > { %636 = vperm.xlu1 %1700, %v2494_v15  }
 0x15e   : > { %660 = vperm.xlu1 %1700, %v406_v34  }
 0x162   : > { %664 = vperm.xlu1 %1700, %v2499_v18  }
 0x166   : > { %1702 = vset.pattern.permute.xlu1 %v2078_v1 }
 0x167   : > { %488 = vperm.xlu1 %1702, %v409_v33  }
 0x16b   : > { %1703 = vset.pattern.permute.xlu1 %v2077_v0 }
 0x16c   : > { %568 = vperm.xlu1 %1703, %v408_v32  }
 0x170   : > { %1705 = vset.pattern.permute.xlu1 %v2079_v5 }
 0x171   : > { %668 = vperm.xlu1 %1705, %v408_v32  }
 0x173   : > { %v513_v35 = vpop.permute.xlu1 %512  ;;  %v414_v36 = vpop.permute.xlu0 %413 }
 0x174   : > { %v579_v61 = vmul.f32 %v2543_v51, %v513_v35  ;;  %v495_v62 = vmul.f32 %v2547_v52, %v414_v36 }
 0x175   : > { %672 = vperm.xlu1 %1705, %v409_v33  }
 0x176   : > { %v595_v4 = vadd.f32 %v579_v61, %v495_v62 }
 0x177   : > { %v517_v37 = vpop.permute.xlu1 %516  ;;  %v419_v38 = vpop.permute.xlu0 %418 }
 0x178   : > { %v580_v54 = vmul.f32 %v2543_v51, %v517_v37  ;;  %v496_v55 = vmul.f32 %v2547_v52, %v419_v38 }
 0x17a   : > { %v596_v59 = vadd.f32 %v580_v54, %v496_v55 }
 0x17c   : > { %v617_v40 = vpop.permute.xlu1 %616  ;;  %v521_v41 = vpop.permute.xlu0 %520 }
 0x17d   : > { %v680_v58 = vmul.f32 %v2549_v53, %v617_v40  ;;  %v581_v28 = vmul.f32 %v2543_v51, %v521_v41 }
 0x17f   : > { %v696_v63 = vadd.f32 %v680_v58, %v596_v59 }
 0x180   : > { %v549_v43 = vpop.permute.xlu0 %548 }
 0x181   : > { %v424_v44 = vpop.permute.xlu1 %423  ;;  %v719_v5 = vmul.f32 %v2560_v2, %v696_v63  ;;  %v588_v20 = vmul.f32 %v2543_v51, %v549_v43 }
 0x182   : > { %v497_v29 = vmul.f32 %v2547_v52, %v424_v44 }
 0x183   : > { %v742_v12 = vadd.f32 %v2564_v8, %v719_v5 }
 0x184   : > { %v2539_v49 = vpop.permute.xlu0 %532  ;;  %v597_v37 = vadd.f32 %v581_v28, %v497_v29 }
 0x185   : > { %v454_v50 = vpop.permute.xlu1 %453  ;;  %v758_v19 = vmax.f32 %v742_v12, 0.0 }
 0x186   : > { %v503_v17 = vmul.f32 %v2547_v52, %v454_v50 }
 0x188   : > { %v2553_v56 = vpop.permute.xlu0 %536 }
 0x189   : > { %v459_v57 = vpop.permute.xlu1 %458 }
 0x18a   : > { %v504_v22 = vmul.f32 %v2547_v52, %v459_v57 }
 0x18c   : > { %v2556_v60 = vpop.permute.xlu0 %564  ;;  %v604_v31 = vadd.f32 %v588_v20, %v504_v22 }
 0x18e   : > { %v525_v0 = vpop.permute.xlu1 %524 }
 0x18f   : > { %v582_v48 = vmul.f32 %v2543_v51, %v525_v0 }
 0x191   : > { %v613_v3 = vpop.permute.xlu0 %612 }
 0x192   : > { %v679_v6 = vmul.f32 %v2549_v53, %v613_v3  ;;  %v545_v7 = vpop.permute.xlu1 %544 }
 0x193   : > { %v587_v14 = vmul.f32 %v2543_v51, %v545_v7 }
 0x194   : > { %v695_v9 = vadd.f32 %v679_v6, %v595_v4 }
 0x195   : > { %v625_v10 = vpop.permute.xlu0 %624  ;;  %v603_v23 = vadd.f32 %v587_v14, %v503_v17 }
 0x196   : > { %v718_v11 = vmul.f32 %v2560_v2, %v695_v9  ;;  %v682_v50 = vmul.f32 %v2549_v53, %v625_v10 }
 0x197   : > { %v621_v13 = vpop.permute.xlu1 %620 }
 0x198   : > { %v741_v15 = vadd.f32 %v2564_v8, %v718_v11  ;;  %v681_v34 = vmul.f32 %v2549_v53, %v621_v13 }
 0x199   : > { %v629_v16 = vpop.permute.xlu0 %628 }
 0x19a   : > { %v757_v18 = vmax.f32 %v741_v15, 0.0  ;;  %v697_v43 = vadd.f32 %v681_v34, %v597_v37  ;;  %v683_v14 = vmul.f32 %v2549_v53, %v629_v16 }
 0x19b   : > { %v645_v21 = vpop.permute.xlu1 %644 }
 0x19c   : > { %v687_v24 = vmul.f32 %v2549_v53, %v645_v21  ;;  %v773_v25 = vpack.c.bf16 %v758_v19, %v757_v18  ;;  %v720_v59 = vmul.f32 %v2560_v2, %v697_v43  ;;  %v584_v21 = vmul.f32 %v2543_v51, %v2539_v49 }
 0x19d   : > { %v657_v26 = vpop.permute.xlu0 %656 }
 0x19e   : > { %v703_v27 = vadd.f32 %v687_v24, %v603_v23  ;;  %922 = vmatmul.mubr.bf16.vlgmr.msra.gmra.mrb[0].mxu0 %v773_v25  ;;  %v743_v6 = vadd.f32 %v2564_v8, %v720_v59  ;;  %v690_v22 = vmul.f32 %v2549_v53, %v657_v26 }
 0x19f   : > { %v649_v30 = vpop.permute.xlu1 %648  ;;  %931 = vmatprep.mubr.bf16.mxu0 %v2078_v1 }
 0x1a0   : > { %v726_v32 = vmul.f32 %v2560_v2, %v703_v27  ;;  %v688_v33 = vmul.f32 %v2549_v53, %v649_v30  ;;  %v759_v11 = vmax.f32 %v743_v6, 0.0 }
 0x1a1   : > { %v2580_v35 = vpop.permute.xlu0 %640 }
 0x1a2   : > { %v704_v36 = vadd.f32 %v688_v33, %v604_v31  ;;  %v749_v41 = vadd.f32 %v2564_v8, %v726_v32 }
 0x1a4   : > { %v727_v38 = vmul.f32 %v2560_v2, %v704_v36  ;;  %v439_v40 = vpop.permute.xlu1 %438  ;;  %v765_v57 = vmax.f32 %v749_v41, 0.0 }
 0x1a5   : > { %v500_v23 = vmul.f32 %v2547_v52, %v439_v40 }
 0x1a6   : > { %v429_v44 = vpop.permute.xlu0 %428  ;;  %v750_v47 = vadd.f32 %v2564_v8, %v727_v38 }
 0x1a7   : > { %v498_v54 = vmul.f32 %v2547_v52, %v429_v44  ;;  %v600_v28 = vadd.f32 %v584_v21, %v500_v23 }
 0x1a8   : > { %v464_v55 = vpop.permute.xlu1 %463  ;;  %v766_v58 = vmax.f32 %v750_v47, 0.0 }
 0x1a9   : > { %v598_v61 = vadd.f32 %v582_v48, %v498_v54  ;;  %v505_v32 = vmul.f32 %v2547_v52, %v464_v55 }
 0x1aa   : > { %v777_v62 = vpack.c.bf16 %v766_v58, %v765_v57  ;;  %v434_v3 = vpop.permute.xlu0 %433 }
 0x1ab   : > { %v698_v63 = vadd.f32 %v682_v50, %v598_v61  ;;  %v499_v7 = vmul.f32 %v2547_v52, %v434_v3 }
 0x1ac   : > { %962 = vmatmul.mubr.bf16.vlgmr.msra.gmra.mrb[0].mxu1 %v777_v62 }
 0x1ad   : > { %v721_v4 = vmul.f32 %v2560_v2, %v698_v63  ;;  %v529_v5 = vpop.permute.xlu1 %528  ;;  %971 = vmatprep.mubr.bf16.mxu1 %v2078_v1 }
 0x1ae   : > { %v583_v0 = vmul.f32 %v2543_v51, %v529_v5  ;;  %v469_v13 = vpop.permute.xlu0 %468 }
 0x1af   : > { %v744_v9 = vadd.f32 %v2564_v8, %v721_v4  ;;  %v506_v18 = vmul.f32 %v2547_v52, %v469_v13 }
 0x1b0   : > { %v599_v15 = vadd.f32 %v583_v0, %v499_v7  ;;  %v686_v0 = vmul.f32 %v2549_v53, %v2580_v35 }
 0x1b1   : > { %v553_v10 = vpop.permute.xlu1 %552  ;;  %v760_v12 = vmax.f32 %v744_v9, 0.0 }
 0x1b2   : > { %v699_v24 = vadd.f32 %v683_v14, %v599_v15  ;;  %v589_v16 = vmul.f32 %v2543_v51, %v553_v10  ;;  %v449_v63 = vpop.permute.xlu0 %448 }
 0x1b3   : > { %v774_v17 = vpack.c.bf16 %v760_v12, %v759_v11  ;;  %v502_v3 = vmul.f32 %v2547_v52, %v449_v63  ;;  %v585_v11 = vmul.f32 %v2543_v51, %v2553_v56 }
 0x1b4   : > { %v722_v29 = vmul.f32 %v2560_v2, %v699_v24  ;;  %v605_v34 = vadd.f32 %v589_v16, %v505_v32  ;;  %v592_v24 = vmul.f32 %v2543_v51, %v2556_v60 }
 0x1b5   : > { %v557_v19 = vpop.permute.xlu1 %556  ;;  %932 = vmatmul.mubr.bf16.gmra.mrb[4].mxu0 %v774_v17 }
 0x1b6   : > { %v590_v20 = vmul.f32 %v2543_v51, %v557_v19  ;;  %941 = vmatprep.mubr.bf16.mxu0 %v2078_v1  ;;  %v745_v38 = vadd.f32 %v2564_v8, %v722_v29 }
 0x1b8   : > { %v606_v25 = vadd.f32 %v590_v20, %v506_v18  ;;  %v761_v47 = vmax.f32 %v745_v38, 0.0 }
 0x1ba   : > { %v633_v27 = vpop.permute.xlu1 %632  ;;  %v706_v30 = vadd.f32 %v690_v22, %v606_v25 }
 0x1bb   : > { %v684_v31 = vmul.f32 %v2549_v53, %v633_v27 }
 0x1bc   : > { %v729_v26 = vmul.f32 %v2560_v2, %v706_v30 }
 0x1bd   : > { %v700_v33 = vadd.f32 %v684_v31, %v600_v28 }
 0x1be   : > { %v653_v49 = vpop.permute.xlu1 %652  ;;  %v752_v50 = vadd.f32 %v2564_v8, %v729_v26 }
 0x1bf   : > { %v723_v36 = vmul.f32 %v2560_v2, %v700_v33  ;;  %v689_v37 = vmul.f32 %v2549_v53, %v653_v49 }
 0x1c0   : > { %v768_v59 = vmax.f32 %v752_v50, 0.0 }
 0x1c1   : > { %v705_v40 = vadd.f32 %v689_v37, %v605_v34  ;;  %v746_v41 = vadd.f32 %v2564_v8, %v723_v36  ;;  %v484_v37 = vpop.permute.xlu0 %483 }
 0x1c3   : > { %v728_v43 = vmul.f32 %v2560_v2, %v705_v40  ;;  %v444_v44 = vpop.permute.xlu1 %443  ;;  %v762_v48 = vmax.f32 %v746_v41, 0.0 }
 0x1c4   : > { %v501_v9 = vmul.f32 %v2547_v52, %v444_v44 }
 0x1c5   : > { %v775_v54 = vpack.c.bf16 %v762_v48, %v761_v47  ;;  %v751_v55 = vadd.f32 %v2564_v8, %v728_v43  ;;  %v573_v47 = vpop.permute.xlu0 %572  ;;  %v509_v48 = vmul.f32 %v2547_v52, %v484_v37 }
 0x1c6   : > { %v601_v13 = vadd.f32 %v585_v11, %v501_v9 }
 0x1c7   : > { %v474_v57 = vpop.permute.xlu1 %473  ;;  %942 = vmatmul.mubr.bf16.gmra.mrb[8].mxu0 %v775_v54  ;;  %v767_v58 = vmax.f32 %v751_v55, 0.0  ;;  %v594_v55 = vmul.f32 %v2543_v51, %v573_v47 }
 0x1c8   : > { %951 = vmatprep.mubr.bf16.mxu0 %v2078_v1  ;;  %v507_v18 = vmul.f32 %v2547_v52, %v474_v57 }
 0x1c9   : > { %v778_v61 = vpack.c.bf16 %v768_v59, %v767_v58 }
 0x1cb   : > { %v479_v62 = vpop.permute.xlu1 %478  ;;  %972 = vmatmul.mubr.bf16.gmra.mrb[4].mxu1 %v778_v61 }
 0x1cc   : > { %981 = vmatprep.mubr.bf16.mxu1 %v2078_v1  ;;  %v508_v35 = vmul.f32 %v2547_v52, %v479_v62 }
 0x1ce   : > { %v608_v27 = vadd.f32 %v592_v24, %v508_v35 }
 0x1d0   : > { %v541_v4 = vpop.permute.xlu1 %540 }
 0x1d1   : > { %v586_v5 = vmul.f32 %v2543_v51, %v541_v4 }
 0x1d3   : > { %v602_v6 = vadd.f32 %v586_v5, %v502_v3 }
 0x1d4   : > { %v561_v7 = vpop.permute.xlu1 %560 }
 0x1d5   : > { %v702_v10 = vadd.f32 %v686_v0, %v602_v6  ;;  %v591_v15 = vmul.f32 %v2543_v51, %v561_v7  ;;  %v797_v7 = vld [vmem:[#allocation11] sm:$0x3] }
 0x1d6   : > { %v2653_v9 = vrot.slane %v797_v7, %v493_v46 }
 0x1d7   : > { %v725_v14 = vmul.f32 %v2560_v2, %v702_v10  ;;  %v607_v21 = vadd.f32 %v591_v15, %v507_v18 }
 0x1d9   : > { %v637_v12 = vpop.permute.xlu1 %636  ;;  %v748_v56 = vadd.f32 %v2564_v8, %v725_v14 }
 0x1da   : > { %v685_v17 = vmul.f32 %v2549_v53, %v637_v12 }
 0x1db   : > { %v764_v32 = vmax.f32 %v748_v56, 0.0 }
 0x1dc   : > { %v701_v19 = vadd.f32 %v685_v17, %v601_v13 }
 0x1dd   : > { %v661_v20 = vpop.permute.xlu1 %660 }
 0x1de   : > { %v724_v22 = vmul.f32 %v2560_v2, %v701_v19  ;;  %v691_v23 = vmul.f32 %v2549_v53, %v661_v20 }
 0x1e0   : > { %v707_v25 = vadd.f32 %v691_v23, %v607_v21  ;;  %v747_v16 = vadd.f32 %v2564_v8, %v724_v22 }
 0x1e1   : > { %v665_v28 = vpop.permute.xlu1 %664 }
 0x1e2   : > { %v730_v29 = vmul.f32 %v2560_v2, %v707_v25  ;;  %v692_v30 = vmul.f32 %v2549_v53, %v665_v28  ;;  %v763_v31 = vmax.f32 %v747_v16, 0.0 }
 0x1e4   : > { %v708_v33 = vadd.f32 %v692_v30, %v608_v27  ;;  %v776_v34 = vpack.c.bf16 %v764_v32, %v763_v31  ;;  %v753_v36 = vadd.f32 %v2564_v8, %v730_v29 }
 0x1e6   : > { %v731_v49 = vmul.f32 %v2560_v2, %v708_v33  ;;  %v489_v26 = vpop.permute.xlu1 %488  ;;  %952 = vmatmul.mubr.bf16.gmra.mrb[12].mxu0 %v776_v34  ;;  %v769_v38 = vmax.f32 %v753_v36, 0.0 }
 0x1e7   : > { %v510_v54 = vmul.f32 %v2547_v52, %v489_v26 }
 0x1e8   : > { %v754_v60 = vadd.f32 %v2564_v8, %v731_v49 }
 0x1e9   : > { %v610_v62 = vadd.f32 %v594_v55, %v510_v54 }
 0x1ea   : > { %v770_v40 = vmax.f32 %v754_v60, 0.0 }
 0x1eb   : > { %v569_v41 = vpop.permute.xlu1 %568 }
 0x1ec   : > { %v779_v43 = vpack.c.bf16 %v770_v40, %v769_v38  ;;  %v593_v44 = vmul.f32 %v2543_v51, %v569_v41 }
 0x1ee   : > { %982 = vmatmul.mubr.bf16.gmra.mrb[8].mxu1 %v779_v43  ;;  %v609_v57 = vadd.f32 %v593_v44, %v509_v48 }
 0x1ef   : > { %991 = vmatprep.mubr.bf16.mxu1 %v2078_v1 }
 0x1f0   : > { %v669_v50 = vpop.permute.xlu1 %668 }
 0x1f1   : > { %v693_v58 = vmul.f32 %v2549_v53, %v669_v50 }
 0x1f3   : > { %v709_v59 = vadd.f32 %v693_v58, %v609_v57 }
 0x1f4   : > { %v673_v61 = vpop.permute.xlu1 %672 }
 0x1f5   : > { %v732_v63 = vmul.f32 %v2560_v2, %v709_v59  ;;  %v694_v3 = vmul.f32 %v2549_v53, %v673_v61  ;;  %v2657_v53 = vrot.slane %v797_v7, %v577_v45 }
 0x1f7   : > { %v710_v4 = vadd.f32 %v694_v3, %v610_v62  ;;  %v755_v1 = vadd.f32 %v2564_v8, %v732_v63 }
 0x1f9   : > { %v733_v5 = vmul.f32 %v2560_v2, %v710_v4  ;;  %v771_v52 = vmax.f32 %v755_v1, 0.0 }
 0x1fb   : > { %v756_v6 = vadd.f32 %v2564_v8, %v733_v5 }
 0x1fd   : > { %v772_v51 = vmax.f32 %v756_v6, 0.0 }
 0x1ff   : > { %v780_v0 = vpack.c.bf16 %v772_v51, %v771_v52 }
 0x201   : > { %992 = vmatmul.mubr.bf16.gmra.mrb[12].mxu1 %v780_v0 }
 0x271   : > { %v923_v10 = vpop.f32.mrb[0].mxu0 }
 0x272   : > { %v924_v2 = vadd.f32 %v923_v10, %v2653_v9  ;;  %v925_v11 = vpop.f32.mrb[1].mxu0 }
 0x273   : > { %v926_v8 = vadd.f32 %v925_v11, %v2657_v53  ;;  %v927_v12 = vpop.f32.mrb[2].mxu0 }
 0x274   : > { %v928_v13 = vadd.f32 %v927_v12, %v2653_v9  ;;  %v929_v14 = vpop.f32.mrb[3].mxu0 }
 0x275   : > { %v1486_v15 = vpack.c.bf16 %v926_v8, %v924_v2  ;;  %v930_v17 = vadd.f32 %v929_v14, %v2657_v53 }
 0x277   : > { %1098 = vst [vmem:[%s2665_s30] sm:$0xff] %v1486_v15  ;;  %v1487_v45 = vpack.c.bf16 %v930_v17, %v928_v13 }
 0x279   : > { %1099 = vst [vmem:[%s2665_s30 + $0x8] sm:$0xff] %v1487_v45 }
 0x27f   : > { %v963_v46 = vpop.f32.mrb[0].mxu1 }
 0x280   : > { %v2670_v18 = vadd.f32 %v963_v46, %v2653_v9  ;;  %v965_v19 = vpop.f32.mrb[1].mxu1 }
 0x281   : > { %v2673_v35 = vadd.f32 %v965_v19, %v2657_v53  ;;  %v967_v20 = vpop.f32.mrb[2].mxu1 }
 0x282   : > { %v2676_v21 = vadd.f32 %v967_v20, %v2653_v9  ;;  %v969_v22 = vpop.f32.mrb[3].mxu1 }
 0x283   : > { %v1494_v23 = vpack.c.bf16 %v2673_v35, %v2670_v18  ;;  %v2681_v56 = vadd.f32 %v969_v22, %v2657_v53 }
 0x285   : > { %1106 = vst [vmem:[%s2665_s30 + $0x40] sm:$0xff] %v1494_v23  ;;  %v1495_v24 = vpack.c.bf16 %v2681_v56, %v2676_v21 }
 0x287   : > { %1107 = vst [vmem:[%s2665_s30 + $0x48] sm:$0xff] %v1495_v24 }
 0x288   : > { %v933_v25 = vpop.f32.mrb[4].mxu0 }
 0x289   : > { %v934_v16 = vadd.f32 %v933_v25, %v2653_v9  ;;  %v935_v27 = vpop.f32.mrb[5].mxu0 }
 0x28a   : > { %v936_v28 = vadd.f32 %v935_v27, %v2657_v53  ;;  %v937_v29 = vpop.f32.mrb[6].mxu0 }
 0x28b   : > { %v1114_v30 = vmax.f32 %v924_v2, %v934_v16  ;;  %v938_v31 = vadd.f32 %v937_v29, %v2653_v9  ;;  %v939_v32 = vpop.f32.mrb[7].mxu0 }
 0x28c   : > { %v1488_v33 = vpack.c.bf16 %v936_v28, %v934_v16  ;;  %v1135_v34 = vmax.f32 %v926_v8, %v936_v28  ;;  %v940_v49 = vadd.f32 %v939_v32, %v2657_v53 }
 0x28d   : > { %v1115_v26 = vmax.f32 %v928_v13, %v938_v31 }
 0x28e   : > { %1100 = vst [vmem:[%s2665_s30 + $0x10] sm:$0xff] %v1488_v33  ;;  %v1489_v36 = vpack.c.bf16 %v940_v49, %v938_v31  ;;  %v1136_v60 = vmax.f32 %v930_v17, %v940_v49 }
 0x290   : > { %1101 = vst [vmem:[%s2665_s30 + $0x18] sm:$0xff] %v1489_v36 }
 0x29a   : > { %v943_v37 = vpop.f32.mrb[8].mxu0 }
 0x29b   : > { %v944_v38 = vadd.f32 %v943_v37, %v2653_v9  ;;  %v945_v40 = vpop.f32.mrb[9].mxu0 }
 0x29c   : > { %v946_v41 = vadd.f32 %v945_v40, %v2657_v53  ;;  %v947_v43 = vpop.f32.mrb[10].mxu0 }
 0x29d   : > { %v1116_v44 = vmax.f32 %v1114_v30, %v944_v38  ;;  %v948_v47 = vadd.f32 %v947_v43, %v2653_v9  ;;  %v949_v48 = vpop.f32.mrb[11].mxu0 }
 0x29e   : > { %v1490_v50 = vpack.c.bf16 %v946_v41, %v944_v38  ;;  %v1137_v54 = vmax.f32 %v1135_v34, %v946_v41  ;;  %v950_v55 = vadd.f32 %v949_v48, %v2657_v53  ;;  %v973_v57 = vpop.f32.mrb[4].mxu1 }
 0x29f   : > { %v1117_v58 = vmax.f32 %v1115_v26, %v948_v47  ;;  %v974_v59 = vadd.f32 %v973_v57, %v2653_v9  ;;  %v975_v61 = vpop.f32.mrb[5].mxu1 }
 0x2a0   : > { %1102 = vst [vmem:[%s2665_s30 + $0x20] sm:$0xff] %v1490_v50  ;;  %v1491_v62 = vpack.c.bf16 %v950_v55, %v948_v47  ;;  %v1138_v63 = vmax.f32 %v1136_v60, %v950_v55  ;;  %v976_v3 = vadd.f32 %v975_v61, %v2657_v53  ;;  %v977_v4 = vpop.f32.mrb[6].mxu1 }
 0x2a1   : > { %v978_v5 = vadd.f32 %v977_v4, %v2653_v9  ;;  %v979_v1 = vpop.f32.mrb[7].mxu1 }
 0x2a2   : > { %1103 = vst [vmem:[%s2665_s30 + $0x28] sm:$0xff] %v1491_v62  ;;  %v1496_v6 = vpack.c.bf16 %v976_v3, %v974_v59  ;;  %v980_v52 = vadd.f32 %v979_v1, %v2657_v53 }
 0x2a4   : > { %1108 = vst [vmem:[%s2665_s30 + $0x50] sm:$0xff] %v1496_v6  ;;  %v1497_v51 = vpack.c.bf16 %v980_v52, %v978_v5 }
 0x2a6   : > { %1109 = vst [vmem:[%s2665_s30 + $0x58] sm:$0xff] %v1497_v51 }
 0x2b9   : > { %v953_v0 = vpop.f32.mrb[12].mxu0 }
 0x2ba   : > { %v954_v7 = vadd.f32 %v953_v0, %v2653_v9  ;;  %v955_v10 = vpop.f32.mrb[13].mxu0 }
 0x2bb   : > { %v956_v2 = vadd.f32 %v955_v10, %v2657_v53  ;;  %v957_v11 = vpop.f32.mrb[14].mxu0  ;;  %v2080_v10 = vmov (!%p1474_p12), 1966171168  }
 0x2bc   : > { %v1118_v8 = vmax.f32 %v1116_v44, %v954_v7  ;;  %v958_v12 = vadd.f32 %v957_v11, %v2653_v9  ;;  %v959_v13 = vpop.f32.mrb[15].mxu0 }
 0x2bd   : > { %v1492_v14 = vpack.c.bf16 %v956_v2, %v954_v7  ;;  %v1139_v15 = vmax.f32 %v1137_v54, %v956_v2  ;;  %v960_v17 = vadd.f32 %v959_v13, %v2657_v53  ;;  %v1164_v2 = vunpack.c.l.s4 (!%p1474_p12), %v2080_v10 }
 0x2be   : > { %v1120_v45 = vmax.f32 %v1118_v8, %v2670_v18  ;;  %v1119_v46 = vmax.f32 %v1117_v58, %v958_v12 }
 0x2bf   : > { %1104 = vst [vmem:[%s2665_s30 + $0x30] sm:$0xff] %v1492_v14  ;;  %v1141_v19 = vmax.f32 %v1139_v15, %v2673_v35  ;;  %v1493_v20 = vpack.c.bf16 %v960_v17, %v958_v12  ;;  %v1140_v22 = vmax.f32 %v1138_v63, %v960_v17  ;;  %v1165_v8 = vunpack.c.0.s8 (!%p1474_p12), %v1164_v2 }
 0x2c0   : > { %v1121_v23 = vmax.f32 %v1119_v46, %v2676_v21  ;;  %v1122_v24 = vmax.f32 %v1120_v45, %v974_v59 }
 0x2c1   : > { %1105 = vst [vmem:[%s2665_s30 + $0x38] sm:$0xff] %v1493_v20  ;;  %v1142_v25 = vmax.f32 %v1140_v22, %v2681_v56  ;;  %v983_v16 = vpop.f32.mrb[8].mxu1  ;;  %v1143_v27 = vmax.f32 %v1141_v19, %v976_v3  ;;  %v1168_v12 = vsub.s32 (!%p1474_p12), %v1165_v8, %v2534_v42 }
 0x2c2   : > { %v984_v28 = vadd.f32 %v983_v16, %v2653_v9  ;;  %v985_v29 = vpop.f32.mrb[9].mxu1  ;;  %v1123_v18 = vmax.f32 %v1121_v23, %v978_v5 }
 0x2c3   : > { %v986_v30 = vadd.f32 %v985_v29, %v2657_v53  ;;  %v987_v31 = vpop.f32.mrb[10].mxu1  ;;  %v1144_v35 = vmax.f32 %v1142_v25, %v980_v52 }
 0x2c4   : > { %v1124_v32 = vmax.f32 %v1122_v24, %v984_v28  ;;  %v988_v33 = vadd.f32 %v987_v31, %v2653_v9  ;;  %v989_v21 = vpop.f32.mrb[11].mxu1 }
 0x2c5   : > { %v1498_v34 = vpack.c.bf16 %v986_v30, %v984_v28  ;;  %v1145_v49 = vmax.f32 %v1143_v27, %v986_v30  ;;  %v990_v56 = vadd.f32 %v989_v21, %v2657_v53 }
 0x2c6   : > { %v1125_v26 = vmax.f32 %v1123_v18, %v988_v33 }
 0x2c7   : > { %1110 = vst [vmem:[%s2665_s30 + $0x60] sm:$0xff] %v1498_v34  ;;  %v1499_v36 = vpack.c.bf16 %v990_v56, %v988_v33  ;;  %v1146_v60 = vmax.f32 %v1144_v35, %v990_v56 }
 0x2c9   : > { %1111 = vst [vmem:[%s2665_s30 + $0x68] sm:$0xff] %v1499_v36 }
 0x2d4   : > { %v993_v37 = vpop.f32.mrb[12].mxu1 }
 0x2d5   : > { %v994_v38 = vadd.f32 %v993_v37, %v2653_v9  ;;  %v995_v40 = vpop.f32.mrb[13].mxu1 }
 0x2d6   : > { %v996_v41 = vadd.f32 %v995_v40, %v2657_v53  ;;  %v997_v43 = vpop.f32.mrb[14].mxu1 }
 0x2d7   : > { %v1126_v44 = vmax.f32 %v1124_v32, %v994_v38  ;;  %v998_v47 = vadd.f32 %v997_v43, %v2653_v9  ;;  %v999_v48 = vpop.f32.mrb[15].mxu1 }
 0x2d8   : > { %v1500_v50 = vpack.c.bf16 %v996_v41, %v994_v38  ;;  %v1147_v54 = vmax.f32 %v1145_v49, %v996_v41  ;;  %v1000_v55 = vadd.f32 %v999_v48, %v2657_v53 }
 0x2d9   : > { %v1127_v57 = vmax.f32 %v1125_v26, %v998_v47 }
 0x2da   : > { %1112 = vst [vmem:[%s2665_s30 + $0x70] sm:$0xff] %v1500_v50  ;;  %v1501_v58 = vpack.c.bf16 %v1000_v55, %v998_v47  ;;  %v1148_v59 = vmax.f32 %v1146_v60, %v1000_v55 }
 0x2db   : > { %v1128_v61 = vmax.f32 %v1126_v44, %v1127_v57 }
 0x2dc   : > { %1113 = vst [vmem:[%s2665_s30 + $0x78] sm:$0xff] %v1501_v58  ;;  %v1149_v62 = vmax.f32 %v1147_v54, %v1148_v59 }
 0x2dd   : > { %v1129_v63 = vrot.slane %v1128_v61, 4 }
 0x2de   : > { %v1150_v3 = vrot.slane %v1149_v62, 4 }
 0x2df   : > { %v1130_v4 = vmax.f32 %v1128_v61, %v1129_v63 }
 0x2e0   : > { %v1151_v5 = vmax.f32 %v1149_v62, %v1150_v3 }
 0x2e1   : > { %v1131_v1 = vrot.slane %v1130_v4, 2 }
 0x2e2   : > { %v1152_v6 = vrot.slane %v1151_v5, 2  ;;  %1159 = sbr.rel (%p1474_p12) target bundleno = 753 (0x2f1), region = 72 }
 0x2e3   : > { %v1132_v9 = vmax.f32 %v1130_v4, %v1131_v1 }
 0x2e4   : > { %v1153_v52 = vmax.f32 %v1151_v5, %v1152_v6 }
 0x2e5   : > { %v1133_v51 = vrot.slane %v1132_v9, 1 }
 0x2e6   : > { %v1154_v0 = vrot.slane %v1153_v52, 1 }
 0x2e7   : > { %v1134_v7 = vmax.f32 %v1132_v9, %v1133_v51 }
 0x2e8   : > { %v1155_v53 = vmax.f32 %v1153_v52, %v1154_v0 }
 0x2ea   : > { %v1162_v11 = vcombine.low %v1134_v7, %v1155_v53 }
 0x2ec   : > { %v1169_v13 = vrot.slane %v1162_v11, %v1168_v12 }
 0x2ee   : > { %v1176_v14 = vrot.slane %v1169_v13, %v1168_v12 }
 0x2f0   : > { %1182 = vst.msk [vmem:[%s2728_s8] sm:$0x3] %vm1180_vm0, %v1176_v14 }
 0x2f1 PF: > { %s2905_s4 = sld [smem:[#allocation22_spill]] }
 0x2f7   : > { %p1475_p5 = scmp.le.s32.totalorder %s2905_s4, 0 }
 0x2f8   : > { %v2081_v15 = vmov (!%p1475_p5), 1966171168   ;;  %v1190_v45 = vcombine.low (!%p1475_p5), %v1134_v7, %v1155_v53  ;;  %v1187_v22 = vld [vmem:[%s2728_s8] sm:$0x3] (!%p1475_p5)  ;;  %vm1209_vm1 = vcmp.lt.s32.totalorder (!%p1475_p5), %v491_v39, 256 }
 0x2f9   : > { %1186 = sbr.rel (%p1475_p5) target bundleno = 774 (0x306), region = 76  ;;  %v1192_v17 = vunpack.c.l.s4 (!%p1475_p5), %v2081_v15 }
 0x2fb   : > { %v1193_v46 = vunpack.c.0.s8 (!%p1475_p5), %v1192_v17 }
 0x2fd   : > { %v1196_v19 = vsub.s32 (!%p1475_p5), %v1193_v46, %v2534_v42 }
 0x2ff   : > { %v1197_v20 = vrot.slane (!%p1475_p5), %v1190_v45, %v1196_v19 }
 0x301   : > { %v1204_v23 = vrot.slane %v1197_v20, %v1196_v19 }
 0x303   : > { %v1206_v24 = vmax.f32 %v1187_v22, %v1204_v23 }
 0x305   : > { %1211 = vst.msk [vmem:[%s2728_s8] sm:$0x3] %vm1209_vm1, %v1206_v24 }
 0x306 PF: > { %s2906_s7 = sld [smem:[#allocation22_spill]]  ;;  %s2907_s1 = sld [smem:[#allocation23_spill]] }
 0x307   : > { %s1234_s6 = sshll.u32 %s2665_s30, 4  ;;  %s2908_s14 = sld [smem:[#allocation35_spill]]  ;;  %s2742_s6 = int_to_ptr.vmem [resolvable:$true] %s1234_s6 }
 0x308   : > { %s1213_s4 = scalar_lea.sflag [#allocation4], %s2441_s22  ;;  %s1901_s13 = scalar_lea.vmem %s2742_s6, 2048 }
 0x309   : > { %p1902_p1 = scmp.ne.s32.totalorder %s2742_s6, %s1901_s13  ;;  %p2909_p11 = scmp.ne.s32.totalorder %s2893_s21, 0 }
 0x30b   : > { %p1903_p9 = pnand %p1902_p1, %p2909_p11 }
 0x30c   : > { %s1502_s18 = sshll.u32 %s2906_s7, 5  ;;  %s1480_s5 = sshll.u32 %s2907_s1, 6 }
 0x30d   : > { %s1231_s2 = sadd.s32 %s1502_s18, %s1480_s5  ;;  %p1904_p2 = pneg %p1903_p9 }
 0x30e   : > { %s1481_s19 = sshll.u32 %s1231_s2, 6  ;;  %s2082_s7 = smov [#allocation13]  }
 0x30f   : > { %s2747_s17 = scalar_lea.hbm %s2908_s14, %s1481_s19  ;;  %s1905_s30 = sshll.u32 %s2082_s7, 4  ;;  %s1906_s30 = int_to_ptr.vmem [resolvable:$false] %s1905_s30 }
 0x310   : > { %s1907_s18 = scalar_lea.vmem %s1906_s30, 4096  ;;  %p1908_p8 = scmp.lt.s32.totalorder %s2742_s6, %s1906_s30 }
 0x311   : > { %p1909_p3 = scmp.lt.s32.totalorder %s1907_s18, %s1901_s13 }
 0x313   : > { %p1910_p10 = por %p1909_p3, %p1908_p8 }
 0x315   : > { %p1911_p4 = pnand %p1910_p10, %p1904_p2 }
 0x317   : > { %1914 = shalt.err (!%p1911_p4)
}
 0x318   : > { %s1915_s5 = scalar_lea.hbm %s2747_s17, 2048  ;;  %s1919_s23 = scalar_lea.hbm %s2908_s14, 8192 }
 0x319   : > { %p1916_p7 = scmp.ne.s32.totalorder %s2747_s17, %s1915_s5  ;;  %p1920_p13 = scmp.lt.u32.totalorder %s2747_s17, %s2908_s14 }
 0x31a   : > { %p1921_p12 = scmp.lt.u32.totalorder %s1919_s23, %s1915_s5  ;;  %p1923_p1 = scmp.lt.u32.totalorder %s1915_s5, %s2747_s17 }
 0x31b   : > { %p1917_p6 = pnand %p1916_p7, %p2909_p11 }
 0x31c   : > { %p1922_p5 = por %p1921_p12, %p1920_p13 }
 0x31d   : > { %p1918_p0 = pneg %p1917_p6 }
 0x31e   : > { %p1924_p9 = por %p1923_p1, %p1922_p5 }
 0x320   : > { %p1925_p2 = pnand %p1924_p9, %p1918_p0 }
 0x322   : > { %1928 = shalt.err (!%p1925_p2)
}
 0x323   : > { %s2083_s13 = smov 128   ;;  %s2084_s30 = smov 8  }
 0x324   : > { %1542 = dma.vmem_to_hbm [thread:$0]  (%p2909_p11), %s2742_s6, 2048, %s2747_s17, %s1213_s4, %s2083_s13, %s2083_s13, %s2084_s30  }
 0x325   : > { %s1503_s18 = sshll.u32 %s2907_s1, 5  ;;  %s2910_s5 = sld [smem:[#allocation36_spill]] }
 0x326   : > { %s1251_s16 = sshll.u32 %s2728_s8, 4  ;;  %s2911_s7 = sand.u32 1, %s2031_s25   ;;  %s1252_s16 = int_to_ptr.vmem [resolvable:$true] %s1251_s16 }
 0x327   : > { %s1218_s0 = scalar_lea.sflag [#allocation15], %s2911_s7  ;;  %s1929_s14 = scalar_lea.vmem %s1252_s16, 32 }
 0x328   : > { %p1930_p8 = scmp.ne.s32.totalorder %s1252_s16, %s1929_s14  ;;  %p2912_p3 = scmp.ne.s32.totalorder %s2896_s3, 0 }
 0x329   : > { %s2085_s10 = smov [#allocation14]  }
 0x32a   : > { %p1931_p10 = pnand %p1930_p8, %p2912_p3  ;;  %s1933_s9 = sshll.u32 %s2085_s10, 4  ;;  %s1934_s9 = int_to_ptr.vmem [resolvable:$false] %s1933_s9 }
 0x32b   : > { %s2777_s23 = scalar_lea.hbm %s2910_s5, %s1503_s18  ;;  %s1935_s21 = scalar_lea.vmem %s1934_s9, 64 }
 0x32c   : > { %p1932_p4 = pneg %p1931_p10  ;;  %p1936_p11 = scmp.lt.s32.totalorder %s1252_s16, %s1934_s9 }
 0x32d   : > { %p1937_p7 = scmp.lt.s32.totalorder %s1935_s21, %s1929_s14 }
 0x32f   : > { %p1938_p6 = por %p1937_p7, %p1936_p11 }
 0x331   : > { %p1939_p0 = pnand %p1938_p6, %p1932_p4 }
 0x333   : > { %1942 = shalt.err (!%p1939_p0)
}
 0x334   : > { %s1943_s22 = scalar_lea.hbm %s2777_s23, 32  ;;  %s1947_s10 = scalar_lea.hbm %s2910_s5, 64 }
 0x335   : > { %p1944_p13 = scmp.ne.s32.totalorder %s2777_s23, %s1943_s22  ;;  %p1948_p1 = scmp.lt.u32.totalorder %s2777_s23, %s2910_s5 }
 0x336   : > { %p1949_p9 = scmp.lt.u32.totalorder %s1947_s10, %s1943_s22  ;;  %p1951_p8 = scmp.lt.u32.totalorder %s1943_s22, %s2777_s23 }
 0x337   : > { %p1945_p12 = pnand %p1944_p13, %p2912_p3 }
 0x338   : > { %p1950_p2 = por %p1949_p9, %p1948_p1 }
 0x339   : > { %p1946_p5 = pneg %p1945_p12 }
 0x33a   : > { %p1952_p10 = por %p1951_p8, %p1950_p2 }
 0x33c   : > { %p1953_p4 = pnand %p1952_p10, %p1946_p5 }
 0x33e   : > { %1956 = shalt.err (!%p1953_p4)
}
 0x33f   : > { %1543 = dma.vmem_to_hbm [thread:$0]  (%p2912_p3), %s1252_s16, 32, %s2777_s23, %s1218_s0  }
 0x340 PF: > { %p1584_p11 = scmp.ge.s32.totalorder %s2067_s11, 2  ;;  %s1263_s14 = sand.u32 1, %s2039_s27  }
 0x341   : > { %p2913_p7 = scmp.ne.s32.totalorder %s2894_s12, 0  ;;  %s1264_s17 = scalar_lea.sflag [#allocation4], %s1263_s14 }
 0x343   : > { %p1567_p6 = pnand %p1584_p11, %p2913_p7 }
 0x345   : > { %2018 = dma.done.wait (!%p1567_p6), %s1264_s17, 2048  }
 0x346   : > { %2020 = vsyncadd (!%p1567_p6), %s1264_s17, 4294965248  ;;  %s1272_s4 = sand.u32 1, %s2027_s24   ;;  %p2914_p0 = scmp.ne.s32.totalorder %s2897_s15, 0 }
 0x347   : > { %s1273_s13 = scalar_lea.sflag [#allocation15], %s1272_s4 }
 0x348   : > { %p1570_p13 = pnand %p1584_p11, %p2914_p0 }
 0x34a   : > { %2022 = dma.done.wait (!%p1570_p13), %s1273_s13, 32  }
 0x34b   : > { %2024 = vsyncadd (!%p1570_p13), %s1273_s13, 4294967264  ;;  %s30_s11 = sadd.s32 1, %s2067_s11   ;;  %s2915_s0 = sld [smem:[#allocation28_spill]] }
 0x34c   : > { %p27_p3 = scmp.ge.s32.totalorder %s30_s11, 6   ;;  %s2916_s30 = sld [smem:[#allocation24_spill]] }
 0x34d   : > { %s2917_s8 = sld [smem:[#allocation25_spill]]  ;;  %s2918_s9 = sld [smem:[#allocation26_spill]] }
 0x34e   : > { %s2919_s10 = sld [smem:[#allocation27_spill]]  ;;  %s2920_s24 = smov %s2031_s25 }
 0x34f   : > { %s2921_s25 = smov %s2035_s26  ;;  %s2922_s26 = smov %s2369_s20 }
 0x350   : > { %s2923_s27 = smov %s2043_s28  ;;  %s2924_s28 = smov %s2047_s29 }
 0x351   : > { %s2925_s29 = smov %s2915_s0  ;;  %29 = sbr.rel (!%p27_p3) target bundleno = 23 (0x17), region = 134 }
 0x358   :  { %1278 = vsyncpa [#allocation3], 1 }
 0x359   :  { %1280 = vsyncpa [#allocation3 + $0x1], 1 }
 0x35a   :  { %1281 = vsyncpa [#allocation6], 1 }
 0x35b   :  { %1282 = vsyncpa [#allocation9], 1 }
 0x35c   :  { %1283 = vsyncpa [#allocation12], 1 }
 0x35d   :  { %1284 = vsyncpa [#allocation4], 1 }
 0x35e   :  { %1286 = vsyncpa [#allocation4 + $0x1], 1 }
 0x35f   :  { %1287 = vsyncpa [#allocation15], 1 }
 0x360   :  { %1289 = vsyncpa [#allocation15 + $0x1], 1 }

// kernel: _lambda_.6
= control target key start
LH: loop header
LB: loop body
LE: loop exit
PB: predicated region body
PF: predicated region fallthrough
CT: control target
= control target key end

     0   :  { %s3432_s0 = inlined_call_operand.hbm [shape: bf16[2,256,256], index: 0, kind: input, shape index: {}]   ;;  %s3433_s1 = inlined_call_operand.hbm [shape: f32[2,1,256], index: 1, kind: input, shape index: {}]   ;;  %s3434_s2 = inlined_call_operand.hbm [shape: bf16[256,512], index: 2, kind: input, shape index: {}]   ;;  %s3435_s3 = inlined_call_operand.hbm [shape: bf16[256,512], index: 3, kind: input, shape index: {}]   ;;  %s3436_s4 = inlined_call_operand.hbm [shape: f32[2,1,512], index: 4, kind: output, shape index: {0}]   ;;  %s3437_s5 = inlined_call_operand.hbm [shape: f32[2,1,512], index: 5, kind: output, shape index: {1}]  }
   0x1   :  { %3448 = sst [smem:[#allocation21_spill]] %s3434_s2 }
   0x2   :  { %3449 = sst [smem:[#allocation22_spill]] %s3435_s3 }
   0x3   :  { %3450 = sst [smem:[#allocation23_spill]] %s3436_s4 }
   0x4   :  { %3451 = sst [smem:[#allocation24_spill]] %s3437_s5 }
   0x5   :  { %11 = vsyncpa [#allocation3], 0 }
   0x6   :  { %13 = vsyncpa [#allocation3 + $0x1], 0 }
   0x7   :  { %14 = vsyncpa [#allocation6], 0 }
   0x8   :  { %16 = vsyncpa [#allocation6 + $0x1], 0 }
   0x9   :  { %17 = vsyncpa [#allocation9], 0 }
   0xa   :  { %18 = vsyncpa [#allocation4], 0 }
   0xb   :  { %20 = vsyncpa [#allocation4 + $0x1], 0 }
   0xc   :  { %21 = vsyncpa [#allocation12], 0 }
   0xd   :  { %23 = vsyncpa [#allocation12 + $0x1], 0  ;;  %s2902_s18 = smov 0   ;;  %s2904_s19 = smov 0  }
   0xe   :  { %s2906_s20 = smov 0   ;;  %s2908_s21 = smov 0  }
   0xf   :  { %s2910_s22 = smov 0   ;;  %s2912_s23 = smov 0  }
  0x10   :  { %s2914_s24 = smov 0   ;;  %s2916_s25 = smov 0  }
  0x11   :  { %s2918_s26 = smov 0   ;;  %s2920_s27 = smov 0  }
  0x12   :  { %s2922_s28 = smov 0  }
  0x13 LB: > { %s2956_s29 = sadd.s32 4294967295, %s2858_s28   ;;  %p63_p0 = scmp.ne.s32.totalorder %s2834_s22, %s2830_s21  ;;  %s2858_s28 = sphi %s2922_s28, %s29_s28   ;;  %s2854_s27 = sphi %s2920_s27, %s3492_s27   ;;  %s2850_s26 = sphi %s2918_s26, %s3491_s26   ;;  %s2846_s25 = sphi %s2916_s25, %s3490_s25   ;;  %s2842_s24 = sphi %s2914_s24, %s3489_s24   ;;  %s2838_s23 = sphi %s2912_s23, %s3488_s23   ;;  %s2834_s22 = sphi %s2910_s22, %s3487_s22   ;;  %s2830_s21 = sphi %s2908_s21, %s3486_s21   ;;  %s2826_s20 = sphi %s2906_s20, %s3485_s20   ;;  %s2822_s19 = sphi %s2904_s19, %s3484_s19   ;;  %s2818_s18 = sphi %s2902_s18, %s3483_s18  }
  0x14   : > { %p3438_p1 = scmp.eq.s32.totalorder %s2956_s29, 0  ;;  %p2045_p3 = scmp.ge.s32.totalorder %s2858_s28, 1 }
  0x15   : > { %p194_p4 = scmp.lt.s32.totalorder %s2858_s28, 5  ;;  %s2860_s7 = smov [#allocation7]  }
  0x16   : > { %p2965_p5 = por %p3438_p1, %p63_p0  ;;  %s206_s8 = sshll.u32 %s2860_s7, 4  ;;  %s207_s8 = int_to_ptr.vmem [resolvable:$true] %s206_s8 }
  0x17   : > { %p2969_p6 = pnand %p2045_p3, %p194_p4  ;;  %s2861_s10 = smov [#allocation8]  }
  0x18   : > { %s3452_s30 = scalar_select %p2965_p5, 1, 0 }
  0x19   : > { %s3453_s6 = scalar_select %p2969_p6, 1, 0 }
  0x1a   : > { %p2237_p7 = pneg %p2969_p6  ;;  %s219_s11 = sshll.u32 %s2861_s10, 4  ;;  %s2981_s11 = int_to_ptr.vmem [resolvable:$true] %s219_s11 }
  0x1b   : > { %s3455_s2 = sld [smem:[#allocation21_spill]] }
  0x1c   : > { %p2977_p8 = pnand %p2237_p7, %p3438_p1 }
  0x1e   : > { %p2578_p10 = pneg %p2977_p8 }
  0x21   : > { %s2576_s14 = scalar_lea.hbm %s3455_s2, 8192 }
  0x22   : > { %p2577_p9 = scmp.ne.s32.totalorder %s3455_s2, %s2576_s14  ;;  %p2583_p13 = scmp.lt.u32.totalorder %s2576_s14, %s3455_s2 }
  0x24   : > { %p2579_p11 = pnand %p2578_p10, %p2577_p9 }
  0x26   : > { %p2580_p12 = pneg %p2579_p11 }
  0x28   : > { %p2585_p0 = pnand %p2583_p13, %p2580_p12 }
  0x2a   : > { %2588 = shalt.err (!%p2585_p0)
}
  0x2b   : > { %s2589_s7 = scalar_lea.vmem %s207_s8, 8192  ;;  %p2597_p2 = scmp.lt.s32.totalorder %s207_s8, %s207_s8 }
  0x2c   : > { %p2590_p3 = scmp.ne.s32.totalorder %s207_s8, %s2589_s7  ;;  %p2598_p1 = scmp.lt.s32.totalorder %s2589_s7, %s2589_s7 }
  0x2e   : > { %p2592_p4 = pnand %p2590_p3, %p2578_p10  ;;  %p2599_p5 = por %p2598_p1, %p2597_p2 }
  0x30   : > { %p2593_p7 = pneg %p2592_p4 }
  0x32   : > { %p2600_p6 = pnand %p2599_p5, %p2593_p7 }
  0x34   : > { %2603 = shalt.err (!%p2600_p6)
}
  0x35   : > { %s2862_s10 = smov 256   ;;  %s2863_s12 = smov 16  }
  0x36   : > { %2240 = dma.hbm_to_vmem [thread:$0]  (!%p2977_p8), %s3455_s2, 8192, %s207_s8, [#allocation6], %s2862_s10, %s2862_s10, %s2863_s12  }
  0x37   : > { %s3456_s3 = sld [smem:[#allocation22_spill]] }
  0x3d   : > { %s2604_s17 = scalar_lea.hbm %s3456_s3, 8192 }
  0x3e   : > { %p2605_p9 = scmp.ne.s32.totalorder %s3456_s3, %s2604_s17  ;;  %p2611_p5 = scmp.lt.u32.totalorder %s2604_s17, %s3456_s3 }
  0x40   : > { %p2607_p1 = pnand %p2605_p9, %p2578_p10 }
  0x42   : > { %p2608_p2 = pneg %p2607_p1 }
  0x44   : > { %p2613_p6 = pnand %p2611_p5, %p2608_p2 }
  0x46   : > { %2616 = shalt.err (!%p2613_p6)
}
  0x47   : > { %s2617_s8 = scalar_lea.vmem %s2981_s11, 8192  ;;  %p2625_p0 = scmp.lt.s32.totalorder %s2981_s11, %s2981_s11 }
  0x48   : > { %p2618_p11 = scmp.ne.s32.totalorder %s2981_s11, %s2617_s8  ;;  %p2626_p3 = scmp.lt.s32.totalorder %s2617_s8, %s2617_s8 }
  0x4a   : > { %p2620_p12 = pnand %p2618_p11, %p2578_p10  ;;  %p2627_p4 = por %p2626_p3, %p2625_p0 }
  0x4c   : > { %p2621_p13 = pneg %p2620_p12 }
  0x4e   : > { %p2628_p7 = pnand %p2627_p4, %p2621_p13 }
  0x50   : > { %2631 = shalt.err (!%p2628_p7)
}
  0x51   : > { %2243 = dma.hbm_to_vmem [thread:$0]  (!%p2977_p8), %s3456_s3, 8192, %s2981_s11, [#allocation9], %s2862_s10, %s2862_s10, %s2863_s12  }
  0x52   : > { %s38_s13 = sadd.s32 1, %s2850_s26  ;;  %s41_s9 = sadd.s32 1, %s2854_s27 }
  0x53   : > { %p39_p10 = scmp.ge.s32.totalorder %s38_s13, 2  ;;  %s50_s14 = sadd.s32 1, %s2838_s23 }
  0x54   : > { %p57_p9 = scmp.ne.s32.totalorder %s2838_s23, %s2834_s22  ;;  %p3446_p1 = scmp.eq.s32.totalorder %s2858_s28, 0 }
  0x55   : > { %s3494_s13 = smov (%p39_p10, %s38_s13), 0  ;;  %s3496_s9 = smov (!%p39_p10, %s41_s9), %s2854_s27 }
  0x56   : > { %3457 = sst [smem:[#allocation19_spill]] %s3494_s13  ;;  %s46_s15 = ssub.s32 %s2850_s26, %s3494_s13 }
  0x57   : > { %p43_p2 = scmp.ge.s32.totalorder %s3496_s9, 2  ;;  %p3445_p5 = scmp.lt.s32.totalorder %s2858_s28, 4 }
  0x58   : > { %p3044_p6 = por %p3446_p1, %p57_p9  ;;  %s233_s10 = sand.u32 1, %s2838_s23  }
  0x59   : > { %s3498_s9 = smov (%p43_p2, %s3496_s9), 0  ;;  %s2049_s12 = sshll.u32 %s233_s10, 7 }
  0x5a   : > { %3459 = sst [smem:[#allocation20_spill]] %s3498_s9  ;;  %s3053_s16 = ssub.s32 %s2854_s27, %s3498_s9 }
  0x5b   : > { %s47_s17 = sor.u32 %s46_s15, %s3053_s16  ;;  %p74_p8 = scmp.eq.s32.totalorder %s3053_s16, 0 }
  0x5c   : > { %p48_p11 = scmp.eq.s32.totalorder %s47_s17, 0  ;;  %s2217_s21 = sshll.u32 %s2850_s26, 5 }
  0x5d   : > { %s2052_s7 = sshll.u32 %s2854_s27, 6  ;;  %s237_s8 = scalar_lea.vmem [#allocation2], %s2049_s12 }
  0x5e   : > { %s247_s4 = sshll.u32 %s237_s8, 4  ;;  %s244_s2 = sadd.s32 %s2217_s21, %s2052_s7  ;;  %s3062_s4 = int_to_ptr.vmem [resolvable:$true] %s247_s4 }
  0x5f   : > { %s3060_s5 = scalar_select %p48_p11, %s2838_s23, %s50_s14  }
  0x60   : > { %s2053_s3 = sshll.u32 %s244_s2, 6  ;;  %p3068_p12 = pnand %p3445_p5, %p3044_p6 }
  0x61   : > { %s3075_s17 = scalar_lea.hbm %s3432_s0, %s2053_s3  ;;  %s3077_s14 = scalar_lea.sflag [#allocation3], %s233_s10 }
  0x62   : > { %s2632_s2 = scalar_lea.hbm %s3075_s17, 2048  ;;  %p2634_p0 = pneg %p3068_p12 }
  0x63   : > { %p2633_p13 = scmp.ne.s32.totalorder %s3075_s17, %s2632_s2  ;;  %s2637_s12 = scalar_lea.hbm %s3432_s0, 8192 }
  0x64   : > { %p2638_p7 = scmp.lt.u32.totalorder %s3075_s17, %s3432_s0  ;;  %p2639_p10 = scmp.lt.u32.totalorder %s2637_s12, %s2632_s2 }
  0x65   : > { %p2635_p3 = pnand %p2634_p0, %p2633_p13  ;;  %p2641_p2 = scmp.lt.u32.totalorder %s2632_s2, %s3075_s17 }
  0x66   : > { %p2640_p9 = por %p2639_p10, %p2638_p7 }
  0x67   : > { %p2636_p4 = pneg %p2635_p3 }
  0x68   : > { %p2642_p6 = por %p2641_p2, %p2640_p9 }
  0x6a   : > { %p2643_p11 = pnand %p2642_p6, %p2636_p4 }
  0x6c   : > { %2646 = shalt.err (!%p2643_p11)
}
  0x6d   : > { %s2647_s10 = scalar_lea.vmem %s3062_s4, 2048  ;;  %s2864_s7 = smov [#allocation2]  }
  0x6e   : > { %p2648_p13 = scmp.ne.s32.totalorder %s3062_s4, %s2647_s10  ;;  %s2652_s8 = sshll.u32 %s2864_s7, 4  ;;  %s2653_s8 = int_to_ptr.vmem [resolvable:$false] %s2652_s8 }
  0x6f   : > { %s2654_s15 = scalar_lea.vmem %s2653_s8, 4096  ;;  %p2655_p1 = scmp.lt.s32.totalorder %s3062_s4, %s2653_s8 }
  0x70   : > { %p2650_p3 = pnand %p2648_p13, %p2634_p0  ;;  %p2656_p7 = scmp.lt.s32.totalorder %s2654_s15, %s2647_s10 }
  0x72   : > { %p2651_p5 = pneg %p2650_p3  ;;  %p2657_p10 = por %p2656_p7, %p2655_p1 }
  0x74   : > { %p2658_p9 = pnand %p2657_p10, %p2651_p5 }
  0x76   : > { %2661 = shalt.err (!%p2658_p9)
}
  0x77   : > { %s2865_s2 = smov 128   ;;  %s2866_s11 = smov 8  }
  0x78   : > { %2247 = dma.hbm_to_vmem [thread:$0]  (!%p3068_p12), %s3075_s17, 2048, %s3062_s4, %s3077_s14, %s2865_s2, %s2865_s2, %s2866_s11  }
  0x79   : > { %s2044_s13 = sadd.s32 4294967294, %s2858_s28   ;;  %s76_s12 = sadd.s32 1, %s2826_s20 }
  0x7a   : > { %s3110_s3 = scalar_select %p74_p8, %s2826_s20, %s76_s12  }
  0x7b   : > { %p83_p1 = scmp.ne.s32.totalorder %s2826_s20, %s2822_s19  ;;  %p89_p5 = scmp.ne.s32.totalorder %s2822_s19, %s2818_s18 }
  0x7c   : > { %p161_p0 = scmp.eq.s32.totalorder %s2044_s13, 3  ;;  %s257_s21 = sand.u32 1, %s2858_s28  }
  0x7d   : > { %p3461_p4 = scmp.eq.s32.totalorder %s2858_s28, 0  ;;  %p3462_p6 = scmp.eq.s32.totalorder %s2956_s29, 0 }
  0x7e   : > { %p3464_p13 = scmp.eq.s32.totalorder %s2956_s29, 3  ;;  %p3131_p12 = por %p161_p0, %p89_p5 }
  0x7f   : > { %p85_p2 = por %p83_p1, %p3461_p4  ;;  %p3121_p11 = por %p89_p5, %p3462_p6 }
  0x80   : > { %p3127_p3 = por %p3464_p13, %p83_p1  ;;  %s259_s4 = sand.u32 1, %s2826_s20  }
  0x81   : > { %s3466_s16 = scalar_select %p3131_p12, 1, 0 }
  0x82   : > { %s3465_s9 = scalar_select %p3127_p3, 1, 0 }
  0x83   : > { %s2054_s17 = sshll.u32 %s259_s4, 1  ;;  %s2218_s14 = sshll.u32 %s2854_s27, 5 }
  0x84   : > { %s3140_s15 = scalar_lea.hbm %s3433_s1, %s2218_s14  ;;  %s261_s2 = scalar_lea.vmem [#allocation5], %s2054_s17 }
  0x85   : > { %s269_s11 = sshll.u32 %s261_s2, 4  ;;  %p3467_p8 = scmp.lt.s32.totalorder %s2858_s28, 4  ;;  %s3148_s11 = int_to_ptr.vmem [resolvable:$true] %s269_s11 }
  0x86   : > { %s258_s12 = scalar_lea.sflag [#allocation6], %s257_s21  ;;  %s2662_s4 = scalar_lea.hbm %s3140_s15, 32 }
  0x87   : > { %p3144_p7 = pnand %p3467_p8, %p85_p2  ;;  %p2663_p10 = scmp.ne.s32.totalorder %s3140_s15, %s2662_s4 }
  0x88   : > { %s2667_s7 = scalar_lea.hbm %s3433_s1, 64  ;;  %p2668_p0 = scmp.lt.u32.totalorder %s3140_s15, %s3433_s1 }
  0x89   : > { %p2664_p9 = pneg %p3144_p7  ;;  %p2669_p4 = scmp.lt.u32.totalorder %s2667_s7, %s2662_s4 }
  0x8a   : > { %p2671_p6 = scmp.lt.u32.totalorder %s2662_s4, %s3140_s15 }
  0x8b   : > { %p2665_p1 = pnand %p2664_p9, %p2663_p10  ;;  %p2670_p2 = por %p2669_p4, %p2668_p0 }
  0x8d   : > { %p2666_p5 = pneg %p2665_p1  ;;  %p2672_p13 = por %p2671_p6, %p2670_p2 }
  0x8f   : > { %p2673_p8 = pnand %p2672_p13, %p2666_p5 }
  0x91   : > { %2676 = shalt.err (!%p2673_p8)
}
  0x92   : > { %s2677_s21 = scalar_lea.vmem %s3148_s11, 32  ;;  %s2867_s17 = smov [#allocation5]  }
  0x93   : > { %p2678_p10 = scmp.ne.s32.totalorder %s3148_s11, %s2677_s21  ;;  %s2682_s14 = sshll.u32 %s2867_s17, 4  ;;  %s2683_s14 = int_to_ptr.vmem [resolvable:$false] %s2682_s14 }
  0x94   : > { %s2684_s8 = scalar_lea.vmem %s2683_s14, 64  ;;  %p2685_p3 = scmp.lt.s32.totalorder %s3148_s11, %s2683_s14 }
  0x95   : > { %p2680_p1 = pnand %p2678_p10, %p2664_p9  ;;  %p2686_p0 = scmp.lt.s32.totalorder %s2684_s8, %s2677_s21 }
  0x97   : > { %p2681_p12 = pneg %p2680_p1  ;;  %p2687_p4 = por %p2686_p0, %p2685_p3 }
  0x99   : > { %p2688_p2 = pnand %p2687_p4, %p2681_p12 }
  0x9b   : > { %2691 = shalt.err (!%p2688_p2)
}
  0x9c   : > { %2250 = dma.hbm_to_vmem [thread:$0]  (!%p3144_p7), %s3140_s15, 32, %s3148_s11, %s258_s12  }
  0x9d   : > { %p3469_p5 = scmp.ne.s32.totalorder %s3453_s6, 0 }
  0x9e   : > { %s280_s4 = sand.u32 (!%p3469_p5), 1, %s2834_s22   ;;  %p3470_p9 = scmp.ne.s32.totalorder (!%p3469_p5), %s3452_s30, 0 }
  0x9f   : > { %278 = sbr.rel (%p3469_p5) target bundleno = 651 (0x28b), region = 36  ;;  %s2058_s7 = sshll.u32 (!%p3469_p5), %s280_s4, 7 }
  0xa0   : > { %s281_s2 = scalar_lea.sflag (!%p3469_p5), [#allocation3], %s280_s4  ;;  %s3178_s17 = scalar_lea.vmem (!%p3469_p5), [#allocation2], %s2058_s7 }
  0xa6   : > { %2793 = dma.done.wait (%p3470_p9), %s281_s2, 2048  }
  0xa7   : > { %2795 = vsyncadd (%p3470_p9), %s281_s2, 4294965248  ;;  %s289_s13 = sand.u32 1, %s2956_s29   ;;  %s3186_s15 = sand.u32 1, %s2822_s19  }
  0xa8   : > { %s2059_s6 = sshll.u32 %s3186_s15, 1  ;;  %s290_s11 = scalar_lea.sflag [#allocation6], %s289_s13 }
  0xa9   : > { %s3189_s12 = scalar_lea.vmem [#allocation5], %s2059_s6 }
  0xaa   : > { %2797 = dma.done.wait (%p3121_p11), %s290_s11, 32  }
  0xab   : > { %2799 = vsyncadd (%p3121_p11), %s290_s11, 4294967264  ;;  %p3471_p3 = scmp.eq.s32.totalorder %s2956_s29, 0 }
  0xad   : > { %2801 = dma.done.wait (%p3471_p3), [#allocation6], 8192   ;;  %p3472_p12 = pmov %p3471_p3 }
  0xae   : > { %p3473_p7 = pmov %p3471_p3 }
  0xaf   : > { %2803 = vsyncadd (%p3472_p12), [#allocation6], 4294959104 }
  0xb0   : > { %2805 = dma.done.wait (%p3473_p7), [#allocation9], 8192   ;;  %p3474_p6 = pmov %p3471_p3 }
  0xb1   : > { %s2062_s30 = sshll.u32 %s3186_s15, 2  ;;  %p2064_p11 = scmp.ne.s32.totalorder %s2842_s24, 0 }
  0xb2   : > { %2807 = vsyncadd (%p3474_p6), [#allocation9], 4294959104  ;;  %s3204_s21 = scalar_lea.vmem [#allocation10], %s2062_s30  ;;  %s3206_s14 = scalar_lea.vmem [#allocation11], %s2062_s30  ;;  %v343_v0 = vlaneseq (!%p2064_p11)  ;;  %v2868_v1 = vmov (!%p2064_p11), 0.0  }
  0xb3   : > { %342 = sbr.rel (%p2064_p11) target bundleno = 186 (0xba), region = 56 }
  0xb4   : > { %vm345_vm0 = vcmp.lt.s32.totalorder (!%p2064_p11), %v343_v0, 512 }
  0xb5   : > { %347 = vst.msk [vmem:[%s3204_s21] sm:$0xf] (!%p2064_p11), %vm345_vm0, %v2868_v1  ;;  %348 = vst.msk [vmem:[%s3206_s14] sm:$0xf] (!%p2064_p11), %vm345_vm0, %v2868_v1 }
  0xba PF: > { %v2360_v2 = vld [vmem:[#allocation8 + $0x4] ss:$16 sps:$4 sm:$0xff]   ;;  %v2362_v3 = vld [vmem:[#allocation8 + $0xc] ss:$16 sps:$4 sm:$0xff]   ;;  %v2364_v4 = vld [vmem:[#allocation8] ss:$16 sps:$4 sm:$0xff]   ;;  %v351_v38 = vlaneseq }
  0xbb   : > { %747 = vmatprep.subr.bf16.mxu0 %v2360_v2  ;;  %v2365_v5 = vld [vmem:[#allocation8 + $0x8] ss:$16 sps:$4 sm:$0xff]   ;;  %788 = vmatprep.subr.bf16.mxu1 %v2362_v3  ;;  %v2366_v6 = vld [vmem:[#allocation8 + $0x24] ss:$16 sps:$4 sm:$0xff]   ;;  %v2368_v7 = vld [vmem:[#allocation8 + $0x2c] ss:$16 sps:$4 sm:$0xff]  }
  0xbc   : > { %748 = vmatpush1.bf16.msra.mxu0 %v2364_v4  ;;  %789 = vmatpush1.bf16.msra.mxu1 %v2365_v5  ;;  %v2370_v8 = vld [vmem:[#allocation8 + $0x20] ss:$16 sps:$4 sm:$0xff]   ;;  %v2371_v9 = vld [vmem:[#allocation8 + $0x28] ss:$16 sps:$4 sm:$0xff]   ;;  %v2372_v10 = vld [vmem:[#allocation8 + $0x44] ss:$16 sps:$4 sm:$0xff]  }
  0xbd   : > { %749 = vmatprep.subr.bf16.mxu0 %v2366_v6  ;;  %790 = vmatprep.subr.bf16.mxu1 %v2368_v7  ;;  %v2374_v11 = vld [vmem:[#allocation8 + $0x4c] ss:$16 sps:$4 sm:$0xff]   ;;  %v2376_v12 = vld [vmem:[#allocation8 + $0x40] ss:$16 sps:$4 sm:$0xff]   ;;  %v2377_v13 = vld [vmem:[#allocation8 + $0x48] ss:$16 sps:$4 sm:$0xff]  }
  0xbe   : > { %v2378_v14 = vld [vmem:[#allocation8 + $0x64] ss:$16 sps:$4 sm:$0xff]   ;;  %v2380_v15 = vld [vmem:[#allocation8 + $0x6c] ss:$16 sps:$4 sm:$0xff]   ;;  %v2382_v16 = vld [vmem:[#allocation8 + $0x60] ss:$16 sps:$4 sm:$0xff]  }
  0xbf   : > { %v2383_v17 = vld [vmem:[#allocation8 + $0x68] ss:$16 sps:$4 sm:$0xff]   ;;  %v2384_v18 = vld [vmem:[#allocation8 + $0x84] ss:$16 sps:$4 sm:$0xff]   ;;  %v2386_v19 = vld [vmem:[#allocation8 + $0x8c] ss:$16 sps:$4 sm:$0xff]  }
  0xc0   : > { %750 = vmatpush1.bf16.msra.mxu0 %v2370_v8  ;;  %791 = vmatpush1.bf16.msra.mxu1 %v2371_v9  ;;  %v2388_v20 = vld [vmem:[#allocation8 + $0x80] ss:$16 sps:$4 sm:$0xff]   ;;  %v2389_v21 = vld [vmem:[#allocation8 + $0x88] ss:$16 sps:$4 sm:$0xff]   ;;  %v2390_v22 = vld [vmem:[#allocation8 + $0xa4] ss:$16 sps:$4 sm:$0xff]  }
  0xc1   : > { %751 = vmatprep.subr.bf16.mxu0 %v2372_v10  ;;  %792 = vmatprep.subr.bf16.mxu1 %v2374_v11  ;;  %v2392_v23 = vld [vmem:[#allocation8 + $0xac] ss:$16 sps:$4 sm:$0xff]   ;;  %v2394_v24 = vld [vmem:[#allocation8 + $0xa0] ss:$16 sps:$4 sm:$0xff]   ;;  %v2395_v25 = vld [vmem:[#allocation8 + $0xa8] ss:$16 sps:$4 sm:$0xff]  }
  0xc2   : > { %v2396_v26 = vld [vmem:[#allocation8 + $0xc4] ss:$16 sps:$4 sm:$0xff]   ;;  %v2398_v27 = vld [vmem:[#allocation8 + $0xcc] ss:$16 sps:$4 sm:$0xff]   ;;  %v2400_v28 = vld [vmem:[#allocation8 + $0xc0] ss:$16 sps:$4 sm:$0xff]  }
  0xc3   : > { %v2401_v29 = vld [vmem:[#allocation8 + $0xc8] ss:$16 sps:$4 sm:$0xff]   ;;  %v2402_v30 = vld [vmem:[#allocation8 + $0xe4] ss:$16 sps:$4 sm:$0xff]   ;;  %v2404_v31 = vld [vmem:[#allocation8 + $0xec] ss:$16 sps:$4 sm:$0xff]  }
  0xc4   : > { %752 = vmatpush1.bf16.msra.mxu0 %v2376_v12  ;;  %793 = vmatpush1.bf16.msra.mxu1 %v2377_v13  ;;  %v2406_v32 = vld [vmem:[#allocation8 + $0xe0] ss:$16 sps:$4 sm:$0xff]   ;;  %v2407_v33 = vld [vmem:[#allocation8 + $0xe8] ss:$16 sps:$4 sm:$0xff]   ;;  %v2408_v34 = vld [vmem:[#allocation8 + $0x104] ss:$16 sps:$4 sm:$0xff]  }
  0xc5   : > { %753 = vmatprep.subr.bf16.mxu0 %v2378_v14  ;;  %794 = vmatprep.subr.bf16.mxu1 %v2380_v15  ;;  %v2410_v35 = vld [vmem:[#allocation8 + $0x10c] ss:$16 sps:$4 sm:$0xff]   ;;  %v2412_v36 = vld [vmem:[#allocation8 + $0x100] ss:$16 sps:$4 sm:$0xff]   ;;  %v2413_v37 = vld [vmem:[#allocation8 + $0x108] ss:$16 sps:$4 sm:$0xff]  }
  0xc6   : > { %v2414_v39 = vld [vmem:[#allocation8 + $0x124] ss:$16 sps:$4 sm:$0xff]   ;;  %v2416_v40 = vld [vmem:[#allocation8 + $0x12c] ss:$16 sps:$4 sm:$0xff]   ;;  %v2418_v41 = vld [vmem:[#allocation8 + $0x120] ss:$16 sps:$4 sm:$0xff]  }
  0xc7   : > { %v3212_v42 = vshrl.u32 %v351_v38, 7  ;;  %v2419_v43 = vld [vmem:[#allocation8 + $0x128] ss:$16 sps:$4 sm:$0xff]   ;;  %v2420_v44 = vld [vmem:[#allocation8 + $0x144] ss:$16 sps:$4 sm:$0xff]   ;;  %s2219_s24 = sshll.u32 %s2846_s25, 6 }
  0xc8   : > { %754 = vmatpush1.bf16.msra.mxu0 %v2382_v16  ;;  %795 = vmatpush1.bf16.msra.mxu1 %v2383_v17  ;;  %v2422_v45 = vld [vmem:[#allocation8 + $0x14c] ss:$16 sps:$4 sm:$0xff]   ;;  %v2424_v46 = vld [vmem:[#allocation8 + $0x140] ss:$16 sps:$4 sm:$0xff]   ;;  %v2425_v47 = vld [vmem:[#allocation8 + $0x148] ss:$16 sps:$4 sm:$0xff]  }
  0xc9   : > { %755 = vmatprep.subr.bf16.mxu0 %v2384_v18  ;;  %796 = vmatprep.subr.bf16.mxu1 %v2386_v19  ;;  %v357_v48 = vsub.s32 1, %v3212_v42  ;;  %v2426_v49 = vld [vmem:[#allocation8 + $0x164] ss:$16 sps:$4 sm:$0xff]   ;;  %v2428_v50 = vld [vmem:[#allocation8 + $0x16c] ss:$16 sps:$4 sm:$0xff]   ;;  %v3217_v3 = vsub.s32 0, %v3212_v42 }
  0xca   : > { %v349_v51 = vld [vmem:[%s3189_s12] sm:$0x3]  ;;  %v2430_v52 = vld [vmem:[#allocation8 + $0x160] ss:$16 sps:$4 sm:$0xff]   ;;  %v2431_v54 = vld [vmem:[#allocation8 + $0x168] ss:$16 sps:$4 sm:$0xff]  }
  0xcb   : > { %v358_v53 = vrot.slane %v349_v51, %v357_v48  ;;  %v2432_v55 = vld [vmem:[#allocation8 + $0x184] ss:$16 sps:$4 sm:$0xff]   ;;  %v2434_v56 = vld [vmem:[#allocation8 + $0x18c] ss:$16 sps:$4 sm:$0xff]   ;;  %v2436_v58 = vld [vmem:[#allocation8 + $0x180] ss:$16 sps:$4 sm:$0xff]   ;;  %v354_v8 = vrot.slane %v349_v51, %v3217_v3 }
  0xcc   : > { %756 = vmatpush1.bf16.msra.mxu0 %v2388_v20  ;;  %797 = vmatpush1.bf16.msra.mxu1 %v2389_v21  ;;  %v2437_v59 = vld [vmem:[#allocation8 + $0x188] ss:$16 sps:$4 sm:$0xff]   ;;  %v2438_v60 = vld [vmem:[#allocation8 + $0x1a4] ss:$16 sps:$4 sm:$0xff]   ;;  %v2440_v61 = vld [vmem:[#allocation8 + $0x1ac] ss:$16 sps:$4 sm:$0xff]  }
  0xcd   : > { %757 = vmatprep.subr.bf16.mxu0 %v2390_v22  ;;  %798 = vmatprep.subr.bf16.mxu1 %v2392_v23  ;;  %v362_v57 = vpack.c.bf16 %v358_v53, %v358_v53  ;;  %v2442_v62 = vld [vmem:[#allocation8 + $0x1a0] ss:$16 sps:$4 sm:$0xff]   ;;  %v2443_v63 = vld [vmem:[#allocation8 + $0x1a8] ss:$16 sps:$4 sm:$0xff]   ;;  %v2444_v0 = vld [vmem:[#allocation8 + $0x1c4] ss:$16 sps:$4 sm:$0xff]   ;;  %v361_v12 = vpack.c.bf16 %v354_v8, %v354_v8 }
  0xce   : > { %v2446_v1 = vld [vmem:[#allocation8 + $0x1cc] ss:$16 sps:$4 sm:$0xff]   ;;  %v2448_v2 = vld [vmem:[#allocation8 + $0x1c0] ss:$16 sps:$4 sm:$0xff]   ;;  %v2449_v4 = vld [vmem:[#allocation8 + $0x1c8] ss:$16 sps:$4 sm:$0xff]  }
  0xcf   : > { %779 = vmatprep.mubr.bf16.mxu0 %v362_v57  ;;  %820 = vmatprep.mubr.bf16.mxu1 %v362_v57  ;;  %v2450_v5 = vld [vmem:[#allocation8 + $0x1e4] ss:$16 sps:$4 sm:$0xff]   ;;  %v2452_v6 = vld [vmem:[#allocation8 + $0x1ec] ss:$16 sps:$4 sm:$0xff]   ;;  %v2454_v7 = vld [vmem:[#allocation8 + $0x1e0] ss:$16 sps:$4 sm:$0xff]  }
  0xd0   : > { %758 = vmatpush1.bf16.msra.mxu0 %v2394_v24  ;;  %799 = vmatpush1.bf16.msra.mxu1 %v2395_v25  ;;  %v2455_v9 = vld [vmem:[#allocation8 + $0x1e8] ss:$16 sps:$4 sm:$0xff]   ;;  %v2458_v10 = vld [vmem:[#allocation7 + $0x4] ss:$16 sps:$4 sm:$0xff]   ;;  %v2461_v11 = vld [vmem:[#allocation7 + $0xc] ss:$16 sps:$4 sm:$0xff]  }
  0xd1   : > { %759 = vmatprep.subr.bf16.mxu0 %v2396_v26  ;;  %800 = vmatprep.subr.bf16.mxu1 %v2398_v27  ;;  %v2456_v13 = vld [vmem:[#allocation7] ss:$16 sps:$4 sm:$0xff]   ;;  %v2459_v14 = vld [vmem:[#allocation7 + $0x8] ss:$16 sps:$4 sm:$0xff]   ;;  %v2464_v15 = vld [vmem:[#allocation7 + $0x24] ss:$16 sps:$4 sm:$0xff]  }
  0xd2   : > { %v2467_v16 = vld [vmem:[#allocation7 + $0x2c] ss:$16 sps:$4 sm:$0xff]   ;;  %v2462_v17 = vld [vmem:[#allocation7 + $0x20] ss:$16 sps:$4 sm:$0xff]   ;;  %v2465_v18 = vld [vmem:[#allocation7 + $0x28] ss:$16 sps:$4 sm:$0xff]  }
  0xd3   : > { %v2470_v19 = vld [vmem:[#allocation7 + $0x44] ss:$16 sps:$4 sm:$0xff]   ;;  %v2473_v20 = vld [vmem:[#allocation7 + $0x4c] ss:$16 sps:$4 sm:$0xff]   ;;  %v2468_v21 = vld [vmem:[#allocation7 + $0x40] ss:$16 sps:$4 sm:$0xff]  }
  0xd4   : > { %760 = vmatpush1.bf16.msra.mxu0 %v2400_v28  ;;  %801 = vmatpush1.bf16.msra.mxu1 %v2401_v29  ;;  %v2471_v22 = vld [vmem:[#allocation7 + $0x48] ss:$16 sps:$4 sm:$0xff]   ;;  %v2476_v23 = vld [vmem:[#allocation7 + $0x64] ss:$16 sps:$4 sm:$0xff]   ;;  %v2479_v24 = vld [vmem:[#allocation7 + $0x6c] ss:$16 sps:$4 sm:$0xff]  }
  0xd5   : > { %761 = vmatprep.subr.bf16.mxu0 %v2402_v30  ;;  %802 = vmatprep.subr.bf16.mxu1 %v2404_v31  ;;  %v2474_v25 = vld [vmem:[#allocation7 + $0x60] ss:$16 sps:$4 sm:$0xff]   ;;  %v2477_v26 = vld [vmem:[#allocation7 + $0x68] ss:$16 sps:$4 sm:$0xff]   ;;  %v2482_v27 = vld [vmem:[#allocation7 + $0x84] ss:$16 sps:$4 sm:$0xff]  }
  0xd6   : > { %v2485_v28 = vld [vmem:[#allocation7 + $0x8c] ss:$16 sps:$4 sm:$0xff]   ;;  %v2480_v29 = vld [vmem:[#allocation7 + $0x80] ss:$16 sps:$4 sm:$0xff]   ;;  %v2483_v30 = vld [vmem:[#allocation7 + $0x88] ss:$16 sps:$4 sm:$0xff]  }
  0xd7   : > { %v2488_v31 = vld [vmem:[#allocation7 + $0xa4] ss:$16 sps:$4 sm:$0xff]   ;;  %v2504_v48 = vld [vmem:[#allocation7 + $0x100] ss:$16 sps:$4 sm:$0xff]   ;;  %v2515_v51 = vld [vmem:[#allocation7 + $0x12c] ss:$16 sps:$4 sm:$0xff]  }
  0xd8   : > { %762 = vmatpush1.bf16.msra.mxu0 %v2406_v32  ;;  %803 = vmatpush1.bf16.msra.mxu1 %v2407_v33  ;;  %v2491_v32 = vld [vmem:[#allocation7 + $0xac] ss:$16 sps:$4 sm:$0xff]   ;;  %v2486_v33 = vld [vmem:[#allocation7 + $0xa0] ss:$16 sps:$4 sm:$0xff]   ;;  %v2513_v53 = vld [vmem:[#allocation7 + $0x128] ss:$16 sps:$4 sm:$0xff]  }
  0xd9   : > { %763 = vmatprep.subr.bf16.mxu0 %v2408_v34  ;;  %804 = vmatprep.subr.bf16.mxu1 %v2410_v35  ;;  %v2489_v34 = vld [vmem:[#allocation7 + $0xa8] ss:$16 sps:$4 sm:$0xff]   ;;  %v2494_v35 = vld [vmem:[#allocation7 + $0xc4] ss:$16 sps:$4 sm:$0xff]   ;;  %v2545_v8 = vld [vmem:[#allocation7 + $0x1cc] ss:$16 sps:$4 sm:$0xff]  }
  0xda   : > { %v2519_v57 = vld [vmem:[#allocation7 + $0x148] ss:$16 sps:$4 sm:$0xff]   ;;  %s1871_s29 = sshll.u32 %s3204_s21, 4  ;;  %vm3324_vm1 = vcmp.lt.s32.totalorder %v351_v38, 512  ;;  %s1885_s10 = sshll.u32 %s3206_s14, 4  ;;  %s3335_s29 = int_to_ptr.vmem [resolvable:$true] %s1871_s29  ;;  %s3346_s10 = int_to_ptr.vmem [resolvable:$true] %s1885_s10 }
  0xdb   : > { %s3477_s7 = sld [smem:[#allocation23_spill]]  ;;  %s3478_s13 = sld [smem:[#allocation24_spill]] }
  0xdc   : > { %764 = vmatpush1.bf16.msra.mxu0 %v2412_v36  ;;  %805 = vmatpush1.bf16.msra.mxu1 %v2413_v37  ;;  %v2497_v36 = vld [vmem:[#allocation7 + $0xcc] ss:$16 sps:$4 sm:$0xff]   ;;  %v2554_v37 = vld [vmem:[%s3178_s17 + $0x4] ss:$8 sps:$4 sm:$0xff]   ;;  %s1852_s11 = scalar_lea.sflag [#allocation4], %s3186_s15  ;;  %s2692_s12 = scalar_lea.vmem %s3335_s29, 64 }
  0xdd   : > { %765 = vmatprep.subr.bf16.mxu0 %v2414_v39  ;;  %806 = vmatprep.subr.bf16.mxu1 %v2416_v40  ;;  %v2492_v39 = vld [vmem:[#allocation7 + $0xc0] ss:$16 sps:$4 sm:$0xff]   ;;  %v2495_v40 = vld [vmem:[#allocation7 + $0xc8] ss:$16 sps:$4 sm:$0xff]   ;;  %p2693_p13 = scmp.ne.s32.totalorder %s3335_s29, %s2692_s12  ;;  %p3479_p8 = scmp.ne.s32.totalorder %s3465_s9, 0 }
  0xde   : > { %s2870_s30 = smov [#allocation10]  }
  0xdf   : > { %p2694_p10 = pnand %p2693_p13, %p3479_p8  ;;  %s2696_s8 = sshll.u32 %s2870_s30, 4  ;;  %s2697_s8 = int_to_ptr.vmem [resolvable:$false] %s2696_s8 }
  0xe0   : > { %766 = vmatpush1.bf16.msra.mxu0 %v2418_v41  ;;  %807 = vmatpush1.bf16.msra.mxu1 %v2419_v43  ;;  %v2500_v41 = vld [vmem:[#allocation7 + $0xe4] ss:$16 sps:$4 sm:$0xff]   ;;  %v2503_v43 = vld [vmem:[#allocation7 + $0xec] ss:$16 sps:$4 sm:$0xff]   ;;  %s2698_s4 = scalar_lea.vmem %s2697_s8, 128  ;;  %p2699_p0 = scmp.lt.s32.totalorder %s3335_s29, %s2697_s8 }
  0xe1   : > { %767 = vmatprep.subr.bf16.mxu0 %v2420_v44  ;;  %808 = vmatprep.subr.bf16.mxu1 %v2422_v45  ;;  %v2498_v44 = vld [vmem:[#allocation7 + $0xe0] ss:$16 sps:$4 sm:$0xff]   ;;  %v2501_v45 = vld [vmem:[#allocation7 + $0xe8] ss:$16 sps:$4 sm:$0xff]   ;;  %s3333_s2 = scalar_lea.hbm %s3477_s7, %s2219_s24  ;;  %s3344_s6 = scalar_lea.hbm %s3478_s13, %s2219_s24 }
  0xe2   : > { %p2695_p1 = pneg %p2694_p10  ;;  %p2700_p4 = scmp.lt.s32.totalorder %s2698_s4, %s2692_s12 }
  0xe4   : > { %768 = vmatpush1.bf16.msra.mxu0 %v2424_v46  ;;  %809 = vmatpush1.bf16.msra.mxu1 %v2425_v47  ;;  %v2506_v46 = vld [vmem:[#allocation7 + $0x104] ss:$16 sps:$4 sm:$0xff]   ;;  %v2509_v47 = vld [vmem:[#allocation7 + $0x10c] ss:$16 sps:$4 sm:$0xff]   ;;  %p2701_p2 = por %p2700_p4, %p2699_p0 }
  0xe5   : > { %769 = vmatprep.subr.bf16.mxu0 %v2426_v49  ;;  %810 = vmatprep.subr.bf16.mxu1 %v2428_v50  ;;  %v2507_v49 = vld [vmem:[#allocation7 + $0x108] ss:$16 sps:$4 sm:$0xff]   ;;  %v2512_v50 = vld [vmem:[#allocation7 + $0x124] ss:$16 sps:$4 sm:$0xff]  }
  0xe6   : > { %p2702_p5 = pnand %p2701_p2, %p2695_p1 }
  0xe8   : > { %770 = vmatpush1.bf16.msra.mxu0 %v2430_v52  ;;  %811 = vmatpush1.bf16.msra.mxu1 %v2431_v54  ;;  %v2510_v52 = vld [vmem:[#allocation7 + $0x120] ss:$16 sps:$4 sm:$0xff]   ;;  %v2518_v54 = vld [vmem:[#allocation7 + $0x144] ss:$16 sps:$4 sm:$0xff]  }
  0xe9   : > { %771 = vmatprep.subr.bf16.mxu0 %v2432_v55  ;;  %812 = vmatprep.subr.bf16.mxu1 %v2434_v56  ;;  %v2521_v55 = vld [vmem:[#allocation7 + $0x14c] ss:$16 sps:$4 sm:$0xff]   ;;  %v2516_v56 = vld [vmem:[#allocation7 + $0x140] ss:$16 sps:$4 sm:$0xff]  }
  0xec   : > { %772 = vmatpush1.bf16.msra.mxu0 %v2436_v58  ;;  %813 = vmatpush1.bf16.msra.mxu1 %v2437_v59  ;;  %v2524_v58 = vld [vmem:[#allocation7 + $0x164] ss:$16 sps:$4 sm:$0xff]   ;;  %v2527_v59 = vld [vmem:[#allocation7 + $0x16c] ss:$16 sps:$4 sm:$0xff]  }
  0xed   : > { %773 = vmatprep.subr.bf16.mxu0 %v2438_v60  ;;  %814 = vmatprep.subr.bf16.mxu1 %v2440_v61  ;;  %v2522_v60 = vld [vmem:[#allocation7 + $0x160] ss:$16 sps:$4 sm:$0xff]   ;;  %v2525_v61 = vld [vmem:[#allocation7 + $0x168] ss:$16 sps:$4 sm:$0xff]  }
  0xf0   : > { %774 = vmatpush1.bf16.msra.mxu0 %v2442_v62  ;;  %815 = vmatpush1.bf16.msra.mxu1 %v2443_v63  ;;  %v2530_v62 = vld [vmem:[#allocation7 + $0x184] ss:$16 sps:$4 sm:$0xff]   ;;  %v2533_v63 = vld [vmem:[#allocation7 + $0x18c] ss:$16 sps:$4 sm:$0xff]  }
  0xf1   : > { %775 = vmatprep.subr.bf16.mxu0 %v2444_v0  ;;  %816 = vmatprep.subr.bf16.mxu1 %v2446_v1  ;;  %v2528_v0 = vld [vmem:[#allocation7 + $0x180] ss:$16 sps:$4 sm:$0xff]   ;;  %v2531_v1 = vld [vmem:[#allocation7 + $0x188] ss:$16 sps:$4 sm:$0xff]  }
  0xf4   : > { %776 = vmatpush1.bf16.msra.mxu0 %v2448_v2  ;;  %817 = vmatpush1.bf16.msra.mxu1 %v2449_v4  ;;  %v2536_v2 = vld [vmem:[#allocation7 + $0x1a4] ss:$16 sps:$4 sm:$0xff]   ;;  %v2539_v4 = vld [vmem:[#allocation7 + $0x1ac] ss:$16 sps:$4 sm:$0xff]  }
  0xf5   : > { %777 = vmatprep.subr.bf16.mxu0 %v2450_v5  ;;  %818 = vmatprep.subr.bf16.mxu1 %v2452_v6  ;;  %v2534_v5 = vld [vmem:[#allocation7 + $0x1a0] ss:$16 sps:$4 sm:$0xff]   ;;  %v2537_v6 = vld [vmem:[#allocation7 + $0x1a8] ss:$16 sps:$4 sm:$0xff]  }
  0xf8   : > { %778 = vmatpush1.bf16.msra.mxu0 %v2454_v7  ;;  %819 = vmatpush1.bf16.msra.mxu1 %v2455_v9  ;;  %v2542_v7 = vld [vmem:[#allocation7 + $0x1c4] ss:$16 sps:$4 sm:$0xff]   ;;  %v2540_v9 = vld [vmem:[#allocation7 + $0x1c0] ss:$16 sps:$4 sm:$0xff]  }
  0xf9   : > { %1325 = vmatprep.subr.bf16.mxu0 %v2458_v10  ;;  %1438 = vmatprep.subr.bf16.mxu1 %v2461_v11  ;;  %v2543_v10 = vld [vmem:[#allocation7 + $0x1c8] ss:$16 sps:$4 sm:$0xff]   ;;  %v2548_v11 = vld [vmem:[#allocation7 + $0x1e4] ss:$16 sps:$4 sm:$0xff]  }
  0xfb   : > { %780 = vmatmul.mubr.bf16.vlgmr.msra.gmra.mrb[0].mxu0 %v361_v12  ;;  %821 = vmatmul.mubr.bf16.vlgmr.msra.gmra.mrb[0].mxu1 %v361_v12  ;;  %v2551_v12 = vld [vmem:[#allocation7 + $0x1ec] ss:$16 sps:$4 sm:$0xff]  }
  0xfc   : > { %1326 = vmatpush1.bf16.msra.mxu0 %v2456_v13  ;;  %1439 = vmatpush1.bf16.msra.mxu1 %v2459_v14  ;;  %v2546_v13 = vld [vmem:[#allocation7 + $0x1e0] ss:$16 sps:$4 sm:$0xff]   ;;  %v2549_v14 = vld [vmem:[#allocation7 + $0x1e8] ss:$16 sps:$4 sm:$0xff]  }
  0xfd   : > { %1327 = vmatprep.subr.bf16.mxu0 %v2464_v15  ;;  %1440 = vmatprep.subr.bf16.mxu1 %v2467_v16  ;;  %v2552_v15 = vld [vmem:[%s3178_s17] ss:$8 sps:$4 sm:$0xff]   ;;  %v2555_v16 = vld [vmem:[%s3178_s17 + $0x14] ss:$8 sps:$4 sm:$0xff]  }
  0xfe   : > { %1357 = vmatprep.mubr.bf16.mxu0 %v2554_v37  ;;  %1470 = vmatprep.mubr.bf16.mxu1 %v2554_v37 }
 0x100   : > { %1328 = vmatpush1.bf16.msra.mxu0 %v2462_v17  ;;  %1441 = vmatpush1.bf16.msra.mxu1 %v2465_v18  ;;  %v2557_v17 = vld [vmem:[%s3178_s17 + $0x10] ss:$8 sps:$4 sm:$0xff]   ;;  %v2558_v18 = vld [vmem:[%s3178_s17 + $0x24] ss:$8 sps:$4 sm:$0xff]  }
 0x101   : > { %1329 = vmatprep.subr.bf16.mxu0 %v2470_v19  ;;  %1442 = vmatprep.subr.bf16.mxu1 %v2473_v20  ;;  %v2560_v19 = vld [vmem:[%s3178_s17 + $0x20] ss:$8 sps:$4 sm:$0xff]   ;;  %v2561_v20 = vld [vmem:[%s3178_s17 + $0x34] ss:$8 sps:$4 sm:$0xff]  }
 0x104   : > { %1330 = vmatpush1.bf16.msra.mxu0 %v2468_v21  ;;  %1443 = vmatpush1.bf16.msra.mxu1 %v2471_v22  ;;  %v2563_v21 = vld [vmem:[%s3178_s17 + $0x30] ss:$8 sps:$4 sm:$0xff]   ;;  %v2564_v22 = vld [vmem:[%s3178_s17 + $0x44] ss:$8 sps:$4 sm:$0xff]  }
 0x105   : > { %1331 = vmatprep.subr.bf16.mxu0 %v2476_v23  ;;  %1444 = vmatprep.subr.bf16.mxu1 %v2479_v24  ;;  %v2566_v23 = vld [vmem:[%s3178_s17 + $0x40] ss:$8 sps:$4 sm:$0xff]   ;;  %v2567_v24 = vld [vmem:[%s3178_s17 + $0x54] ss:$8 sps:$4 sm:$0xff]  }
 0x108   : > { %1332 = vmatpush1.bf16.msra.mxu0 %v2474_v25  ;;  %1445 = vmatpush1.bf16.msra.mxu1 %v2477_v26  ;;  %v2569_v25 = vld [vmem:[%s3178_s17 + $0x50] ss:$8 sps:$4 sm:$0xff]   ;;  %v2570_v26 = vld [vmem:[%s3178_s17 + $0x64] ss:$8 sps:$4 sm:$0xff]  }
 0x109   : > { %1333 = vmatprep.subr.bf16.mxu0 %v2482_v27  ;;  %1446 = vmatprep.subr.bf16.mxu1 %v2485_v28  ;;  %v2572_v27 = vld [vmem:[%s3178_s17 + $0x60] ss:$8 sps:$4 sm:$0xff]   ;;  %v2573_v28 = vld [vmem:[%s3178_s17 + $0x74] ss:$8 sps:$4 sm:$0xff]  }
 0x10c   : > { %1334 = vmatpush1.bf16.msra.mxu0 %v2480_v29  ;;  %1447 = vmatpush1.bf16.msra.mxu1 %v2483_v30  ;;  %v2575_v29 = vld [vmem:[%s3178_s17 + $0x70] ss:$8 sps:$4 sm:$0xff]  }
 0x10d   : > { %1335 = vmatprep.subr.bf16.mxu0 %v2488_v31  ;;  %1448 = vmatprep.subr.bf16.mxu1 %v2491_v32 }
 0x110   : > { %1336 = vmatpush1.bf16.msra.mxu0 %v2486_v33  ;;  %1449 = vmatpush1.bf16.msra.mxu1 %v2489_v34 }
 0x111   : > { %1337 = vmatprep.subr.bf16.mxu0 %v2494_v35  ;;  %1450 = vmatprep.subr.bf16.mxu1 %v2497_v36 }
 0x114   : > { %1338 = vmatpush1.bf16.msra.mxu0 %v2492_v39  ;;  %1451 = vmatpush1.bf16.msra.mxu1 %v2495_v40  ;;  %v2869_v39 = vmov 1966171168  }
 0x115   : > { %1339 = vmatprep.subr.bf16.mxu0 %v2500_v41  ;;  %1452 = vmatprep.subr.bf16.mxu1 %v2503_v43  ;;  %v1643_v40 = vunpack.c.l.s4 %v2869_v39 }
 0x118   : > { %1340 = vmatpush1.bf16.msra.mxu0 %v2498_v44  ;;  %1453 = vmatpush1.bf16.msra.mxu1 %v2501_v45 }
 0x119   : > { %1341 = vmatprep.subr.bf16.mxu0 %v2506_v46  ;;  %1454 = vmatprep.subr.bf16.mxu1 %v2509_v47 }
 0x11c   : > { %1342 = vmatpush1.bf16.msra.mxu0 %v2504_v48  ;;  %1455 = vmatpush1.bf16.msra.mxu1 %v2507_v49 }
 0x11d   : > { %1343 = vmatprep.subr.bf16.mxu0 %v2512_v50  ;;  %1456 = vmatprep.subr.bf16.mxu1 %v2515_v51 }
 0x120   : > { %1344 = vmatpush1.bf16.msra.mxu0 %v2510_v52  ;;  %1457 = vmatpush1.bf16.msra.mxu1 %v2513_v53  ;;  %v1644_v52 = vunpack.c.0.s8 %v1643_v40 }
 0x121   : > { %1345 = vmatprep.subr.bf16.mxu0 %v2518_v54  ;;  %1458 = vmatprep.subr.bf16.mxu1 %v2521_v55 }
 0x124   : > { %1346 = vmatpush1.bf16.msra.mxu0 %v2516_v56  ;;  %1459 = vmatpush1.bf16.msra.mxu1 %v2519_v57 }
 0x125   : > { %1347 = vmatprep.subr.bf16.mxu0 %v2524_v58  ;;  %1460 = vmatprep.subr.bf16.mxu1 %v2527_v59 }
 0x128   : > { %1348 = vmatpush1.bf16.msra.mxu0 %v2522_v60  ;;  %1461 = vmatpush1.bf16.msra.mxu1 %v2525_v61 }
 0x129   : > { %1349 = vmatprep.subr.bf16.mxu0 %v2530_v62  ;;  %1462 = vmatprep.subr.bf16.mxu1 %v2533_v63 }
 0x12c   : > { %1350 = vmatpush1.bf16.msra.mxu0 %v2528_v0  ;;  %1463 = vmatpush1.bf16.msra.mxu1 %v2531_v1 }
 0x12d   : > { %1351 = vmatprep.subr.bf16.mxu0 %v2536_v2  ;;  %1464 = vmatprep.subr.bf16.mxu1 %v2539_v4 }
 0x130   : > { %1352 = vmatpush1.bf16.msra.mxu0 %v2534_v5  ;;  %1465 = vmatpush1.bf16.msra.mxu1 %v2537_v6 }
 0x131   : > { %1353 = vmatprep.subr.bf16.mxu0 %v2542_v7  ;;  %1466 = vmatprep.subr.bf16.mxu1 %v2545_v8 }
 0x134   : > { %1354 = vmatpush1.bf16.msra.mxu0 %v2540_v9  ;;  %1467 = vmatpush1.bf16.msra.mxu1 %v2543_v10 }
 0x135   : > { %1355 = vmatprep.subr.bf16.mxu0 %v2548_v11  ;;  %1468 = vmatprep.subr.bf16.mxu1 %v2551_v12 }
 0x138   : > { %1356 = vmatpush1.bf16.msra.mxu0 %v2546_v13  ;;  %1469 = vmatpush1.bf16.msra.mxu1 %v2549_v14 }
 0x13b   : > { %1358 = vmatmul.mubr.bf16.vlgmr.msra.gmra.mrb[4].mxu0 %v2552_v15  ;;  %1471 = vmatmul.mubr.bf16.vlgmr.msra.gmra.mrb[4].mxu1 %v2552_v15 }
 0x13c   : > { %1367 = vmatprep.mubr.bf16.mxu0 %v2555_v16  ;;  %1480 = vmatprep.mubr.bf16.mxu1 %v2555_v16 }
 0x143   : > { %1368 = vmatmul.mubr.bf16.gmra.mrb[8].mxu0 %v2557_v17  ;;  %1481 = vmatmul.mubr.bf16.gmra.mrb[8].mxu1 %v2557_v17 }
 0x144   : > { %1377 = vmatprep.mubr.bf16.mxu0 %v2558_v18  ;;  %1490 = vmatprep.mubr.bf16.mxu1 %v2558_v18 }
 0x14b   : > { %1378 = vmatmul.mubr.bf16.gmra.mrb[12].mxu0 %v2560_v19  ;;  %1491 = vmatmul.mubr.bf16.gmra.mrb[12].mxu1 %v2560_v19 }
 0x14c   : > { %1387 = vmatprep.mubr.bf16.mxu0 %v2561_v20  ;;  %1500 = vmatprep.mubr.bf16.mxu1 %v2561_v20 }
 0x153   : > { %1388 = vmatmul.mubr.bf16.gmra.mrb[16].mxu0 %v2563_v21  ;;  %1501 = vmatmul.mubr.bf16.gmra.mrb[16].mxu1 %v2563_v21  ;;  %v3259_v21 = vsub.s32 %v1644_v52, %v3212_v42 }
 0x154   : > { %1397 = vmatprep.mubr.bf16.mxu0 %v2564_v22  ;;  %1510 = vmatprep.mubr.bf16.mxu1 %v2564_v22 }
 0x15b   : > { %1398 = vmatmul.mubr.bf16.gmra.mrb[20].mxu0 %v2566_v23  ;;  %1511 = vmatmul.mubr.bf16.gmra.mrb[20].mxu1 %v2566_v23 }
 0x15c   : > { %1407 = vmatprep.mubr.bf16.mxu0 %v2567_v24  ;;  %1520 = vmatprep.mubr.bf16.mxu1 %v2567_v24 }
 0x163   : > { %1408 = vmatmul.mubr.bf16.gmra.mrb[24].mxu0 %v2569_v25  ;;  %1521 = vmatmul.mubr.bf16.gmra.mrb[24].mxu1 %v2569_v25 }
 0x164   : > { %1417 = vmatprep.mubr.bf16.mxu0 %v2570_v26  ;;  %1530 = vmatprep.mubr.bf16.mxu1 %v2570_v26 }
 0x16b   : > { %1418 = vmatmul.mubr.bf16.gmra.mrb[28].mxu0 %v2572_v27  ;;  %1531 = vmatmul.mubr.bf16.gmra.mrb[28].mxu1 %v2572_v27 }
 0x16c   : > { %1427 = vmatprep.mubr.bf16.mxu0 %v2573_v28  ;;  %1540 = vmatprep.mubr.bf16.mxu1 %v2573_v28 }
 0x173   : > { %1428 = vmatmul.mubr.bf16.gmra.mrb[32].mxu0 %v2575_v29  ;;  %1541 = vmatmul.mubr.bf16.gmra.mrb[32].mxu1 %v2575_v29 }
 0x1ce   : > { %v781_v30 = vpop.f32.mrb[0].mxu0  ;;  %v822_v31 = vpop.f32.mrb[0].mxu1 }
 0x1cf   : > { %v783_v32 = vpop.f32.mrb[1].mxu0  ;;  %v824_v33 = vpop.f32.mrb[1].mxu1  ;;  %v3237_v41 = vrot.slane %v781_v30, %v3217_v3  ;;  %v3240_v43 = vrot.slane %v822_v31, %v3217_v3 }
 0x1d0   : > { %v785_v34 = vpop.f32.mrb[2].mxu0  ;;  %v826_v35 = vpop.f32.mrb[2].mxu1  ;;  %v3243_v44 = vrot.slane %v783_v32, %v3217_v3  ;;  %v3246_v45 = vrot.slane %v824_v33, %v3217_v3 }
 0x1d1   : > { %v786_v36 = vpop.f32.mrb[3].mxu0  ;;  %v827_v37 = vpop.f32.mrb[3].mxu1 }
 0x20e   : > { %v1359_v46 = vpop.f32.mrb[4].mxu0  ;;  %v1472_v47 = vpop.f32.mrb[4].mxu1 }
 0x20f   : > { %v1360_v48 = vadd.f32 %v1359_v46, %v3237_v41  ;;  %v1473_v49 = vadd.f32 %v1472_v47, %v3240_v43  ;;  %v1361_v50 = vpop.f32.mrb[5].mxu0  ;;  %v1474_v51 = vpop.f32.mrb[5].mxu1 }
 0x210   : > { %v1362_v53 = vadd.f32 %v1361_v50, %v3243_v44  ;;  %v1475_v54 = vadd.f32 %v1474_v51, %v3246_v45  ;;  %v1363_v55 = vpop.f32.mrb[6].mxu0  ;;  %v1476_v56 = vpop.f32.mrb[6].mxu1 }
 0x211   : > { %v1672_v57 = vmul.f32 %v1360_v48, %v1360_v48  ;;  %v1674_v58 = vmul.f32 %v1473_v49, %v1473_v49  ;;  %v1364_v3 = vadd.f32 %v1363_v55, %v3237_v41  ;;  %v1477_v59 = vadd.f32 %v1476_v56, %v3240_v43  ;;  %v1365_v60 = vpop.f32.mrb[7].mxu0  ;;  %v1478_v61 = vpop.f32.mrb[7].mxu1 }
 0x212   : > { %v1673_v62 = vmul.f32 %v1362_v53, %v1362_v53  ;;  %v1675_v63 = vmul.f32 %v1475_v54, %v1475_v54  ;;  %v1366_v0 = vadd.f32 %v1365_v60, %v3243_v44  ;;  %v1479_v1 = vadd.f32 %v1478_v61, %v3246_v45 }
 0x213   : > { %v1552_v2 = vadd.f32 %v1364_v3, %v1360_v48  ;;  %v1676_v4 = vmul.f32 %v1364_v3, %v1364_v3  ;;  %v1594_v5 = vadd.f32 %v1477_v59, %v1473_v49  ;;  %v1678_v6 = vmul.f32 %v1477_v59, %v1477_v59 }
 0x214   : > { %v1573_v7 = vadd.f32 %v1366_v0, %v1362_v53  ;;  %v1677_v8 = vmul.f32 %v1366_v0, %v1366_v0  ;;  %v1615_v9 = vadd.f32 %v1479_v1, %v1475_v54  ;;  %v1679_v10 = vmul.f32 %v1479_v1, %v1479_v1 }
 0x215   : > { %v1736_v11 = vadd.f32 %v1676_v4, %v1672_v57  ;;  %v1778_v12 = vadd.f32 %v1678_v6, %v1674_v58 }
 0x216   : > { %v1757_v13 = vadd.f32 %v1677_v8, %v1673_v62  ;;  %v1799_v14 = vadd.f32 %v1679_v10, %v1675_v63  ;;  %v1369_v15 = vpop.f32.mrb[8].mxu0  ;;  %v1482_v16 = vpop.f32.mrb[8].mxu1 }
 0x217   : > { %v1370_v17 = vadd.f32 %v1369_v15, %v3237_v41  ;;  %v1483_v18 = vadd.f32 %v1482_v16, %v3240_v43  ;;  %v1371_v19 = vpop.f32.mrb[9].mxu0  ;;  %v1484_v20 = vpop.f32.mrb[9].mxu1 }
 0x218   : > { %v1372_v22 = vadd.f32 %v1371_v19, %v3243_v44  ;;  %v1485_v23 = vadd.f32 %v1484_v20, %v3246_v45  ;;  %v1373_v24 = vpop.f32.mrb[10].mxu0  ;;  %v1486_v25 = vpop.f32.mrb[10].mxu1 }
 0x219   : > { %v1553_v26 = vadd.f32 %v1552_v2, %v1370_v17  ;;  %v1680_v27 = vmul.f32 %v1370_v17, %v1370_v17  ;;  %v1595_v28 = vadd.f32 %v1594_v5, %v1483_v18  ;;  %v1682_v29 = vmul.f32 %v1483_v18, %v1483_v18  ;;  %v1375_v30 = vpop.f32.mrb[11].mxu0  ;;  %v1488_v31 = vpop.f32.mrb[11].mxu1 }
 0x21a   : > { %v1574_v32 = vadd.f32 %v1573_v7, %v1372_v22  ;;  %v1681_v33 = vmul.f32 %v1372_v22, %v1372_v22  ;;  %v1616_v34 = vadd.f32 %v1615_v9, %v1485_v23  ;;  %v1683_v35 = vmul.f32 %v1485_v23, %v1485_v23 }
 0x21b   : > { %v1737_v36 = vadd.f32 %v1736_v11, %v1680_v27  ;;  %v1779_v37 = vadd.f32 %v1778_v12, %v1682_v29  ;;  %v1374_v42 = vadd.f32 %v1373_v24, %v3237_v41  ;;  %v1487_v39 = vadd.f32 %v1486_v25, %v3240_v43 }
 0x21c   : > { %v1758_v40 = vadd.f32 %v1757_v13, %v1681_v33  ;;  %v1800_v46 = vadd.f32 %v1799_v14, %v1683_v35  ;;  %v1376_v47 = vadd.f32 %v1375_v30, %v3243_v44  ;;  %v1489_v48 = vadd.f32 %v1488_v31, %v3246_v45 }
 0x21d   : > { %v1554_v49 = vadd.f32 %v1553_v26, %v1374_v42  ;;  %v1684_v50 = vmul.f32 %v1374_v42, %v1374_v42  ;;  %v1596_v51 = vadd.f32 %v1595_v28, %v1487_v39  ;;  %v1686_v52 = vmul.f32 %v1487_v39, %v1487_v39 }
 0x21e   : > { %v1575_v53 = vadd.f32 %v1574_v32, %v1376_v47  ;;  %v1685_v54 = vmul.f32 %v1376_v47, %v1376_v47  ;;  %v1617_v55 = vadd.f32 %v1616_v34, %v1489_v48  ;;  %v1687_v56 = vmul.f32 %v1489_v48, %v1489_v48  ;;  %v1379_v57 = vpop.f32.mrb[12].mxu0  ;;  %v1492_v58 = vpop.f32.mrb[12].mxu1 }
 0x21f   : > { %v1738_v3 = vadd.f32 %v1737_v36, %v1684_v50  ;;  %v1780_v59 = vadd.f32 %v1779_v37, %v1686_v52  ;;  %v1380_v60 = vadd.f32 %v1379_v57, %v3237_v41  ;;  %v1493_v61 = vadd.f32 %v1492_v58, %v3240_v43  ;;  %v1381_v62 = vpop.f32.mrb[13].mxu0  ;;  %v1494_v63 = vpop.f32.mrb[13].mxu1 }
 0x220   : > { %v1759_v0 = vadd.f32 %v1758_v40, %v1685_v54  ;;  %v1801_v1 = vadd.f32 %v1800_v46, %v1687_v56  ;;  %v1382_v2 = vadd.f32 %v1381_v62, %v3243_v44  ;;  %v1495_v4 = vadd.f32 %v1494_v63, %v3246_v45  ;;  %v1383_v5 = vpop.f32.mrb[14].mxu0  ;;  %v1496_v6 = vpop.f32.mrb[14].mxu1 }
 0x221   : > { %v1555_v7 = vadd.f32 %v1554_v49, %v1380_v60  ;;  %v1688_v8 = vmul.f32 %v1380_v60, %v1380_v60  ;;  %v1597_v9 = vadd.f32 %v1596_v51, %v1493_v61  ;;  %v1690_v10 = vmul.f32 %v1493_v61, %v1493_v61  ;;  %v1385_v11 = vpop.f32.mrb[15].mxu0  ;;  %v1498_v12 = vpop.f32.mrb[15].mxu1 }
 0x222   : > { %v1576_v13 = vadd.f32 %v1575_v53, %v1382_v2  ;;  %v1689_v14 = vmul.f32 %v1382_v2, %v1382_v2  ;;  %v1618_v15 = vadd.f32 %v1617_v55, %v1495_v4  ;;  %v1691_v16 = vmul.f32 %v1495_v4, %v1495_v4 }
 0x223   : > { %v1739_v17 = vadd.f32 %v1738_v3, %v1688_v8  ;;  %v1781_v18 = vadd.f32 %v1780_v59, %v1690_v10  ;;  %v1384_v19 = vadd.f32 %v1383_v5, %v3237_v41  ;;  %v1497_v20 = vadd.f32 %v1496_v6, %v3240_v43 }
 0x224   : > { %v1760_v22 = vadd.f32 %v1759_v0, %v1689_v14  ;;  %v1802_v23 = vadd.f32 %v1801_v1, %v1691_v16  ;;  %v1386_v24 = vadd.f32 %v1385_v11, %v3243_v44  ;;  %v1499_v25 = vadd.f32 %v1498_v12, %v3246_v45 }
 0x225   : > { %v1556_v26 = vadd.f32 %v1555_v7, %v1384_v19  ;;  %v1692_v27 = vmul.f32 %v1384_v19, %v1384_v19  ;;  %v1598_v28 = vadd.f32 %v1597_v9, %v1497_v20  ;;  %v1694_v29 = vmul.f32 %v1497_v20, %v1497_v20 }
 0x226   : > { %v1577_v30 = vadd.f32 %v1576_v13, %v1386_v24  ;;  %v1693_v31 = vmul.f32 %v1386_v24, %v1386_v24  ;;  %v1619_v32 = vadd.f32 %v1618_v15, %v1499_v25  ;;  %v1695_v33 = vmul.f32 %v1499_v25, %v1499_v25  ;;  %v1389_v34 = vpop.f32.mrb[16].mxu0  ;;  %v1502_v35 = vpop.f32.mrb[16].mxu1 }
 0x227   : > { %v1740_v36 = vadd.f32 %v1739_v17, %v1692_v27  ;;  %v1782_v37 = vadd.f32 %v1781_v18, %v1694_v29  ;;  %v1390_v42 = vadd.f32 %v1389_v34, %v3237_v41  ;;  %v1503_v39 = vadd.f32 %v1502_v35, %v3240_v43  ;;  %v1391_v40 = vpop.f32.mrb[17].mxu0  ;;  %v1504_v46 = vpop.f32.mrb[17].mxu1 }
 0x228   : > { %v1761_v47 = vadd.f32 %v1760_v22, %v1693_v31  ;;  %v1803_v48 = vadd.f32 %v1802_v23, %v1695_v33  ;;  %v1392_v49 = vadd.f32 %v1391_v40, %v3243_v44  ;;  %v1505_v50 = vadd.f32 %v1504_v46, %v3246_v45  ;;  %v1393_v51 = vpop.f32.mrb[18].mxu0  ;;  %v1506_v52 = vpop.f32.mrb[18].mxu1 }
 0x229   : > { %v1557_v53 = vadd.f32 %v1556_v26, %v1390_v42  ;;  %v1696_v54 = vmul.f32 %v1390_v42, %v1390_v42  ;;  %v1599_v55 = vadd.f32 %v1598_v28, %v1503_v39  ;;  %v1698_v56 = vmul.f32 %v1503_v39, %v1503_v39  ;;  %v1395_v57 = vpop.f32.mrb[19].mxu0  ;;  %v1508_v58 = vpop.f32.mrb[19].mxu1 }
 0x22a   : > { %v1578_v3 = vadd.f32 %v1577_v30, %v1392_v49  ;;  %v1697_v59 = vmul.f32 %v1392_v49, %v1392_v49  ;;  %v1620_v60 = vadd.f32 %v1619_v32, %v1505_v50  ;;  %v1699_v61 = vmul.f32 %v1505_v50, %v1505_v50 }
 0x22b   : > { %v1741_v62 = vadd.f32 %v1740_v36, %v1696_v54  ;;  %v1783_v63 = vadd.f32 %v1782_v37, %v1698_v56  ;;  %v1394_v0 = vadd.f32 %v1393_v51, %v3237_v41  ;;  %v1507_v1 = vadd.f32 %v1506_v52, %v3240_v43 }
 0x22c   : > { %v1762_v2 = vadd.f32 %v1761_v47, %v1697_v59  ;;  %v1804_v4 = vadd.f32 %v1803_v48, %v1699_v61  ;;  %v1396_v5 = vadd.f32 %v1395_v57, %v3243_v44  ;;  %v1509_v6 = vadd.f32 %v1508_v58, %v3246_v45 }
 0x22d   : > { %v1558_v7 = vadd.f32 %v1557_v53, %v1394_v0  ;;  %v1700_v8 = vmul.f32 %v1394_v0, %v1394_v0  ;;  %v1600_v9 = vadd.f32 %v1599_v55, %v1507_v1  ;;  %v1702_v10 = vmul.f32 %v1507_v1, %v1507_v1 }
 0x22e   : > { %v1579_v11 = vadd.f32 %v1578_v3, %v1396_v5  ;;  %v1701_v12 = vmul.f32 %v1396_v5, %v1396_v5  ;;  %v1621_v13 = vadd.f32 %v1620_v60, %v1509_v6  ;;  %v1703_v14 = vmul.f32 %v1509_v6, %v1509_v6  ;;  %v1399_v15 = vpop.f32.mrb[20].mxu0  ;;  %v1512_v16 = vpop.f32.mrb[20].mxu1 }
 0x22f   : > { %v1742_v17 = vadd.f32 %v1741_v62, %v1700_v8  ;;  %v1784_v18 = vadd.f32 %v1783_v63, %v1702_v10  ;;  %v1400_v19 = vadd.f32 %v1399_v15, %v3237_v41  ;;  %v1513_v20 = vadd.f32 %v1512_v16, %v3240_v43  ;;  %v1401_v22 = vpop.f32.mrb[21].mxu0  ;;  %v1514_v23 = vpop.f32.mrb[21].mxu1 }
 0x230   : > { %v1763_v24 = vadd.f32 %v1762_v2, %v1701_v12  ;;  %v1805_v25 = vadd.f32 %v1804_v4, %v1703_v14  ;;  %v1402_v26 = vadd.f32 %v1401_v22, %v3243_v44  ;;  %v1515_v27 = vadd.f32 %v1514_v23, %v3246_v45  ;;  %v1403_v28 = vpop.f32.mrb[22].mxu0  ;;  %v1516_v29 = vpop.f32.mrb[22].mxu1 }
 0x231   : > { %v1559_v30 = vadd.f32 %v1558_v7, %v1400_v19  ;;  %v1704_v31 = vmul.f32 %v1400_v19, %v1400_v19  ;;  %v1601_v32 = vadd.f32 %v1600_v9, %v1513_v20  ;;  %v1706_v33 = vmul.f32 %v1513_v20, %v1513_v20  ;;  %v1405_v34 = vpop.f32.mrb[23].mxu0  ;;  %v1518_v35 = vpop.f32.mrb[23].mxu1 }
 0x232   : > { %v1580_v36 = vadd.f32 %v1579_v11, %v1402_v26  ;;  %v1705_v37 = vmul.f32 %v1402_v26, %v1402_v26  ;;  %v1622_v42 = vadd.f32 %v1621_v13, %v1515_v27  ;;  %v1707_v39 = vmul.f32 %v1515_v27, %v1515_v27 }
 0x233   : > { %v1743_v40 = vadd.f32 %v1742_v17, %v1704_v31  ;;  %v1785_v46 = vadd.f32 %v1784_v18, %v1706_v33  ;;  %v1404_v47 = vadd.f32 %v1403_v28, %v3237_v41  ;;  %v1517_v48 = vadd.f32 %v1516_v29, %v3240_v43 }
 0x234   : > { %v1764_v49 = vadd.f32 %v1763_v24, %v1705_v37  ;;  %v1806_v50 = vadd.f32 %v1805_v25, %v1707_v39  ;;  %v1406_v51 = vadd.f32 %v1405_v34, %v3243_v44  ;;  %v1519_v52 = vadd.f32 %v1518_v35, %v3246_v45 }
 0x235   : > { %v1560_v53 = vadd.f32 %v1559_v30, %v1404_v47  ;;  %v1708_v54 = vmul.f32 %v1404_v47, %v1404_v47  ;;  %v1602_v55 = vadd.f32 %v1601_v32, %v1517_v48  ;;  %v1710_v56 = vmul.f32 %v1517_v48, %v1517_v48 }
 0x236   : > { %v1581_v57 = vadd.f32 %v1580_v36, %v1406_v51  ;;  %v1709_v58 = vmul.f32 %v1406_v51, %v1406_v51  ;;  %v1623_v3 = vadd.f32 %v1622_v42, %v1519_v52  ;;  %v1711_v59 = vmul.f32 %v1519_v52, %v1519_v52  ;;  %v1409_v60 = vpop.f32.mrb[24].mxu0  ;;  %v1522_v61 = vpop.f32.mrb[24].mxu1 }
 0x237   : > { %v1744_v62 = vadd.f32 %v1743_v40, %v1708_v54  ;;  %v1786_v63 = vadd.f32 %v1785_v46, %v1710_v56  ;;  %v1410_v0 = vadd.f32 %v1409_v60, %v3237_v41  ;;  %v1523_v1 = vadd.f32 %v1522_v61, %v3240_v43  ;;  %v1411_v2 = vpop.f32.mrb[25].mxu0  ;;  %v1524_v4 = vpop.f32.mrb[25].mxu1 }
 0x238   : > { %v1765_v5 = vadd.f32 %v1764_v49, %v1709_v58  ;;  %v1807_v6 = vadd.f32 %v1806_v50, %v1711_v59  ;;  %v1412_v7 = vadd.f32 %v1411_v2, %v3243_v44  ;;  %v1525_v8 = vadd.f32 %v1524_v4, %v3246_v45  ;;  %v1413_v9 = vpop.f32.mrb[26].mxu0  ;;  %v1526_v10 = vpop.f32.mrb[26].mxu1 }
 0x239   : > { %v1561_v11 = vadd.f32 %v1560_v53, %v1410_v0  ;;  %v1712_v12 = vmul.f32 %v1410_v0, %v1410_v0  ;;  %v1603_v13 = vadd.f32 %v1602_v55, %v1523_v1  ;;  %v1714_v14 = vmul.f32 %v1523_v1, %v1523_v1  ;;  %v1415_v15 = vpop.f32.mrb[27].mxu0  ;;  %v1528_v16 = vpop.f32.mrb[27].mxu1 }
 0x23a   : > { %v1582_v17 = vadd.f32 %v1581_v57, %v1412_v7  ;;  %v1713_v18 = vmul.f32 %v1412_v7, %v1412_v7  ;;  %v1624_v19 = vadd.f32 %v1623_v3, %v1525_v8  ;;  %v1715_v20 = vmul.f32 %v1525_v8, %v1525_v8 }
 0x23b   : > { %v1745_v22 = vadd.f32 %v1744_v62, %v1712_v12  ;;  %v1787_v23 = vadd.f32 %v1786_v63, %v1714_v14  ;;  %v1414_v24 = vadd.f32 %v1413_v9, %v3237_v41  ;;  %v1527_v25 = vadd.f32 %v1526_v10, %v3240_v43 }
 0x23c   : > { %v1766_v26 = vadd.f32 %v1765_v5, %v1713_v18  ;;  %v1808_v27 = vadd.f32 %v1807_v6, %v1715_v20  ;;  %v1416_v28 = vadd.f32 %v1415_v15, %v3243_v44  ;;  %v1529_v29 = vadd.f32 %v1528_v16, %v3246_v45 }
 0x23d   : > { %v1562_v30 = vadd.f32 %v1561_v11, %v1414_v24  ;;  %v1716_v31 = vmul.f32 %v1414_v24, %v1414_v24  ;;  %v1604_v32 = vadd.f32 %v1603_v13, %v1527_v25  ;;  %v1718_v33 = vmul.f32 %v1527_v25, %v1527_v25 }
 0x23e   : > { %v1583_v34 = vadd.f32 %v1582_v17, %v1416_v28  ;;  %v1717_v35 = vmul.f32 %v1416_v28, %v1416_v28  ;;  %v1625_v36 = vadd.f32 %v1624_v19, %v1529_v29  ;;  %v1719_v37 = vmul.f32 %v1529_v29, %v1529_v29  ;;  %v1419_v42 = vpop.f32.mrb[28].mxu0  ;;  %v1532_v39 = vpop.f32.mrb[28].mxu1 }
 0x23f   : > { %v1746_v40 = vadd.f32 %v1745_v22, %v1716_v31  ;;  %v1788_v46 = vadd.f32 %v1787_v23, %v1718_v33  ;;  %v1420_v47 = vadd.f32 %v1419_v42, %v3237_v41  ;;  %v1533_v48 = vadd.f32 %v1532_v39, %v3240_v43  ;;  %v1421_v49 = vpop.f32.mrb[29].mxu0  ;;  %v1534_v50 = vpop.f32.mrb[29].mxu1 }
 0x240   : > { %v1767_v51 = vadd.f32 %v1766_v26, %v1717_v35  ;;  %v1809_v52 = vadd.f32 %v1808_v27, %v1719_v37  ;;  %v1422_v53 = vadd.f32 %v1421_v49, %v3243_v44  ;;  %v1535_v54 = vadd.f32 %v1534_v50, %v3246_v45  ;;  %v1423_v55 = vpop.f32.mrb[30].mxu0  ;;  %v1536_v56 = vpop.f32.mrb[30].mxu1 }
 0x241   : > { %v1563_v57 = vadd.f32 %v1562_v30, %v1420_v47  ;;  %v1720_v58 = vmul.f32 %v1420_v47, %v1420_v47  ;;  %v1605_v3 = vadd.f32 %v1604_v32, %v1533_v48  ;;  %v1722_v59 = vmul.f32 %v1533_v48, %v1533_v48  ;;  %v1425_v60 = vpop.f32.mrb[31].mxu0  ;;  %v1538_v61 = vpop.f32.mrb[31].mxu1 }
 0x242   : > { %v1584_v62 = vadd.f32 %v1583_v34, %v1422_v53  ;;  %v1721_v63 = vmul.f32 %v1422_v53, %v1422_v53  ;;  %v1626_v0 = vadd.f32 %v1625_v36, %v1535_v54  ;;  %v1723_v1 = vmul.f32 %v1535_v54, %v1535_v54 }
 0x243   : > { %v1747_v2 = vadd.f32 %v1746_v40, %v1720_v58  ;;  %v1789_v4 = vadd.f32 %v1788_v46, %v1722_v59  ;;  %v1424_v5 = vadd.f32 %v1423_v55, %v3237_v41  ;;  %v1537_v6 = vadd.f32 %v1536_v56, %v3240_v43 }
 0x244   : > { %v1768_v7 = vadd.f32 %v1767_v51, %v1721_v63  ;;  %v1810_v8 = vadd.f32 %v1809_v52, %v1723_v1  ;;  %v1426_v9 = vadd.f32 %v1425_v60, %v3243_v44  ;;  %v1539_v10 = vadd.f32 %v1538_v61, %v3246_v45 }
 0x245   : > { %v1564_v11 = vadd.f32 %v1563_v57, %v1424_v5  ;;  %v1724_v12 = vmul.f32 %v1424_v5, %v1424_v5  ;;  %v1606_v13 = vadd.f32 %v1605_v3, %v1537_v6  ;;  %v1726_v14 = vmul.f32 %v1537_v6, %v1537_v6 }
 0x246   : > { %v1585_v15 = vadd.f32 %v1584_v62, %v1426_v9  ;;  %v1725_v16 = vmul.f32 %v1426_v9, %v1426_v9  ;;  %v1627_v17 = vadd.f32 %v1626_v0, %v1539_v10  ;;  %v1727_v18 = vmul.f32 %v1539_v10, %v1539_v10  ;;  %v1429_v19 = vpop.f32.mrb[32].mxu0  ;;  %v1542_v20 = vpop.f32.mrb[32].mxu1 }
 0x247   : > { %v1748_v22 = vadd.f32 %v1747_v2, %v1724_v12  ;;  %v1790_v23 = vadd.f32 %v1789_v4, %v1726_v14  ;;  %v1430_v24 = vadd.f32 %v1429_v19, %v3237_v41  ;;  %v1543_v25 = vadd.f32 %v1542_v20, %v3240_v43  ;;  %v1431_v26 = vpop.f32.mrb[33].mxu0  ;;  %v1544_v27 = vpop.f32.mrb[33].mxu1 }
 0x248   : > { %v1769_v28 = vadd.f32 %v1768_v7, %v1725_v16  ;;  %v1811_v29 = vadd.f32 %v1810_v8, %v1727_v18  ;;  %v1432_v30 = vadd.f32 %v1431_v26, %v3243_v44  ;;  %v1545_v31 = vadd.f32 %v1544_v27, %v3246_v45  ;;  %v1433_v32 = vpop.f32.mrb[34].mxu0  ;;  %v1546_v33 = vpop.f32.mrb[34].mxu1 }
 0x249   : > { %v1565_v34 = vadd.f32 %v1564_v11, %v1430_v24  ;;  %v1728_v35 = vmul.f32 %v1430_v24, %v1430_v24  ;;  %v1607_v36 = vadd.f32 %v1606_v13, %v1543_v25  ;;  %v1730_v37 = vmul.f32 %v1543_v25, %v1543_v25  ;;  %v1435_v42 = vpop.f32.mrb[35].mxu0  ;;  %v1548_v39 = vpop.f32.mrb[35].mxu1 }
 0x24a   : > { %v1586_v40 = vadd.f32 %v1585_v15, %v1432_v30  ;;  %v1729_v46 = vmul.f32 %v1432_v30, %v1432_v30  ;;  %v1628_v47 = vadd.f32 %v1627_v17, %v1545_v31  ;;  %v1731_v48 = vmul.f32 %v1545_v31, %v1545_v31 }
 0x24b   : > { %v1749_v49 = vadd.f32 %v1748_v22, %v1728_v35  ;;  %v1791_v50 = vadd.f32 %v1790_v23, %v1730_v37  ;;  %v1434_v51 = vadd.f32 %v1433_v32, %v3237_v41  ;;  %v1547_v52 = vadd.f32 %v1546_v33, %v3240_v43 }
 0x24c   : > { %v1770_v53 = vadd.f32 %v1769_v28, %v1729_v46  ;;  %v1812_v54 = vadd.f32 %v1811_v29, %v1731_v48  ;;  %v1436_v55 = vadd.f32 %v1435_v42, %v3243_v44  ;;  %v1549_v56 = vadd.f32 %v1548_v39, %v3246_v45 }
 0x24d   : > { %v1566_v57 = vadd.f32 %v1565_v34, %v1434_v51  ;;  %v1732_v58 = vmul.f32 %v1434_v51, %v1434_v51  ;;  %v1608_v3 = vadd.f32 %v1607_v36, %v1547_v52  ;;  %v1734_v59 = vmul.f32 %v1547_v52, %v1547_v52 }
 0x24e   : > { %v1587_v60 = vadd.f32 %v1586_v40, %v1436_v55  ;;  %v1733_v61 = vmul.f32 %v1436_v55, %v1436_v55  ;;  %v1629_v62 = vadd.f32 %v1628_v47, %v1549_v56  ;;  %v1735_v63 = vmul.f32 %v1549_v56, %v1549_v56 }
 0x24f   : > { %v1567_v0 = vrot.slane %v1566_v57, 4  ;;  %v1750_v1 = vadd.f32 %v1749_v49, %v1732_v58  ;;  %v1609_v2 = vrot.slane %v1608_v3, 4  ;;  %v1792_v41 = vadd.f32 %v1791_v50, %v1734_v59 }
 0x250   : > { %v1588_v4 = vrot.slane %v1587_v60, 4  ;;  %v1771_v43 = vadd.f32 %v1770_v53, %v1733_v61  ;;  %v1630_v5 = vrot.slane %v1629_v62, 4  ;;  %v1813_v6 = vadd.f32 %v1812_v54, %v1735_v63  ;;  %v1551_v63 = vld [vmem:[%s3204_s21] sm:$0xf] }
 0x251   : > { %v1568_v7 = vadd.f32 %v1567_v0, %v1566_v57  ;;  %v1751_v44 = vrot.slane %v1750_v1, 4  ;;  %v1610_v8 = vadd.f32 %v1609_v2, %v1608_v3  ;;  %v1793_v45 = vrot.slane %v1792_v41, 4 }
 0x252   : > { %v1589_v9 = vadd.f32 %v1588_v4, %v1587_v60  ;;  %v1772_v10 = vrot.slane %v1771_v43, 4  ;;  %v1631_v11 = vadd.f32 %v1630_v5, %v1629_v62  ;;  %v1814_v12 = vrot.slane %v1813_v6, 4 }
 0x253   : > { %v1569_v13 = vrot.slane %v1568_v7, 2  ;;  %v1752_v14 = vadd.f32 %v1751_v44, %v1750_v1  ;;  %v1611_v15 = vrot.slane %v1610_v8, 2  ;;  %v1794_v16 = vadd.f32 %v1793_v45, %v1792_v41  ;;  %v1671_v41 = vld [vmem:[%s3206_s14] sm:$0xf] }
 0x254   : > { %v1590_v17 = vrot.slane %v1589_v9, 2  ;;  %v1773_v18 = vadd.f32 %v1772_v10, %v1771_v43  ;;  %v1632_v19 = vrot.slane %v1631_v11, 2  ;;  %v1815_v20 = vadd.f32 %v1814_v12, %v1813_v6 }
 0x255   : > { %v1570_v22 = vadd.f32 %v1569_v13, %v1568_v7  ;;  %v1753_v23 = vrot.slane %v1752_v14, 2  ;;  %v1612_v24 = vadd.f32 %v1611_v15, %v1610_v8  ;;  %v1795_v25 = vrot.slane %v1794_v16, 2 }
 0x256   : > { %v1591_v26 = vadd.f32 %v1590_v17, %v1589_v9  ;;  %v1774_v27 = vrot.slane %v1773_v18, 2  ;;  %v1633_v28 = vadd.f32 %v1632_v19, %v1631_v11  ;;  %v1816_v29 = vrot.slane %v1815_v20, 2 }
 0x257   : > { %v1571_v30 = vrot.slane %v1570_v22, 1  ;;  %v1754_v31 = vadd.f32 %v1753_v23, %v1752_v14  ;;  %v1613_v32 = vrot.slane %v1612_v24, 1  ;;  %v1796_v33 = vadd.f32 %v1795_v25, %v1794_v16 }
 0x258   : > { %v1592_v34 = vrot.slane %v1591_v26, 1  ;;  %v1775_v35 = vadd.f32 %v1774_v27, %v1773_v18  ;;  %v1634_v36 = vrot.slane %v1633_v28, 1  ;;  %v1817_v37 = vadd.f32 %v1816_v29, %v1815_v20 }
 0x259   : > { %v1572_v42 = vadd.f32 %v1571_v30, %v1570_v22  ;;  %v1755_v39 = vrot.slane %v1754_v31, 1  ;;  %v1614_v40 = vadd.f32 %v1613_v32, %v1612_v24  ;;  %v1797_v46 = vrot.slane %v1796_v33, 1 }
 0x25a   : > { %v1593_v47 = vadd.f32 %v1592_v34, %v1591_v26  ;;  %v1776_v48 = vrot.slane %v1775_v35, 1  ;;  %v1635_v49 = vadd.f32 %v1634_v36, %v1633_v28  ;;  %v1818_v50 = vrot.slane %v1817_v37, 1 }
 0x25b   : > { %v1756_v51 = vadd.f32 %v1755_v39, %v1754_v31  ;;  %v1798_v52 = vadd.f32 %v1797_v46, %v1796_v33 }
 0x25c   : > { %v1640_v53 = vcombine.low %v1572_v42, %v1593_v47  ;;  %v1777_v54 = vadd.f32 %v1776_v48, %v1775_v35  ;;  %v1641_v55 = vcombine.low %v1614_v40, %v1635_v49  ;;  %v1819_v56 = vadd.f32 %v1818_v50, %v1817_v37 }
 0x25e   : > { %v1648_v57 = vrot.slane %v1640_v53, %v3259_v21  ;;  %v1824_v58 = vcombine.low %v1756_v51, %v1777_v54  ;;  %v1655_v3 = vrot.slane %v1641_v55, %v3259_v21  ;;  %v1825_v59 = vcombine.low %v1798_v52, %v1819_v56 }
 0x260   : > { %v1656_v60 = vcombine.low %v1648_v57, %v1655_v3  ;;  %v1832_v61 = vrot.slane %v1824_v58, %v3259_v21  ;;  %v1839_v62 = vrot.slane %v1825_v59, %v3259_v21 }
 0x262   : > { %v1663_v0 = vrot.slane %v1656_v60, %v3259_v21  ;;  %v1840_v1 = vcombine.low %v1832_v61, %v1839_v62 }
 0x264   : > { %v1665_v4 = vadd.f32 %v1663_v0, %v1551_v63  ;;  %v1847_v43 = vrot.slane %v1840_v1, %v3259_v21 }
 0x266   : > { %1670 = vst.msk [vmem:[%s3204_s21] sm:$0xf] %vm3324_vm1, %v1665_v4  ;;  %v1849_v38 = vadd.f32 %v1847_v43, %v1671_v41 }
 0x267   : > { %2705 = shalt.err (!%p2702_p5)
}
 0x268   : > { %s2706_s21 = scalar_lea.hbm %s3333_s2, 64  ;;  %s2710_s17 = scalar_lea.hbm %s3477_s7, 128 }
 0x269   : > { %p2707_p9 = scmp.ne.s32.totalorder %s3333_s2, %s2706_s21  ;;  %p2711_p7 = scmp.lt.u32.totalorder %s3333_s2, %s3477_s7 }
 0x26a   : > { %p2712_p6 = scmp.lt.u32.totalorder %s2710_s17, %s2706_s21  ;;  %p2714_p13 = scmp.lt.u32.totalorder %s2706_s21, %s3333_s2 }
 0x26b   : > { %p2708_p3 = pnand %p2707_p9, %p3479_p8 }
 0x26c   : > { %p2713_p11 = por %p2712_p6, %p2711_p7 }
 0x26d   : > { %p2709_p12 = pneg %p2708_p3 }
 0x26e   : > { %p2715_p10 = por %p2714_p13, %p2713_p11 }
 0x270   : > { %p2716_p1 = pnand %p2715_p10, %p2709_p12 }
 0x272   : > { %2719 = shalt.err (!%p2716_p1)
}
 0x273   : > { %2233 = dma.vmem_to_hbm [thread:$0]  (%p3479_p8), %s3335_s29, 64, %s3333_s2, %s1852_s11   ;;  %1850 = vst.msk [vmem:[%s3206_s14] sm:$0xf] %vm3324_vm1, %v1849_v38 }
 0x274   : > { %s1857_s12 = scalar_lea.sflag [#allocation12], %s3186_s15  ;;  %s2720_s4 = scalar_lea.vmem %s3346_s10, 64 }
 0x275   : > { %p2721_p0 = scmp.ne.s32.totalorder %s3346_s10, %s2720_s4  ;;  %s2871_s21 = smov [#allocation11]  }
 0x276   : > { %s2724_s24 = sshll.u32 %s2871_s21, 4  ;;  %s2725_s24 = int_to_ptr.vmem [resolvable:$false] %s2724_s24 }
 0x277   : > { %p2722_p4 = pnand %p2721_p0, %p3479_p8  ;;  %s2726_s25 = scalar_lea.vmem %s2725_s24, 128 }
 0x278   : > { %p2727_p5 = scmp.lt.s32.totalorder %s3346_s10, %s2725_s24  ;;  %p2728_p9 = scmp.lt.s32.totalorder %s2726_s25, %s2720_s4 }
 0x279   : > { %p2723_p2 = pneg %p2722_p4 }
 0x27a   : > { %p2729_p3 = por %p2728_p9, %p2727_p5 }
 0x27c   : > { %p2730_p12 = pnand %p2729_p3, %p2723_p2 }
 0x27e   : > { %2733 = shalt.err (!%p2730_p12)
}
 0x27f   : > { %s2734_s15 = scalar_lea.hbm %s3344_s6, 64  ;;  %s2738_s2 = scalar_lea.hbm %s3478_s13, 128 }
 0x280   : > { %p2735_p7 = scmp.ne.s32.totalorder %s3344_s6, %s2734_s15  ;;  %p2739_p13 = scmp.lt.u32.totalorder %s3344_s6, %s3478_s13 }
 0x281   : > { %p2740_p10 = scmp.lt.u32.totalorder %s2738_s2, %s2734_s15  ;;  %p2742_p0 = scmp.lt.u32.totalorder %s2734_s15, %s3344_s6 }
 0x282   : > { %p2736_p6 = pnand %p2735_p7, %p3479_p8 }
 0x283   : > { %p2741_p1 = por %p2740_p10, %p2739_p13 }
 0x284   : > { %p2737_p11 = pneg %p2736_p6 }
 0x285   : > { %p2743_p4 = por %p2742_p0, %p2741_p1 }
 0x287   : > { %p2744_p2 = pnand %p2743_p4, %p2737_p11 }
 0x289   : > { %2747 = shalt.err (!%p2744_p2)
}
 0x28a   : > { %2234 = dma.vmem_to_hbm [thread:$0]  (%p3479_p8), %s3346_s10, 64, %s3344_s6, %s1857_s12  }
 0x28b PF: > { %p2263_p5 = scmp.ge.s32.totalorder %s2858_s28, 2  ;;  %s1897_s30 = sand.u32 1, %s2818_s18  }
 0x28c   : > { %p3480_p9 = scmp.ne.s32.totalorder %s3466_s16, 0  ;;  %s1898_s8 = scalar_lea.sflag [#allocation4], %s1897_s30 }
 0x28e   : > { %p2252_p3 = pnand %p2263_p5, %p3480_p9 }
 0x290   : > { %2809 = dma.done.wait (!%p2252_p3), %s1898_s8, 64  }
 0x291   : > { %2811 = vsyncadd (!%p2252_p3), %s1898_s8, 4294967232  ;;  %s1907_s4 = scalar_lea.sflag [#allocation12], %s1897_s30 }
 0x292   : > { %2813 = dma.done.wait (!%p2252_p3), %s1907_s4, 64  }
 0x293   : > { %2815 = vsyncadd (!%p2252_p3), %s1907_s4, 4294967232  ;;  %s29_s28 = sadd.s32 1, %s2858_s28   ;;  %s3481_s9 = sld [smem:[#allocation19_spill]] }
 0x294   : > { %p26_p12 = scmp.ge.s32.totalorder %s29_s28, 6   ;;  %s3482_s16 = sld [smem:[#allocation20_spill]] }
 0x295   : > { %s3483_s18 = smov %s2822_s19  ;;  %s3484_s19 = smov %s2826_s20 }
 0x296   : > { %s3485_s20 = smov %s3110_s3  ;;  %s3486_s21 = smov %s2834_s22 }
 0x297   : > { %s3487_s22 = smov %s2838_s23  ;;  %s3488_s23 = smov %s3060_s5 }
 0x298   : > { %s3489_s24 = smov %s2850_s26  ;;  %s3490_s25 = smov %s2854_s27 }
 0x299   : > { %s3491_s26 = smov %s3481_s9  ;;  %28 = sbr.rel (!%p26_p12) target bundleno = 19 (0x13), region = 123 }
 0x29a   : > { %s3492_s27 = smov %s3482_s16 }
 0x2a0   :  { %1912 = vsyncpa [#allocation3], 1 }
 0x2a1   :  { %1914 = vsyncpa [#allocation3 + $0x1], 1 }
 0x2a2   :  { %1915 = vsyncpa [#allocation6], 1 }
 0x2a3   :  { %1917 = vsyncpa [#allocation6 + $0x1], 1 }
 0x2a4   :  { %1918 = vsyncpa [#allocation9], 1 }
 0x2a5   :  { %1919 = vsyncpa [#allocation4], 1 }
 0x2a6   :  { %1921 = vsyncpa [#allocation4 + $0x1], 1 }
 0x2a7   :  { %1922 = vsyncpa [#allocation12], 1 }
 0x2a8   :  { %1924 = vsyncpa [#allocation12 + $0x1], 1 }

// kernel: _lambda_.7
= control target key start
LH: loop header
LB: loop body
LE: loop exit
PB: predicated region body
PF: predicated region fallthrough
CT: control target
= control target key end

     0   :  { %s4910_s0 = inlined_call_operand.hbm [shape: bf16[2,256,256], index: 0, kind: input, shape index: {}]   ;;  %s4911_s1 = inlined_call_operand.hbm [shape: f32[2,1,256], index: 1, kind: input, shape index: {}]   ;;  %s4912_s2 = inlined_call_operand.hbm [shape: bf16[256,512], index: 2, kind: input, shape index: {}]   ;;  %s4913_s3 = inlined_call_operand.hbm [shape: bf16[256,512], index: 3, kind: input, shape index: {}]   ;;  %s4914_s4 = inlined_call_operand.hbm [shape: f32[1,512], index: 4, kind: input, shape index: {}]   ;;  %s4915_s5 = inlined_call_operand.hbm [shape: f32[1,512], index: 5, kind: input, shape index: {}]   ;;  %s4916_s6 = inlined_call_operand.hbm [shape: bf16[512,256], index: 6, kind: input, shape index: {}]   ;;  %s4917_s7 = inlined_call_operand.hbm [shape: f32[1,256], index: 7, kind: input, shape index: {}]   ;;  %s4918_s8 = inlined_call_operand.hbm [shape: f32[2,1,256], index: 8, kind: output, shape index: {}]  }
   0x1   :  { %4932 = sst [smem:[#allocation29_spill]] %s4910_s0 }
   0x2   :  { %4933 = sst [smem:[#allocation30_spill]] %s4911_s1 }
   0x3   :  { %4934 = sst [smem:[#allocation31_spill]] %s4912_s2 }
   0x4   :  { %4935 = sst [smem:[#allocation32_spill]] %s4913_s3 }
   0x5   :  { %4936 = sst [smem:[#allocation33_spill]] %s4914_s4 }
   0x6   :  { %4937 = sst [smem:[#allocation34_spill]] %s4915_s5 }
   0x7   :  { %4938 = sst [smem:[#allocation35_spill]] %s4918_s8 }
   0x8   :  { %13 = vsyncpa [#allocation3], 0 }
   0x9   :  { %15 = vsyncpa [#allocation3 + $0x1], 0 }
   0xa   :  { %16 = vsyncpa [#allocation6], 0 }
   0xb   :  { %18 = vsyncpa [#allocation6 + $0x1], 0 }
   0xc   :  { %19 = vsyncpa [#allocation9], 0 }
   0xd   :  { %20 = vsyncpa [#allocation12], 0 }
   0xe   :  { %21 = vsyncpa [#allocation15], 0 }
   0xf   :  { %22 = vsyncpa [#allocation4], 0 }
  0x10   :  { %24 = vsyncpa [#allocation4 + $0x1], 0  ;;  %s4058_s27 = smov 0   ;;  %s4060_s28 = smov 0  }
  0x11   :  { %s4062_s29 = smov 0   ;;  %s4064_s30 = smov 0  }
  0x12   :  { %s4066_s9 = smov 0   ;;  %s4068_s10 = smov 0  }
  0x13   :  { %s4070_s11 = smov 0   ;;  %s4072_s12 = smov 0  }
  0x14   :  { %s4074_s13 = smov 0   ;;  %s4076_s14 = smov 0  }
  0x15   :  { %s4078_s15 = smov 0  }
  0x16 LB: > { %4939 = sst [smem:[#allocation24_spill]] %s3956_s27  ;;  %s4114_s16 = sadd.s32 4294967295, %s3996_s15   ;;  %s3996_s15 = sphi %s4078_s15, %s30_s15   ;;  %s3992_s14 = sphi %s4076_s14, %s5002_s14   ;;  %s3988_s13 = sphi %s4074_s13, %s5001_s13   ;;  %s3984_s12 = sphi %s4072_s12, %s5000_s12   ;;  %s3980_s11 = sphi %s4070_s11, %s4999_s11   ;;  %s3976_s10 = sphi %s4068_s10, %s4998_s10   ;;  %s3972_s9 = sphi %s4066_s9, %s4997_s9   ;;  %s3968_s30 = sphi %s4064_s30, %s4996_s30   ;;  %s3964_s29 = sphi %s4062_s29, %s4995_s29   ;;  %s3960_s28 = sphi %s4060_s28, %s4994_s28   ;;  %s3956_s27 = sphi %s4058_s27, %s4991_s27  }
  0x17   : > { %4940 = sst [smem:[#allocation25_spill]] %s3960_s28  ;;  %p2832_p0 = scmp.ge.s32.totalorder %s3996_s15, 1 }
  0x18   : > { %4941 = sst [smem:[#allocation26_spill]] %s3980_s11  ;;  %p4924_p1 = scmp.eq.s32.totalorder %s4114_s16, 0 }
  0x19   : > { %4942 = sst [smem:[#allocation27_spill]] %s3984_s12  ;;  %p253_p2 = scmp.lt.s32.totalorder %s3996_s15, 5 }
  0x1a   : > { %s3998_s18 = smov [#allocation7]   ;;  %s3999_s21 = smov [#allocation8]  }
  0x1b   : > { %p4119_p3 = pnand %p2832_p0, %p253_p2  ;;  %s265_s19 = sshll.u32 %s3998_s18, 4  ;;  %s4123_s19 = int_to_ptr.vmem [resolvable:$true] %s265_s19 }
  0x1c   : > { %s278_s22 = sshll.u32 %s3999_s21, 4  ;;  %s4000_s23 = smov [#allocation11]   ;;  %s4133_s22 = int_to_ptr.vmem [resolvable:$true] %s278_s22 }
  0x1d   : > { %s4943_s17 = scalar_select %p4119_p3, 1, 0 }
  0x1e   : > { %p3170_p4 = pneg %p4119_p3  ;;  %s4135_s24 = sshll.u32 %s4000_s23, 4  ;;  %s304_s24 = int_to_ptr.vmem [resolvable:$true] %s4135_s24 }
  0x1f   : > { %4944 = sst [smem:[#allocation28_spill]] %s4943_s17  ;;  %s4946_s2 = sld [smem:[#allocation31_spill]] }
  0x20   : > { %p4129_p5 = pnand %p3170_p4, %p4924_p1 }
  0x22   : > { %p4145_p7 = pneg %p4129_p5 }
  0x25   : > { %s3626_s18 = scalar_lea.hbm %s4946_s2, 8192 }
  0x26   : > { %p3627_p6 = scmp.ne.s32.totalorder %s4946_s2, %s3626_s18  ;;  %p3633_p10 = scmp.lt.u32.totalorder %s3626_s18, %s4946_s2 }
  0x28   : > { %p3629_p8 = pnand %p4145_p7, %p3627_p6 }
  0x2a   : > { %p3630_p9 = pneg %p3629_p8 }
  0x2c   : > { %p3635_p11 = pnand %p3633_p10, %p3630_p9 }
  0x2e   : > { %3638 = shalt.err (!%p3635_p11)
}
  0x2f   : > { %s3639_s8 = scalar_lea.vmem %s4123_s19, 8192  ;;  %p3647_p2 = scmp.lt.s32.totalorder %s4123_s19, %s4123_s19 }
  0x30   : > { %p3640_p12 = scmp.ne.s32.totalorder %s4123_s19, %s3639_s8  ;;  %p3648_p4 = scmp.lt.s32.totalorder %s3639_s8, %s3639_s8 }
  0x32   : > { %p3642_p13 = pnand %p3640_p12, %p4145_p7  ;;  %p3649_p6 = por %p3648_p4, %p3647_p2 }
  0x34   : > { %p3643_p0 = pneg %p3642_p13 }
  0x36   : > { %p3650_p8 = pnand %p3649_p6, %p3643_p0 }
  0x38   : > { %3653 = shalt.err (!%p3650_p8)
}
  0x39   : > { %s4001_s12 = smov 256   ;;  %s4002_s25 = smov 16  }
  0x3a   : > { %3173 = dma.hbm_to_vmem [thread:$0]  (!%p4129_p5), %s4946_s2, 8192, %s4123_s19, [#allocation6], %s4001_s12, %s4001_s12, %s4002_s25  }
  0x3b   : > { %s4948_s3 = sld [smem:[#allocation32_spill]] }
  0x41   : > { %s3654_s17 = scalar_lea.hbm %s4948_s3, 8192 }
  0x42   : > { %p3655_p9 = scmp.ne.s32.totalorder %s4948_s3, %s3654_s17  ;;  %p3661_p12 = scmp.lt.u32.totalorder %s3654_s17, %s4948_s3 }
  0x44   : > { %p3657_p10 = pnand %p3655_p9, %p4145_p7 }
  0x46   : > { %p3658_p11 = pneg %p3657_p10 }
  0x48   : > { %p3663_p13 = pnand %p3661_p12, %p3658_p11 }
  0x4a   : > { %3666 = shalt.err (!%p3663_p13)
}
  0x4b   : > { %s3667_s19 = scalar_lea.vmem %s4133_s22, 8192  ;;  %p3675_p6 = scmp.lt.s32.totalorder %s4133_s22, %s4133_s22 }
  0x4c   : > { %p3668_p0 = scmp.ne.s32.totalorder %s4133_s22, %s3667_s19  ;;  %p3676_p8 = scmp.lt.s32.totalorder %s3667_s19, %s3667_s19 }
  0x4e   : > { %p3670_p2 = pnand %p3668_p0, %p4145_p7  ;;  %p3677_p9 = por %p3676_p8, %p3675_p6 }
  0x50   : > { %p3671_p4 = pneg %p3670_p2 }
  0x52   : > { %p3678_p10 = pnand %p3677_p9, %p3671_p4 }
  0x54   : > { %3681 = shalt.err (!%p3678_p10)
}
  0x55   : > { %3176 = dma.hbm_to_vmem [thread:$0]  (!%p4129_p5), %s4948_s3, 8192, %s4133_s22, [#allocation9], %s4001_s12, %s4001_s12, %s4002_s25  }
  0x56   : > { %s4949_s5 = sld [smem:[#allocation34_spill]] }
  0x5c   : > { %s3682_s26 = scalar_lea.hbm %s4949_s5, 64 }
  0x5d   : > { %p3683_p11 = scmp.ne.s32.totalorder %s4949_s5, %s3682_s26  ;;  %p3689_p0 = scmp.lt.u32.totalorder %s3682_s26, %s4949_s5 }
  0x5f   : > { %p3685_p12 = pnand %p3683_p11, %p4145_p7 }
  0x61   : > { %p3686_p13 = pneg %p3685_p12 }
  0x63   : > { %p3691_p2 = pnand %p3689_p0, %p3686_p13 }
  0x65   : > { %3694 = shalt.err (!%p3691_p2)
}
  0x66   : > { %s3695_s19 = scalar_lea.vmem %s304_s24, 64  ;;  %p3703_p9 = scmp.lt.s32.totalorder %s304_s24, %s304_s24 }
  0x67   : > { %p3696_p4 = scmp.ne.s32.totalorder %s304_s24, %s3695_s19  ;;  %p3704_p10 = scmp.lt.s32.totalorder %s3695_s19, %s3695_s19 }
  0x69   : > { %p3698_p6 = pnand %p3696_p4, %p4145_p7  ;;  %p3705_p1 = por %p3704_p10, %p3703_p9 }
  0x6b   : > { %p3699_p8 = pneg %p3698_p6 }
  0x6d   : > { %p3706_p3 = pnand %p3705_p1, %p3699_p8 }
  0x6f   : > { %3709 = shalt.err (!%p3706_p3)
}
  0x70   : > { %3182 = dma.hbm_to_vmem [thread:$0]  (!%p4129_p5), %s4949_s5, 64, %s304_s24, [#allocation12]  }
  0x71   : > { %s4003_s25 = smov [#allocation10]   ;;  %s4004_s27 = smov [#allocation13]  }
  0x72   : > { %s292_s1 = sshll.u32 %s4003_s25, 4  ;;  %s313_s28 = sshll.u32 %s4004_s27, 4  ;;  %s293_s1 = int_to_ptr.vmem [resolvable:$true] %s292_s1  ;;  %s314_s28 = int_to_ptr.vmem [resolvable:$true] %s313_s28 }
  0x73   : > { %s4950_s4 = sld [smem:[#allocation33_spill]] }
  0x79   : > { %s3710_s18 = scalar_lea.hbm %s4950_s4, 64 }
  0x7a   : > { %p3711_p1 = scmp.ne.s32.totalorder %s4950_s4, %s3710_s18  ;;  %p3717_p12 = scmp.lt.u32.totalorder %s3710_s18, %s4950_s4 }
  0x7c   : > { %p3713_p3 = pnand %p3711_p1, %p4145_p7 }
  0x7e   : > { %p3714_p11 = pneg %p3713_p3 }
  0x80   : > { %p3719_p13 = pnand %p3717_p12, %p3714_p11 }
  0x82   : > { %3722 = shalt.err (!%p3719_p13)
}
  0x83   : > { %s3723_s24 = scalar_lea.vmem %s293_s1, 64  ;;  %p3731_p6 = scmp.lt.s32.totalorder %s293_s1, %s293_s1 }
  0x84   : > { %p3724_p0 = scmp.ne.s32.totalorder %s293_s1, %s3723_s24  ;;  %p3732_p8 = scmp.lt.s32.totalorder %s3723_s24, %s3723_s24 }
  0x86   : > { %p3726_p2 = pnand %p3724_p0, %p4145_p7  ;;  %p3733_p9 = por %p3732_p8, %p3731_p6 }
  0x88   : > { %p3727_p4 = pneg %p3726_p2 }
  0x8a   : > { %p3734_p10 = pnand %p3733_p9, %p3727_p4 }
  0x8c   : > { %3737 = shalt.err (!%p3734_p10)
}
  0x8d   : > { %3179 = dma.hbm_to_vmem [thread:$0]  (!%p4129_p5), %s4950_s4, 64, %s293_s1, [#allocation9]  }
  0x8e   : > { %s3738_s17 = scalar_lea.hbm %s4916_s6, 8192 }
  0x8f   : > { %p3739_p1 = scmp.ne.s32.totalorder %s4916_s6, %s3738_s17  ;;  %p3745_p12 = scmp.lt.u32.totalorder %s3738_s17, %s4916_s6 }
  0x91   : > { %p3741_p3 = pnand %p3739_p1, %p4145_p7 }
  0x93   : > { %p3742_p11 = pneg %p3741_p3 }
  0x95   : > { %p3747_p13 = pnand %p3745_p12, %p3742_p11 }
  0x97   : > { %3750 = shalt.err (!%p3747_p13)
}
  0x98   : > { %s3751_s8 = scalar_lea.vmem %s314_s28, 8192  ;;  %p3759_p6 = scmp.lt.s32.totalorder %s314_s28, %s314_s28 }
  0x99   : > { %p3752_p0 = scmp.ne.s32.totalorder %s314_s28, %s3751_s8  ;;  %p3760_p8 = scmp.lt.s32.totalorder %s3751_s8, %s3751_s8 }
  0x9b   : > { %p3754_p2 = pnand %p3752_p0, %p4145_p7  ;;  %p3761_p9 = por %p3760_p8, %p3759_p6 }
  0x9d   : > { %p3755_p4 = pneg %p3754_p2 }
  0x9f   : > { %p3762_p10 = pnand %p3761_p9, %p3755_p4 }
  0xa1   : > { %3765 = shalt.err (!%p3762_p10)
}
  0xa2   : > { %s4926_s1 = smov 128   ;;  %s4927_s19 = smov 8  }
  0xa3   : > { %3185 = dma.hbm_to_vmem [thread:$0]  (!%p4129_p5), %s4916_s6, 8192, %s314_s28, [#allocation12], %s4926_s1, %s4926_s1, %s4927_s19  }
  0xa4   : > { %s4007_s12 = smov [#allocation14]   ;;  %s3766_s26 = scalar_lea.hbm %s4917_s7, 32 }
  0xa5   : > { %s327_s25 = sshll.u32 %s4007_s12, 4  ;;  %p3767_p1 = scmp.ne.s32.totalorder %s4917_s7, %s3766_s26  ;;  %s328_s25 = int_to_ptr.vmem [resolvable:$true] %s327_s25 }
  0xa6   : > { %p3773_p12 = scmp.lt.u32.totalorder %s3766_s26, %s4917_s7 }
  0xa7   : > { %p3769_p3 = pnand %p3767_p1, %p4145_p7 }
  0xa9   : > { %p3770_p11 = pneg %p3769_p3 }
  0xab   : > { %p3775_p13 = pnand %p3773_p12, %p3770_p11 }
  0xad   : > { %3778 = shalt.err (!%p3775_p13)
}
  0xae   : > { %s3779_s28 = scalar_lea.vmem %s328_s25, 32  ;;  %p3787_p6 = scmp.lt.s32.totalorder %s328_s25, %s328_s25 }
  0xaf   : > { %p3780_p0 = scmp.ne.s32.totalorder %s328_s25, %s3779_s28  ;;  %p3788_p8 = scmp.lt.s32.totalorder %s3779_s28, %s3779_s28 }
  0xb1   : > { %p3782_p2 = pnand %p3780_p0, %p4145_p7  ;;  %p3789_p9 = por %p3788_p8, %p3787_p6 }
  0xb3   : > { %p3783_p4 = pneg %p3782_p2 }
  0xb5   : > { %p3790_p10 = pnand %p3789_p9, %p3783_p4 }
  0xb7   : > { %3793 = shalt.err (!%p3790_p10)
}
  0xb8   : > { %3188 = dma.hbm_to_vmem [thread:$0]  (!%p4129_p5), %s4917_s7, 32, %s328_s25, [#allocation15]  }
  0xb9   : > { %s39_s11 = sadd.s32 1, %s3988_s13  ;;  %s42_s20 = sadd.s32 1, %s3992_s14 }
  0xba   : > { %p40_p7 = scmp.ge.s32.totalorder %s39_s11, 2  ;;  %s51_s12 = sadd.s32 1, %s3976_s10 }
  0xbb   : > { %p58_p1 = scmp.ne.s32.totalorder %s3976_s10, %s3972_s9  ;;  %p4929_p3 = scmp.eq.s32.totalorder %s3996_s15, 0 }
  0xbc   : > { %s5004_s11 = smov (%p40_p7, %s39_s11), 0  ;;  %s5006_s20 = smov (!%p40_p7, %s42_s20), %s3992_s14 }
  0xbd   : > { %s47_s27 = ssub.s32 %s3988_s13, %s5004_s11  ;;  %p4278_p11 = por %p4929_p3, %p58_p1 }
  0xbe   : > { %p44_p5 = scmp.ge.s32.totalorder %s5006_s20, 2  ;;  %p64_p12 = scmp.ne.s32.totalorder %s3972_s9, %s3968_s30 }
  0xbf   : > { %p4928_p13 = scmp.lt.s32.totalorder %s3996_s15, 4  ;;  %s338_s25 = sand.u32 1, %s3976_s10  }
  0xc0   : > { %s5008_s20 = smov (%p44_p5, %s5006_s20), 0  ;;  %p4952_p0 = scmp.eq.s32.totalorder %s4114_s16, 0 }
  0xc1   : > { %s4296_s18 = ssub.s32 %s3992_s14, %s5008_s20  ;;  %s2840_s21 = sshll.u32 %s338_s25, 7 }
  0xc2   : > { %p4290_p2 = por %p4952_p0, %p64_p12  ;;  %s48_s23 = sor.u32 %s47_s27, %s4296_s18 }
  0xc3   : > { %p49_p6 = scmp.eq.s32.totalorder %s48_s23, 0  ;;  %s3073_s30 = sshll.u32 %s3988_s13, 5 }
  0xc4   : > { %s2843_s8 = sshll.u32 %s3992_s14, 6  ;;  %s342_s22 = scalar_lea.vmem [#allocation2], %s2840_s21 }
  0xc5   : > { %s4303_s28 = scalar_select %p49_p6, %s3976_s10, %s51_s12  }
  0xc6   : > { %s349_s24 = sadd.s32 %s3073_s30, %s2843_s8  ;;  %s352_s1 = sshll.u32 %s342_s22, 4  ;;  %s4305_s1 = int_to_ptr.vmem [resolvable:$true] %s352_s1 }
  0xc7   : > { %s2844_s19 = sshll.u32 %s349_s24, 6  ;;  %s4954_s0 = sld [smem:[#allocation29_spill]] }
  0xc8   : > { %p4316_p8 = pnand %p4928_p13, %p4278_p11  ;;  %s4320_s27 = scalar_lea.sflag [#allocation3], %s338_s25 }
  0xca   : > { %p3796_p10 = pneg %p4316_p8 }
  0xcd   : > { %s4310_s4 = scalar_lea.hbm %s4954_s0, %s2844_s19  ;;  %s3799_s19 = scalar_lea.hbm %s4954_s0, 8192 }
  0xce   : > { %s3794_s21 = scalar_lea.hbm %s4310_s4, 2048  ;;  %p3800_p11 = scmp.lt.u32.totalorder %s4310_s4, %s4954_s0 }
  0xcf   : > { %p3795_p9 = scmp.ne.s32.totalorder %s4310_s4, %s3794_s21  ;;  %p3801_p5 = scmp.lt.u32.totalorder %s3799_s19, %s3794_s21 }
  0xd0   : > { %p3803_p0 = scmp.lt.u32.totalorder %s3794_s21, %s4310_s4 }
  0xd1   : > { %p3797_p7 = pnand %p3796_p10, %p3795_p9  ;;  %p3802_p12 = por %p3801_p5, %p3800_p11 }
  0xd3   : > { %p3798_p1 = pneg %p3797_p7  ;;  %p3804_p6 = por %p3803_p0, %p3802_p12 }
  0xd5   : > { %p3805_p13 = pnand %p3804_p6, %p3798_p1 }
  0xd7   : > { %3808 = shalt.err (!%p3805_p13)
}
  0xd8   : > { %s3809_s25 = scalar_lea.vmem %s4305_s1, 2048  ;;  %s4008_s30 = smov [#allocation2]  }
  0xd9   : > { %p3810_p9 = scmp.ne.s32.totalorder %s4305_s1, %s3809_s25  ;;  %s3814_s8 = sshll.u32 %s4008_s30, 4  ;;  %s3815_s8 = int_to_ptr.vmem [resolvable:$false] %s3814_s8 }
  0xda   : > { %s3816_s24 = scalar_lea.vmem %s3815_s8, 4096  ;;  %p3817_p4 = scmp.lt.s32.totalorder %s4305_s1, %s3815_s8 }
  0xdb   : > { %p3812_p7 = pnand %p3810_p9, %p3796_p10  ;;  %p3818_p11 = scmp.lt.s32.totalorder %s3816_s24, %s3809_s25 }
  0xdd   : > { %p3813_p3 = pneg %p3812_p7  ;;  %p3819_p5 = por %p3818_p11, %p3817_p4 }
  0xdf   : > { %p3820_p12 = pnand %p3819_p5, %p3813_p3 }
  0xe1   : > { %3823 = shalt.err (!%p3820_p12)
}
  0xe2   : > { %s4956_s22 = smov 8   ;;  %s4957_s21 = smov 128  }
  0xe3   : > { %s4958_s2 = sld [smem:[#allocation25_spill]]  ;;  %s4959_s3 = sld [smem:[#allocation24_spill]] }
  0xe4   : > { %3192 = dma.hbm_to_vmem [thread:$0]  (!%p4316_p8), %s4310_s4, 2048, %s4305_s1, %s4320_s27, %s4957_s21, %s4957_s21, %s4956_s22  }
  0xe5   : > { %s2831_s12 = sadd.s32 4294967294, %s3996_s15   ;;  %s77_s19 = sadd.s32 1, %s3964_s29 }
  0xe6   : > { %p4960_p13 = scmp.eq.s32.totalorder %s4296_s18, 0  ;;  %p4961_p4 = scmp.eq.s32.totalorder %s3996_s15, 0 }
  0xe7   : > { %p240_p0 = scmp.eq.s32.totalorder %s4114_s16, 3  ;;  %p246_p6 = scmp.eq.s32.totalorder %s2831_s12, 3 }
  0xe8   : > { %s4358_s17 = scalar_select %p4960_p13, %s3964_s29, %s77_s19  }
  0xe9   : > { %p84_p3 = scmp.ne.s32.totalorder %s3964_s29, %s4958_s2  ;;  %p90_p1 = scmp.ne.s32.totalorder %s4958_s2, %s4959_s3 }
  0xea   : > { %p4963_p9 = scmp.eq.s32.totalorder %s4114_s16, 0  ;;  %s362_s4 = sand.u32 1, %s3996_s15  }
  0xeb   : > { %p4362_p10 = por %p84_p3, %p4961_p4  ;;  %p4376_p8 = por %p240_p0, %p84_p3 }
  0xec   : > { %p4371_p7 = por %p90_p1, %p4963_p9  ;;  %p4380_p11 = por %p246_p6, %p90_p1 }
  0xed   : > { %s4965_s1 = scalar_select %p4376_p8, 1, 0 }
  0xee   : > { %s4964_s25 = scalar_select %p4371_p7, 1, 0 }
  0xef   : > { %s4966_s18 = scalar_select %p4380_p11, 1, 0 }
  0xf0   : > { %s364_s27 = sand.u32 1, %s3964_s29   ;;  %s3074_s8 = sshll.u32 %s3992_s14, 5 }
  0xf1   : > { %s2845_s30 = sshll.u32 %s364_s27, 1  ;;  %s4967_s21 = sld [smem:[#allocation30_spill]] }
  0xf2   : > { %s366_s3 = scalar_lea.vmem [#allocation5], %s2845_s30  ;;  %p4968_p5 = scmp.lt.s32.totalorder %s3996_s15, 4 }
  0xf3   : > { %s374_s12 = sshll.u32 %s366_s3, 4  ;;  %s363_s27 = scalar_lea.sflag [#allocation6], %s362_s4  ;;  %s4399_s12 = int_to_ptr.vmem [resolvable:$true] %s374_s12 }
  0xf4   : > { %p4395_p12 = pnand %p4968_p5, %p4362_p10 }
  0xf6   : > { %p3826_p13 = pneg %p4395_p12 }
  0xf7   : > { %s4389_s2 = scalar_lea.hbm %s4967_s21, %s3074_s8  ;;  %s3829_s8 = scalar_lea.hbm %s4967_s21, 64 }
  0xf8   : > { %s3824_s24 = scalar_lea.hbm %s4389_s2, 32  ;;  %p3830_p10 = scmp.lt.u32.totalorder %s4389_s2, %s4967_s21 }
  0xf9   : > { %p3825_p3 = scmp.ne.s32.totalorder %s4389_s2, %s3824_s24  ;;  %p3831_p0 = scmp.lt.u32.totalorder %s3829_s8, %s3824_s24 }
  0xfa   : > { %p3833_p9 = scmp.lt.u32.totalorder %s3824_s24, %s4389_s2 }
  0xfb   : > { %p3827_p4 = pnand %p3826_p13, %p3825_p3  ;;  %p3832_p6 = por %p3831_p0, %p3830_p10 }
  0xfd   : > { %p3828_p1 = pneg %p3827_p4  ;;  %p3834_p5 = por %p3833_p9, %p3832_p6 }
  0xff   : > { %p3835_p11 = pnand %p3834_p5, %p3828_p1 }
 0x101   : > { %3838 = shalt.err (!%p3835_p11)
}
 0x102   : > { %s3839_s4 = scalar_lea.vmem %s4399_s12, 32  ;;  %s4009_s30 = smov [#allocation5]  }
 0x103   : > { %p3840_p3 = scmp.ne.s32.totalorder %s4399_s12, %s3839_s4  ;;  %s3844_s23 = sshll.u32 %s4009_s30, 4  ;;  %s3845_s23 = int_to_ptr.vmem [resolvable:$false] %s3844_s23 }
 0x104   : > { %s3846_s22 = scalar_lea.vmem %s3845_s23, 64  ;;  %p3847_p7 = scmp.lt.s32.totalorder %s4399_s12, %s3845_s23 }
 0x105   : > { %p3842_p4 = pnand %p3840_p3, %p3826_p13  ;;  %p3848_p10 = scmp.lt.s32.totalorder %s3846_s22, %s3839_s4 }
 0x107   : > { %p3843_p8 = pneg %p3842_p4  ;;  %p3849_p0 = por %p3848_p10, %p3847_p7 }
 0x109   : > { %p3850_p6 = pnand %p3849_p0, %p3843_p8 }
 0x10b   : > { %3853 = shalt.err (!%p3850_p6)
}
 0x10c   : > { %3195 = dma.hbm_to_vmem [thread:$0]  (!%p4395_p12), %s4389_s2, 32, %s4399_s12, %s363_s27  }
 0x10d   : > { %s4970_s24 = sld [smem:[#allocation28_spill]] }
 0x113   : > { %p4971_p11 = scmp.ne.s32.totalorder %s4970_s24, 0 }
 0x114   : > { %s385_s8 = sand.u32 (!%p4971_p11), 1, %s3972_s9  }
 0x115   : > { %383 = sbr.rel (%p4971_p11) target bundleno = 1071 (0x42f), region = 52  ;;  %s2849_s3 = sshll.u32 (!%p4971_p11), %s385_s8, 7 }
 0x116   : > { %s386_s30 = scalar_lea.sflag (!%p4971_p11), [#allocation3], %s385_s8  ;;  %s4429_s0 = scalar_lea.vmem (!%p4971_p11), [#allocation2], %s2849_s3 }
 0x11c   : > { %3927 = dma.done.wait (%p4290_p2), %s386_s30, 2048  }
 0x11d   : > { %3929 = vsyncadd (%p4290_p2), %s386_s30, 4294965248  ;;  %s4972_s19 = sld [smem:[#allocation25_spill]]  ;;  %s394_s2 = sand.u32 1, %s4114_s16  }
 0x11e   : > { %s395_s4 = scalar_lea.sflag [#allocation6], %s394_s2  ;;  %p4973_p7 = scmp.ne.s32.totalorder %s4964_s25, 0 }
 0x123   : > { %s396_s12 = sand.u32 1, %s4972_s19  }
 0x124   : > { %s4439_s27 = sshll.u32 %s396_s12, 1 }
 0x125   : > { %s398_s23 = scalar_lea.vmem [#allocation5], %s4439_s27 }
 0x126   : > { %3931 = dma.done.wait (%p4973_p7), %s395_s4, 32  }
 0x127   : > { %3933 = vsyncadd (%p4973_p7), %s395_s4, 4294967264  ;;  %p4974_p8 = scmp.eq.s32.totalorder %s4114_s16, 0 }
 0x129   : > { %3935 = dma.done.wait (%p4974_p8), [#allocation6], 8192   ;;  %p4975_p2 = pmov %p4974_p8 }
 0x12b   : > { %3937 = vsyncadd (%p4975_p2), [#allocation6], 4294959104  ;;  %p4976_p12 = pmov %p4975_p2 }
 0x12c   : > { %p4977_p13 = pmov %p4975_p2 }
 0x12d   : > { %3939 = dma.done.wait (%p4976_p12), [#allocation9], 8256  }
 0x12e   : > { %3941 = vsyncadd (%p4977_p13), [#allocation9], 4294959040  ;;  %p4978_p1 = pmov %p4975_p2 }
 0x130   : > { %3943 = dma.done.wait (%p4978_p1), [#allocation12], 8256   ;;  %p4979_p9 = pmov %p4978_p1 }
 0x131   : > { %p4980_p5 = pmov %p4978_p1 }
 0x132   : > { %3945 = vsyncadd (%p4979_p9), [#allocation12], 4294959040 }
 0x133   : > { %3947 = dma.done.wait (%p4980_p5), [#allocation15], 32   ;;  %p4981_p3 = pmov %p4978_p1 }
 0x134   : > { %v3314_v0 = vld [vmem:[#allocation8 + $0x4] ss:$16 sps:$4 sm:$0xff]   ;;  %v3318_v2 = vld [vmem:[#allocation8] ss:$16 sps:$4 sm:$0xff]   ;;  %v463_v36 = vlaneseq  ;;  %v461_v49 = vld [vmem:[%s398_s23] sm:$0x3] }
 0x135   : > { %3949 = vsyncadd (%p4981_p3), [#allocation15], 4294967264  ;;  %v3316_v1 = vld [vmem:[#allocation7 + $0x4] ss:$16 sps:$4 sm:$0xff]   ;;  %859 = vmatprep.subr.bf16.mxu1 %v3314_v0  ;;  %v3319_v3 = vld [vmem:[#allocation7] ss:$16 sps:$4 sm:$0xff]  }
 0x136   : > { %1437 = vmatprep.subr.bf16.mxu0 %v3316_v1  ;;  %v3320_v4 = vld [vmem:[#allocation8 + $0x24] ss:$16 sps:$4 sm:$0xff]   ;;  %860 = vmatpush1.bf16.msra.mxu1 %v3318_v2  ;;  %v3324_v6 = vld [vmem:[#allocation8 + $0x20] ss:$16 sps:$4 sm:$0xff]   ;;  %v4463_v40 = vshrl.u32 %v463_v36, 7  ;;  %s4982_s16 = sld [smem:[#allocation26_spill]] }
 0x137   : > { %1438 = vmatpush1.bf16.msra.mxu0 %v3319_v3  ;;  %v3322_v5 = vld [vmem:[#allocation7 + $0x24] ss:$16 sps:$4 sm:$0xff]   ;;  %861 = vmatprep.subr.bf16.mxu1 %v3320_v4  ;;  %v3325_v7 = vld [vmem:[#allocation7 + $0x20] ss:$16 sps:$4 sm:$0xff]  }
 0x138   : > { %1439 = vmatprep.subr.bf16.mxu0 %v3322_v5  ;;  %v3326_v8 = vld [vmem:[#allocation8 + $0x44] ss:$16 sps:$4 sm:$0xff]   ;;  %v3330_v10 = vld [vmem:[#allocation8 + $0x40] ss:$16 sps:$4 sm:$0xff]   ;;  %v4466_v46 = vsub.s32 1, %v4463_v40  ;;  %v4476_v3 = vsub.s32 0, %v4463_v40 }
 0x139   : > { %v3328_v9 = vld [vmem:[#allocation7 + $0x44] ss:$16 sps:$4 sm:$0xff]   ;;  %v3331_v11 = vld [vmem:[#allocation7 + $0x40] ss:$16 sps:$4 sm:$0xff]  }
 0x13a   : > { %862 = vmatpush1.bf16.msra.mxu1 %v3324_v6  ;;  %v3332_v12 = vld [vmem:[#allocation8 + $0x64] ss:$16 sps:$4 sm:$0xff]   ;;  %v3336_v14 = vld [vmem:[#allocation8 + $0x60] ss:$16 sps:$4 sm:$0xff]   ;;  %v470_v53 = vrot.slane %v461_v49, %v4466_v46 }
 0x13b   : > { %1440 = vmatpush1.bf16.msra.mxu0 %v3325_v7  ;;  %863 = vmatprep.subr.bf16.mxu1 %v3326_v8  ;;  %v3334_v13 = vld [vmem:[#allocation7 + $0x64] ss:$16 sps:$4 sm:$0xff]   ;;  %v3337_v15 = vld [vmem:[#allocation7 + $0x60] ss:$16 sps:$4 sm:$0xff]   ;;  %v466_v7 = vrot.slane %v461_v49, %v4476_v3  ;;  %v3457_v49 = vld [vmem:[#allocation8 + $0x148] ss:$16 sps:$4 sm:$0xff]  }
 0x13c   : > { %1441 = vmatprep.subr.bf16.mxu0 %v3328_v9  ;;  %v3338_v16 = vld [vmem:[#allocation8 + $0x84] ss:$16 sps:$4 sm:$0xff]   ;;  %v3342_v18 = vld [vmem:[#allocation8 + $0x80] ss:$16 sps:$4 sm:$0xff]   ;;  %v474_v55 = vpack.c.bf16 %v470_v53, %v470_v53  ;;  %v3415_v9 = vld [vmem:[#allocation8 + $0xc] ss:$16 sps:$4 sm:$0xff]  }
 0x13d   : > { %v3340_v17 = vld [vmem:[#allocation7 + $0x84] ss:$16 sps:$4 sm:$0xff]   ;;  %v3343_v19 = vld [vmem:[#allocation7 + $0x80] ss:$16 sps:$4 sm:$0xff]   ;;  %v3468_v53 = vld [vmem:[#allocation8 + $0x18c] ss:$16 sps:$4 sm:$0xff]  }
 0x13e   : > { %864 = vmatpush1.bf16.msra.mxu1 %v3330_v10  ;;  %v3344_v20 = vld [vmem:[#allocation8 + $0xa4] ss:$16 sps:$4 sm:$0xff]   ;;  %v3348_v22 = vld [vmem:[#allocation8 + $0xa0] ss:$16 sps:$4 sm:$0xff]   ;;  %891 = vmatprep.mubr.bf16.mxu1 %v474_v55  ;;  %p3066_p4 = scmp.ne.s32.totalorder %s4982_s16, 0 }
 0x13f   : > { %1442 = vmatpush1.bf16.msra.mxu0 %v3331_v11  ;;  %865 = vmatprep.subr.bf16.mxu1 %v3332_v12  ;;  %v3346_v21 = vld [vmem:[#allocation7 + $0xa4] ss:$16 sps:$4 sm:$0xff]   ;;  %v3349_v23 = vld [vmem:[#allocation7 + $0xa0] ss:$16 sps:$4 sm:$0xff]   ;;  %v4482_v11 = vpack.c.bf16 %v466_v7, %v466_v7  ;;  %v3413_v12 = vld [vmem:[#allocation8 + $0x8] ss:$16 sps:$4 sm:$0xff]  }
 0x140   : > { %1443 = vmatprep.subr.bf16.mxu0 %v3334_v13  ;;  %v3350_v24 = vld [vmem:[#allocation8 + $0xc4] ss:$16 sps:$4 sm:$0xff]   ;;  %v3354_v26 = vld [vmem:[#allocation8 + $0xc0] ss:$16 sps:$4 sm:$0xff]   ;;  %v3475_v7 = vld [vmem:[#allocation8 + $0x1c8] ss:$16 sps:$4 sm:$0xff]  }
 0x141   : > { %v3352_v25 = vld [vmem:[#allocation7 + $0xc4] ss:$16 sps:$4 sm:$0xff]   ;;  %v3355_v27 = vld [vmem:[#allocation7 + $0xc0] ss:$16 sps:$4 sm:$0xff]   ;;  %vm2619_vm0 = vcmp.lt.s32.totalorder (!%p3066_p4), %v463_v36, 256 }
 0x142   : > { %866 = vmatpush1.bf16.msra.mxu1 %v3336_v14  ;;  %v3356_v28 = vld [vmem:[#allocation8 + $0xe4] ss:$16 sps:$4 sm:$0xff]   ;;  %v3360_v30 = vld [vmem:[#allocation8 + $0xe0] ss:$16 sps:$4 sm:$0xff]   ;;  %v3418_v14 = vld [vmem:[#allocation8 + $0x2c] ss:$16 sps:$4 sm:$0xff]  }
 0x143   : > { %1444 = vmatpush1.bf16.msra.mxu0 %v3337_v15  ;;  %867 = vmatprep.subr.bf16.mxu1 %v3338_v16  ;;  %v3358_v29 = vld [vmem:[#allocation7 + $0xe4] ss:$16 sps:$4 sm:$0xff]   ;;  %v3361_v31 = vld [vmem:[#allocation7 + $0xe0] ss:$16 sps:$4 sm:$0xff]   ;;  %v3416_v15 = vld [vmem:[#allocation8 + $0x28] ss:$16 sps:$4 sm:$0xff]  }
 0x144   : > { %1445 = vmatprep.subr.bf16.mxu0 %v3340_v17  ;;  %v3362_v32 = vld [vmem:[#allocation8 + $0x104] ss:$16 sps:$4 sm:$0xff]   ;;  %v3366_v34 = vld [vmem:[#allocation8 + $0x100] ss:$16 sps:$4 sm:$0xff]   ;;  %v3423_v16 = vld [vmem:[#allocation8 + $0x4c] ss:$16 sps:$4 sm:$0xff]  }
 0x145   : > { %v3364_v33 = vld [vmem:[#allocation7 + $0x104] ss:$16 sps:$4 sm:$0xff]   ;;  %v3367_v35 = vld [vmem:[#allocation7 + $0x100] ss:$16 sps:$4 sm:$0xff]   ;;  %v3421_v17 = vld [vmem:[#allocation8 + $0x48] ss:$16 sps:$4 sm:$0xff]  }
 0x146   : > { %868 = vmatpush1.bf16.msra.mxu1 %v3342_v18  ;;  %v3368_v37 = vld [vmem:[#allocation8 + $0x124] ss:$16 sps:$4 sm:$0xff]   ;;  %v3372_v39 = vld [vmem:[#allocation8 + $0x120] ss:$16 sps:$4 sm:$0xff]  }
 0x147   : > { %1446 = vmatpush1.bf16.msra.mxu0 %v3343_v19  ;;  %869 = vmatprep.subr.bf16.mxu1 %v3344_v20  ;;  %v3370_v38 = vld [vmem:[#allocation7 + $0x124] ss:$16 sps:$4 sm:$0xff]   ;;  %v3373_v41 = vld [vmem:[#allocation7 + $0x120] ss:$16 sps:$4 sm:$0xff]   ;;  %v3427_v20 = vld [vmem:[#allocation8 + $0x6c] ss:$16 sps:$4 sm:$0xff]  }
 0x148   : > { %1447 = vmatprep.subr.bf16.mxu0 %v3346_v21  ;;  %v3374_v42 = vld [vmem:[#allocation8 + $0x144] ss:$16 sps:$4 sm:$0xff]   ;;  %v3378_v44 = vld [vmem:[#allocation8 + $0x140] ss:$16 sps:$4 sm:$0xff]   ;;  %v3425_v21 = vld [vmem:[#allocation8 + $0x68] ss:$16 sps:$4 sm:$0xff]  }
 0x149   : > { %v3376_v43 = vld [vmem:[#allocation7 + $0x144] ss:$16 sps:$4 sm:$0xff]   ;;  %v3379_v45 = vld [vmem:[#allocation7 + $0x140] ss:$16 sps:$4 sm:$0xff]  }
 0x14a   : > { %870 = vmatpush1.bf16.msra.mxu1 %v3348_v22  ;;  %v3380_v47 = vld [vmem:[#allocation8 + $0x164] ss:$16 sps:$4 sm:$0xff]   ;;  %v3384_v50 = vld [vmem:[#allocation8 + $0x160] ss:$16 sps:$4 sm:$0xff]   ;;  %v3432_v22 = vld [vmem:[#allocation8 + $0x8c] ss:$16 sps:$4 sm:$0xff]  }
 0x14b   : > { %1448 = vmatpush1.bf16.msra.mxu0 %v3349_v23  ;;  %871 = vmatprep.subr.bf16.mxu1 %v3350_v24  ;;  %v3382_v48 = vld [vmem:[#allocation7 + $0x164] ss:$16 sps:$4 sm:$0xff]   ;;  %v3385_v51 = vld [vmem:[#allocation7 + $0x160] ss:$16 sps:$4 sm:$0xff]   ;;  %v3430_v23 = vld [vmem:[#allocation8 + $0x88] ss:$16 sps:$4 sm:$0xff]  }
 0x14c   : > { %1449 = vmatprep.subr.bf16.mxu0 %v3352_v25  ;;  %v3386_v52 = vld [vmem:[#allocation8 + $0x184] ss:$16 sps:$4 sm:$0xff]   ;;  %v4472_v56 = vld [vmem:[%s4429_s0 + $0x4] ss:$8 sps:$4 sm:$0xff]   ;;  %v4485_v13 = vld [vmem:[%s4429_s0 + $0x14] ss:$8 sps:$4 sm:$0xff]  }
 0x14d   : > { %v3388_v54 = vld [vmem:[#allocation7 + $0x184] ss:$16 sps:$4 sm:$0xff]   ;;  %v3390_v57 = vld [vmem:[#allocation8 + $0x180] ss:$16 sps:$4 sm:$0xff]   ;;  %1469 = vmatprep.mubr.bf16.mxu0 %v4472_v56 }
 0x14e   : > { %872 = vmatpush1.bf16.msra.mxu1 %v3354_v26  ;;  %v3391_v58 = vld [vmem:[#allocation7 + $0x180] ss:$16 sps:$4 sm:$0xff]   ;;  %v3392_v59 = vld [vmem:[#allocation8 + $0x1a4] ss:$16 sps:$4 sm:$0xff]   ;;  %v3436_v26 = vld [vmem:[#allocation8 + $0xac] ss:$16 sps:$4 sm:$0xff]  }
 0x14f   : > { %1450 = vmatpush1.bf16.msra.mxu0 %v3355_v27  ;;  %873 = vmatprep.subr.bf16.mxu1 %v3356_v28  ;;  %v3394_v60 = vld [vmem:[#allocation7 + $0x1a4] ss:$16 sps:$4 sm:$0xff]   ;;  %v3396_v61 = vld [vmem:[#allocation8 + $0x1a0] ss:$16 sps:$4 sm:$0xff]   ;;  %v3434_v27 = vld [vmem:[#allocation8 + $0xa8] ss:$16 sps:$4 sm:$0xff]  }
 0x150   : > { %1451 = vmatprep.subr.bf16.mxu0 %v3358_v29  ;;  %v3397_v62 = vld [vmem:[#allocation7 + $0x1a0] ss:$16 sps:$4 sm:$0xff]   ;;  %v3398_v63 = vld [vmem:[#allocation8 + $0x1c4] ss:$16 sps:$4 sm:$0xff]   ;;  %v3441_v28 = vld [vmem:[#allocation8 + $0xcc] ss:$16 sps:$4 sm:$0xff]  }
 0x151   : > { %v3400_v0 = vld [vmem:[#allocation7 + $0x1c4] ss:$16 sps:$4 sm:$0xff]   ;;  %v3402_v1 = vld [vmem:[#allocation8 + $0x1c0] ss:$16 sps:$4 sm:$0xff]   ;;  %v3439_v29 = vld [vmem:[#allocation8 + $0xc8] ss:$16 sps:$4 sm:$0xff]  }
 0x152   : > { %874 = vmatpush1.bf16.msra.mxu1 %v3360_v30  ;;  %v3403_v2 = vld [vmem:[#allocation7 + $0x1c0] ss:$16 sps:$4 sm:$0xff]   ;;  %v3404_v4 = vld [vmem:[#allocation8 + $0x1e4] ss:$16 sps:$4 sm:$0xff]  }
 0x153   : > { %1452 = vmatpush1.bf16.msra.mxu0 %v3361_v31  ;;  %875 = vmatprep.subr.bf16.mxu1 %v3362_v32  ;;  %v3406_v5 = vld [vmem:[#allocation7 + $0x1e4] ss:$16 sps:$4 sm:$0xff]   ;;  %v3408_v6 = vld [vmem:[#allocation8 + $0x1e0] ss:$16 sps:$4 sm:$0xff]   ;;  %v3445_v32 = vld [vmem:[#allocation8 + $0xec] ss:$16 sps:$4 sm:$0xff]  }
 0x154   : > { %1453 = vmatprep.subr.bf16.mxu0 %v3364_v33  ;;  %v3409_v8 = vld [vmem:[#allocation7 + $0x1e0] ss:$16 sps:$4 sm:$0xff]   ;;  %v4480_v10 = vld [vmem:[%s4429_s0] ss:$8 sps:$4 sm:$0xff]   ;;  %v4491_v18 = vld [vmem:[%s4429_s0 + $0x10] ss:$8 sps:$4 sm:$0xff]  }
 0x155   : > { %v4494_v19 = vld [vmem:[%s4429_s0 + $0x24] ss:$8 sps:$4 sm:$0xff]   ;;  %v4499_v24 = vld [vmem:[%s4429_s0 + $0x20] ss:$8 sps:$4 sm:$0xff]   ;;  %v4502_v25 = vld [vmem:[%s4429_s0 + $0x34] ss:$8 sps:$4 sm:$0xff]  }
 0x156   : > { %876 = vmatpush1.bf16.msra.mxu1 %v3366_v34  ;;  %v4507_v30 = vld [vmem:[%s4429_s0 + $0x30] ss:$8 sps:$4 sm:$0xff]   ;;  %v4510_v31 = vld [vmem:[%s4429_s0 + $0x44] ss:$8 sps:$4 sm:$0xff]  }
 0x157   : > { %1454 = vmatpush1.bf16.msra.mxu0 %v3367_v35  ;;  %877 = vmatprep.subr.bf16.mxu1 %v3368_v37  ;;  %v3443_v33 = vld [vmem:[#allocation8 + $0xe8] ss:$16 sps:$4 sm:$0xff]   ;;  %v3450_v34 = vld [vmem:[#allocation8 + $0x10c] ss:$16 sps:$4 sm:$0xff]  }
 0x158   : > { %1455 = vmatprep.subr.bf16.mxu0 %v3370_v38  ;;  %v3448_v35 = vld [vmem:[#allocation8 + $0x108] ss:$16 sps:$4 sm:$0xff]   ;;  %v4515_v37 = vld [vmem:[%s4429_s0 + $0x40] ss:$8 sps:$4 sm:$0xff]  }
 0x159   : > { %v4518_v38 = vld [vmem:[%s4429_s0 + $0x54] ss:$8 sps:$4 sm:$0xff]  }
 0x15a   : > { %878 = vmatpush1.bf16.msra.mxu1 %v3372_v39  ;;  %v3454_v39 = vld [vmem:[#allocation8 + $0x12c] ss:$16 sps:$4 sm:$0xff]  }
 0x15b   : > { %1456 = vmatpush1.bf16.msra.mxu0 %v3373_v41  ;;  %879 = vmatprep.subr.bf16.mxu1 %v3374_v42  ;;  %v3452_v41 = vld [vmem:[#allocation8 + $0x128] ss:$16 sps:$4 sm:$0xff]   ;;  %v3459_v42 = vld [vmem:[#allocation8 + $0x14c] ss:$16 sps:$4 sm:$0xff]  }
 0x15c   : > { %1457 = vmatprep.subr.bf16.mxu0 %v3376_v43  ;;  %v3530_v43 = vld [vmem:[#allocation13] ss:$8 sps:$4 sm:$0xff]  }
 0x15e   : > { %880 = vmatpush1.bf16.msra.mxu1 %v3378_v44  ;;  %v3532_v44 = vld [vmem:[#allocation13 + $0x4] ss:$8 sps:$4 sm:$0xff]  }
 0x15f   : > { %1458 = vmatpush1.bf16.msra.mxu0 %v3379_v45  ;;  %881 = vmatprep.subr.bf16.mxu1 %v3380_v47  ;;  %v3533_v45 = vld [vmem:[#allocation13 + $0x10] ss:$8 sps:$4 sm:$0xff]   ;;  %v3535_v47 = vld [vmem:[#allocation13 + $0x14] ss:$8 sps:$4 sm:$0xff]  }
 0x160   : > { %1459 = vmatprep.subr.bf16.mxu0 %v3382_v48  ;;  %v4523_v48 = vld [vmem:[%s4429_s0 + $0x50] ss:$8 sps:$4 sm:$0xff]  }
 0x162   : > { %882 = vmatpush1.bf16.msra.mxu1 %v3384_v50  ;;  %v4526_v50 = vld [vmem:[%s4429_s0 + $0x64] ss:$8 sps:$4 sm:$0xff]  }
 0x163   : > { %1460 = vmatpush1.bf16.msra.mxu0 %v3385_v51  ;;  %883 = vmatprep.subr.bf16.mxu1 %v3386_v52  ;;  %v3463_v51 = vld [vmem:[#allocation8 + $0x16c] ss:$16 sps:$4 sm:$0xff]   ;;  %v3461_v52 = vld [vmem:[#allocation8 + $0x168] ss:$16 sps:$4 sm:$0xff]  }
 0x164   : > { %1461 = vmatprep.subr.bf16.mxu0 %v3388_v54  ;;  %v3536_v54 = vld [vmem:[#allocation13 + $0x20] ss:$8 sps:$4 sm:$0xff]  }
 0x166   : > { %884 = vmatpush1.bf16.msra.mxu1 %v3390_v57  ;;  %v3539_v57 = vld [vmem:[#allocation13 + $0x30] ss:$8 sps:$4 sm:$0xff]  }
 0x167   : > { %1462 = vmatpush1.bf16.msra.mxu0 %v3391_v58  ;;  %885 = vmatprep.subr.bf16.mxu1 %v3392_v59  ;;  %v3541_v58 = vld [vmem:[#allocation13 + $0x34] ss:$8 sps:$4 sm:$0xff]  }
 0x168   : > { %1463 = vmatprep.subr.bf16.mxu0 %v3394_v60  ;;  %v4531_v59 = vld [vmem:[%s4429_s0 + $0x60] ss:$8 sps:$4 sm:$0xff]   ;;  %v3466_v60 = vld [vmem:[#allocation8 + $0x188] ss:$16 sps:$4 sm:$0xff]  }
 0x16a   : > { %886 = vmatpush1.bf16.msra.mxu1 %v3396_v61  ;;  %v4534_v61 = vld [vmem:[%s4429_s0 + $0x74] ss:$8 sps:$4 sm:$0xff]  }
 0x16b   : > { %1464 = vmatpush1.bf16.msra.mxu0 %v3397_v62  ;;  %887 = vmatprep.subr.bf16.mxu1 %v3398_v63  ;;  %v3472_v62 = vld [vmem:[#allocation8 + $0x1ac] ss:$16 sps:$4 sm:$0xff]   ;;  %v3470_v63 = vld [vmem:[#allocation8 + $0x1a8] ss:$16 sps:$4 sm:$0xff]  }
 0x16c   : > { %1465 = vmatprep.subr.bf16.mxu0 %v3400_v0  ;;  %v3477_v0 = vld [vmem:[#allocation8 + $0x1cc] ss:$16 sps:$4 sm:$0xff]  }
 0x16e   : > { %888 = vmatpush1.bf16.msra.mxu1 %v3402_v1  ;;  %v3542_v1 = vld [vmem:[#allocation13 + $0x40] ss:$8 sps:$4 sm:$0xff]  }
 0x16f   : > { %1466 = vmatpush1.bf16.msra.mxu0 %v3403_v2  ;;  %889 = vmatprep.subr.bf16.mxu1 %v3404_v4  ;;  %v3544_v2 = vld [vmem:[#allocation13 + $0x44] ss:$8 sps:$4 sm:$0xff]   ;;  %v3545_v4 = vld [vmem:[#allocation13 + $0x50] ss:$8 sps:$4 sm:$0xff]  }
 0x170   : > { %1467 = vmatprep.subr.bf16.mxu0 %v3406_v5  ;;  %v3547_v5 = vld [vmem:[#allocation13 + $0x54] ss:$8 sps:$4 sm:$0xff]  }
 0x172   : > { %890 = vmatpush1.bf16.msra.mxu1 %v3408_v6  ;;  %v4539_v6 = vld [vmem:[%s4429_s0 + $0x70] ss:$8 sps:$4 sm:$0xff]   ;;  %s4836_s0 = scalar_lea.vmem [#allocation16], %s4439_s27 }
 0x173   : > { %1468 = vmatpush1.bf16.msra.mxu0 %v3409_v8  ;;  %900 = vmatprep.subr.bf16.mxu1 %v3415_v9  ;;  %v3481_v8 = vld [vmem:[#allocation8 + $0x1ec] ss:$16 sps:$4 sm:$0xff]   ;;  %v3548_v9 = vld [vmem:[#allocation13 + $0x60] ss:$8 sps:$4 sm:$0xff]  }
 0x174   : > { %2327 = vmatprep.subr.bf16.mxu0 %v3532_v44  ;;  %v3499_v44 = vld [vmem:[#allocation7 + $0xac] ss:$16 sps:$4 sm:$0xff]  }
 0x175   : > { %892 = vmatmul.mubr.bf16.vlgmr.msra.gmra.mrb[0].mxu1 %v4482_v11 }
 0x176   : > { %1470 = vmatmul.mubr.bf16.vlgmr.msra.gmra.mrb[0].mxu0 %v4480_v10  ;;  %901 = vmatpush1.bf16.msra.mxu1 %v3413_v12  ;;  %v3550_v12 = vld [vmem:[#allocation13 + $0x64] ss:$8 sps:$4 sm:$0xff]  }
 0x177   : > { %1479 = vmatprep.mubr.bf16.mxu0 %v4485_v13  ;;  %902 = vmatprep.subr.bf16.mxu1 %v3418_v14  ;;  %v3479_v14 = vld [vmem:[#allocation8 + $0x1e8] ss:$16 sps:$4 sm:$0xff]  }
 0x178   : > { %932 = vmatprep.mubr.bf16.mxu1 %v474_v55  ;;  %2328 = vmatpush1.bf16.msra.mxu0 %v3530_v43  ;;  %v3538_v55 = vld [vmem:[#allocation13 + $0x24] ss:$8 sps:$4 sm:$0xff]   ;;  %v3494_v43 = vld [vmem:[#allocation7 + $0x88] ss:$16 sps:$4 sm:$0xff]  }
 0x179   : > { %2329 = vmatprep.subr.bf16.mxu0 %v3535_v47  ;;  %v3497_v47 = vld [vmem:[#allocation7 + $0xa8] ss:$16 sps:$4 sm:$0xff]  }
 0x17a   : > { %903 = vmatpush1.bf16.msra.mxu1 %v3416_v15  ;;  %v3553_v15 = vld [vmem:[#allocation13 + $0x74] ss:$8 sps:$4 sm:$0xff]  }
 0x17b   : > { %904 = vmatprep.subr.bf16.mxu1 %v3423_v16  ;;  %v3484_v16 = vld [vmem:[#allocation7 + $0xc] ss:$16 sps:$4 sm:$0xff]  }
 0x17c   : > { %2330 = vmatpush1.bf16.msra.mxu0 %v3533_v45  ;;  %v3566_v45 = vld [vmem:[#allocation13 + $0xc0] ss:$8 sps:$4 sm:$0xff]  }
 0x17d   : > { %2331 = vmatprep.subr.bf16.mxu0 %v3538_v55  ;;  %v3574_v55 = vld [vmem:[#allocation13 + $0xe4] ss:$8 sps:$4 sm:$0xff]  }
 0x17e   : > { %1480 = vmatmul.mubr.bf16.gmra.mrb[4].mxu0 %v4491_v18  ;;  %905 = vmatpush1.bf16.msra.mxu1 %v3421_v17  ;;  %v3551_v17 = vld [vmem:[#allocation13 + $0x70] ss:$8 sps:$4 sm:$0xff]  }
 0x17f   : > { %1489 = vmatprep.mubr.bf16.mxu0 %v4494_v19  ;;  %906 = vmatprep.subr.bf16.mxu1 %v3427_v20  ;;  %v3556_v20 = vld [vmem:[#allocation13 + $0x84] ss:$8 sps:$4 sm:$0xff]  }
 0x180   : > { %2332 = vmatpush1.bf16.msra.mxu0 %v3536_v54  ;;  %v3505_v54 = vld [vmem:[#allocation7 + $0xec] ss:$16 sps:$4 sm:$0xff]  }
 0x181   : > { %2333 = vmatprep.subr.bf16.mxu0 %v3541_v58  ;;  %v3572_v58 = vld [vmem:[#allocation13 + $0xe0] ss:$8 sps:$4 sm:$0xff]  }
 0x182   : > { %907 = vmatpush1.bf16.msra.mxu1 %v3425_v21  ;;  %v3482_v21 = vld [vmem:[#allocation7 + $0x8] ss:$16 sps:$4 sm:$0xff]  }
 0x183   : > { %908 = vmatprep.subr.bf16.mxu1 %v3432_v22  ;;  %v3487_v22 = vld [vmem:[#allocation7 + $0x2c] ss:$16 sps:$4 sm:$0xff]  }
 0x184   : > { %2334 = vmatpush1.bf16.msra.mxu0 %v3539_v57  ;;  %v3503_v57 = vld [vmem:[#allocation7 + $0xe8] ss:$16 sps:$4 sm:$0xff]  }
 0x185   : > { %2335 = vmatprep.subr.bf16.mxu0 %v3544_v2  ;;  %v3509_v2 = vld [vmem:[#allocation7 + $0x128] ss:$16 sps:$4 sm:$0xff]  }
 0x186   : > { %1490 = vmatmul.mubr.bf16.gmra.mrb[8].mxu0 %v4499_v24  ;;  %909 = vmatpush1.bf16.msra.mxu1 %v3430_v23  ;;  %v3554_v23 = vld [vmem:[#allocation13 + $0x80] ss:$8 sps:$4 sm:$0xff]  }
 0x187   : > { %1499 = vmatprep.mubr.bf16.mxu0 %v4502_v25  ;;  %910 = vmatprep.subr.bf16.mxu1 %v3436_v26  ;;  %v3559_v26 = vld [vmem:[#allocation13 + $0x94] ss:$8 sps:$4 sm:$0xff]  }
 0x188   : > { %2336 = vmatpush1.bf16.msra.mxu0 %v3542_v1  ;;  %v3511_v1 = vld [vmem:[#allocation7 + $0x12c] ss:$16 sps:$4 sm:$0xff]  }
 0x189   : > { %2337 = vmatprep.subr.bf16.mxu0 %v3547_v5  ;;  %v3512_v5 = vld [vmem:[#allocation7 + $0x148] ss:$16 sps:$4 sm:$0xff]  }
 0x18a   : > { %911 = vmatpush1.bf16.msra.mxu1 %v3434_v27  ;;  %v3485_v27 = vld [vmem:[#allocation7 + $0x28] ss:$16 sps:$4 sm:$0xff]  }
 0x18b   : > { %912 = vmatprep.subr.bf16.mxu1 %v3441_v28  ;;  %v3490_v28 = vld [vmem:[#allocation7 + $0x4c] ss:$16 sps:$4 sm:$0xff]  }
 0x18c   : > { %2338 = vmatpush1.bf16.msra.mxu0 %v3545_v4  ;;  %v3514_v4 = vld [vmem:[#allocation7 + $0x14c] ss:$16 sps:$4 sm:$0xff]  }
 0x18d   : > { %2339 = vmatprep.subr.bf16.mxu0 %v3550_v12  ;;  %v3518_v12 = vld [vmem:[#allocation7 + $0x188] ss:$16 sps:$4 sm:$0xff]  }
 0x18e   : > { %1500 = vmatmul.mubr.bf16.gmra.mrb[12].mxu0 %v4507_v30  ;;  %913 = vmatpush1.bf16.msra.mxu1 %v3439_v29  ;;  %v3557_v29 = vld [vmem:[#allocation13 + $0x90] ss:$8 sps:$4 sm:$0xff]  }
 0x18f   : > { %1509 = vmatprep.mubr.bf16.mxu0 %v4510_v31  ;;  %914 = vmatprep.subr.bf16.mxu1 %v3445_v32  ;;  %v3562_v32 = vld [vmem:[#allocation13 + $0xa4] ss:$8 sps:$4 sm:$0xff]  }
 0x190   : > { %2340 = vmatpush1.bf16.msra.mxu0 %v3548_v9  ;;  %v3520_v9 = vld [vmem:[#allocation7 + $0x18c] ss:$16 sps:$4 sm:$0xff]  }
 0x191   : > { %2341 = vmatprep.subr.bf16.mxu0 %v3553_v15  ;;  %v3521_v15 = vld [vmem:[#allocation7 + $0x1a8] ss:$16 sps:$4 sm:$0xff]  }
 0x192   : > { %915 = vmatpush1.bf16.msra.mxu1 %v3443_v33  ;;  %v3488_v33 = vld [vmem:[#allocation7 + $0x48] ss:$16 sps:$4 sm:$0xff]  }
 0x193   : > { %916 = vmatprep.subr.bf16.mxu1 %v3450_v34  ;;  %v3493_v34 = vld [vmem:[#allocation7 + $0x6c] ss:$16 sps:$4 sm:$0xff]  }
 0x194   : > { %2342 = vmatpush1.bf16.msra.mxu0 %v3551_v17  ;;  %v3524_v17 = vld [vmem:[#allocation7 + $0x1c8] ss:$16 sps:$4 sm:$0xff]  }
 0x195   : > { %2343 = vmatprep.subr.bf16.mxu0 %v3556_v20  ;;  %v3529_v20 = vld [vmem:[#allocation7 + $0x1ec] ss:$16 sps:$4 sm:$0xff]  }
 0x196   : > { %1510 = vmatmul.mubr.bf16.gmra.mrb[16].mxu0 %v4515_v37  ;;  %917 = vmatpush1.bf16.msra.mxu1 %v3448_v35  ;;  %v3560_v35 = vld [vmem:[#allocation13 + $0xa0] ss:$8 sps:$4 sm:$0xff]  }
 0x197   : > { %1519 = vmatprep.mubr.bf16.mxu0 %v4518_v38  ;;  %918 = vmatprep.subr.bf16.mxu1 %v3454_v39  ;;  %v3491_v39 = vld [vmem:[#allocation7 + $0x68] ss:$16 sps:$4 sm:$0xff]  }
 0x198   : > { %2344 = vmatpush1.bf16.msra.mxu0 %v3554_v23 }
 0x199   : > { %2345 = vmatprep.subr.bf16.mxu0 %v3559_v26 }
 0x19a   : > { %919 = vmatpush1.bf16.msra.mxu1 %v3452_v41  ;;  %v3496_v41 = vld [vmem:[#allocation7 + $0x8c] ss:$16 sps:$4 sm:$0xff]  }
 0x19b   : > { %920 = vmatprep.subr.bf16.mxu1 %v3459_v42  ;;  %v3568_v42 = vld [vmem:[#allocation13 + $0xc4] ss:$8 sps:$4 sm:$0xff]  }
 0x19c   : > { %2346 = vmatpush1.bf16.msra.mxu0 %v3557_v29 }
 0x19d   : > { %2347 = vmatprep.subr.bf16.mxu0 %v3562_v32 }
 0x19e   : > { %1520 = vmatmul.mubr.bf16.gmra.mrb[20].mxu0 %v4523_v48  ;;  %921 = vmatpush1.bf16.msra.mxu1 %v3457_v49  ;;  %v3502_v49 = vld [vmem:[#allocation7 + $0xcc] ss:$16 sps:$4 sm:$0xff]  }
 0x19f   : > { %1529 = vmatprep.mubr.bf16.mxu0 %v4526_v50  ;;  %922 = vmatprep.subr.bf16.mxu1 %v3463_v51  ;;  %v3571_v51 = vld [vmem:[#allocation13 + $0xd4] ss:$8 sps:$4 sm:$0xff]  }
 0x1a0   : > { %2348 = vmatpush1.bf16.msra.mxu0 %v3560_v35 }
 0x1a2   : > { %923 = vmatpush1.bf16.msra.mxu1 %v3461_v52  ;;  %v3500_v52 = vld [vmem:[#allocation7 + $0xc8] ss:$16 sps:$4 sm:$0xff]  }
 0x1a3   : > { %924 = vmatprep.subr.bf16.mxu1 %v3468_v53  ;;  %v3569_v53 = vld [vmem:[#allocation13 + $0xd0] ss:$8 sps:$4 sm:$0xff]  }
 0x1a6   : > { %1530 = vmatmul.mubr.bf16.gmra.mrb[24].mxu0 %v4531_v59  ;;  %925 = vmatpush1.bf16.msra.mxu1 %v3466_v60  ;;  %v3508_v60 = vld [vmem:[#allocation7 + $0x10c] ss:$16 sps:$4 sm:$0xff]  }
 0x1a7   : > { %1539 = vmatprep.mubr.bf16.mxu0 %v4534_v61  ;;  %926 = vmatprep.subr.bf16.mxu1 %v3472_v62  ;;  %v3577_v62 = vld [vmem:[#allocation13 + $0xf4] ss:$8 sps:$4 sm:$0xff]  }
 0x1aa   : > { %927 = vmatpush1.bf16.msra.mxu1 %v3470_v63  ;;  %v3506_v63 = vld [vmem:[#allocation7 + $0x108] ss:$16 sps:$4 sm:$0xff]  }
 0x1ab   : > { %928 = vmatprep.subr.bf16.mxu1 %v3477_v0  ;;  %v3575_v0 = vld [vmem:[#allocation13 + $0xf0] ss:$8 sps:$4 sm:$0xff]  }
 0x1ae   : > { %1540 = vmatmul.mubr.bf16.gmra.mrb[28].mxu0 %v4539_v6  ;;  %929 = vmatpush1.bf16.msra.mxu1 %v3475_v7  ;;  %v3517_v7 = vld [vmem:[#allocation7 + $0x16c] ss:$16 sps:$4 sm:$0xff]  }
 0x1af   : > { %930 = vmatprep.subr.bf16.mxu1 %v3481_v8  ;;  %v3515_v8 = vld [vmem:[#allocation7 + $0x168] ss:$16 sps:$4 sm:$0xff]  }
 0x1b2   : > { %931 = vmatpush1.bf16.msra.mxu1 %v3479_v14  ;;  %v3523_v14 = vld [vmem:[#allocation7 + $0x1ac] ss:$16 sps:$4 sm:$0xff]  }
 0x1b3   : > { %1550 = vmatprep.subr.bf16.mxu1 %v3484_v16  ;;  %v3526_v16 = vld [vmem:[#allocation7 + $0x1cc] ss:$16 sps:$4 sm:$0xff]  }
 0x1b5   : > { %933 = vmatmul.mubr.bf16.vlgmr.msra.gmra.mrb[4].mxu1 %v4482_v11  ;;  %v3565_v11 = vld [vmem:[#allocation13 + $0xb4] ss:$8 sps:$4 sm:$0xff]  }
 0x1b6   : > { %1551 = vmatpush1.bf16.msra.mxu1 %v3482_v21  ;;  %1582 = vmatprep.mubr.bf16.mxu1 %v4472_v56  ;;  %v3563_v56 = vld [vmem:[#allocation13 + $0xb0] ss:$8 sps:$4 sm:$0xff]  }
 0x1b7   : > { %1552 = vmatprep.subr.bf16.mxu1 %v3487_v22  ;;  %2349 = vmatprep.subr.bf16.mxu0 %v3565_v11  ;;  %v3527_v21 = vld [vmem:[#allocation7 + $0x1e8] ss:$16 sps:$4 sm:$0xff]   ;;  %v3580_v22 = vld [vmem:[#allocation13 + $0x104] ss:$8 sps:$4 sm:$0xff]  }
 0x1b8   : > { %2350 = vmatpush1.bf16.msra.mxu0 %v3563_v56 }
 0x1b9   : > { %2351 = vmatprep.subr.bf16.mxu0 %v3568_v42 }
 0x1ba   : > { %1553 = vmatpush1.bf16.msra.mxu1 %v3485_v27 }
 0x1bb   : > { %1554 = vmatprep.subr.bf16.mxu1 %v3490_v28 }
 0x1bc   : > { %2352 = vmatpush1.bf16.msra.mxu0 %v3566_v45 }
 0x1bd   : > { %2353 = vmatprep.subr.bf16.mxu0 %v3571_v51 }
 0x1be   : > { %1555 = vmatpush1.bf16.msra.mxu1 %v3488_v33 }
 0x1bf   : > { %1556 = vmatprep.subr.bf16.mxu1 %v3493_v34 }
 0x1c0   : > { %2354 = vmatpush1.bf16.msra.mxu0 %v3569_v53 }
 0x1c1   : > { %2355 = vmatprep.subr.bf16.mxu0 %v3574_v55 }
 0x1c2   : > { %1557 = vmatpush1.bf16.msra.mxu1 %v3491_v39 }
 0x1c3   : > { %1558 = vmatprep.subr.bf16.mxu1 %v3496_v41 }
 0x1c4   : > { %2356 = vmatpush1.bf16.msra.mxu0 %v3572_v58 }
 0x1c5   : > { %2357 = vmatprep.subr.bf16.mxu0 %v3577_v62 }
 0x1c6   : > { %1559 = vmatpush1.bf16.msra.mxu1 %v3494_v43 }
 0x1c7   : > { %1560 = vmatprep.subr.bf16.mxu1 %v3499_v44 }
 0x1c8   : > { %2358 = vmatpush1.bf16.msra.mxu0 %v3575_v0  ;;  %v3578_v0 = vld [vmem:[#allocation13 + $0x100] ss:$8 sps:$4 sm:$0xff]  }
 0x1c9   : > { %2440 = vmatprep.subr.bf16.mxu0 %v3580_v22 }
 0x1ca   : > { %1561 = vmatpush1.bf16.msra.mxu1 %v3497_v47 }
 0x1cb   : > { %1562 = vmatprep.subr.bf16.mxu1 %v3502_v49 }
 0x1ce   : > { %1563 = vmatpush1.bf16.msra.mxu1 %v3500_v52 }
 0x1cf   : > { %1564 = vmatprep.subr.bf16.mxu1 %v3505_v54 }
 0x1d2   : > { %1565 = vmatpush1.bf16.msra.mxu1 %v3503_v57 }
 0x1d3   : > { %1566 = vmatprep.subr.bf16.mxu1 %v3508_v60 }
 0x1d6   : > { %1567 = vmatpush1.bf16.msra.mxu1 %v3506_v63 }
 0x1d7   : > { %1568 = vmatprep.subr.bf16.mxu1 %v3511_v1 }
 0x1da   : > { %1569 = vmatpush1.bf16.msra.mxu1 %v3509_v2 }
 0x1db   : > { %1570 = vmatprep.subr.bf16.mxu1 %v3514_v4  ;;  %v3583_v4 = vld [vmem:[#allocation13 + $0x114] ss:$8 sps:$4 sm:$0xff]  }
 0x1de   : > { %1571 = vmatpush1.bf16.msra.mxu1 %v3512_v5 }
 0x1df   : > { %1572 = vmatprep.subr.bf16.mxu1 %v3517_v7 }
 0x1e2   : > { %1573 = vmatpush1.bf16.msra.mxu1 %v3515_v8 }
 0x1e3   : > { %1574 = vmatprep.subr.bf16.mxu1 %v3520_v9 }
 0x1e6   : > { %1575 = vmatpush1.bf16.msra.mxu1 %v3518_v12 }
 0x1e7   : > { %1576 = vmatprep.subr.bf16.mxu1 %v3523_v14  ;;  %v3581_v14 = vld [vmem:[#allocation13 + $0x110] ss:$8 sps:$4 sm:$0xff]  }
 0x1ea   : > { %1577 = vmatpush1.bf16.msra.mxu1 %v3521_v15 }
 0x1eb   : > { %1578 = vmatprep.subr.bf16.mxu1 %v3526_v16 }
 0x1ee   : > { %1579 = vmatpush1.bf16.msra.mxu1 %v3524_v17 }
 0x1ef   : > { %1580 = vmatprep.subr.bf16.mxu1 %v3529_v20 }
 0x1f2   : > { %1581 = vmatpush1.bf16.msra.mxu1 %v3527_v21  ;;  %v3586_v21 = vld [vmem:[#allocation13 + $0x124] ss:$8 sps:$4 sm:$0xff]  }
 0x1f5   : > { %1583 = vmatmul.mubr.bf16.vlgmr.msra.gmra.mrb[8].mxu1 %v4480_v10  ;;  %v4559_v10 = vld [vmem:[#allocation10] sm:$0xf] }
 0x1f6   : > { %1592 = vmatprep.mubr.bf16.mxu1 %v4485_v13  ;;  %v4561_v13 = vld [vmem:[#allocation11] sm:$0xf] }
 0x1f7   : > { %v4585_v27 = vrot.slane %v4561_v13, %v4466_v46 }
 0x1fd   : > { %1593 = vmatmul.mubr.bf16.gmra.mrb[12].mxu1 %v4491_v18 }
 0x1fe   : > { %1602 = vmatprep.mubr.bf16.mxu1 %v4494_v19 }
 0x205   : > { %1603 = vmatmul.mubr.bf16.gmra.mrb[16].mxu1 %v4499_v24 }
 0x206   : > { %1612 = vmatprep.mubr.bf16.mxu1 %v4502_v25  ;;  %v4568_v25 = vrot.slane %v4559_v10, %v4476_v3 }
 0x20d   : > { %1613 = vmatmul.mubr.bf16.gmra.mrb[20].mxu1 %v4507_v30 }
 0x20e   : > { %1622 = vmatprep.mubr.bf16.mxu1 %v4510_v31 }
 0x215   : > { %1623 = vmatmul.mubr.bf16.gmra.mrb[24].mxu1 %v4515_v37  ;;  %v4572_v37 = vrot.slane %v4559_v10, %v4466_v46 }
 0x216   : > { %1632 = vmatprep.mubr.bf16.mxu1 %v4518_v38 }
 0x21d   : > { %1633 = vmatmul.mubr.bf16.gmra.mrb[28].mxu1 %v4523_v48 }
 0x21e   : > { %1642 = vmatprep.mubr.bf16.mxu1 %v4526_v50 }
 0x225   : > { %1643 = vmatmul.mubr.bf16.gmra.mrb[32].mxu1 %v4531_v59 }
 0x226   : > { %1652 = vmatprep.mubr.bf16.mxu1 %v4534_v61  ;;  %v4580_v61 = vrot.slane %v4561_v13, %v4476_v3 }
 0x22d   : > { %1653 = vmatmul.mubr.bf16.gmra.mrb[36].mxu1 %v4539_v6 }
 0x248   : > { %v893_v18 = vpop.f32.mrb[0].mxu1 }
 0x249   : > { %v1471_v19 = vpop.f32.mrb[0].mxu0  ;;  %v4564_v24 = vrot.slane %v893_v18, %v4476_v3  ;;  %v895_v30 = vpop.f32.mrb[1].mxu1 }
 0x24a   : > { %v1473_v31 = vpop.f32.mrb[1].mxu0  ;;  %v4575_v38 = vrot.slane %v895_v30, %v4476_v3  ;;  %v897_v48 = vpop.f32.mrb[2].mxu1 }
 0x24b   : > { %v1475_v50 = vpop.f32.mrb[2].mxu0  ;;  %v1472_v59 = vadd.f32 %v1471_v19, %v4564_v24  ;;  %v898_v23 = vpop.f32.mrb[3].mxu1 }
 0x24c   : > { %v1476_v6 = vadd.f32 %v1475_v50, %v4564_v24  ;;  %v1477_v26 = vpop.f32.mrb[3].mxu0  ;;  %v1474_v28 = vadd.f32 %v1473_v31, %v4575_v38 }
 0x24d   : > { %v1478_v29 = vadd.f32 %v1477_v26, %v4575_v38  ;;  %v1685_v32 = vmul.f32 %v4568_v25, %v1472_v59 }
 0x24e   : > { %v1689_v33 = vmul.f32 %v4568_v25, %v1476_v6  ;;  %v1686_v34 = vmul.f32 %v4572_v37, %v1474_v28  ;;  %v3584_v28 = vld [vmem:[#allocation13 + $0x120] ss:$8 sps:$4 sm:$0xff]  }
 0x24f   : > { %v1690_v35 = vmul.f32 %v4572_v37, %v1478_v29  ;;  %v1771_v11 = vadd.f32 %v4580_v61, %v1685_v32 }
 0x250   : > { %v1775_v39 = vadd.f32 %v4580_v61, %v1689_v33  ;;  %v1772_v41 = vadd.f32 %v4585_v27, %v1686_v34  ;;  %v3589_v33 = vld [vmem:[#allocation13 + $0x134] ss:$8 sps:$4 sm:$0xff]  }
 0x251   : > { %v1776_v56 = vadd.f32 %v4585_v27, %v1690_v35  ;;  %v1481_v42 = vpop.f32.mrb[4].mxu0  ;;  %v1835_v43 = vmax.f32 %v1771_v11, 0.0 }
 0x252   : > { %v1839_v44 = vmax.f32 %v1775_v39, 0.0  ;;  %v1482_v45 = vadd.f32 %v1481_v42, %v4564_v24  ;;  %v1483_v47 = vpop.f32.mrb[5].mxu0  ;;  %v1836_v49 = vmax.f32 %v1772_v41, 0.0 }
 0x253   : > { %v1840_v51 = vmax.f32 %v1776_v56, 0.0  ;;  %v1484_v52 = vadd.f32 %v1483_v47, %v4575_v38  ;;  %v1485_v53 = vpop.f32.mrb[6].mxu0  ;;  %v3587_v56 = vld [vmem:[#allocation13 + $0x130] ss:$8 sps:$4 sm:$0xff]   ;;  %v3592_v47 = vld [vmem:[#allocation13 + $0x144] ss:$8 sps:$4 sm:$0xff]  }
 0x254   : > { %v1899_v54 = vpack.c.bf16 %v1839_v44, %v1835_v43  ;;  %v1693_v55 = vmul.f32 %v4568_v25, %v1482_v45  ;;  %v1486_v57 = vadd.f32 %v1485_v53, %v4564_v24  ;;  %v1487_v58 = vpop.f32.mrb[7].mxu0 }
 0x255   : > { %v1694_v60 = vmul.f32 %v4572_v37, %v1484_v52  ;;  %v1488_v62 = vadd.f32 %v1487_v58, %v4575_v38  ;;  %v1900_v63 = vpack.c.bf16 %v1840_v51, %v1836_v49 }
 0x256   : > { %v1779_v1 = vadd.f32 %v4580_v61, %v1693_v55  ;;  %v1697_v2 = vmul.f32 %v4568_v25, %v1486_v57 }
 0x257   : > { %v1780_v5 = vadd.f32 %v4585_v27, %v1694_v60  ;;  %v1698_v7 = vmul.f32 %v4572_v37, %v1488_v62  ;;  %2359 = vmatprep.mubr.bf16.mxu0 %v1900_v63 }
 0x258   : > { %v1783_v8 = vadd.f32 %v4580_v61, %v1697_v2  ;;  %2360 = vmatmul.mubr.bf16.vlgmr.msra.gmra.mrb[32].mxu0 %v1899_v54  ;;  %v1843_v15 = vmax.f32 %v1779_v1, 0.0 }
 0x259   : > { %v1784_v9 = vadd.f32 %v4585_v27, %v1698_v7  ;;  %v1491_v12 = vpop.f32.mrb[8].mxu0  ;;  %2441 = vmatpush1.bf16.msra.mxu0 %v3578_v0  ;;  %v1844_v22 = vmax.f32 %v1780_v5, 0.0  ;;  %v3590_v0 = vld [vmem:[#allocation13 + $0x140] ss:$8 sps:$4 sm:$0xff]  }
 0x25a   : > { %v1847_v16 = vmax.f32 %v1783_v8, 0.0  ;;  %v1492_v17 = vadd.f32 %v1491_v12, %v4564_v24  ;;  %v1493_v20 = vpop.f32.mrb[9].mxu0  ;;  %2442 = vmatprep.subr.bf16.mxu0 %v3583_v4  ;;  %v3595_v4 = vld [vmem:[#allocation13 + $0x154] ss:$8 sps:$4 sm:$0xff]  }
 0x25b   : > { %v1848_v18 = vmax.f32 %v1784_v9, 0.0  ;;  %v1494_v19 = vadd.f32 %v1493_v20, %v4575_v38  ;;  %v1495_v30 = vpop.f32.mrb[10].mxu0 }
 0x25c   : > { %v1701_v31 = vmul.f32 %v4568_v25, %v1492_v17  ;;  %v1496_v48 = vadd.f32 %v1495_v30, %v4564_v24  ;;  %v1497_v50 = vpop.f32.mrb[11].mxu0  ;;  %v1903_v59 = vpack.c.bf16 %v1847_v16, %v1843_v15 }
 0x25d   : > { %v1702_v6 = vmul.f32 %v4572_v37, %v1494_v19  ;;  %v1498_v23 = vadd.f32 %v1497_v50, %v4575_v38  ;;  %v1904_v26 = vpack.c.bf16 %v1848_v18, %v1844_v22  ;;  %2443 = vmatpush1.bf16.msra.mxu0 %v3581_v14  ;;  %v3593_v14 = vld [vmem:[#allocation13 + $0x150] ss:$8 sps:$4 sm:$0xff]  }
 0x25e   : > { %v1787_v29 = vadd.f32 %v4580_v61, %v1701_v31  ;;  %v1705_v32 = vmul.f32 %v4568_v25, %v1496_v48  ;;  %2444 = vmatprep.subr.bf16.mxu0 %v3586_v21  ;;  %v3598_v21 = vld [vmem:[#allocation13 + $0x164] ss:$8 sps:$4 sm:$0xff]  }
 0x25f   : > { %v1788_v34 = vadd.f32 %v4585_v27, %v1702_v6  ;;  %v1706_v35 = vmul.f32 %v4572_v37, %v1498_v23  ;;  %2369 = vmatprep.mubr.bf16.mxu0 %v1904_v26 }
 0x260   : > { %v1791_v11 = vadd.f32 %v4580_v61, %v1705_v32  ;;  %2370 = vmatmul.mubr.bf16.gmra.mrb[36].mxu0 %v1903_v59  ;;  %v1851_v42 = vmax.f32 %v1787_v29, 0.0 }
 0x261   : > { %v1792_v39 = vadd.f32 %v4585_v27, %v1706_v35  ;;  %v1501_v41 = vpop.f32.mrb[12].mxu0  ;;  %2445 = vmatpush1.bf16.msra.mxu0 %v3584_v28  ;;  %v1852_v49 = vmax.f32 %v1788_v34, 0.0  ;;  %v3596_v28 = vld [vmem:[#allocation13 + $0x160] ss:$8 sps:$4 sm:$0xff]  }
 0x262   : > { %v1855_v43 = vmax.f32 %v1791_v11, 0.0  ;;  %v1502_v44 = vadd.f32 %v1501_v41, %v4564_v24  ;;  %v1503_v45 = vpop.f32.mrb[13].mxu0  ;;  %2446 = vmatprep.subr.bf16.mxu0 %v3589_v33  ;;  %v3601_v33 = vld [vmem:[#allocation13 + $0x174] ss:$8 sps:$4 sm:$0xff]  }
 0x263   : > { %v1856_v51 = vmax.f32 %v1792_v39, 0.0  ;;  %v1504_v52 = vadd.f32 %v1503_v45, %v4575_v38  ;;  %v1505_v53 = vpop.f32.mrb[14].mxu0 }
 0x264   : > { %v1709_v54 = vmul.f32 %v4568_v25, %v1502_v44  ;;  %v1506_v55 = vadd.f32 %v1505_v53, %v4564_v24  ;;  %v1507_v57 = vpop.f32.mrb[15].mxu0  ;;  %v1907_v58 = vpack.c.bf16 %v1855_v43, %v1851_v42 }
 0x265   : > { %v1710_v60 = vmul.f32 %v4572_v37, %v1504_v52  ;;  %v1508_v62 = vadd.f32 %v1507_v57, %v4575_v38  ;;  %v1908_v63 = vpack.c.bf16 %v1856_v51, %v1852_v49  ;;  %2447 = vmatpush1.bf16.msra.mxu0 %v3587_v56  ;;  %v3599_v56 = vld [vmem:[#allocation13 + $0x170] ss:$8 sps:$4 sm:$0xff]  }
 0x266   : > { %v1795_v1 = vadd.f32 %v4580_v61, %v1709_v54  ;;  %v1713_v2 = vmul.f32 %v4568_v25, %v1506_v55  ;;  %2448 = vmatprep.subr.bf16.mxu0 %v3592_v47  ;;  %v3604_v47 = vld [vmem:[#allocation13 + $0x184] ss:$8 sps:$4 sm:$0xff]  }
 0x267   : > { %v1796_v5 = vadd.f32 %v4585_v27, %v1710_v60  ;;  %v1714_v7 = vmul.f32 %v4572_v37, %v1508_v62  ;;  %2379 = vmatprep.mubr.bf16.mxu0 %v1908_v63 }
 0x268   : > { %v1799_v8 = vadd.f32 %v4580_v61, %v1713_v2  ;;  %2380 = vmatmul.mubr.bf16.gmra.mrb[40].mxu0 %v1907_v58  ;;  %v1859_v15 = vmax.f32 %v1795_v1, 0.0 }
 0x269   : > { %v1800_v9 = vadd.f32 %v4585_v27, %v1714_v7  ;;  %v1511_v12 = vpop.f32.mrb[16].mxu0  ;;  %2449 = vmatpush1.bf16.msra.mxu0 %v3590_v0  ;;  %v1860_v22 = vmax.f32 %v1796_v5, 0.0  ;;  %v3602_v0 = vld [vmem:[#allocation13 + $0x180] ss:$8 sps:$4 sm:$0xff]  }
 0x26a   : > { %v1863_v16 = vmax.f32 %v1799_v8, 0.0  ;;  %v1512_v17 = vadd.f32 %v1511_v12, %v4564_v24  ;;  %v1513_v20 = vpop.f32.mrb[17].mxu0  ;;  %2450 = vmatprep.subr.bf16.mxu0 %v3595_v4  ;;  %v3607_v4 = vld [vmem:[#allocation13 + $0x194] ss:$8 sps:$4 sm:$0xff]  }
 0x26b   : > { %v1864_v18 = vmax.f32 %v1800_v9, 0.0  ;;  %v1514_v19 = vadd.f32 %v1513_v20, %v4575_v38  ;;  %v1515_v30 = vpop.f32.mrb[18].mxu0 }
 0x26c   : > { %v1717_v31 = vmul.f32 %v4568_v25, %v1512_v17  ;;  %v1516_v48 = vadd.f32 %v1515_v30, %v4564_v24  ;;  %v1517_v50 = vpop.f32.mrb[19].mxu0  ;;  %v1911_v59 = vpack.c.bf16 %v1863_v16, %v1859_v15 }
 0x26d   : > { %v1718_v6 = vmul.f32 %v4572_v37, %v1514_v19  ;;  %v1518_v23 = vadd.f32 %v1517_v50, %v4575_v38  ;;  %v1912_v26 = vpack.c.bf16 %v1864_v18, %v1860_v22  ;;  %2451 = vmatpush1.bf16.msra.mxu0 %v3593_v14  ;;  %v3605_v14 = vld [vmem:[#allocation13 + $0x190] ss:$8 sps:$4 sm:$0xff]  }
 0x26e   : > { %v1803_v29 = vadd.f32 %v4580_v61, %v1717_v31  ;;  %v1721_v32 = vmul.f32 %v4568_v25, %v1516_v48  ;;  %2452 = vmatprep.subr.bf16.mxu0 %v3598_v21  ;;  %v3610_v21 = vld [vmem:[#allocation13 + $0x1a4] ss:$8 sps:$4 sm:$0xff]  }
 0x26f   : > { %v1804_v34 = vadd.f32 %v4585_v27, %v1718_v6  ;;  %v1722_v35 = vmul.f32 %v4572_v37, %v1518_v23  ;;  %2389 = vmatprep.mubr.bf16.mxu0 %v1912_v26 }
 0x270   : > { %v1807_v11 = vadd.f32 %v4580_v61, %v1721_v32  ;;  %2390 = vmatmul.mubr.bf16.gmra.mrb[44].mxu0 %v1911_v59  ;;  %v1867_v42 = vmax.f32 %v1803_v29, 0.0 }
 0x271   : > { %v1808_v39 = vadd.f32 %v4585_v27, %v1722_v35  ;;  %v1521_v41 = vpop.f32.mrb[20].mxu0  ;;  %2453 = vmatpush1.bf16.msra.mxu0 %v3596_v28  ;;  %v1868_v49 = vmax.f32 %v1804_v34, 0.0  ;;  %v3608_v28 = vld [vmem:[#allocation13 + $0x1a0] ss:$8 sps:$4 sm:$0xff]  }
 0x272   : > { %v1871_v43 = vmax.f32 %v1807_v11, 0.0  ;;  %v1522_v44 = vadd.f32 %v1521_v41, %v4564_v24  ;;  %v1523_v45 = vpop.f32.mrb[21].mxu0  ;;  %2454 = vmatprep.subr.bf16.mxu0 %v3601_v33  ;;  %v3613_v33 = vld [vmem:[#allocation13 + $0x1b4] ss:$8 sps:$4 sm:$0xff]  }
 0x273   : > { %v1872_v51 = vmax.f32 %v1808_v39, 0.0  ;;  %v1524_v52 = vadd.f32 %v1523_v45, %v4575_v38  ;;  %v1525_v53 = vpop.f32.mrb[22].mxu0 }
 0x274   : > { %v1725_v54 = vmul.f32 %v4568_v25, %v1522_v44  ;;  %v1526_v55 = vadd.f32 %v1525_v53, %v4564_v24  ;;  %v1527_v57 = vpop.f32.mrb[23].mxu0  ;;  %v1915_v58 = vpack.c.bf16 %v1871_v43, %v1867_v42 }
 0x275   : > { %v1726_v60 = vmul.f32 %v4572_v37, %v1524_v52  ;;  %v1528_v62 = vadd.f32 %v1527_v57, %v4575_v38  ;;  %v1916_v63 = vpack.c.bf16 %v1872_v51, %v1868_v49  ;;  %2455 = vmatpush1.bf16.msra.mxu0 %v3599_v56  ;;  %v3611_v56 = vld [vmem:[#allocation13 + $0x1b0] ss:$8 sps:$4 sm:$0xff]  }
 0x276   : > { %v1811_v1 = vadd.f32 %v4580_v61, %v1725_v54  ;;  %v1729_v2 = vmul.f32 %v4568_v25, %v1526_v55  ;;  %2456 = vmatprep.subr.bf16.mxu0 %v3604_v47  ;;  %v3616_v47 = vld [vmem:[#allocation13 + $0x1c4] ss:$8 sps:$4 sm:$0xff]  }
 0x277   : > { %v1812_v5 = vadd.f32 %v4585_v27, %v1726_v60  ;;  %v1730_v7 = vmul.f32 %v4572_v37, %v1528_v62  ;;  %2399 = vmatprep.mubr.bf16.mxu0 %v1916_v63 }
 0x278   : > { %v1815_v8 = vadd.f32 %v4580_v61, %v1729_v2  ;;  %2400 = vmatmul.mubr.bf16.gmra.mrb[48].mxu0 %v1915_v58  ;;  %v1875_v15 = vmax.f32 %v1811_v1, 0.0 }
 0x279   : > { %v1816_v9 = vadd.f32 %v4585_v27, %v1730_v7  ;;  %v1531_v12 = vpop.f32.mrb[24].mxu0  ;;  %2457 = vmatpush1.bf16.msra.mxu0 %v3602_v0  ;;  %v1876_v22 = vmax.f32 %v1812_v5, 0.0  ;;  %v3614_v0 = vld [vmem:[#allocation13 + $0x1c0] ss:$8 sps:$4 sm:$0xff]  }
 0x27a   : > { %v1879_v16 = vmax.f32 %v1815_v8, 0.0  ;;  %v1532_v17 = vadd.f32 %v1531_v12, %v4564_v24  ;;  %v1533_v20 = vpop.f32.mrb[25].mxu0  ;;  %2458 = vmatprep.subr.bf16.mxu0 %v3607_v4  ;;  %v3619_v4 = vld [vmem:[#allocation13 + $0x1d4] ss:$8 sps:$4 sm:$0xff]  }
 0x27b   : > { %v1880_v18 = vmax.f32 %v1816_v9, 0.0  ;;  %v1534_v19 = vadd.f32 %v1533_v20, %v4575_v38  ;;  %v1535_v30 = vpop.f32.mrb[26].mxu0  ;;  %v3617_v9 = vld [vmem:[#allocation13 + $0x1d0] ss:$8 sps:$4 sm:$0xff]  }
 0x27c   : > { %v1733_v31 = vmul.f32 %v4568_v25, %v1532_v17  ;;  %v1536_v48 = vadd.f32 %v1535_v30, %v4564_v24  ;;  %v1537_v50 = vpop.f32.mrb[27].mxu0  ;;  %v1919_v59 = vpack.c.bf16 %v1879_v16, %v1875_v15  ;;  %v1679_v30 = vsub.s32 3, %v4463_v40 }
 0x27d   : > { %v1734_v6 = vmul.f32 %v4572_v37, %v1534_v19  ;;  %v1538_v23 = vadd.f32 %v1537_v50, %v4575_v38  ;;  %v1920_v26 = vpack.c.bf16 %v1880_v18, %v1876_v22  ;;  %2459 = vmatpush1.bf16.msra.mxu0 %v3605_v14  ;;  %v3620_v18 = vld [vmem:[#allocation13 + $0x1e0] ss:$8 sps:$4 sm:$0xff]   ;;  %v1675_v19 = vsub.s32 2, %v4463_v40 }
 0x27e   : > { %v1819_v29 = vadd.f32 %v4580_v61, %v1733_v31  ;;  %v1737_v32 = vmul.f32 %v4568_v25, %v1536_v48  ;;  %2460 = vmatprep.subr.bf16.mxu0 %v3610_v21  ;;  %v4690_v50 = vrot.slane %v4559_v10, %v1679_v30 }
 0x27f   : > { %v1820_v34 = vadd.f32 %v4585_v27, %v1734_v6  ;;  %v1738_v35 = vmul.f32 %v4572_v37, %v1538_v23  ;;  %2409 = vmatprep.mubr.bf16.mxu0 %v1920_v26  ;;  %v4684_v31 = vrot.slane %v4559_v10, %v1675_v19  ;;  %v4696_v23 = vrot.slane %v4561_v13, %v1675_v19 }
 0x280   : > { %v1823_v11 = vadd.f32 %v4580_v61, %v1737_v32  ;;  %2410 = vmatmul.mubr.bf16.gmra.mrb[52].mxu0 %v1919_v59  ;;  %v1883_v42 = vmax.f32 %v1819_v29, 0.0  ;;  %v4700_v29 = vrot.slane %v4561_v13, %v1679_v30 }
 0x281   : > { %v1824_v39 = vadd.f32 %v4585_v27, %v1738_v35  ;;  %v1541_v41 = vpop.f32.mrb[28].mxu0  ;;  %2461 = vmatpush1.bf16.msra.mxu0 %v3608_v28  ;;  %v1884_v49 = vmax.f32 %v1820_v34, 0.0 }
 0x282   : > { %v1887_v43 = vmax.f32 %v1823_v11, 0.0  ;;  %v1542_v44 = vadd.f32 %v1541_v41, %v4564_v24  ;;  %v1543_v45 = vpop.f32.mrb[29].mxu0  ;;  %2462 = vmatprep.subr.bf16.mxu0 %v3613_v33 }
 0x283   : > { %v1888_v51 = vmax.f32 %v1824_v39, 0.0  ;;  %v1544_v52 = vadd.f32 %v1543_v45, %v4575_v38  ;;  %v1545_v53 = vpop.f32.mrb[30].mxu0 }
 0x284   : > { %v1741_v54 = vmul.f32 %v4568_v25, %v1542_v44  ;;  %v1546_v55 = vadd.f32 %v1545_v53, %v4564_v24  ;;  %v1547_v57 = vpop.f32.mrb[31].mxu0  ;;  %v1923_v58 = vpack.c.bf16 %v1887_v43, %v1883_v42 }
 0x285   : > { %v1742_v60 = vmul.f32 %v4572_v37, %v1544_v52  ;;  %v1548_v62 = vadd.f32 %v1547_v57, %v4575_v38  ;;  %v1924_v63 = vpack.c.bf16 %v1888_v51, %v1884_v49  ;;  %2463 = vmatpush1.bf16.msra.mxu0 %v3611_v56 }
 0x286   : > { %v1827_v1 = vadd.f32 %v4580_v61, %v1741_v54  ;;  %v1745_v2 = vmul.f32 %v4568_v25, %v1546_v55  ;;  %2464 = vmatprep.subr.bf16.mxu0 %v3616_v47  ;;  %v3622_v25 = vld [vmem:[#allocation13 + $0x1e4] ss:$8 sps:$4 sm:$0xff]  }
 0x287   : > { %v1828_v5 = vadd.f32 %v4585_v27, %v1742_v60  ;;  %v1746_v7 = vmul.f32 %v4572_v37, %v1548_v62  ;;  %2419 = vmatprep.mubr.bf16.mxu0 %v1924_v63 }
 0x288   : > { %v1831_v24 = vadd.f32 %v4580_v61, %v1745_v2  ;;  %2420 = vmatmul.mubr.bf16.gmra.mrb[56].mxu0 %v1923_v58  ;;  %v934_v38 = vpop.f32.mrb[4].mxu1  ;;  %v1891_v12 = vmax.f32 %v1827_v1, 0.0  ;;  %v3625_v61 = vld [vmem:[#allocation13 + $0x1f4] ss:$8 sps:$4 sm:$0xff]  }
 0x289   : > { %v1832_v8 = vadd.f32 %v4585_v27, %v1746_v7  ;;  %2465 = vmatpush1.bf16.msra.mxu0 %v3614_v0  ;;  %v936_v15 = vpop.f32.mrb[5].mxu1  ;;  %v1892_v16 = vmax.f32 %v1828_v5, 0.0  ;;  %v3623_v27 = vld [vmem:[#allocation13 + $0x1f0] ss:$8 sps:$4 sm:$0xff]   ;;  %v4687_v48 = vrot.slane %v934_v38, %v4476_v3 }
 0x28a   : > { %v1895_v14 = vmax.f32 %v1831_v24, 0.0  ;;  %2466 = vmatprep.subr.bf16.mxu0 %v3619_v4  ;;  %v938_v20 = vpop.f32.mrb[6].mxu1  ;;  %v4693_v59 = vrot.slane %v936_v15, %v4476_v3 }
 0x28b   : > { %v1896_v17 = vmax.f32 %v1832_v8, 0.0  ;;  %v939_v21 = vpop.f32.mrb[7].mxu1 }
 0x28c   : > { %v1927_v22 = vpack.c.bf16 %v1895_v14, %v1891_v12 }
 0x28d   : > { %v1928_v37 = vpack.c.bf16 %v1896_v17, %v1892_v16  ;;  %2467 = vmatpush1.bf16.msra.mxu0 %v3617_v9 }
 0x28e   : > { %2468 = vmatprep.subr.bf16.mxu0 %v3622_v25 }
 0x28f   : > { %2429 = vmatprep.mubr.bf16.mxu0 %v1928_v37 }
 0x290   : > { %2430 = vmatmul.mubr.bf16.gmra.mrb[60].mxu0 %v1927_v22 }
 0x291   : > { %2469 = vmatpush1.bf16.msra.mxu0 %v3620_v18 }
 0x292   : > { %2470 = vmatprep.subr.bf16.mxu0 %v3625_v61 }
 0x295   : > { %2471 = vmatpush1.bf16.msra.mxu0 %v3623_v27 }
 0x2c8   : > { %v1584_v6 = vpop.f32.mrb[8].mxu1 }
 0x2c9   : > { %v1585_v26 = vadd.f32 %v1584_v6, %v4687_v48  ;;  %v1586_v28 = vpop.f32.mrb[9].mxu1 }
 0x2ca   : > { %v1587_v32 = vadd.f32 %v1586_v28, %v4693_v59  ;;  %v1588_v33 = vpop.f32.mrb[10].mxu1 }
 0x2cb   : > { %v1687_v34 = vmul.f32 %v4684_v31, %v1585_v26  ;;  %v1589_v10 = vadd.f32 %v1588_v33, %v4687_v48  ;;  %v1590_v35 = vpop.f32.mrb[11].mxu1 }
 0x2cc   : > { %v1688_v11 = vmul.f32 %v4690_v50, %v1587_v32  ;;  %v1591_v39 = vadd.f32 %v1590_v35, %v4693_v59 }
 0x2cd   : > { %v1773_v41 = vadd.f32 %v4696_v23, %v1687_v34  ;;  %v1691_v56 = vmul.f32 %v4684_v31, %v1589_v10 }
 0x2ce   : > { %v1774_v42 = vadd.f32 %v4700_v29, %v1688_v11  ;;  %v1692_v13 = vmul.f32 %v4690_v50, %v1591_v39 }
 0x2cf   : > { %v1777_v43 = vadd.f32 %v4696_v23, %v1691_v56  ;;  %v1837_v47 = vmax.f32 %v1773_v41, 0.0 }
 0x2d0   : > { %v1778_v44 = vadd.f32 %v4700_v29, %v1692_v13  ;;  %v1594_v45 = vpop.f32.mrb[12].mxu1  ;;  %v1838_v53 = vmax.f32 %v1774_v42, 0.0 }
 0x2d1   : > { %v1841_v49 = vmax.f32 %v1777_v43, 0.0  ;;  %v1595_v51 = vadd.f32 %v1594_v45, %v4687_v48  ;;  %v1596_v52 = vpop.f32.mrb[13].mxu1 }
 0x2d2   : > { %v1842_v54 = vmax.f32 %v1778_v44, 0.0  ;;  %v1597_v55 = vadd.f32 %v1596_v52, %v4693_v59  ;;  %v1598_v57 = vpop.f32.mrb[14].mxu1 }
 0x2d3   : > { %v1901_v58 = vpack.c.bf16 %v1841_v49, %v1837_v47  ;;  %v1695_v60 = vmul.f32 %v4684_v31, %v1595_v51  ;;  %v1599_v62 = vadd.f32 %v1598_v57, %v4687_v48  ;;  %v1600_v63 = vpop.f32.mrb[15].mxu1 }
 0x2d4   : > { %v1696_v0 = vmul.f32 %v4690_v50, %v1597_v55  ;;  %v1601_v1 = vadd.f32 %v1600_v63, %v4693_v59  ;;  %v1902_v2 = vpack.c.bf16 %v1842_v54, %v1838_v53 }
 0x2d5   : > { %v1781_v4 = vadd.f32 %v4696_v23, %v1695_v60  ;;  %v1699_v5 = vmul.f32 %v4684_v31, %v1599_v62 }
 0x2d6   : > { %v1782_v7 = vadd.f32 %v4700_v29, %v1696_v0  ;;  %v1700_v24 = vmul.f32 %v4690_v50, %v1601_v1  ;;  %2472 = vmatprep.mubr.bf16.mxu0 %v1902_v2 }
 0x2d7   : > { %v1785_v8 = vadd.f32 %v4696_v23, %v1699_v5  ;;  %2473 = vmatmul.mubr.bf16.vlgmr.msra.gmra.mrb[32].mxu0 %v1901_v58  ;;  %v1845_v12 = vmax.f32 %v1781_v4, 0.0 }
 0x2d8   : > { %v1786_v38 = vadd.f32 %v4700_v29, %v1700_v24  ;;  %v1604_v9 = vpop.f32.mrb[16].mxu1  ;;  %v1846_v16 = vmax.f32 %v1782_v7, 0.0 }
 0x2d9   : > { %v1849_v14 = vmax.f32 %v1785_v8, 0.0  ;;  %v1605_v15 = vadd.f32 %v1604_v9, %v4687_v48  ;;  %v1606_v25 = vpop.f32.mrb[17].mxu1 }
 0x2da   : > { %v1850_v17 = vmax.f32 %v1786_v38, 0.0  ;;  %v1607_v20 = vadd.f32 %v1606_v25, %v4693_v59  ;;  %v1608_v21 = vpop.f32.mrb[18].mxu1 }
 0x2db   : > { %v1703_v22 = vmul.f32 %v4684_v31, %v1605_v15  ;;  %v1609_v37 = vadd.f32 %v1608_v21, %v4687_v48  ;;  %v1610_v18 = vpop.f32.mrb[19].mxu1  ;;  %v1905_v61 = vpack.c.bf16 %v1849_v14, %v1845_v12 }
 0x2dc   : > { %v1704_v27 = vmul.f32 %v4690_v50, %v1607_v20  ;;  %v1611_v19 = vadd.f32 %v1610_v18, %v4693_v59  ;;  %v1906_v30 = vpack.c.bf16 %v1850_v17, %v1846_v16 }
 0x2dd   : > { %v1789_v6 = vadd.f32 %v4696_v23, %v1703_v22  ;;  %v1707_v26 = vmul.f32 %v4684_v31, %v1609_v37 }
 0x2de   : > { %v1790_v28 = vadd.f32 %v4700_v29, %v1704_v27  ;;  %v1708_v32 = vmul.f32 %v4690_v50, %v1611_v19  ;;  %2482 = vmatprep.mubr.bf16.mxu0 %v1906_v30 }
 0x2df   : > { %v1793_v33 = vadd.f32 %v4696_v23, %v1707_v26  ;;  %2483 = vmatmul.mubr.bf16.gmra.mrb[36].mxu0 %v1905_v61  ;;  %v1853_v35 = vmax.f32 %v1789_v6, 0.0 }
 0x2e0   : > { %v1794_v34 = vadd.f32 %v4700_v29, %v1708_v32  ;;  %v1614_v10 = vpop.f32.mrb[20].mxu1  ;;  %v1854_v56 = vmax.f32 %v1790_v28, 0.0 }
 0x2e1   : > { %v1857_v11 = vmax.f32 %v1793_v33, 0.0  ;;  %v1615_v39 = vadd.f32 %v1614_v10, %v4687_v48  ;;  %v1616_v41 = vpop.f32.mrb[21].mxu1 }
 0x2e2   : > { %v1858_v42 = vmax.f32 %v1794_v34, 0.0  ;;  %v1617_v13 = vadd.f32 %v1616_v41, %v4693_v59  ;;  %v1618_v43 = vpop.f32.mrb[22].mxu1 }
 0x2e3   : > { %v1711_v44 = vmul.f32 %v4684_v31, %v1615_v39  ;;  %v1619_v45 = vadd.f32 %v1618_v43, %v4687_v48  ;;  %v1620_v47 = vpop.f32.mrb[23].mxu1  ;;  %v1909_v49 = vpack.c.bf16 %v1857_v11, %v1853_v35 }
 0x2e4   : > { %v1712_v51 = vmul.f32 %v4690_v50, %v1617_v13  ;;  %v1621_v52 = vadd.f32 %v1620_v47, %v4693_v59  ;;  %v1910_v53 = vpack.c.bf16 %v1858_v42, %v1854_v56 }
 0x2e5   : > { %v1797_v54 = vadd.f32 %v4696_v23, %v1711_v44  ;;  %v1715_v55 = vmul.f32 %v4684_v31, %v1619_v45 }
 0x2e6   : > { %v1798_v57 = vadd.f32 %v4700_v29, %v1712_v51  ;;  %v1716_v58 = vmul.f32 %v4690_v50, %v1621_v52  ;;  %2492 = vmatprep.mubr.bf16.mxu0 %v1910_v53 }
 0x2e7   : > { %v1801_v60 = vadd.f32 %v4696_v23, %v1715_v55  ;;  %2493 = vmatmul.mubr.bf16.gmra.mrb[40].mxu0 %v1909_v49  ;;  %v1861_v0 = vmax.f32 %v1797_v54, 0.0 }
 0x2e8   : > { %v1802_v62 = vadd.f32 %v4700_v29, %v1716_v58  ;;  %v1624_v63 = vpop.f32.mrb[24].mxu1  ;;  %v1862_v5 = vmax.f32 %v1798_v57, 0.0 }
 0x2e9   : > { %v1865_v1 = vmax.f32 %v1801_v60, 0.0  ;;  %v1625_v2 = vadd.f32 %v1624_v63, %v4687_v48  ;;  %v1626_v4 = vpop.f32.mrb[25].mxu1 }
 0x2ea   : > { %v1866_v7 = vmax.f32 %v1802_v62, 0.0  ;;  %v1627_v24 = vadd.f32 %v1626_v4, %v4693_v59  ;;  %v1628_v8 = vpop.f32.mrb[26].mxu1 }
 0x2eb   : > { %v1719_v38 = vmul.f32 %v4684_v31, %v1625_v2  ;;  %v1629_v9 = vadd.f32 %v1628_v8, %v4687_v48  ;;  %v1630_v12 = vpop.f32.mrb[27].mxu1  ;;  %v1913_v14 = vpack.c.bf16 %v1865_v1, %v1861_v0 }
 0x2ec   : > { %v1720_v15 = vmul.f32 %v4690_v50, %v1627_v24  ;;  %v1631_v25 = vadd.f32 %v1630_v12, %v4693_v59  ;;  %v1914_v16 = vpack.c.bf16 %v1866_v7, %v1862_v5 }
 0x2ed   : > { %v1805_v17 = vadd.f32 %v4696_v23, %v1719_v38  ;;  %v1723_v20 = vmul.f32 %v4684_v31, %v1629_v9 }
 0x2ee   : > { %v1806_v21 = vadd.f32 %v4700_v29, %v1720_v15  ;;  %v1724_v22 = vmul.f32 %v4690_v50, %v1631_v25  ;;  %2502 = vmatprep.mubr.bf16.mxu0 %v1914_v16 }
 0x2ef   : > { %v1809_v37 = vadd.f32 %v4696_v23, %v1723_v20  ;;  %2503 = vmatmul.mubr.bf16.gmra.mrb[44].mxu0 %v1913_v14  ;;  %v1869_v27 = vmax.f32 %v1805_v17, 0.0 }
 0x2f0   : > { %v1810_v18 = vadd.f32 %v4700_v29, %v1724_v22  ;;  %v1634_v61 = vpop.f32.mrb[28].mxu1  ;;  %v1870_v26 = vmax.f32 %v1806_v21, 0.0 }
 0x2f1   : > { %v1873_v19 = vmax.f32 %v1809_v37, 0.0  ;;  %v1635_v30 = vadd.f32 %v1634_v61, %v4687_v48  ;;  %v1636_v6 = vpop.f32.mrb[29].mxu1 }
 0x2f2   : > { %v1874_v28 = vmax.f32 %v1810_v18, 0.0  ;;  %v1637_v32 = vadd.f32 %v1636_v6, %v4693_v59  ;;  %v1638_v33 = vpop.f32.mrb[30].mxu1 }
 0x2f3   : > { %v1727_v34 = vmul.f32 %v4684_v31, %v1635_v30  ;;  %v1639_v10 = vadd.f32 %v1638_v33, %v4687_v48  ;;  %v1640_v35 = vpop.f32.mrb[31].mxu1  ;;  %v1917_v11 = vpack.c.bf16 %v1873_v19, %v1869_v27 }
 0x2f4   : > { %v1728_v39 = vmul.f32 %v4690_v50, %v1637_v32  ;;  %v1641_v41 = vadd.f32 %v1640_v35, %v4693_v59  ;;  %v1918_v56 = vpack.c.bf16 %v1874_v28, %v1870_v26 }
 0x2f5   : > { %v1813_v42 = vadd.f32 %v4696_v23, %v1727_v34  ;;  %v1731_v13 = vmul.f32 %v4684_v31, %v1639_v10 }
 0x2f6   : > { %v1814_v43 = vadd.f32 %v4700_v29, %v1728_v39  ;;  %v1732_v44 = vmul.f32 %v4690_v50, %v1641_v41  ;;  %2512 = vmatprep.mubr.bf16.mxu0 %v1918_v56 }
 0x2f7   : > { %v1817_v45 = vadd.f32 %v4696_v23, %v1731_v13  ;;  %2513 = vmatmul.mubr.bf16.gmra.mrb[48].mxu0 %v1917_v11  ;;  %v1877_v51 = vmax.f32 %v1813_v42, 0.0  ;;  %v1995_v42 = vld [vmem:[#allocation14] sm:$0x3] }
 0x2f8   : > { %v1818_v47 = vadd.f32 %v4700_v29, %v1732_v44  ;;  %v1644_v49 = vpop.f32.mrb[32].mxu1  ;;  %v1878_v55 = vmax.f32 %v1814_v43, 0.0 }
 0x2f9   : > { %v1881_v52 = vmax.f32 %v1817_v45, 0.0  ;;  %v1645_v53 = vadd.f32 %v1644_v49, %v4687_v48  ;;  %v1646_v54 = vpop.f32.mrb[33].mxu1  ;;  %v4803_v45 = vrot.slane %v1995_v42, %v4476_v3 }
 0x2fa   : > { %v1882_v57 = vmax.f32 %v1818_v47, 0.0  ;;  %v1647_v58 = vadd.f32 %v1646_v54, %v4693_v59  ;;  %v1648_v60 = vpop.f32.mrb[34].mxu1 }
 0x2fb   : > { %v1735_v62 = vmul.f32 %v4684_v31, %v1645_v53  ;;  %v1649_v63 = vadd.f32 %v1648_v60, %v4687_v48  ;;  %v1650_v0 = vpop.f32.mrb[35].mxu1  ;;  %v1921_v1 = vpack.c.bf16 %v1881_v52, %v1877_v51 }
 0x2fc   : > { %v1736_v2 = vmul.f32 %v4690_v50, %v1647_v58  ;;  %v1651_v4 = vadd.f32 %v1650_v0, %v4693_v59  ;;  %v1922_v5 = vpack.c.bf16 %v1882_v57, %v1878_v55 }
 0x2fd   : > { %v1821_v7 = vadd.f32 %v4696_v23, %v1735_v62  ;;  %v1739_v24 = vmul.f32 %v4684_v31, %v1649_v63 }
 0x2fe   : > { %v1822_v8 = vadd.f32 %v4700_v29, %v1736_v2  ;;  %v1740_v38 = vmul.f32 %v4690_v50, %v1651_v4  ;;  %2522 = vmatprep.mubr.bf16.mxu0 %v1922_v5 }
 0x2ff   : > { %v1825_v9 = vadd.f32 %v4696_v23, %v1739_v24  ;;  %2523 = vmatmul.mubr.bf16.gmra.mrb[52].mxu0 %v1921_v1  ;;  %v1885_v15 = vmax.f32 %v1821_v7, 0.0 }
 0x300   : > { %v1826_v12 = vadd.f32 %v4700_v29, %v1740_v38  ;;  %v1654_v14 = vpop.f32.mrb[36].mxu1  ;;  %v1886_v20 = vmax.f32 %v1822_v8, 0.0 }
 0x301   : > { %v1889_v25 = vmax.f32 %v1825_v9, 0.0  ;;  %v1655_v16 = vadd.f32 %v1654_v14, %v4687_v48  ;;  %v1656_v17 = vpop.f32.mrb[37].mxu1 }
 0x302   : > { %v1890_v21 = vmax.f32 %v1826_v12, 0.0  ;;  %v1657_v22 = vadd.f32 %v1656_v17, %v4693_v59  ;;  %v1658_v37 = vpop.f32.mrb[38].mxu1 }
 0x303   : > { %v1743_v18 = vmul.f32 %v4684_v31, %v1655_v16  ;;  %v1659_v61 = vadd.f32 %v1658_v37, %v4687_v48  ;;  %v1660_v27 = vpop.f32.mrb[39].mxu1  ;;  %v1925_v19 = vpack.c.bf16 %v1889_v25, %v1885_v15 }
 0x304   : > { %v1744_v30 = vmul.f32 %v4690_v50, %v1657_v22  ;;  %v1661_v6 = vadd.f32 %v1660_v27, %v4693_v59  ;;  %v1926_v26 = vpack.c.bf16 %v1890_v21, %v1886_v20 }
 0x305   : > { %v1829_v28 = vadd.f32 %v4696_v23, %v1743_v18  ;;  %v1747_v32 = vmul.f32 %v4684_v31, %v1659_v61  ;;  %v4798_v31 = vrot.slane %v1995_v42, %v4466_v46 }
 0x306   : > { %v1830_v33 = vadd.f32 %v4700_v29, %v1744_v30  ;;  %v1748_v34 = vmul.f32 %v4690_v50, %v1661_v6  ;;  %2532 = vmatprep.mubr.bf16.mxu0 %v1926_v26 }
 0x307   : > { %v1833_v10 = vadd.f32 %v4696_v23, %v1747_v32  ;;  %2533 = vmatmul.mubr.bf16.gmra.mrb[56].mxu0 %v1925_v19  ;;  %v1893_v35 = vmax.f32 %v1829_v28, 0.0 }
 0x308   : > { %v1834_v48 = vadd.f32 %v4700_v29, %v1748_v34  ;;  %v1894_v39 = vmax.f32 %v1830_v33, 0.0 }
 0x309   : > { %v1897_v11 = vmax.f32 %v1833_v10, 0.0 }
 0x30a   : > { %v1898_v41 = vmax.f32 %v1834_v48, 0.0 }
 0x30b   : > { %v1929_v59 = vpack.c.bf16 %v1897_v11, %v1893_v35 }
 0x30c   : > { %v1930_v56 = vpack.c.bf16 %v1898_v41, %v1894_v39 }
 0x30e   : > { %2542 = vmatprep.mubr.bf16.mxu0 %v1930_v56 }
 0x30f   : > { %2543 = vmatmul.mubr.bf16.gmra.mrb[60].mxu0 %v1929_v59 }
 0x3aa   : > { %v2474_v13 = vpop.f32.mrb[32].mxu0 }
 0x3ab   : > { %v2476_v50 = vpop.f32.mrb[33].mxu0  ;;  %v3076_v49 = vadd.f32 %v2474_v13, %v4803_v45 }
 0x3ac   : > { %v3077_v43 = vadd.f32 %v2476_v50, %v4798_v31  ;;  %v2478_v23 = vpop.f32.mrb[34].mxu0 }
 0x3ad   : > { %v2480_v44 = vpop.f32.mrb[35].mxu0  ;;  %v3078_v54 = vadd.f32 %v2478_v23, %v4803_v45 }
 0x3ae   : > { %v3079_v29 = vadd.f32 %v2480_v44, %v4798_v31 }
 0x3b2   : > { %v2484_v47 = vpop.f32.mrb[36].mxu0 }
 0x3b3   : > { %v3080_v51 = vadd.f32 %v2484_v47, %v4803_v45  ;;  %v2486_v52 = vpop.f32.mrb[37].mxu0 }
 0x3b4   : > { %v3081_v46 = vadd.f32 %v2486_v52, %v4798_v31  ;;  %v2488_v53 = vpop.f32.mrb[38].mxu0 }
 0x3b5   : > { %v2553_v55 = vmax.f32 %v3076_v49, %v3080_v51  ;;  %v3082_v57 = vadd.f32 %v2488_v53, %v4803_v45  ;;  %v2490_v58 = vpop.f32.mrb[39].mxu0 }
 0x3b6   : > { %v2574_v60 = vmax.f32 %v3077_v43, %v3081_v46  ;;  %v3083_v62 = vadd.f32 %v2490_v58, %v4798_v31 }
 0x3b7   : > { %v2554_v3 = vmax.f32 %v3078_v54, %v3082_v57 }
 0x3b8   : > { %v2575_v63 = vmax.f32 %v3079_v29, %v3083_v62 }
 0x3ba   : > { %v2494_v0 = vpop.f32.mrb[40].mxu0 }
 0x3bb   : > { %v3084_v1 = vadd.f32 %v2494_v0, %v4803_v45  ;;  %v2496_v2 = vpop.f32.mrb[41].mxu0 }
 0x3bc   : > { %v3085_v4 = vadd.f32 %v2496_v2, %v4798_v31  ;;  %v2498_v5 = vpop.f32.mrb[42].mxu0 }
 0x3bd   : > { %v2555_v7 = vmax.f32 %v2553_v55, %v3084_v1  ;;  %v3086_v24 = vadd.f32 %v2498_v5, %v4803_v45  ;;  %v2500_v8 = vpop.f32.mrb[43].mxu0 }
 0x3be   : > { %v2576_v38 = vmax.f32 %v2574_v60, %v3085_v4  ;;  %v3087_v9 = vadd.f32 %v2500_v8, %v4798_v31 }
 0x3bf   : > { %v2556_v12 = vmax.f32 %v2554_v3, %v3086_v24 }
 0x3c0   : > { %v2577_v14 = vmax.f32 %v2575_v63, %v3087_v9 }
 0x3c2   : > { %v2504_v15 = vpop.f32.mrb[44].mxu0 }
 0x3c3   : > { %v3088_v25 = vadd.f32 %v2504_v15, %v4803_v45  ;;  %v2506_v16 = vpop.f32.mrb[45].mxu0 }
 0x3c4   : > { %v3089_v17 = vadd.f32 %v2506_v16, %v4798_v31  ;;  %v2508_v20 = vpop.f32.mrb[46].mxu0 }
 0x3c5   : > { %v2557_v21 = vmax.f32 %v2555_v7, %v3088_v25  ;;  %v3090_v22 = vadd.f32 %v2508_v20, %v4803_v45  ;;  %v2510_v37 = vpop.f32.mrb[47].mxu0 }
 0x3c6   : > { %v2578_v18 = vmax.f32 %v2576_v38, %v3089_v17  ;;  %v3091_v61 = vadd.f32 %v2510_v37, %v4798_v31 }
 0x3c7   : > { %v2558_v27 = vmax.f32 %v2556_v12, %v3090_v22 }
 0x3c8   : > { %v2579_v19 = vmax.f32 %v2577_v14, %v3091_v61 }
 0x3ca   : > { %v2514_v30 = vpop.f32.mrb[48].mxu0 }
 0x3cb   : > { %v3092_v6 = vadd.f32 %v2514_v30, %v4803_v45  ;;  %v2516_v26 = vpop.f32.mrb[49].mxu0 }
 0x3cc   : > { %v3093_v28 = vadd.f32 %v2516_v26, %v4798_v31  ;;  %v2518_v32 = vpop.f32.mrb[50].mxu0 }
 0x3cd   : > { %v2559_v33 = vmax.f32 %v2557_v21, %v3092_v6  ;;  %v3094_v34 = vadd.f32 %v2518_v32, %v4803_v45  ;;  %v2520_v10 = vpop.f32.mrb[51].mxu0 }
 0x3ce   : > { %v2580_v48 = vmax.f32 %v2578_v18, %v3093_v28  ;;  %v3095_v35 = vadd.f32 %v2520_v10, %v4798_v31 }
 0x3cf   : > { %v2560_v11 = vmax.f32 %v2558_v27, %v3094_v34 }
 0x3d0   : > { %v2581_v39 = vmax.f32 %v2579_v19, %v3095_v35 }
 0x3d2   : > { %v2524_v41 = vpop.f32.mrb[52].mxu0 }
 0x3d3   : > { %v3096_v59 = vadd.f32 %v2524_v41, %v4803_v45  ;;  %v2526_v56 = vpop.f32.mrb[53].mxu0 }
 0x3d4   : > { %v3097_v42 = vadd.f32 %v2526_v56, %v4798_v31  ;;  %v2528_v13 = vpop.f32.mrb[54].mxu0 }
 0x3d5   : > { %v2561_v50 = vmax.f32 %v2559_v33, %v3096_v59  ;;  %v3098_v43 = vadd.f32 %v2528_v13, %v4803_v45  ;;  %v2530_v23 = vpop.f32.mrb[55].mxu0 }
 0x3d6   : > { %v2582_v44 = vmax.f32 %v2580_v48, %v3097_v42  ;;  %v3099_v29 = vadd.f32 %v2530_v23, %v4798_v31 }
 0x3d7   : > { %v2562_v47 = vmax.f32 %v2560_v11, %v3098_v43 }
 0x3d8   : > { %v2583_v49 = vmax.f32 %v2581_v39, %v3099_v29 }
 0x3da   : > { %v2534_v51 = vpop.f32.mrb[56].mxu0 }
 0x3db   : > { %v3100_v52 = vadd.f32 %v2534_v51, %v4803_v45  ;;  %v2536_v46 = vpop.f32.mrb[57].mxu0 }
 0x3dc   : > { %v3101_v53 = vadd.f32 %v2536_v46, %v4798_v31  ;;  %v2538_v54 = vpop.f32.mrb[58].mxu0 }
 0x3dd   : > { %v2563_v55 = vmax.f32 %v2561_v50, %v3100_v52  ;;  %v3102_v57 = vadd.f32 %v2538_v54, %v4803_v45  ;;  %v2540_v58 = vpop.f32.mrb[59].mxu0 }
 0x3de   : > { %v2584_v60 = vmax.f32 %v2582_v44, %v3101_v53  ;;  %v3103_v62 = vadd.f32 %v2540_v58, %v4798_v31 }
 0x3df   : > { %v2564_v3 = vmax.f32 %v2562_v47, %v3102_v57 }
 0x3e0   : > { %v2585_v63 = vmax.f32 %v2583_v49, %v3103_v62 }
 0x3e2   : > { %v2544_v0 = vpop.f32.mrb[60].mxu0 }
 0x3e3   : > { %v3104_v1 = vadd.f32 %v2544_v0, %v4803_v45  ;;  %v2546_v2 = vpop.f32.mrb[61].mxu0 }
 0x3e4   : > { %v3105_v4 = vadd.f32 %v2546_v2, %v4798_v31  ;;  %v2548_v5 = vpop.f32.mrb[62].mxu0 }
 0x3e5   : > { %v2565_v7 = vmax.f32 %v2563_v55, %v3104_v1  ;;  %v3106_v24 = vadd.f32 %v2548_v5, %v4803_v45  ;;  %v2550_v8 = vpop.f32.mrb[63].mxu0 }
 0x3e6   : > { %v2586_v38 = vmax.f32 %v2584_v60, %v3105_v4  ;;  %v3107_v9 = vadd.f32 %v2550_v8, %v4798_v31  ;;  %v4010_v31 = vmov (!%p3066_p4), 1966171168  }
 0x3e7   : > { %v2566_v12 = vmax.f32 %v2564_v3, %v3106_v24  ;;  %v2603_v6 = vunpack.c.l.s4 (!%p3066_p4), %v4010_v31 }
 0x3e8   : > { %v2587_v14 = vmax.f32 %v2585_v63, %v3107_v9 }
 0x3e9   : > { %v2567_v15 = vmax.f32 %v2565_v7, %v2566_v12  ;;  %v2604_v28 = vunpack.c.0.s8 (!%p3066_p4), %v2603_v6 }
 0x3ea   : > { %v2588_v25 = vmax.f32 %v2586_v38, %v2587_v14 }
 0x3eb   : > { %v2568_v16 = vrot.slane %v2567_v15, 4  ;;  %v2607_v32 = vsub.s32 (!%p3066_p4), %v2604_v28, %v4463_v40 }
 0x3ec   : > { %v2589_v17 = vrot.slane %v2588_v25, 4 }
 0x3ed   : > { %v2569_v20 = vmax.f32 %v2567_v15, %v2568_v16 }
 0x3ee   : > { %v2590_v21 = vmax.f32 %v2588_v25, %v2589_v17 }
 0x3ef   : > { %v2570_v22 = vrot.slane %v2569_v20, 2 }
 0x3f0   : > { %v2591_v37 = vrot.slane %v2590_v21, 2  ;;  %2598 = sbr.rel (%p3066_p4) target bundleno = 1023 (0x3ff), region = 88 }
 0x3f1   : > { %v2571_v18 = vmax.f32 %v2569_v20, %v2570_v22 }
 0x3f2   : > { %v2592_v61 = vmax.f32 %v2590_v21, %v2591_v37 }
 0x3f3   : > { %v2572_v27 = vrot.slane %v2571_v18, 1 }
 0x3f4   : > { %v2593_v19 = vrot.slane %v2592_v61, 1 }
 0x3f5   : > { %v2573_v45 = vmax.f32 %v2571_v18, %v2572_v27 }
 0x3f6   : > { %v2594_v30 = vmax.f32 %v2592_v61, %v2593_v19 }
 0x3f8   : > { %v2601_v26 = vcombine.low %v2573_v45, %v2594_v30 }
 0x3fa   : > { %v2608_v33 = vrot.slane %v2601_v26, %v2607_v32 }
 0x3fc   : > { %v2615_v34 = vrot.slane %v2608_v33, %v2607_v32 }
 0x3fe   : > { %2621 = vst.msk [vmem:[%s4836_s0] sm:$0x3] %vm2619_vm0, %v2615_v34 }
 0x3ff PF: > { %s4983_s26 = sld [smem:[#allocation26_spill]] }
 0x405   : > { %p3067_p10 = scmp.le.s32.totalorder %s4983_s26, 0 }
 0x406   : > { %v4011_v10 = vmov (!%p3067_p10), 1966171168   ;;  %v2629_v35 = vcombine.low (!%p3067_p10), %v2573_v45, %v2594_v30  ;;  %v2626_v59 = vld [vmem:[%s4836_s0] sm:$0x3] (!%p3067_p10)  ;;  %vm2648_vm1 = vcmp.lt.s32.totalorder (!%p3067_p10), %v463_v36, 256 }
 0x407   : > { %2625 = sbr.rel (%p3067_p10) target bundleno = 1044 (0x414), region = 92  ;;  %v2631_v48 = vunpack.c.l.s4 (!%p3067_p10), %v4011_v10 }
 0x409   : > { %v2632_v11 = vunpack.c.0.s8 (!%p3067_p10), %v2631_v48 }
 0x40b   : > { %v2635_v39 = vsub.s32 (!%p3067_p10), %v2632_v11, %v4463_v40 }
 0x40d   : > { %v2636_v41 = vrot.slane (!%p3067_p10), %v2629_v35, %v2635_v39 }
 0x40f   : > { %v2643_v56 = vrot.slane %v2636_v41, %v2635_v39 }
 0x411   : > { %v2645_v42 = vmax.f32 %v2626_v59, %v2643_v56 }
 0x413   : > { %2650 = vst.msk [vmem:[%s4836_s0] sm:$0x3] %vm2648_vm1, %v2645_v42 }
 0x414 PF: > { %s4984_s25 = sld [smem:[#allocation27_spill]]  ;;  %s4986_s30 = sld [smem:[#allocation35_spill]] }
 0x415   : > { %s2666_s27 = sshll.u32 %s4836_s0, 4  ;;  %s2652_s4 = scalar_lea.sflag [#allocation4], %s396_s12  ;;  %s2667_s27 = int_to_ptr.vmem [resolvable:$true] %s2666_s27 }
 0x416   : > { %s3854_s23 = scalar_lea.vmem %s2667_s27, 32  ;;  %p4988_p6 = scmp.ne.s32.totalorder %s4965_s1, 0 }
 0x417   : > { %p3855_p0 = scmp.ne.s32.totalorder %s2667_s27, %s3854_s23  ;;  %s4012_s16 = smov [#allocation16]  }
 0x418   : > { %s3858_s26 = sshll.u32 %s4012_s16, 4  ;;  %s3859_s26 = int_to_ptr.vmem [resolvable:$false] %s3858_s26 }
 0x419   : > { %p3856_p11 = pnand %p3855_p0, %p4988_p6  ;;  %s3860_s5 = scalar_lea.vmem %s3859_s26, 64 }
 0x41a   : > { %s3075_s24 = sshll.u32 %s4984_s25, 5  ;;  %s4987_s19 = smov %s4986_s30 }
 0x41b   : > { %s4851_s2 = scalar_lea.hbm %s4986_s30, %s3075_s24  ;;  %p3857_p7 = pneg %p3856_p11 }
 0x41c   : > { %p3861_p8 = scmp.lt.s32.totalorder %s2667_s27, %s3859_s26  ;;  %p3862_p2 = scmp.lt.s32.totalorder %s3860_s5, %s3854_s23 }
 0x41e   : > { %p3863_p12 = por %p3862_p2, %p3861_p8 }
 0x420   : > { %p3864_p13 = pnand %p3863_p12, %p3857_p7 }
 0x422   : > { %3867 = shalt.err (!%p3864_p13)
}
 0x423   : > { %s3868_s12 = scalar_lea.hbm %s4851_s2, 32  ;;  %s3872_s22 = scalar_lea.hbm %s4987_s19, 64 }
 0x424   : > { %p3869_p1 = scmp.ne.s32.totalorder %s4851_s2, %s3868_s12  ;;  %p3873_p3 = scmp.lt.u32.totalorder %s4851_s2, %s4987_s19 }
 0x425   : > { %p3874_p4 = scmp.lt.u32.totalorder %s3872_s22, %s3868_s12  ;;  %p3876_p0 = scmp.lt.u32.totalorder %s3868_s12, %s4851_s2 }
 0x426   : > { %p3870_p9 = pnand %p3869_p1, %p4988_p6 }
 0x427   : > { %p3875_p10 = por %p3874_p4, %p3873_p3 }
 0x428   : > { %p3871_p5 = pneg %p3870_p9 }
 0x429   : > { %p3877_p11 = por %p3876_p0, %p3875_p10 }
 0x42b   : > { %p3878_p7 = pnand %p3877_p11, %p3871_p5 }
 0x42d   : > { %3881 = shalt.err (!%p3878_p7)
}
 0x42e   : > { %3168 = dma.vmem_to_hbm [thread:$0]  (%p4988_p6), %s2667_s27, 32, %s4851_s2, %s2652_s4  }
 0x42f PF: > { %s4989_s5 = sld [smem:[#allocation24_spill]]  ;;  %p3213_p8 = scmp.ge.s32.totalorder %s3996_s15, 2 }
 0x430   : > { %p4990_p2 = scmp.ne.s32.totalorder %s4966_s18, 0 }
 0x432   : > { %p3197_p12 = pnand %p3213_p8, %p4990_p2 }
 0x435   : > { %s2678_s3 = sand.u32 1, %s4989_s5  }
 0x436   : > { %s2679_s30 = scalar_lea.sflag [#allocation4], %s2678_s3 }
 0x437   : > { %3951 = dma.done.wait (!%p3197_p12), %s2679_s30, 32  }
 0x438   : > { %3953 = vsyncadd (!%p3197_p12), %s2679_s30, 4294967264  ;;  %s30_s15 = sadd.s32 1, %s3996_s15   ;;  %s4991_s27 = sld [smem:[#allocation25_spill]] }
 0x439   : > { %p27_p13 = scmp.ge.s32.totalorder %s30_s15, 6   ;;  %s4992_s1 = smov %s4303_s28 }
 0x43a   : > { %s4993_s2 = smov %s5004_s11  ;;  %s4994_s28 = smov %s3964_s29 }
 0x43b   : > { %s4995_s29 = smov %s4358_s17  ;;  %s4996_s30 = smov %s3972_s9 }
 0x43c   : > { %s4997_s9 = smov %s3976_s10  ;;  %s4998_s10 = smov %s4992_s1 }
 0x43d   : > { %s4999_s11 = smov %s3988_s13  ;;  %s5000_s12 = smov %s3992_s14 }
 0x43e   : > { %s5001_s13 = smov %s4993_s2  ;;  %s5002_s14 = smov %s5008_s20 }
 0x43f   :  { %29 = sbr.rel (!%p27_p13) target bundleno = 22 (0x16), region = 142 }
 0x446   :  { %2684 = vsyncpa [#allocation3], 1 }
 0x447   :  { %2686 = vsyncpa [#allocation3 + $0x1], 1 }
 0x448   :  { %2687 = vsyncpa [#allocation6], 1 }
 0x449   :  { %2689 = vsyncpa [#allocation6 + $0x1], 1 }
 0x44a   :  { %2690 = vsyncpa [#allocation9], 1 }
 0x44b   :  { %2691 = vsyncpa [#allocation12], 1 }
 0x44c   :  { %2692 = vsyncpa [#allocation15], 1 }
 0x44d   :  { %2693 = vsyncpa [#allocation4], 1 }
 0x44e   :  { %2695 = vsyncpa [#allocation4 + $0x1], 1 }

</bundles_post_ra>
